<compile_context>
chip_gen: v6e
topology: v6e:2x2x1
jax: 0.10.0
libtpu: 0.0.40
codegen_flags: <defaults>
</compile_context>

<pallas_src>
from functools import partial

import jax
import jax.numpy as jnp
from jax.experimental import pallas as pl
from jax.experimental.pallas import tpu as pltpu

IN_DIM = 84 * 84           # 7056 (kept unpadded end-to-end)
HPAD = 128                 # all hidden dims padded to 128 lanes
N_CHUNK = 1024             # final-layer lane chunk (6x1024 + 912)
DEFAULT_TB = 256           # batch tile cap (fills MXU M rows; >=2 steps for big B)

# true (unpadded) layer widths
ENC_DIMS = [IN_DIM, 128, 64, 12, 3]
DEC_DIMS = [3, 12, 64, 128, IN_DIM]


# --------------------------------------------------------------------------
# Kernel
# --------------------------------------------------------------------------
def _autoencoder_kernel(x_ref,
                        w1, b1, w2, b2, w3, b3, w4, b4,      # encoder
                        w5, b5, w6, b6, w7, b7, w8, b8,      # decoder
                        out_ref):
    def dense(h, w_ref, b_ref, relu=True):
        # bf16 MXU inputs, f32 accumulation; bias add + ReLU in f32,
        # activation handed to the next layer as bf16.
        y = jnp.dot(h, w_ref[...], preferred_element_type=jnp.float32) + b_ref[...]
        if relu:
            y = jnp.maximum(y, 0.0)
        return y.astype(jnp.bfloat16)

    h = x_ref[...]                          # (TB, 7056) bf16 — no cast needed

    # ---- encoder ----
    h = dense(h, w1, b1)
    h = dense(h, w2, b2)
    h = dense(h, w3, b3)
    h = dense(h, w4, b4, relu=False)        # bottleneck: no activation

    # ---- decoder (all but last layer) ----
    h = dense(h, w5, b5)
    h = dense(h, w6, b6)
    h = dense(h, w7, b7)                    # (TB, 128) bf16

    # ---- final layer, chunked over the 7056 output lanes ----
    for lo in range(0, IN_DIM, N_CHUNK):    # static unroll: 6x1024 + 912
        hi = min(lo + N_CHUNK, IN_DIM)
        logits = jnp.dot(h, w8[:, lo:hi], preferred_element_type=jnp.float32)
        logits = logits + b8[:, lo:hi]
        # sigmoid(x) = 0.5 * tanh(x/2) + 0.5  -> single EUP op per element
        y = 0.5 * jnp.tanh(0.5 * logits) + 0.5
        out_ref[:, lo:hi] = y.astype(out_ref.dtype)


# --------------------------------------------------------------------------
# Parameters
# --------------------------------------------------------------------------
def init_params(key):
    """Deterministic params: list of (W (in,out), b (out,)) per layer, 8 layers."""
    dims = list(zip(ENC_DIMS[:-1], ENC_DIMS[1:])) + list(zip(DEC_DIMS[:-1], DEC_DIMS[1:]))
    params = []
    for fan_in, fan_out in dims:
        key, kw, kb = jax.random.split(key, 3)
        bound = 1.0 / jnp.sqrt(fan_in)
        w = jax.random.uniform(kw, (fan_in, fan_out), jnp.float32, -bound, bound)
        b = jax.random.uniform(kb, (fan_out,), jnp.float32, -bound, bound)
        params.append((w, b))
    return params


def pad_params(params):
    """Zero-pad hidden dims to 128 lanes.  First-layer K (7056) and last-layer N
    (7056) stay unpadded.  Weights stored bf16 (MXU-native), biases f32."""
    n = len(params)
    padded = []
    for i, (w, b) in enumerate(params):
        rows = w.shape[0] if i == 0 else HPAD
        cols = w.shape[1] if i == n - 1 else HPAD
        wp = jnp.zeros((rows, cols), jnp.float32).at[:w.shape[0], :w.shape[1]].set(w)
        bp = jnp.zeros((1, cols), jnp.float32).at[0, :b.shape[0]].set(b)
        padded.append((wp.astype(jnp.bfloat16), bp))
    return padded


# --------------------------------------------------------------------------
# Wrapper
# --------------------------------------------------------------------------
def _cdiv(a, b):
    return -(-a // b)


def _round_up(x, m):
    return _cdiv(x, m) * m


def _choose_tiling(batch):
    """Pick (tb, padded_batch).  Small batches -> a single tile (no forced grid
    split on 1-TC v5e/v6e); large batches naturally give >=2 'parallel' steps
    (DEFAULT_TB=256) which v7x's 2 TensorCores can share."""
    ngrid = _cdiv(batch, DEFAULT_TB)
    tb = _round_up(_cdiv(batch, ngrid), 8)
    return tb, ngrid * tb


def _build_forward(batch_pad, tb):
    in_specs = [pl.BlockSpec((tb, IN_DIM), lambda i: (i, 0))]     # x tile
    # 8 x (weight, bias): grid-invariant full-array blocks (each is small; default
    # double-buffering costs ~3.7 MiB total, so no Buffered(1) probe is needed).
    for _ in range(8):
        in_specs.append(pl.BlockSpec(None, lambda i: (0, 0)))     # placeholder
    # replace placeholders with concrete shapes at call time (done below)
    return in_specs


def _make_pallas_call(batch_pad, tb, flat_params):
    in_specs = [pl.BlockSpec((tb, IN_DIM), lambda i: (i, 0))]     # x tile
    for arr in flat_params:
        in_specs.append(pl.BlockSpec(arr.shape, lambda i: (0, 0)))

    return pl.pallas_call(
        _autoencoder_kernel,
        out_shape=jax.ShapeDtypeStruct((batch_pad, IN_DIM), jnp.bfloat16),
        grid_spec=pltpu.PrefetchScalarGridSpec(
            num_scalar_prefetch=0,
            grid=(batch_pad // tb,),
            in_specs=in_specs,
            out_specs=pl.BlockSpec((tb, IN_DIM), lambda i: (i, 0)),
        ),
        compiler_params=pltpu.CompilerParams(
            dimension_semantics=("parallel",),
            # raised vs. v5e's 16 MiB default, safe under v7x's 64 MiB physical
            vmem_limit_bytes=48 * 1024 * 1024,
        ),
    )


@jax.jit
def autoencoder_forward(x, flat_params):
    """x: (B, 7056) any float dtype.  flat_params: tuple (w1,b1,...,w8,b8) padded.
    Returns (B, 7056) bf16 reconstruction."""
    B = x.shape[0]
    tb, B_pad = _choose_tiling(B)

    xb = x.astype(jnp.bfloat16)
    if B_pad != B:
        xb = jnp.pad(xb, ((0, B_pad - B), (0, 0)))

    fn = _make_pallas_call(B_pad, tb, flat_params)
    out = fn(xb, *flat_params)
    if B_pad != B:
        out = out[:B]
    return out


# --------------------------------------------------------------------------
# Reference (pure JAX, f32)
# --------------------------------------------------------------------------
def reference_forward(x, params):
    h = x
    for idx, (w, b) in enumerate(params):
        h = h @ w + b
        if idx not in (3, 7):          # no ReLU after bottleneck / final layer
            h = jnp.maximum(h, 0.0)
    return jax.nn.sigmoid(h)


if __name__ == "__main__":
    key = jax.random.PRNGKey(0)
    kx, kp = jax.random.split(key)

    B = 16
    x = jax.random.uniform(kx, (B, IN_DIM), jnp.float32)   # image-like input in [0,1)

    params = init_params(kp)
    padded = pad_params(params)
    flat = tuple(a for wb in padded for a in wb)            # (w1,b1,...,w8,b8)

    out = autoencoder_forward(x, flat)
    out = jax.block_until_ready(out)

    ref = reference_forward(x, params)
    assert out.shape == (B, IN_DIM)
    max_err = float(jnp.max(jnp.abs(out.astype(jnp.float32) - ref)))
    # bf16 inputs/weights/activations + bf16 output vs. pure-f32 reference
    assert max_err < 5e-2, max_err

    print("KERNEL_OK")
</pallas_src>

<mosaic_0001>
module attributes {stable_mosaic.version = 11 : i64} {
  func.func @_autoencoder_kernel(%arg0: i32, %arg1: memref<16x7056xbf16, #tpu.memory_space<vmem>>, %arg2: memref<7056x128xbf16, #tpu.memory_space<vmem>>, %arg3: memref<1x128xf32, #tpu.memory_space<vmem>>, %arg4: memref<128x128xbf16, #tpu.memory_space<vmem>>, %arg5: memref<1x128xf32, #tpu.memory_space<vmem>>, %arg6: memref<128x128xbf16, #tpu.memory_space<vmem>>, %arg7: memref<1x128xf32, #tpu.memory_space<vmem>>, %arg8: memref<128x128xbf16, #tpu.memory_space<vmem>>, %arg9: memref<1x128xf32, #tpu.memory_space<vmem>>, %arg10: memref<128x128xbf16, #tpu.memory_space<vmem>>, %arg11: memref<1x128xf32, #tpu.memory_space<vmem>>, %arg12: memref<128x128xbf16, #tpu.memory_space<vmem>>, %arg13: memref<1x128xf32, #tpu.memory_space<vmem>>, %arg14: memref<128x128xbf16, #tpu.memory_space<vmem>>, %arg15: memref<1x128xf32, #tpu.memory_space<vmem>>, %arg16: memref<128x7056xbf16, #tpu.memory_space<vmem>>, %arg17: memref<1x7056xf32, #tpu.memory_space<vmem>>, %arg18: memref<16x7056xbf16, #tpu.memory_space<vmem>>) attributes {dimension_semantics = [#tpu.dimension_semantics<parallel>], iteration_bounds = array<i64: 1>, scalar_prefetch = 0 : i64, scratch_operands = 0 : i64, tpu.core_type = #tpu.core_type<tc>, window_params = [{transform_indices = @transform_0, window_bounds = array<i64: 16, 7056>}, {pipeline_mode = #tpu.pipeline_mode<synchronous>, transform_indices = @transform_1, window_bounds = array<i64: 7056, 128>}, {pipeline_mode = #tpu.pipeline_mode<synchronous>, transform_indices = @transform_2, window_bounds = array<i64: 1, 128>}, {pipeline_mode = #tpu.pipeline_mode<synchronous>, transform_indices = @transform_3, window_bounds = array<i64: 128, 128>}, {pipeline_mode = #tpu.pipeline_mode<synchronous>, transform_indices = @transform_4, window_bounds = array<i64: 1, 128>}, {pipeline_mode = #tpu.pipeline_mode<synchronous>, transform_indices = @transform_5, window_bounds = array<i64: 128, 128>}, {pipeline_mode = #tpu.pipeline_mode<synchronous>, transform_indices = @transform_6, window_bounds = array<i64: 1, 128>}, {pipeline_mode = #tpu.pipeline_mode<synchronous>, transform_indices = @transform_7, window_bounds = array<i64: 128, 128>}, {pipeline_mode = #tpu.pipeline_mode<synchronous>, transform_indices = @transform_8, window_bounds = array<i64: 1, 128>}, {pipeline_mode = #tpu.pipeline_mode<synchronous>, transform_indices = @transform_9, window_bounds = array<i64: 128, 128>}, {pipeline_mode = #tpu.pipeline_mode<synchronous>, transform_indices = @transform_10, window_bounds = array<i64: 1, 128>}, {pipeline_mode = #tpu.pipeline_mode<synchronous>, transform_indices = @transform_11, window_bounds = array<i64: 128, 128>}, {pipeline_mode = #tpu.pipeline_mode<synchronous>, transform_indices = @transform_12, window_bounds = array<i64: 1, 128>}, {pipeline_mode = #tpu.pipeline_mode<synchronous>, transform_indices = @transform_13, window_bounds = array<i64: 128, 128>}, {pipeline_mode = #tpu.pipeline_mode<synchronous>, transform_indices = @transform_14, window_bounds = array<i64: 1, 128>}, {pipeline_mode = #tpu.pipeline_mode<synchronous>, transform_indices = @transform_15, window_bounds = array<i64: 128, 7056>}, {pipeline_mode = #tpu.pipeline_mode<synchronous>, transform_indices = @transform_16, window_bounds = array<i64: 1, 7056>}, {transform_indices = @transform_17, window_bounds = array<i64: 16, 7056>}]} {
    %c0 = arith.constant 0 : index
    %c0_0 = arith.constant 0 : index
    %0 = vector.load %arg1[%c0, %c0_0] : memref<16x7056xbf16, #tpu.memory_space<vmem>>, vector<16x7056xbf16>
    %c0_1 = arith.constant 0 : index
    %c0_2 = arith.constant 0 : index
    %1 = vector.load %arg2[%c0_1, %c0_2] : memref<7056x128xbf16, #tpu.memory_space<vmem>>, vector<7056x128xbf16>
    %cst = arith.constant dense<0.000000e+00> : vector<16x128xf32>
    %2 = tpu.matmul %0, %1, %cst {dimension_numbers = #tpu.dot_dimension_numbers<[1], [0], [0], [1], [0, 0, 1, 1], [], []>} : vector<16x7056xbf16>, vector<7056x128xbf16>, vector<16x128xf32> -> vector<16x128xf32>
    %c0_3 = arith.constant 0 : index
    %c0_4 = arith.constant 0 : index
    %3 = vector.load %arg3[%c0_3, %c0_4] : memref<1x128xf32, #tpu.memory_space<vmem>>, vector<1x128xf32>
    %4 = vector.broadcast %3 : vector<1x128xf32> to vector<16x128xf32>
    %5 = arith.addf %2, %4 : vector<16x128xf32>
    %cst_5 = arith.constant 0.000000e+00 : f32
    %6 = vector.broadcast %cst_5 : f32 to vector<16x128xf32>
    %7 = arith.maximumf %5, %6 : vector<16x128xf32>
    %8 = arith.truncf %7 : vector<16x128xf32> to vector<16x128xbf16>
    %c0_6 = arith.constant 0 : index
    %c0_7 = arith.constant 0 : index
    %9 = vector.load %arg4[%c0_6, %c0_7] : memref<128x128xbf16, #tpu.memory_space<vmem>>, vector<128x128xbf16>
    %cst_8 = arith.constant dense<0.000000e+00> : vector<16x128xf32>
    %10 = tpu.matmul %8, %9, %cst_8 {dimension_numbers = #tpu.dot_dimension_numbers<[1], [0], [0], [1], [0, 0, 1, 1], [], []>} : vector<16x128xbf16>, vector<128x128xbf16>, vector<16x128xf32> -> vector<16x128xf32>
    %c0_9 = arith.constant 0 : index
    %c0_10 = arith.constant 0 : index
    %11 = vector.load %arg5[%c0_9, %c0_10] : memref<1x128xf32, #tpu.memory_space<vmem>>, vector<1x128xf32>
    %12 = vector.broadcast %11 : vector<1x128xf32> to vector<16x128xf32>
    %13 = arith.addf %10, %12 : vector<16x128xf32>
    %cst_11 = arith.constant 0.000000e+00 : f32
    %14 = vector.broadcast %cst_11 : f32 to vector<16x128xf32>
    %15 = arith.maximumf %13, %14 : vector<16x128xf32>
    %16 = arith.truncf %15 : vector<16x128xf32> to vector<16x128xbf16>
    %c0_12 = arith.constant 0 : index
    %c0_13 = arith.constant 0 : index
    %17 = vector.load %arg6[%c0_12, %c0_13] : memref<128x128xbf16, #tpu.memory_space<vmem>>, vector<128x128xbf16>
    %cst_14 = arith.constant dense<0.000000e+00> : vector<16x128xf32>
    %18 = tpu.matmul %16, %17, %cst_14 {dimension_numbers = #tpu.dot_dimension_numbers<[1], [0], [0], [1], [0, 0, 1, 1], [], []>} : vector<16x128xbf16>, vector<128x128xbf16>, vector<16x128xf32> -> vector<16x128xf32>
    %c0_15 = arith.constant 0 : index
    %c0_16 = arith.constant 0 : index
    %19 = vector.load %arg7[%c0_15, %c0_16] : memref<1x128xf32, #tpu.memory_space<vmem>>, vector<1x128xf32>
    %20 = vector.broadcast %19 : vector<1x128xf32> to vector<16x128xf32>
    %21 = arith.addf %18, %20 : vector<16x128xf32>
    %cst_17 = arith.constant 0.000000e+00 : f32
    %22 = vector.broadcast %cst_17 : f32 to vector<16x128xf32>
    %23 = arith.maximumf %21, %22 : vector<16x128xf32>
    %24 = arith.truncf %23 : vector<16x128xf32> to vector<16x128xbf16>
    %c0_18 = arith.constant 0 : index
    %c0_19 = arith.constant 0 : index
    %25 = vector.load %arg8[%c0_18, %c0_19] : memref<128x128xbf16, #tpu.memory_space<vmem>>, vector<128x128xbf16>
    %cst_20 = arith.constant dense<0.000000e+00> : vector<16x128xf32>
    %26 = tpu.matmul %24, %25, %cst_20 {dimension_numbers = #tpu.dot_dimension_numbers<[1], [0], [0], [1], [0, 0, 1, 1], [], []>} : vector<16x128xbf16>, vector<128x128xbf16>, vector<16x128xf32> -> vector<16x128xf32>
    %c0_21 = arith.constant 0 : index
    %c0_22 = arith.constant 0 : index
    %27 = vector.load %arg9[%c0_21, %c0_22] : memref<1x128xf32, #tpu.memory_space<vmem>>, vector<1x128xf32>
    %28 = vector.broadcast %27 : vector<1x128xf32> to vector<16x128xf32>
    %29 = arith.addf %26, %28 : vector<16x128xf32>
    %30 = arith.truncf %29 : vector<16x128xf32> to vector<16x128xbf16>
    %c0_23 = arith.constant 0 : index
    %c0_24 = arith.constant 0 : index
    %31 = vector.load %arg10[%c0_23, %c0_24] : memref<128x128xbf16, #tpu.memory_space<vmem>>, vector<128x128xbf16>
    %cst_25 = arith.constant dense<0.000000e+00> : vector<16x128xf32>
    %32 = tpu.matmul %30, %31, %cst_25 {dimension_numbers = #tpu.dot_dimension_numbers<[1], [0], [0], [1], [0, 0, 1, 1], [], []>} : vector<16x128xbf16>, vector<128x128xbf16>, vector<16x128xf32> -> vector<16x128xf32>
    %c0_26 = arith.constant 0 : index
    %c0_27 = arith.constant 0 : index
    %33 = vector.load %arg11[%c0_26, %c0_27] : memref<1x128xf32, #tpu.memory_space<vmem>>, vector<1x128xf32>
    %34 = vector.broadcast %33 : vector<1x128xf32> to vector<16x128xf32>
    %35 = arith.addf %32, %34 : vector<16x128xf32>
    %cst_28 = arith.constant 0.000000e+00 : f32
    %36 = vector.broadcast %cst_28 : f32 to vector<16x128xf32>
    %37 = arith.maximumf %35, %36 : vector<16x128xf32>
    %38 = arith.truncf %37 : vector<16x128xf32> to vector<16x128xbf16>
    %c0_29 = arith.constant 0 : index
    %c0_30 = arith.constant 0 : index
    %39 = vector.load %arg12[%c0_29, %c0_30] : memref<128x128xbf16, #tpu.memory_space<vmem>>, vector<128x128xbf16>
    %cst_31 = arith.constant dense<0.000000e+00> : vector<16x128xf32>
    %40 = tpu.matmul %38, %39, %cst_31 {dimension_numbers = #tpu.dot_dimension_numbers<[1], [0], [0], [1], [0, 0, 1, 1], [], []>} : vector<16x128xbf16>, vector<128x128xbf16>, vector<16x128xf32> -> vector<16x128xf32>
    %c0_32 = arith.constant 0 : index
    %c0_33 = arith.constant 0 : index
    %41 = vector.load %arg13[%c0_32, %c0_33] : memref<1x128xf32, #tpu.memory_space<vmem>>, vector<1x128xf32>
    %42 = vector.broadcast %41 : vector<1x128xf32> to vector<16x128xf32>
    %43 = arith.addf %40, %42 : vector<16x128xf32>
    %cst_34 = arith.constant 0.000000e+00 : f32
    %44 = vector.broadcast %cst_34 : f32 to vector<16x128xf32>
    %45 = arith.maximumf %43, %44 : vector<16x128xf32>
    %46 = arith.truncf %45 : vector<16x128xf32> to vector<16x128xbf16>
    %c0_35 = arith.constant 0 : index
    %c0_36 = arith.constant 0 : index
    %47 = vector.load %arg14[%c0_35, %c0_36] : memref<128x128xbf16, #tpu.memory_space<vmem>>, vector<128x128xbf16>
    %cst_37 = arith.constant dense<0.000000e+00> : vector<16x128xf32>
    %48 = tpu.matmul %46, %47, %cst_37 {dimension_numbers = #tpu.dot_dimension_numbers<[1], [0], [0], [1], [0, 0, 1, 1], [], []>} : vector<16x128xbf16>, vector<128x128xbf16>, vector<16x128xf32> -> vector<16x128xf32>
    %c0_38 = arith.constant 0 : index
    %c0_39 = arith.constant 0 : index
    %49 = vector.load %arg15[%c0_38, %c0_39] : memref<1x128xf32, #tpu.memory_space<vmem>>, vector<1x128xf32>
    %50 = vector.broadcast %49 : vector<1x128xf32> to vector<16x128xf32>
    %51 = arith.addf %48, %50 : vector<16x128xf32>
    %cst_40 = arith.constant 0.000000e+00 : f32
    %52 = vector.broadcast %cst_40 : f32 to vector<16x128xf32>
    %53 = arith.maximumf %51, %52 : vector<16x128xf32>
    %54 = arith.truncf %53 : vector<16x128xf32> to vector<16x128xbf16>
    %c0_41 = arith.constant 0 : index
    %c0_42 = arith.constant 0 : index
    %55 = vector.load %arg16[%c0_41, %c0_42] : memref<128x7056xbf16, #tpu.memory_space<vmem>>, vector<128x1024xbf16>
    %cst_43 = arith.constant dense<0.000000e+00> : vector<16x1024xf32>
    %56 = tpu.matmul %54, %55, %cst_43 {dimension_numbers = #tpu.dot_dimension_numbers<[1], [0], [0], [1], [0, 0, 1, 1], [], []>} : vector<16x128xbf16>, vector<128x1024xbf16>, vector<16x1024xf32> -> vector<16x1024xf32>
    %c0_44 = arith.constant 0 : index
    %c0_45 = arith.constant 0 : index
    %57 = vector.load %arg17[%c0_44, %c0_45] : memref<1x7056xf32, #tpu.memory_space<vmem>>, vector<1x1024xf32>
    %58 = vector.broadcast %57 : vector<1x1024xf32> to vector<16x1024xf32>
    %59 = arith.addf %56, %58 : vector<16x1024xf32>
    %cst_46 = arith.constant 5.000000e-01 : f32
    %60 = vector.broadcast %cst_46 : f32 to vector<16x1024xf32>
    %61 = arith.mulf %60, %59 : vector<16x1024xf32>
    %62 = math.tanh %61 : vector<16x1024xf32>
    %cst_47 = arith.constant 5.000000e-01 : f32
    %63 = vector.broadcast %cst_47 : f32 to vector<16x1024xf32>
    %64 = arith.mulf %63, %62 : vector<16x1024xf32>
    %cst_48 = arith.constant 5.000000e-01 : f32
    %65 = vector.broadcast %cst_48 : f32 to vector<16x1024xf32>
    %66 = arith.addf %64, %65 : vector<16x1024xf32>
    %67 = arith.truncf %66 : vector<16x1024xf32> to vector<16x1024xbf16>
    %c0_49 = arith.constant 0 : index
    %c0_50 = arith.constant 0 : index
    %68 = vector.load %arg18[%c0_49, %c0_50] : memref<16x7056xbf16, #tpu.memory_space<vmem>>, vector<16x1024xbf16>
    tpu.vector_store %arg18[%c0_49, %c0_50], %67 {strides = array<i32>} : memref<16x7056xbf16, #tpu.memory_space<vmem>>, vector<16x1024xbf16>,
    %c0_51 = arith.constant 0 : index
    %c1024 = arith.constant 1024 : index
    %69 = vector.load %arg16[%c0_51, %c1024] : memref<128x7056xbf16, #tpu.memory_space<vmem>>, vector<128x1024xbf16>
    %cst_52 = arith.constant dense<0.000000e+00> : vector<16x1024xf32>
    %70 = tpu.matmul %54, %69, %cst_52 {dimension_numbers = #tpu.dot_dimension_numbers<[1], [0], [0], [1], [0, 0, 1, 1], [], []>} : vector<16x128xbf16>, vector<128x1024xbf16>, vector<16x1024xf32> -> vector<16x1024xf32>
    %c0_53 = arith.constant 0 : index
    %c1024_54 = arith.constant 1024 : index
    %71 = vector.load %arg17[%c0_53, %c1024_54] : memref<1x7056xf32, #tpu.memory_space<vmem>>, vector<1x1024xf32>
    %72 = vector.broadcast %71 : vector<1x1024xf32> to vector<16x1024xf32>
    %73 = arith.addf %70, %72 : vector<16x1024xf32>
    %cst_55 = arith.constant 5.000000e-01 : f32
    %74 = vector.broadcast %cst_55 : f32 to vector<16x1024xf32>
    %75 = arith.mulf %74, %73 : vector<16x1024xf32>
    %76 = math.tanh %75 : vector<16x1024xf32>
    %cst_56 = arith.constant 5.000000e-01 : f32
    %77 = vector.broadcast %cst_56 : f32 to vector<16x1024xf32>
    %78 = arith.mulf %77, %76 : vector<16x1024xf32>
    %cst_57 = arith.constant 5.000000e-01 : f32
    %79 = vector.broadcast %cst_57 : f32 to vector<16x1024xf32>
    %80 = arith.addf %78, %79 : vector<16x1024xf32>
    %81 = arith.truncf %80 : vector<16x1024xf32> to vector<16x1024xbf16>
    %c0_58 = arith.constant 0 : index
    %c1024_59 = arith.constant 1024 : index
    %82 = vector.load %arg18[%c0_58, %c1024_59] : memref<16x7056xbf16, #tpu.memory_space<vmem>>, vector<16x1024xbf16>
    tpu.vector_store %arg18[%c0_58, %c1024_59], %81 {strides = array<i32>} : memref<16x7056xbf16, #tpu.memory_space<vmem>>, vector<16x1024xbf16>,
    %c0_60 = arith.constant 0 : index
    %c2048 = arith.constant 2048 : index
    %83 = vector.load %arg16[%c0_60, %c2048] : memref<128x7056xbf16, #tpu.memory_space<vmem>>, vector<128x1024xbf16>
    %cst_61 = arith.constant dense<0.000000e+00> : vector<16x1024xf32>
    %84 = tpu.matmul %54, %83, %cst_61 {dimension_numbers = #tpu.dot_dimension_numbers<[1], [0], [0], [1], [0, 0, 1, 1], [], []>} : vector<16x128xbf16>, vector<128x1024xbf16>, vector<16x1024xf32> -> vector<16x1024xf32>
    %c0_62 = arith.constant 0 : index
    %c2048_63 = arith.constant 2048 : index
    %85 = vector.load %arg17[%c0_62, %c2048_63] : memref<1x7056xf32, #tpu.memory_space<vmem>>, vector<1x1024xf32>
    %86 = vector.broadcast %85 : vector<1x1024xf32> to vector<16x1024xf32>
    %87 = arith.addf %84, %86 : vector<16x1024xf32>
    %cst_64 = arith.constant 5.000000e-01 : f32
    %88 = vector.broadcast %cst_64 : f32 to vector<16x1024xf32>
    %89 = arith.mulf %88, %87 : vector<16x1024xf32>
    %90 = math.tanh %89 : vector<16x1024xf32>
    %cst_65 = arith.constant 5.000000e-01 : f32
    %91 = vector.broadcast %cst_65 : f32 to vector<16x1024xf32>
    %92 = arith.mulf %91, %90 : vector<16x1024xf32>
    %cst_66 = arith.constant 5.000000e-01 : f32
    %93 = vector.broadcast %cst_66 : f32 to vector<16x1024xf32>
    %94 = arith.addf %92, %93 : vector<16x1024xf32>
    %95 = arith.truncf %94 : vector<16x1024xf32> to vector<16x1024xbf16>
    %c0_67 = arith.constant 0 : index
    %c2048_68 = arith.constant 2048 : index
    %96 = vector.load %arg18[%c0_67, %c2048_68] : memref<16x7056xbf16, #tpu.memory_space<vmem>>, vector<16x1024xbf16>
    tpu.vector_store %arg18[%c0_67, %c2048_68], %95 {strides = array<i32>} : memref<16x7056xbf16, #tpu.memory_space<vmem>>, vector<16x1024xbf16>,
    %c0_69 = arith.constant 0 : index
    %c3072 = arith.constant 3072 : index
    %97 = vector.load %arg16[%c0_69, %c3072] : memref<128x7056xbf16, #tpu.memory_space<vmem>>, vector<128x1024xbf16>
    %cst_70 = arith.constant dense<0.000000e+00> : vector<16x1024xf32>
    %98 = tpu.matmul %54, %97, %cst_70 {dimension_numbers = #tpu.dot_dimension_numbers<[1], [0], [0], [1], [0, 0, 1, 1], [], []>} : vector<16x128xbf16>, vector<128x1024xbf16>, vector<16x1024xf32> -> vector<16x1024xf32>
    %c0_71 = arith.constant 0 : index
    %c3072_72 = arith.constant 3072 : index
    %99 = vector.load %arg17[%c0_71, %c3072_72] : memref<1x7056xf32, #tpu.memory_space<vmem>>, vector<1x1024xf32>
    %100 = vector.broadcast %99 : vector<1x1024xf32> to vector<16x1024xf32>
    %101 = arith.addf %98, %100 : vector<16x1024xf32>
    %cst_73 = arith.constant 5.000000e-01 : f32
    %102 = vector.broadcast %cst_73 : f32 to vector<16x1024xf32>
    %103 = arith.mulf %102, %101 : vector<16x1024xf32>
    %104 = math.tanh %103 : vector<16x1024xf32>
    %cst_74 = arith.constant 5.000000e-01 : f32
    %105 = vector.broadcast %cst_74 : f32 to vector<16x1024xf32>
    %106 = arith.mulf %105, %104 : vector<16x1024xf32>
    %cst_75 = arith.constant 5.000000e-01 : f32
    %107 = vector.broadcast %cst_75 : f32 to vector<16x1024xf32>
    %108 = arith.addf %106, %107 : vector<16x1024xf32>
    %109 = arith.truncf %108 : vector<16x1024xf32> to vector<16x1024xbf16>
    %c0_76 = arith.constant 0 : index
    %c3072_77 = arith.constant 3072 : index
    %110 = vector.load %arg18[%c0_76, %c3072_77] : memref<16x7056xbf16, #tpu.memory_space<vmem>>, vector<16x1024xbf16>
    tpu.vector_store %arg18[%c0_76, %c3072_77], %109 {strides = array<i32>} : memref<16x7056xbf16, #tpu.memory_space<vmem>>, vector<16x1024xbf16>,
    %c0_78 = arith.constant 0 : index
    %c4096 = arith.constant 4096 : index
    %111 = vector.load %arg16[%c0_78, %c4096] : memref<128x7056xbf16, #tpu.memory_space<vmem>>, vector<128x1024xbf16>
    %cst_79 = arith.constant dense<0.000000e+00> : vector<16x1024xf32>
    %112 = tpu.matmul %54, %111, %cst_79 {dimension_numbers = #tpu.dot_dimension_numbers<[1], [0], [0], [1], [0, 0, 1, 1], [], []>} : vector<16x128xbf16>, vector<128x1024xbf16>, vector<16x1024xf32> -> vector<16x1024xf32>
    %c0_80 = arith.constant 0 : index
    %c4096_81 = arith.constant 4096 : index
    %113 = vector.load %arg17[%c0_80, %c4096_81] : memref<1x7056xf32, #tpu.memory_space<vmem>>, vector<1x1024xf32>
    %114 = vector.broadcast %113 : vector<1x1024xf32> to vector<16x1024xf32>
    %115 = arith.addf %112, %114 : vector<16x1024xf32>
    %cst_82 = arith.constant 5.000000e-01 : f32
    %116 = vector.broadcast %cst_82 : f32 to vector<16x1024xf32>
    %117 = arith.mulf %116, %115 : vector<16x1024xf32>
    %118 = math.tanh %117 : vector<16x1024xf32>
    %cst_83 = arith.constant 5.000000e-01 : f32
    %119 = vector.broadcast %cst_83 : f32 to vector<16x1024xf32>
    %120 = arith.mulf %119, %118 : vector<16x1024xf32>
    %cst_84 = arith.constant 5.000000e-01 : f32
    %121 = vector.broadcast %cst_84 : f32 to vector<16x1024xf32>
    %122 = arith.addf %120, %121 : vector<16x1024xf32>
    %123 = arith.truncf %122 : vector<16x1024xf32> to vector<16x1024xbf16>
    %c0_85 = arith.constant 0 : index
    %c4096_86 = arith.constant 4096 : index
    %124 = vector.load %arg18[%c0_85, %c4096_86] : memref<16x7056xbf16, #tpu.memory_space<vmem>>, vector<16x1024xbf16>
    tpu.vector_store %arg18[%c0_85, %c4096_86], %123 {strides = array<i32>} : memref<16x7056xbf16, #tpu.memory_space<vmem>>, vector<16x1024xbf16>,
    %c0_87 = arith.constant 0 : index
    %c5120 = arith.constant 5120 : index
    %125 = vector.load %arg16[%c0_87, %c5120] : memref<128x7056xbf16, #tpu.memory_space<vmem>>, vector<128x1024xbf16>
    %cst_88 = arith.constant dense<0.000000e+00> : vector<16x1024xf32>
    %126 = tpu.matmul %54, %125, %cst_88 {dimension_numbers = #tpu.dot_dimension_numbers<[1], [0], [0], [1], [0, 0, 1, 1], [], []>} : vector<16x128xbf16>, vector<128x1024xbf16>, vector<16x1024xf32> -> vector<16x1024xf32>
    %c0_89 = arith.constant 0 : index
    %c5120_90 = arith.constant 5120 : index
    %127 = vector.load %arg17[%c0_89, %c5120_90] : memref<1x7056xf32, #tpu.memory_space<vmem>>, vector<1x1024xf32>
    %128 = vector.broadcast %127 : vector<1x1024xf32> to vector<16x1024xf32>
    %129 = arith.addf %126, %128 : vector<16x1024xf32>
    %cst_91 = arith.constant 5.000000e-01 : f32
    %130 = vector.broadcast %cst_91 : f32 to vector<16x1024xf32>
    %131 = arith.mulf %130, %129 : vector<16x1024xf32>
    %132 = math.tanh %131 : vector<16x1024xf32>
    %cst_92 = arith.constant 5.000000e-01 : f32
    %133 = vector.broadcast %cst_92 : f32 to vector<16x1024xf32>
    %134 = arith.mulf %133, %132 : vector<16x1024xf32>
    %cst_93 = arith.constant 5.000000e-01 : f32
    %135 = vector.broadcast %cst_93 : f32 to vector<16x1024xf32>
    %136 = arith.addf %134, %135 : vector<16x1024xf32>
    %137 = arith.truncf %136 : vector<16x1024xf32> to vector<16x1024xbf16>
    %c0_94 = arith.constant 0 : index
    %c5120_95 = arith.constant 5120 : index
    %138 = vector.load %arg18[%c0_94, %c5120_95] : memref<16x7056xbf16, #tpu.memory_space<vmem>>, vector<16x1024xbf16>
    tpu.vector_store %arg18[%c0_94, %c5120_95], %137 {strides = array<i32>} : memref<16x7056xbf16, #tpu.memory_space<vmem>>, vector<16x1024xbf16>,
    %c0_96 = arith.constant 0 : index
    %c6144 = arith.constant 6144 : index
    %139 = vector.load %arg16[%c0_96, %c6144] : memref<128x7056xbf16, #tpu.memory_space<vmem>>, vector<128x912xbf16>
    %cst_97 = arith.constant dense<0.000000e+00> : vector<16x912xf32>
    %140 = tpu.matmul %54, %139, %cst_97 {dimension_numbers = #tpu.dot_dimension_numbers<[1], [0], [0], [1], [0, 0, 1, 1], [], []>} : vector<16x128xbf16>, vector<128x912xbf16>, vector<16x912xf32> -> vector<16x912xf32>
    %c0_98 = arith.constant 0 : index
    %c6144_99 = arith.constant 6144 : index
    %141 = vector.load %arg17[%c0_98, %c6144_99] : memref<1x7056xf32, #tpu.memory_space<vmem>>, vector<1x912xf32>
    %142 = vector.broadcast %141 : vector<1x912xf32> to vector<16x912xf32>
    %143 = arith.addf %140, %142 : vector<16x912xf32>
    %cst_100 = arith.constant 5.000000e-01 : f32
    %144 = vector.broadcast %cst_100 : f32 to vector<16x912xf32>
    %145 = arith.mulf %144, %143 : vector<16x912xf32>
    %146 = math.tanh %145 : vector<16x912xf32>
    %cst_101 = arith.constant 5.000000e-01 : f32
    %147 = vector.broadcast %cst_101 : f32 to vector<16x912xf32>
    %148 = arith.mulf %147, %146 : vector<16x912xf32>
    %cst_102 = arith.constant 5.000000e-01 : f32
    %149 = vector.broadcast %cst_102 : f32 to vector<16x912xf32>
    %150 = arith.addf %148, %149 : vector<16x912xf32>
    %151 = arith.truncf %150 : vector<16x912xf32> to vector<16x912xbf16>
    %c0_103 = arith.constant 0 : index
    %c6144_104 = arith.constant 6144 : index
    %152 = vector.load %arg18[%c0_103, %c6144_104] : memref<16x7056xbf16, #tpu.memory_space<vmem>>, vector<16x912xbf16>
    tpu.vector_store %arg18[%c0_103, %c6144_104], %151 {strides = array<i32>} : memref<16x7056xbf16, #tpu.memory_space<vmem>>, vector<16x912xbf16>,
    return
  }
  func.func @transform_0(%arg0: i32) -> (i32, i32) {
    %c0_i32 = arith.constant 0 : i32
    %c0_i32_0 = arith.constant 0 : i32
    return %arg0, %c0_i32 : i32, i32
  }
  func.func @transform_1(%arg0: i32) -> (i32, i32) {
    %c0_i32 = arith.constant 0 : i32
    %c0_i32_0 = arith.constant 0 : i32
    %c0_i32_1 = arith.constant 0 : i32
    return %c0_i32, %c0_i32_0 : i32, i32
  }
  func.func @transform_2(%arg0: i32) -> (i32, i32) {
    %c0_i32 = arith.constant 0 : i32
    %c0_i32_0 = arith.constant 0 : i32
    %c0_i32_1 = arith.constant 0 : i32
    return %c0_i32, %c0_i32_0 : i32, i32
  }
  func.func @transform_3(%arg0: i32) -> (i32, i32) {
    %c0_i32 = arith.constant 0 : i32
    %c0_i32_0 = arith.constant 0 : i32
    %c0_i32_1 = arith.constant 0 : i32
    return %c0_i32, %c0_i32_0 : i32, i32
  }
  func.func @transform_4(%arg0: i32) -> (i32, i32) {
    %c0_i32 = arith.constant 0 : i32
    %c0_i32_0 = arith.constant 0 : i32
    %c0_i32_1 = arith.constant 0 : i32
    return %c0_i32, %c0_i32_0 : i32, i32
  }
  func.func @transform_5(%arg0: i32) -> (i32, i32) {
    %c0_i32 = arith.constant 0 : i32
    %c0_i32_0 = arith.constant 0 : i32
    %c0_i32_1 = arith.constant 0 : i32
    return %c0_i32, %c0_i32_0 : i32, i32
  }
  func.func @transform_6(%arg0: i32) -> (i32, i32) {
    %c0_i32 = arith.constant 0 : i32
    %c0_i32_0 = arith.constant 0 : i32
    %c0_i32_1 = arith.constant 0 : i32
    return %c0_i32, %c0_i32_0 : i32, i32
  }
  func.func @transform_7(%arg0: i32) -> (i32, i32) {
    %c0_i32 = arith.constant 0 : i32
    %c0_i32_0 = arith.constant 0 : i32
    %c0_i32_1 = arith.constant 0 : i32
    return %c0_i32, %c0_i32_0 : i32, i32
  }
  func.func @transform_8(%arg0: i32) -> (i32, i32) {
    %c0_i32 = arith.constant 0 : i32
    %c0_i32_0 = arith.constant 0 : i32
    %c0_i32_1 = arith.constant 0 : i32
    return %c0_i32, %c0_i32_0 : i32, i32
  }
  func.func @transform_9(%arg0: i32) -> (i32, i32) {
    %c0_i32 = arith.constant 0 : i32
    %c0_i32_0 = arith.constant 0 : i32
    %c0_i32_1 = arith.constant 0 : i32
    return %c0_i32, %c0_i32_0 : i32, i32
  }
  func.func @transform_10(%arg0: i32) -> (i32, i32) {
    %c0_i32 = arith.constant 0 : i32
    %c0_i32_0 = arith.constant 0 : i32
    %c0_i32_1 = arith.constant 0 : i32
    return %c0_i32, %c0_i32_0 : i32, i32
  }
  func.func @transform_11(%arg0: i32) -> (i32, i32) {
    %c0_i32 = arith.constant 0 : i32
    %c0_i32_0 = arith.constant 0 : i32
    %c0_i32_1 = arith.constant 0 : i32
    return %c0_i32, %c0_i32_0 : i32, i32
  }
  func.func @transform_12(%arg0: i32) -> (i32, i32) {
    %c0_i32 = arith.constant 0 : i32
    %c0_i32_0 = arith.constant 0 : i32
    %c0_i32_1 = arith.constant 0 : i32
    return %c0_i32, %c0_i32_0 : i32, i32
  }
  func.func @transform_13(%arg0: i32) -> (i32, i32) {
    %c0_i32 = arith.constant 0 : i32
    %c0_i32_0 = arith.constant 0 : i32
    %c0_i32_1 = arith.constant 0 : i32
    return %c0_i32, %c0_i32_0 : i32, i32
  }
  func.func @transform_14(%arg0: i32) -> (i32, i32) {
    %c0_i32 = arith.constant 0 : i32
    %c0_i32_0 = arith.constant 0 : i32
    %c0_i32_1 = arith.constant 0 : i32
    return %c0_i32, %c0_i32_0 : i32, i32
  }
  func.func @transform_15(%arg0: i32) -> (i32, i32) {
    %c0_i32 = arith.constant 0 : i32
    %c0_i32_0 = arith.constant 0 : i32
    %c0_i32_1 = arith.constant 0 : i32
    return %c0_i32, %c0_i32_0 : i32, i32
  }
  func.func @transform_16(%arg0: i32) -> (i32, i32) {
    %c0_i32 = arith.constant 0 : i32
    %c0_i32_0 = arith.constant 0 : i32
    %c0_i32_1 = arith.constant 0 : i32
    return %c0_i32, %c0_i32_0 : i32, i32
  }
  func.func @transform_17(%arg0: i32) -> (i32, i32) {
    %c0_i32 = arith.constant 0 : i32
    %c0_i32_0 = arith.constant 0 : i32
    return %arg0, %c0_i32 : i32, i32
  }
}

</mosaic_0001>

<bundles_post_ra>
// kernel: autoencoder_forward.1
= control target key start
LH: loop header
LB: loop body
LE: loop exit
PB: predicated region body
PF: predicated region fallthrough
CT: control target
= control target key end

     0   :  { %s17139_s0 = inlined_call_operand.vmem [shape: bf16[16,7056], index: 0, kind: input, shape index: {}]   ;;  %s17140_s1 = inlined_call_operand.vmem [shape: bf16[7056,128], index: 1, kind: input, shape index: {}]   ;;  %s17141_s2 = inlined_call_operand.vmem [shape: f32[1,128], index: 2, kind: input, shape index: {}]   ;;  %s17142_s3 = inlined_call_operand.vmem [shape: bf16[128,128], index: 3, kind: input, shape index: {}]   ;;  %s17143_s4 = inlined_call_operand.vmem [shape: f32[1,128], index: 4, kind: input, shape index: {}]   ;;  %s17144_s5 = inlined_call_operand.vmem [shape: bf16[128,128], index: 5, kind: input, shape index: {}]   ;;  %s17145_s6 = inlined_call_operand.vmem [shape: f32[1,128], index: 6, kind: input, shape index: {}]   ;;  %s17146_s7 = inlined_call_operand.vmem [shape: bf16[128,128], index: 7, kind: input, shape index: {}]   ;;  %s17147_s8 = inlined_call_operand.vmem [shape: f32[1,128], index: 8, kind: input, shape index: {}]   ;;  %s17148_s9 = inlined_call_operand.vmem [shape: bf16[128,128], index: 9, kind: input, shape index: {}]   ;;  %s17149_s10 = inlined_call_operand.vmem [shape: f32[1,128], index: 10, kind: input, shape index: {}]   ;;  %s17150_s11 = inlined_call_operand.vmem [shape: bf16[128,128], index: 11, kind: input, shape index: {}]   ;;  %s17151_s12 = inlined_call_operand.vmem [shape: f32[1,128], index: 12, kind: input, shape index: {}]   ;;  %s17152_s13 = inlined_call_operand.vmem [shape: bf16[128,128], index: 13, kind: input, shape index: {}]   ;;  %s17153_s14 = inlined_call_operand.vmem [shape: f32[1,128], index: 14, kind: input, shape index: {}]   ;;  %s17154_s15 = inlined_call_operand.vmem [shape: bf16[128,7056], index: 15, kind: input, shape index: {}]   ;;  %s17155_s16 = inlined_call_operand.vmem [shape: f32[1,7056], index: 16, kind: input, shape index: {}]   ;;  %s17156_s17 = inlined_call_operand.hbm [shape: bf16[16,7056], index: 17, kind: output, shape index: {}]  }
   0x1   :  { %17163 = sst [smem:[#allocation14_spill]] %s17139_s0 }
   0x2   :  { %17164 = sst [smem:[#allocation15_spill]] %s17140_s1 }
   0x3   :  { %s17165_s26 = sld [smem:[#allocation15_spill]]  ;;  %vm3928_vm0 = vcmask 130048  }
   0x4   :  { %s17166_s20 = sld [smem:[#allocation14_spill]] }
   0x9   :  { %v12703_v0 = vld [vmem:[%s17165_s26 + $0x78] sm:$0xff]   ;;  %v12707_v4 = vld [vmem:[%s17165_s26 + $0x70] sm:$0xff]   ;;  %v12711_v8 = vld [vmem:[%s17165_s26 + $0x68] sm:$0xff]  }
   0xa   :  { %v12704_v1 = vld [vmem:[%s17165_s26 + $0xf8] sm:$0xff]   ;;  %11929 = vmatprep.subr.bf16.mxu0 %v12703_v0  ;;  %v12708_v5 = vld [vmem:[%s17165_s26 + $0xf0] sm:$0xff]   ;;  %v12712_v9 = vld [vmem:[%s17165_s26 + $0xe8] sm:$0xff]  }
   0xb   :  { %v12705_v2 = vld [vmem:[%s17165_s26 + $0x38] sm:$0xff]   ;;  %11951 = vmatprep.subr.bf16.mxu1 %v12704_v1  ;;  %v12709_v6 = vld [vmem:[%s17165_s26 + $0x30] sm:$0xff]   ;;  %v12713_v10 = vld [vmem:[%s17165_s26 + $0x28] sm:$0xff]  }
   0xc   :  { %v12706_v3 = vld [vmem:[%s17165_s26 + $0xb8] sm:$0xff]   ;;  %11930 = vmatpush3.bf16.msra.mxu0 %v12705_v2  ;;  %v12710_v7 = vld [vmem:[%s17165_s26 + $0xb0] sm:$0xff]   ;;  %v12714_v11 = vld [vmem:[%s17165_s26 + $0xa8] sm:$0xff]  }
   0xd   :  { %11952 = vmatpush3.bf16.msra.mxu1 %v12706_v3  ;;  %11931 = vmatprep.subr.bf16.mxu0 %v12707_v4  ;;  %v12715_v12 = vld [vmem:[%s17165_s26 + $0x60] sm:$0xff]   ;;  %v12719_v16 = vld [vmem:[%s17165_s26 + $0x58] sm:$0xff]   ;;  %v12723_v20 = vld [vmem:[%s17165_s26 + $0x50] sm:$0xff]  }
   0xe   :  { %11953 = vmatprep.subr.bf16.mxu1 %v12708_v5  ;;  %v12716_v13 = vld [vmem:[%s17165_s26 + $0xe0] sm:$0xff]   ;;  %v12720_v17 = vld [vmem:[%s17165_s26 + $0xd8] sm:$0xff]   ;;  %v12724_v21 = vld [vmem:[%s17165_s26 + $0xd0] sm:$0xff]  }
   0xf   :  { %v12717_v14 = vld [vmem:[%s17165_s26 + $0x20] sm:$0xff]   ;;  %v12721_v18 = vld [vmem:[%s17165_s26 + $0x18] sm:$0xff]   ;;  %v12725_v22 = vld [vmem:[%s17165_s26 + $0x10] sm:$0xff]  }
  0x10   :  { %11932 = vmatpush3.bf16.msra.mxu0 %v12709_v6  ;;  %v12718_v15 = vld [vmem:[%s17165_s26 + $0xa0] sm:$0xff]   ;;  %v12722_v19 = vld [vmem:[%s17165_s26 + $0x98] sm:$0xff]   ;;  %v12726_v23 = vld [vmem:[%s17165_s26 + $0x90] sm:$0xff]  }
  0x11   :  { %11954 = vmatpush3.bf16.msra.mxu1 %v12710_v7  ;;  %11933 = vmatprep.subr.bf16.mxu0 %v12711_v8  ;;  %v12727_v24 = vld [vmem:[%s17165_s26 + $0x48] sm:$0xff]   ;;  %v12731_v28 = vld [vmem:[%s17165_s26 + $0x40] sm:$0xff]   ;;  %v12735_v40 = vld [vmem:[%s17165_s26 + $0x178] sm:$0xff]  }
  0x12   :  { %11955 = vmatprep.subr.bf16.mxu1 %v12712_v9  ;;  %v12728_v25 = vld [vmem:[%s17165_s26 + $0xc8] sm:$0xff]   ;;  %v12732_v29 = vld [vmem:[%s17165_s26 + $0xc0] sm:$0xff]   ;;  %v12736_v41 = vld [vmem:[%s17165_s26 + $0x1f8] sm:$0xff]  }
  0x13   :  { %v12729_v26 = vld [vmem:[%s17165_s26 + $0x8] sm:$0xff]   ;;  %v12733_v30 = vld [vmem:[%s17165_s26] sm:$0xff]   ;;  %v12737_v42 = vld [vmem:[%s17165_s26 + $0x138] sm:$0xff]  }
  0x14   :  { %11934 = vmatpush3.bf16.msra.mxu0 %v12713_v10  ;;  %v12730_v27 = vld [vmem:[%s17165_s26 + $0x88] sm:$0xff]   ;;  %v12734_v31 = vld [vmem:[%s17165_s26 + $0x80] sm:$0xff]   ;;  %v12738_v43 = vld [vmem:[%s17165_s26 + $0x1b8] sm:$0xff]  }
  0x15   :  { %11956 = vmatpush3.bf16.msra.mxu1 %v12714_v11  ;;  %11935 = vmatprep.subr.bf16.mxu0 %v12715_v12  ;;  %v58_v32 = vld [vmem:[%s17166_s20] sm:$0xff]  ;;  %v59_v34 = vld [vmem:[%s17166_s20 + $0x8] sm:$0xff]  ;;  %v12739_v44 = vld [vmem:[%s17165_s26 + $0x170] sm:$0xff]  }
  0x16   :  { %11957 = vmatprep.subr.bf16.mxu1 %v12716_v13  ;;  %v86_v33 = vld [vmem:[%s17166_s20 + $0xe0] sm:$0xff]  ;;  %v87_v37 = vld [vmem:[%s17166_s20 + $0xe8] sm:$0xff]  ;;  %v12740_v45 = vld [vmem:[%s17165_s26 + $0x1f0] sm:$0xff]  }
  0x17   :  { %v10817_v35 = vcombine.low %v58_v32, %v86_v33  ;;  %v10818_v36 = vcombine.high %v58_v32, %v86_v33  ;;  %v10819_v38 = vcombine.low %v59_v34, %v87_v37  ;;  %v10820_v39 = vcombine.high %v59_v34, %v87_v37  ;;  %v12741_v46 = vld [vmem:[%s17165_s26 + $0x130] sm:$0xff]   ;;  %v12743_v48 = vld [vmem:[%s17165_s26 + $0x168] sm:$0xff]   ;;  %v12747_v52 = vld [vmem:[%s17165_s26 + $0x160] sm:$0xff]  }
  0x18   :  { %11936 = vmatpush3.bf16.msra.mxu0 %v12717_v14  ;;  %v12742_v47 = vld [vmem:[%s17165_s26 + $0x1b0] sm:$0xff]   ;;  %v12744_v49 = vld [vmem:[%s17165_s26 + $0x1e8] sm:$0xff]   ;;  %v12748_v53 = vld [vmem:[%s17165_s26 + $0x1e0] sm:$0xff]  }
  0x19   :  { %11958 = vmatpush3.bf16.msra.mxu1 %v12718_v15  ;;  %11937 = vmatprep.subr.bf16.mxu0 %v12719_v16  ;;  %v12745_v50 = vld [vmem:[%s17165_s26 + $0x128] sm:$0xff]   ;;  %v12749_v54 = vld [vmem:[%s17165_s26 + $0x120] sm:$0xff]   ;;  %v12751_v56 = vld [vmem:[%s17165_s26 + $0x158] sm:$0xff]  }
  0x1a   :  { %11959 = vmatprep.subr.bf16.mxu1 %v12720_v17  ;;  %3964 = vmatprep.mubr.bf16.mxu0 %v10818_v36  ;;  %v12746_v51 = vld [vmem:[%s17165_s26 + $0x1a8] sm:$0xff]   ;;  %v12750_v55 = vld [vmem:[%s17165_s26 + $0x1a0] sm:$0xff]   ;;  %v12752_v57 = vld [vmem:[%s17165_s26 + $0x1d8] sm:$0xff]  }
  0x1b   :  { %4005 = vmatprep.mubr.bf16.mxu1 %v10820_v39  ;;  %v12753_v58 = vld [vmem:[%s17165_s26 + $0x118] sm:$0xff]   ;;  %v12755_v60 = vld [vmem:[%s17165_s26 + $0x150] sm:$0xff]   ;;  %v12759_v0 = vld [vmem:[%s17165_s26 + $0x148] sm:$0xff]  }
  0x1c   :  { %11938 = vmatpush3.bf16.msra.mxu0 %v12721_v18  ;;  %v12754_v59 = vld [vmem:[%s17165_s26 + $0x198] sm:$0xff]   ;;  %v12756_v61 = vld [vmem:[%s17165_s26 + $0x1d0] sm:$0xff]   ;;  %v12760_v1 = vld [vmem:[%s17165_s26 + $0x1c8] sm:$0xff]  }
  0x1d   :  { %11960 = vmatpush3.bf16.msra.mxu1 %v12722_v19  ;;  %11939 = vmatprep.subr.bf16.mxu0 %v12723_v20  ;;  %v12757_v62 = vld [vmem:[%s17165_s26 + $0x110] sm:$0xff]   ;;  %v12761_v2 = vld [vmem:[%s17165_s26 + $0x108] sm:$0xff]   ;;  %v12763_v4 = vld [vmem:[%s17165_s26 + $0x140] sm:$0xff]  }
  0x1e   :  { %11961 = vmatprep.subr.bf16.mxu1 %v12724_v21  ;;  %v12758_v63 = vld [vmem:[%s17165_s26 + $0x190] sm:$0xff]   ;;  %v12762_v3 = vld [vmem:[%s17165_s26 + $0x188] sm:$0xff]   ;;  %v12764_v5 = vld [vmem:[%s17165_s26 + $0x1c0] sm:$0xff]  }
  0x1f   :  { %v12765_v6 = vld [vmem:[%s17165_s26 + $0x100] sm:$0xff]   ;;  %v60_v8 = vld [vmem:[%s17166_s20 + $0x10] sm:$0xff]  ;;  %v61_v12 = vld [vmem:[%s17166_s20 + $0x18] sm:$0xff] }
  0x20   :  { %11940 = vmatpush3.bf16.msra.mxu0 %v12725_v22  ;;  %v12766_v7 = vld [vmem:[%s17165_s26 + $0x180] sm:$0xff]   ;;  %v88_v9 = vld [vmem:[%s17166_s20 + $0xf0] sm:$0xff]  ;;  %v89_v13 = vld [vmem:[%s17166_s20 + $0xf8] sm:$0xff] }
  0x21   :  { %11962 = vmatpush3.bf16.msra.mxu1 %v12726_v23  ;;  %11941 = vmatprep.subr.bf16.mxu0 %v12727_v24  ;;  %v10821_v10 = vcombine.low %v60_v8, %v88_v9  ;;  %v10822_v11 = vcombine.high %v60_v8, %v88_v9  ;;  %v10823_v14 = vcombine.low %v61_v12, %v89_v13  ;;  %v12767_v16 = vld [vmem:[%s17165_s26 + $0x278] sm:$0xff]   ;;  %v12771_v20 = vld [vmem:[%s17165_s26 + $0x270] sm:$0xff]   ;;  %v12775_v24 = vld [vmem:[%s17165_s26 + $0x268] sm:$0xff]  }
  0x22   :  { %11963 = vmatprep.subr.bf16.mxu1 %v12728_v25  ;;  %v10824_v15 = vcombine.high %v61_v12, %v89_v13  ;;  %v12768_v17 = vld [vmem:[%s17165_s26 + $0x2f8] sm:$0xff]   ;;  %v12772_v21 = vld [vmem:[%s17165_s26 + $0x2f0] sm:$0xff]   ;;  %v12776_v25 = vld [vmem:[%s17165_s26 + $0x2e8] sm:$0xff]  }
  0x23   :  { %v12769_v18 = vld [vmem:[%s17165_s26 + $0x238] sm:$0xff]   ;;  %v12773_v22 = vld [vmem:[%s17165_s26 + $0x230] sm:$0xff]  }
  0x24   :  { %11942 = vmatpush3.bf16.msra.mxu0 %v12729_v26  ;;  %v12770_v19 = vld [vmem:[%s17165_s26 + $0x2b8] sm:$0xff]   ;;  %v12774_v23 = vld [vmem:[%s17165_s26 + $0x2b0] sm:$0xff]   ;;  %v12777_v26 = vld [vmem:[%s17165_s26 + $0x228] sm:$0xff]  }
  0x25   :  { %11964 = vmatpush3.bf16.msra.mxu1 %v12730_v27  ;;  %11943 = vmatprep.subr.bf16.mxu0 %v12731_v28  ;;  %v12778_v27 = vld [vmem:[%s17165_s26 + $0x2a8] sm:$0xff]   ;;  %v12779_v28 = vld [vmem:[%s17165_s26 + $0x260] sm:$0xff]   ;;  %v12783_v32 = vld [vmem:[%s17165_s26 + $0x258] sm:$0xff]  }
  0x26   :  { %11965 = vmatprep.subr.bf16.mxu1 %v12732_v29  ;;  %v12780_v29 = vld [vmem:[%s17165_s26 + $0x2e0] sm:$0xff]   ;;  %v12784_v33 = vld [vmem:[%s17165_s26 + $0x2d8] sm:$0xff]   ;;  %v12787_v36 = vld [vmem:[%s17165_s26 + $0x250] sm:$0xff]  }
  0x27   :  { %v12785_v34 = vld [vmem:[%s17165_s26 + $0x218] sm:$0xff]   ;;  %v12788_v37 = vld [vmem:[%s17165_s26 + $0x2d0] sm:$0xff]  }
  0x28   :  { %11944 = vmatpush3.bf16.msra.mxu0 %v12733_v30  ;;  %v12781_v30 = vld [vmem:[%s17165_s26 + $0x220] sm:$0xff]   ;;  %v12790_v39 = vld [vmem:[%s17165_s26 + $0x290] sm:$0xff]   ;;  %v12815_v8 = vld [vmem:[%s17165_s26 + $0x358] sm:$0xff]  }
  0x29   :  { %11966 = vmatpush3.bf16.msra.mxu1 %v12734_v31  ;;  %11973 = vmatprep.subr.bf16.mxu0 %v12735_v40  ;;  %v12782_v31 = vld [vmem:[%s17165_s26 + $0x2a0] sm:$0xff]   ;;  %v12791_v40 = vld [vmem:[%s17165_s26 + $0x248] sm:$0xff]   ;;  %v12816_v9 = vld [vmem:[%s17165_s26 + $0x3d8] sm:$0xff]  }
  0x2a   :  { %11995 = vmatprep.subr.bf16.mxu1 %v12736_v41  ;;  %v12792_v41 = vld [vmem:[%s17165_s26 + $0x2c8] sm:$0xff]   ;;  %v12819_v12 = vld [vmem:[%s17165_s26 + $0x350] sm:$0xff]  }
  0x2b   :  { %3965 = vmatmul.mubr.bf16.vlgmr.msra.gmra.mxu0 %v10817_v35  ;;  %v12786_v35 = vld [vmem:[%s17165_s26 + $0x298] sm:$0xff]   ;;  %v12820_v13 = vld [vmem:[%s17165_s26 + $0x3d0] sm:$0xff]  }
  0x2c   :  { %4006 = vmatmul.mubr.bf16.vlgmr.msra.gmra.mxu1 %v10819_v38  ;;  %11974 = vmatpush3.bf16.msra.mxu0 %v12737_v42  ;;  %v12789_v38 = vld [vmem:[%s17165_s26 + $0x210] sm:$0xff]   ;;  %v12793_v42 = vld [vmem:[%s17165_s26 + $0x208] sm:$0xff]  }
  0x2d   :  { %11996 = vmatpush3.bf16.msra.mxu1 %v12738_v43  ;;  %11975 = vmatprep.subr.bf16.mxu0 %v12739_v44  ;;  %v12794_v43 = vld [vmem:[%s17165_s26 + $0x288] sm:$0xff]   ;;  %v12795_v44 = vld [vmem:[%s17165_s26 + $0x240] sm:$0xff]  }
  0x2e   :  { %11997 = vmatprep.subr.bf16.mxu1 %v12740_v45  ;;  %4046 = vmatprep.mubr.bf16.mxu0 %v10822_v11  ;;  %v12796_v45 = vld [vmem:[%s17165_s26 + $0x2c0] sm:$0xff]   ;;  %v12818_v11 = vld [vmem:[%s17165_s26 + $0x398] sm:$0xff]  }
  0x2f   :  { %4087 = vmatprep.mubr.bf16.mxu1 %v10824_v15  ;;  %v12822_v15 = vld [vmem:[%s17165_s26 + $0x390] sm:$0xff]  }
  0x30   :  { %11976 = vmatpush3.bf16.msra.mxu0 %v12741_v46  ;;  %v12797_v46 = vld [vmem:[%s17165_s26 + $0x200] sm:$0xff]  }
  0x31   :  { %11998 = vmatpush3.bf16.msra.mxu1 %v12742_v47  ;;  %11977 = vmatprep.subr.bf16.mxu0 %v12743_v48  ;;  %v12798_v47 = vld [vmem:[%s17165_s26 + $0x280] sm:$0xff]  }
  0x32   :  { %11999 = vmatprep.subr.bf16.mxu1 %v12744_v49  ;;  %v62_v48 = vld [vmem:[%s17166_s20 + $0x20] sm:$0xff] }
  0x33   :  { %v90_v49 = vld [vmem:[%s17166_s20 + $0x100] sm:$0xff] }
  0x34   :  { %11978 = vmatpush3.bf16.msra.mxu0 %v12745_v50  ;;  %v63_v50 = vld [vmem:[%s17166_s20 + $0x28] sm:$0xff] }
  0x35   :  { %12000 = vmatpush3.bf16.msra.mxu1 %v12746_v51  ;;  %11979 = vmatprep.subr.bf16.mxu0 %v12747_v52  ;;  %v91_v51 = vld [vmem:[%s17166_s20 + $0x108] sm:$0xff]  ;;  %v10825_v52 = vcombine.low %v62_v48, %v90_v49 }
  0x36   :  { %12001 = vmatprep.subr.bf16.mxu1 %v12748_v53  ;;  %v10826_v53 = vcombine.high %v62_v48, %v90_v49  ;;  %v12847_v48 = vld [vmem:[%s17165_s26 + $0x458] sm:$0xff]  }
  0x37   :  { %v12848_v49 = vld [vmem:[%s17165_s26 + $0x4d8] sm:$0xff]  }
  0x38   :  { %11980 = vmatpush3.bf16.msra.mxu0 %v12749_v54  ;;  %v10827_v54 = vcombine.low %v63_v50, %v91_v51 }
  0x39   :  { %12002 = vmatpush3.bf16.msra.mxu1 %v12750_v55  ;;  %11981 = vmatprep.subr.bf16.mxu0 %v12751_v56  ;;  %v10828_v55 = vcombine.high %v63_v50, %v91_v51  ;;  %v12799_v56 = vld [vmem:[%s17165_s26 + $0x378] sm:$0xff]  }
  0x3a   :  { %12003 = vmatprep.subr.bf16.mxu1 %v12752_v57  ;;  %v12800_v57 = vld [vmem:[%s17165_s26 + $0x3f8] sm:$0xff]  }
  0x3b   :  { %v12849_v50 = vld [vmem:[%s17165_s26 + $0x418] sm:$0xff]  }
  0x3c   :  { %11982 = vmatpush3.bf16.msra.mxu0 %v12753_v58  ;;  %v12801_v58 = vld [vmem:[%s17165_s26 + $0x338] sm:$0xff]  }
  0x3d   :  { %12004 = vmatpush3.bf16.msra.mxu1 %v12754_v59  ;;  %11983 = vmatprep.subr.bf16.mxu0 %v12755_v60  ;;  %v12802_v59 = vld [vmem:[%s17165_s26 + $0x3b8] sm:$0xff]   ;;  %v12803_v60 = vld [vmem:[%s17165_s26 + $0x370] sm:$0xff]  }
  0x3e   :  { %12005 = vmatprep.subr.bf16.mxu1 %v12756_v61  ;;  %v12804_v61 = vld [vmem:[%s17165_s26 + $0x3f0] sm:$0xff]   ;;  %v12850_v51 = vld [vmem:[%s17165_s26 + $0x498] sm:$0xff]  }
  0x40   :  { %11984 = vmatpush3.bf16.msra.mxu0 %v12757_v62  ;;  %v12805_v62 = vld [vmem:[%s17165_s26 + $0x330] sm:$0xff]  }
  0x41   :  { %12006 = vmatpush3.bf16.msra.mxu1 %v12758_v63  ;;  %11985 = vmatprep.subr.bf16.mxu0 %v12759_v0  ;;  %v12806_v63 = vld [vmem:[%s17165_s26 + $0x3b0] sm:$0xff]   ;;  %v12807_v0 = vld [vmem:[%s17165_s26 + $0x368] sm:$0xff]  }
  0x42   :  { %12007 = vmatprep.subr.bf16.mxu1 %v12760_v1  ;;  %v12808_v1 = vld [vmem:[%s17165_s26 + $0x3e8] sm:$0xff]  }
  0x44   :  { %11986 = vmatpush3.bf16.msra.mxu0 %v12761_v2  ;;  %v12809_v2 = vld [vmem:[%s17165_s26 + $0x328] sm:$0xff]  }
  0x45   :  { %12008 = vmatpush3.bf16.msra.mxu1 %v12762_v3  ;;  %11987 = vmatprep.subr.bf16.mxu0 %v12763_v4  ;;  %v12810_v3 = vld [vmem:[%s17165_s26 + $0x3a8] sm:$0xff]   ;;  %v12811_v4 = vld [vmem:[%s17165_s26 + $0x360] sm:$0xff]  }
  0x46   :  { %12009 = vmatprep.subr.bf16.mxu1 %v12764_v5  ;;  %v12812_v5 = vld [vmem:[%s17165_s26 + $0x3e0] sm:$0xff]  }
  0x48   :  { %11988 = vmatpush3.bf16.msra.mxu0 %v12765_v6  ;;  %v12813_v6 = vld [vmem:[%s17165_s26 + $0x320] sm:$0xff]  }
  0x49   :  { %12010 = vmatpush3.bf16.msra.mxu1 %v12766_v7  ;;  %12017 = vmatprep.subr.bf16.mxu0 %v12767_v16  ;;  %v12814_v7 = vld [vmem:[%s17165_s26 + $0x3a0] sm:$0xff]   ;;  %v12823_v16 = vld [vmem:[%s17165_s26 + $0x348] sm:$0xff]  }
  0x4a   :  { %12039 = vmatprep.subr.bf16.mxu1 %v12768_v17  ;;  %v12824_v17 = vld [vmem:[%s17165_s26 + $0x3c8] sm:$0xff]  }
  0x4b   :  { %4047 = vmatmul.mubr.bf16.vlgmr.msra.gmra.mxu0 %v10821_v10  ;;  %v12817_v10 = vld [vmem:[%s17165_s26 + $0x318] sm:$0xff]  }
  0x4c   :  { %4088 = vmatmul.mubr.bf16.vlgmr.msra.gmra.mxu1 %v10823_v14  ;;  %12018 = vmatpush3.bf16.msra.mxu0 %v12769_v18  ;;  %v12821_v14 = vld [vmem:[%s17165_s26 + $0x310] sm:$0xff]   ;;  %v12825_v18 = vld [vmem:[%s17165_s26 + $0x308] sm:$0xff]  }
  0x4d   :  { %12040 = vmatpush3.bf16.msra.mxu1 %v12770_v19  ;;  %12019 = vmatprep.subr.bf16.mxu0 %v12771_v20  ;;  %v12826_v19 = vld [vmem:[%s17165_s26 + $0x388] sm:$0xff]   ;;  %v12827_v20 = vld [vmem:[%s17165_s26 + $0x340] sm:$0xff]  }
  0x4e   :  { %12041 = vmatprep.subr.bf16.mxu1 %v12772_v21  ;;  %4128 = vmatprep.mubr.bf16.mxu0 %v10826_v53  ;;  %v12828_v21 = vld [vmem:[%s17165_s26 + $0x3c0] sm:$0xff]   ;;  %v12852_v53 = vld [vmem:[%s17165_s26 + $0x4d0] sm:$0xff]  }
  0x4f   :  { %4169 = vmatprep.mubr.bf16.mxu1 %v10828_v55  ;;  %v12854_v55 = vld [vmem:[%s17165_s26 + $0x490] sm:$0xff]  }
  0x50   :  { %12020 = vmatpush3.bf16.msra.mxu0 %v12773_v22  ;;  %v12829_v22 = vld [vmem:[%s17165_s26 + $0x300] sm:$0xff]  }
  0x51   :  { %12042 = vmatpush3.bf16.msra.mxu1 %v12774_v23  ;;  %12021 = vmatprep.subr.bf16.mxu0 %v12775_v24  ;;  %v12830_v23 = vld [vmem:[%s17165_s26 + $0x380] sm:$0xff]   ;;  %v64_v24 = vld [vmem:[%s17166_s20 + $0x30] sm:$0xff] }
  0x52   :  { %12043 = vmatprep.subr.bf16.mxu1 %v12776_v25  ;;  %v92_v25 = vld [vmem:[%s17166_s20 + $0x110] sm:$0xff] }
  0x54   :  { %12022 = vmatpush3.bf16.msra.mxu0 %v12777_v26  ;;  %v65_v26 = vld [vmem:[%s17166_s20 + $0x38] sm:$0xff] }
  0x55   :  { %12044 = vmatpush3.bf16.msra.mxu1 %v12778_v27  ;;  %12023 = vmatprep.subr.bf16.mxu0 %v12779_v28  ;;  %v10829_v27 = vcombine.low %v64_v24, %v92_v25  ;;  %v10830_v28 = vcombine.high %v64_v24, %v92_v25  ;;  %v12879_v24 = vld [vmem:[%s17165_s26 + $0x558] sm:$0xff]  }
  0x56   :  { %12045 = vmatprep.subr.bf16.mxu1 %v12780_v29  ;;  %v93_v29 = vld [vmem:[%s17166_s20 + $0x118] sm:$0xff] }
  0x57   :  { %v12880_v25 = vld [vmem:[%s17165_s26 + $0x5d8] sm:$0xff]  }
  0x58   :  { %12024 = vmatpush3.bf16.msra.mxu0 %v12781_v30  ;;  %v10831_v30 = vcombine.low %v65_v26, %v93_v29 }
  0x59   :  { %12046 = vmatpush3.bf16.msra.mxu1 %v12782_v31  ;;  %12025 = vmatprep.subr.bf16.mxu0 %v12783_v32  ;;  %v10832_v31 = vcombine.high %v65_v26, %v93_v29  ;;  %v12831_v32 = vld [vmem:[%s17165_s26 + $0x478] sm:$0xff]   ;;  %v12884_v29 = vld [vmem:[%s17165_s26 + $0x5d0] sm:$0xff]  }
  0x5a   :  { %12047 = vmatprep.subr.bf16.mxu1 %v12784_v33  ;;  %v12832_v33 = vld [vmem:[%s17165_s26 + $0x4f8] sm:$0xff]  }
  0x5b   :  { %v12881_v26 = vld [vmem:[%s17165_s26 + $0x518] sm:$0xff]  }
  0x5c   :  { %12026 = vmatpush3.bf16.msra.mxu0 %v12785_v34  ;;  %v12833_v34 = vld [vmem:[%s17165_s26 + $0x438] sm:$0xff]  }
  0x5d   :  { %12048 = vmatpush3.bf16.msra.mxu1 %v12786_v35  ;;  %12027 = vmatprep.subr.bf16.mxu0 %v12787_v36  ;;  %v12834_v35 = vld [vmem:[%s17165_s26 + $0x4b8] sm:$0xff]   ;;  %v12835_v36 = vld [vmem:[%s17165_s26 + $0x470] sm:$0xff]  }
  0x5e   :  { %12049 = vmatprep.subr.bf16.mxu1 %v12788_v37  ;;  %v12836_v37 = vld [vmem:[%s17165_s26 + $0x4f0] sm:$0xff]  }
  0x60   :  { %12028 = vmatpush3.bf16.msra.mxu0 %v12789_v38  ;;  %v12837_v38 = vld [vmem:[%s17165_s26 + $0x430] sm:$0xff]  }
  0x61   :  { %12050 = vmatpush3.bf16.msra.mxu1 %v12790_v39  ;;  %12029 = vmatprep.subr.bf16.mxu0 %v12791_v40  ;;  %v12838_v39 = vld [vmem:[%s17165_s26 + $0x4b0] sm:$0xff]   ;;  %v12839_v40 = vld [vmem:[%s17165_s26 + $0x468] sm:$0xff]  }
  0x62   :  { %12051 = vmatprep.subr.bf16.mxu1 %v12792_v41  ;;  %v12840_v41 = vld [vmem:[%s17165_s26 + $0x4e8] sm:$0xff]  }
  0x64   :  { %12030 = vmatpush3.bf16.msra.mxu0 %v12793_v42  ;;  %v12841_v42 = vld [vmem:[%s17165_s26 + $0x428] sm:$0xff]  }
  0x65   :  { %12052 = vmatpush3.bf16.msra.mxu1 %v12794_v43  ;;  %12031 = vmatprep.subr.bf16.mxu0 %v12795_v44  ;;  %v12842_v43 = vld [vmem:[%s17165_s26 + $0x4a8] sm:$0xff]   ;;  %v12843_v44 = vld [vmem:[%s17165_s26 + $0x460] sm:$0xff]  }
  0x66   :  { %12053 = vmatprep.subr.bf16.mxu1 %v12796_v45  ;;  %v12844_v45 = vld [vmem:[%s17165_s26 + $0x4e0] sm:$0xff]  }
  0x68   :  { %12032 = vmatpush3.bf16.msra.mxu0 %v12797_v46  ;;  %v12845_v46 = vld [vmem:[%s17165_s26 + $0x420] sm:$0xff]  }
  0x69   :  { %12054 = vmatpush3.bf16.msra.mxu1 %v12798_v47  ;;  %12061 = vmatprep.subr.bf16.mxu0 %v12799_v56  ;;  %v12846_v47 = vld [vmem:[%s17165_s26 + $0x4a0] sm:$0xff]   ;;  %v12855_v56 = vld [vmem:[%s17165_s26 + $0x448] sm:$0xff]  }
  0x6a   :  { %12083 = vmatprep.subr.bf16.mxu1 %v12800_v57  ;;  %v12856_v57 = vld [vmem:[%s17165_s26 + $0x4c8] sm:$0xff]  }
  0x6b   :  { %4129 = vmatmul.mubr.bf16.vlgmr.msra.gmra.mxu0 %v10825_v52  ;;  %v12851_v52 = vld [vmem:[%s17165_s26 + $0x450] sm:$0xff]  }
  0x6c   :  { %4170 = vmatmul.mubr.bf16.vlgmr.msra.gmra.mxu1 %v10827_v54  ;;  %12062 = vmatpush3.bf16.msra.mxu0 %v12801_v58  ;;  %v12853_v54 = vld [vmem:[%s17165_s26 + $0x410] sm:$0xff]   ;;  %v12857_v58 = vld [vmem:[%s17165_s26 + $0x408] sm:$0xff]  }
  0x6d   :  { %12084 = vmatpush3.bf16.msra.mxu1 %v12802_v59  ;;  %12063 = vmatprep.subr.bf16.mxu0 %v12803_v60  ;;  %v12858_v59 = vld [vmem:[%s17165_s26 + $0x488] sm:$0xff]   ;;  %v12859_v60 = vld [vmem:[%s17165_s26 + $0x440] sm:$0xff]  }
  0x6e   :  { %12085 = vmatprep.subr.bf16.mxu1 %v12804_v61  ;;  %4210 = vmatprep.mubr.bf16.mxu0 %v10830_v28  ;;  %v12860_v61 = vld [vmem:[%s17165_s26 + $0x4c0] sm:$0xff]   ;;  %v12883_v28 = vld [vmem:[%s17165_s26 + $0x550] sm:$0xff]  }
  0x6f   :  { %4251 = vmatprep.mubr.bf16.mxu1 %v10832_v31  ;;  %v12886_v31 = vld [vmem:[%s17165_s26 + $0x590] sm:$0xff]  }
  0x70   :  { %12064 = vmatpush3.bf16.msra.mxu0 %v12805_v62  ;;  %v12861_v62 = vld [vmem:[%s17165_s26 + $0x400] sm:$0xff]  }
  0x71   :  { %12086 = vmatpush3.bf16.msra.mxu1 %v12806_v63  ;;  %12065 = vmatprep.subr.bf16.mxu0 %v12807_v0  ;;  %v12862_v63 = vld [vmem:[%s17165_s26 + $0x480] sm:$0xff]  }
  0x72   :  { %12087 = vmatprep.subr.bf16.mxu1 %v12808_v1  ;;  %v66_v0 = vld [vmem:[%s17166_s20 + $0x40] sm:$0xff] }
  0x73   :  { %v94_v1 = vld [vmem:[%s17166_s20 + $0x120] sm:$0xff] }
  0x74   :  { %12066 = vmatpush3.bf16.msra.mxu0 %v12809_v2  ;;  %v10833_v2 = vcombine.low %v66_v0, %v94_v1 }
  0x75   :  { %12088 = vmatpush3.bf16.msra.mxu1 %v12810_v3  ;;  %12067 = vmatprep.subr.bf16.mxu0 %v12811_v4  ;;  %v10834_v3 = vcombine.high %v66_v0, %v94_v1  ;;  %v67_v4 = vld [vmem:[%s17166_s20 + $0x48] sm:$0xff]  ;;  %v12911_v0 = vld [vmem:[%s17165_s26 + $0x658] sm:$0xff]  }
  0x76   :  { %12089 = vmatprep.subr.bf16.mxu1 %v12812_v5  ;;  %v95_v5 = vld [vmem:[%s17166_s20 + $0x128] sm:$0xff]  ;;  %v12912_v1 = vld [vmem:[%s17165_s26 + $0x6d8] sm:$0xff]  }
  0x78   :  { %12068 = vmatpush3.bf16.msra.mxu0 %v12813_v6  ;;  %v10835_v6 = vcombine.low %v67_v4, %v95_v5 }
  0x79   :  { %12090 = vmatpush3.bf16.msra.mxu1 %v12814_v7  ;;  %12069 = vmatprep.subr.bf16.mxu0 %v12815_v8  ;;  %v10836_v7 = vcombine.high %v67_v4, %v95_v5  ;;  %v12863_v8 = vld [vmem:[%s17165_s26 + $0x578] sm:$0xff]   ;;  %v12915_v4 = vld [vmem:[%s17165_s26 + $0x650] sm:$0xff]  }
  0x7a   :  { %12091 = vmatprep.subr.bf16.mxu1 %v12816_v9  ;;  %v12864_v9 = vld [vmem:[%s17165_s26 + $0x5f8] sm:$0xff]   ;;  %v12916_v5 = vld [vmem:[%s17165_s26 + $0x6d0] sm:$0xff]  }
  0x7c   :  { %12070 = vmatpush3.bf16.msra.mxu0 %v12817_v10  ;;  %v12865_v10 = vld [vmem:[%s17165_s26 + $0x538] sm:$0xff]  }
  0x7d   :  { %12092 = vmatpush3.bf16.msra.mxu1 %v12818_v11  ;;  %12071 = vmatprep.subr.bf16.mxu0 %v12819_v12  ;;  %v12866_v11 = vld [vmem:[%s17165_s26 + $0x5b8] sm:$0xff]   ;;  %v12867_v12 = vld [vmem:[%s17165_s26 + $0x570] sm:$0xff]  }
  0x7e   :  { %12093 = vmatprep.subr.bf16.mxu1 %v12820_v13  ;;  %v12868_v13 = vld [vmem:[%s17165_s26 + $0x5f0] sm:$0xff]  }
  0x80   :  { %12072 = vmatpush3.bf16.msra.mxu0 %v12821_v14  ;;  %v12869_v14 = vld [vmem:[%s17165_s26 + $0x530] sm:$0xff]  }
  0x81   :  { %12094 = vmatpush3.bf16.msra.mxu1 %v12822_v15  ;;  %12073 = vmatprep.subr.bf16.mxu0 %v12823_v16  ;;  %v12870_v15 = vld [vmem:[%s17165_s26 + $0x5b0] sm:$0xff]   ;;  %v12871_v16 = vld [vmem:[%s17165_s26 + $0x568] sm:$0xff]  }
  0x82   :  { %12095 = vmatprep.subr.bf16.mxu1 %v12824_v17  ;;  %v12872_v17 = vld [vmem:[%s17165_s26 + $0x5e8] sm:$0xff]  }
  0x84   :  { %12074 = vmatpush3.bf16.msra.mxu0 %v12825_v18  ;;  %v12873_v18 = vld [vmem:[%s17165_s26 + $0x528] sm:$0xff]  }
  0x85   :  { %12096 = vmatpush3.bf16.msra.mxu1 %v12826_v19  ;;  %12075 = vmatprep.subr.bf16.mxu0 %v12827_v20  ;;  %v12874_v19 = vld [vmem:[%s17165_s26 + $0x5a8] sm:$0xff]   ;;  %v12875_v20 = vld [vmem:[%s17165_s26 + $0x560] sm:$0xff]  }
  0x86   :  { %12097 = vmatprep.subr.bf16.mxu1 %v12828_v21  ;;  %v12876_v21 = vld [vmem:[%s17165_s26 + $0x5e0] sm:$0xff]  }
  0x88   :  { %12076 = vmatpush3.bf16.msra.mxu0 %v12829_v22  ;;  %v12877_v22 = vld [vmem:[%s17165_s26 + $0x520] sm:$0xff]  }
  0x89   :  { %12098 = vmatpush3.bf16.msra.mxu1 %v12830_v23  ;;  %12105 = vmatprep.subr.bf16.mxu0 %v12831_v32  ;;  %v12878_v23 = vld [vmem:[%s17165_s26 + $0x5a0] sm:$0xff]   ;;  %v12887_v32 = vld [vmem:[%s17165_s26 + $0x548] sm:$0xff]  }
  0x8a   :  { %12127 = vmatprep.subr.bf16.mxu1 %v12832_v33  ;;  %v12888_v33 = vld [vmem:[%s17165_s26 + $0x5c8] sm:$0xff]  }
  0x8b   :  { %4211 = vmatmul.mubr.bf16.vlgmr.msra.gmra.mxu0 %v10829_v27  ;;  %v12882_v27 = vld [vmem:[%s17165_s26 + $0x598] sm:$0xff]  }
  0x8c   :  { %4252 = vmatmul.mubr.bf16.vlgmr.msra.gmra.mxu1 %v10831_v30  ;;  %12106 = vmatpush3.bf16.msra.mxu0 %v12833_v34  ;;  %v12885_v30 = vld [vmem:[%s17165_s26 + $0x510] sm:$0xff]   ;;  %v12889_v34 = vld [vmem:[%s17165_s26 + $0x508] sm:$0xff]  }
  0x8d   :  { %12128 = vmatpush3.bf16.msra.mxu1 %v12834_v35  ;;  %12107 = vmatprep.subr.bf16.mxu0 %v12835_v36  ;;  %v12890_v35 = vld [vmem:[%s17165_s26 + $0x588] sm:$0xff]   ;;  %v12891_v36 = vld [vmem:[%s17165_s26 + $0x540] sm:$0xff]  }
  0x8e   :  { %12129 = vmatprep.subr.bf16.mxu1 %v12836_v37  ;;  %4292 = vmatprep.mubr.bf16.mxu0 %v10834_v3  ;;  %v12892_v37 = vld [vmem:[%s17165_s26 + $0x5c0] sm:$0xff]   ;;  %v12914_v3 = vld [vmem:[%s17165_s26 + $0x698] sm:$0xff]  }
  0x8f   :  { %4333 = vmatprep.mubr.bf16.mxu1 %v10836_v7  ;;  %v12918_v7 = vld [vmem:[%s17165_s26 + $0x690] sm:$0xff]  }
  0x90   :  { %12108 = vmatpush3.bf16.msra.mxu0 %v12837_v38  ;;  %v12893_v38 = vld [vmem:[%s17165_s26 + $0x500] sm:$0xff]  }
  0x91   :  { %12130 = vmatpush3.bf16.msra.mxu1 %v12838_v39  ;;  %12109 = vmatprep.subr.bf16.mxu0 %v12839_v40  ;;  %v12894_v39 = vld [vmem:[%s17165_s26 + $0x580] sm:$0xff]   ;;  %v68_v40 = vld [vmem:[%s17166_s20 + $0x50] sm:$0xff] }
  0x92   :  { %12131 = vmatprep.subr.bf16.mxu1 %v12840_v41  ;;  %v96_v41 = vld [vmem:[%s17166_s20 + $0x130] sm:$0xff] }
  0x94   :  { %12110 = vmatpush3.bf16.msra.mxu0 %v12841_v42  ;;  %v69_v42 = vld [vmem:[%s17166_s20 + $0x58] sm:$0xff] }
  0x95   :  { %12132 = vmatpush3.bf16.msra.mxu1 %v12842_v43  ;;  %12111 = vmatprep.subr.bf16.mxu0 %v12843_v44  ;;  %v97_v43 = vld [vmem:[%s17166_s20 + $0x138] sm:$0xff]  ;;  %v10837_v44 = vcombine.low %v68_v40, %v96_v41 }
  0x96   :  { %12133 = vmatprep.subr.bf16.mxu1 %v12844_v45  ;;  %v10838_v45 = vcombine.high %v68_v40, %v96_v41  ;;  %v12943_v40 = vld [vmem:[%s17165_s26 + $0x758] sm:$0xff]  }
  0x97   :  { %v12944_v41 = vld [vmem:[%s17165_s26 + $0x7d8] sm:$0xff]  }
  0x98   :  { %12112 = vmatpush3.bf16.msra.mxu0 %v12845_v46  ;;  %v10839_v46 = vcombine.low %v69_v42, %v97_v43 }
  0x99   :  { %12134 = vmatpush3.bf16.msra.mxu1 %v12846_v47  ;;  %12113 = vmatprep.subr.bf16.mxu0 %v12847_v48  ;;  %v10840_v47 = vcombine.high %v69_v42, %v97_v43  ;;  %v12895_v48 = vld [vmem:[%s17165_s26 + $0x678] sm:$0xff]  }
  0x9a   :  { %12135 = vmatprep.subr.bf16.mxu1 %v12848_v49  ;;  %v12896_v49 = vld [vmem:[%s17165_s26 + $0x6f8] sm:$0xff]  }
  0x9b   :  { %v12945_v42 = vld [vmem:[%s17165_s26 + $0x718] sm:$0xff]  }
  0x9c   :  { %12114 = vmatpush3.bf16.msra.mxu0 %v12849_v50  ;;  %v12897_v50 = vld [vmem:[%s17165_s26 + $0x638] sm:$0xff]  }
  0x9d   :  { %12136 = vmatpush3.bf16.msra.mxu1 %v12850_v51  ;;  %12115 = vmatprep.subr.bf16.mxu0 %v12851_v52  ;;  %v12898_v51 = vld [vmem:[%s17165_s26 + $0x6b8] sm:$0xff]   ;;  %v12899_v52 = vld [vmem:[%s17165_s26 + $0x670] sm:$0xff]  }
  0x9e   :  { %12137 = vmatprep.subr.bf16.mxu1 %v12852_v53  ;;  %v12900_v53 = vld [vmem:[%s17165_s26 + $0x6f0] sm:$0xff]   ;;  %v12946_v43 = vld [vmem:[%s17165_s26 + $0x798] sm:$0xff]  }
  0xa0   :  { %12116 = vmatpush3.bf16.msra.mxu0 %v12853_v54  ;;  %v12901_v54 = vld [vmem:[%s17165_s26 + $0x630] sm:$0xff]  }
  0xa1   :  { %12138 = vmatpush3.bf16.msra.mxu1 %v12854_v55  ;;  %12117 = vmatprep.subr.bf16.mxu0 %v12855_v56  ;;  %v12902_v55 = vld [vmem:[%s17165_s26 + $0x6b0] sm:$0xff]   ;;  %v12903_v56 = vld [vmem:[%s17165_s26 + $0x668] sm:$0xff]  }
  0xa2   :  { %12139 = vmatprep.subr.bf16.mxu1 %v12856_v57  ;;  %v12904_v57 = vld [vmem:[%s17165_s26 + $0x6e8] sm:$0xff]  }
  0xa4   :  { %12118 = vmatpush3.bf16.msra.mxu0 %v12857_v58  ;;  %v12905_v58 = vld [vmem:[%s17165_s26 + $0x628] sm:$0xff]  }
  0xa5   :  { %12140 = vmatpush3.bf16.msra.mxu1 %v12858_v59  ;;  %12119 = vmatprep.subr.bf16.mxu0 %v12859_v60  ;;  %v12906_v59 = vld [vmem:[%s17165_s26 + $0x6a8] sm:$0xff]   ;;  %v12907_v60 = vld [vmem:[%s17165_s26 + $0x660] sm:$0xff]  }
  0xa6   :  { %12141 = vmatprep.subr.bf16.mxu1 %v12860_v61  ;;  %v12908_v61 = vld [vmem:[%s17165_s26 + $0x6e0] sm:$0xff]  }
  0xa8   :  { %12120 = vmatpush3.bf16.msra.mxu0 %v12861_v62  ;;  %v12909_v62 = vld [vmem:[%s17165_s26 + $0x620] sm:$0xff]  }
  0xa9   :  { %12142 = vmatpush3.bf16.msra.mxu1 %v12862_v63  ;;  %12149 = vmatprep.subr.bf16.mxu0 %v12863_v8  ;;  %v12910_v63 = vld [vmem:[%s17165_s26 + $0x6a0] sm:$0xff]   ;;  %v12919_v8 = vld [vmem:[%s17165_s26 + $0x648] sm:$0xff]  }
  0xaa   :  { %12171 = vmatprep.subr.bf16.mxu1 %v12864_v9  ;;  %v12920_v9 = vld [vmem:[%s17165_s26 + $0x6c8] sm:$0xff]  }
  0xab   :  { %4293 = vmatmul.mubr.bf16.vlgmr.msra.gmra.mxu0 %v10833_v2  ;;  %v12913_v2 = vld [vmem:[%s17165_s26 + $0x618] sm:$0xff]  }
  0xac   :  { %4334 = vmatmul.mubr.bf16.vlgmr.msra.gmra.mxu1 %v10835_v6  ;;  %12150 = vmatpush3.bf16.msra.mxu0 %v12865_v10  ;;  %v12917_v6 = vld [vmem:[%s17165_s26 + $0x610] sm:$0xff]   ;;  %v12921_v10 = vld [vmem:[%s17165_s26 + $0x608] sm:$0xff]  }
  0xad   :  { %12172 = vmatpush3.bf16.msra.mxu1 %v12866_v11  ;;  %12151 = vmatprep.subr.bf16.mxu0 %v12867_v12  ;;  %v12922_v11 = vld [vmem:[%s17165_s26 + $0x688] sm:$0xff]   ;;  %v12923_v12 = vld [vmem:[%s17165_s26 + $0x640] sm:$0xff]  }
  0xae   :  { %12173 = vmatprep.subr.bf16.mxu1 %v12868_v13  ;;  %4374 = vmatprep.mubr.bf16.mxu0 %v10838_v45  ;;  %v12924_v13 = vld [vmem:[%s17165_s26 + $0x6c0] sm:$0xff]   ;;  %v12948_v45 = vld [vmem:[%s17165_s26 + $0x7d0] sm:$0xff]  }
  0xaf   :  { %4415 = vmatprep.mubr.bf16.mxu1 %v10840_v47  ;;  %v12950_v47 = vld [vmem:[%s17165_s26 + $0x790] sm:$0xff]  }
  0xb0   :  { %12152 = vmatpush3.bf16.msra.mxu0 %v12869_v14  ;;  %v12925_v14 = vld [vmem:[%s17165_s26 + $0x600] sm:$0xff]  }
  0xb1   :  { %12174 = vmatpush3.bf16.msra.mxu1 %v12870_v15  ;;  %12153 = vmatprep.subr.bf16.mxu0 %v12871_v16  ;;  %v12926_v15 = vld [vmem:[%s17165_s26 + $0x680] sm:$0xff]  }
  0xb2   :  { %12175 = vmatprep.subr.bf16.mxu1 %v12872_v17  ;;  %v70_v16 = vld [vmem:[%s17166_s20 + $0x60] sm:$0xff] }
  0xb3   :  { %v98_v17 = vld [vmem:[%s17166_s20 + $0x140] sm:$0xff] }
  0xb4   :  { %12154 = vmatpush3.bf16.msra.mxu0 %v12873_v18  ;;  %v71_v18 = vld [vmem:[%s17166_s20 + $0x68] sm:$0xff] }
  0xb5   :  { %12176 = vmatpush3.bf16.msra.mxu1 %v12874_v19  ;;  %12155 = vmatprep.subr.bf16.mxu0 %v12875_v20  ;;  %v10841_v19 = vcombine.low %v70_v16, %v98_v17  ;;  %v10842_v20 = vcombine.high %v70_v16, %v98_v17  ;;  %v12975_v16 = vld [vmem:[%s17165_s26 + $0x858] sm:$0xff]  }
  0xb6   :  { %12177 = vmatprep.subr.bf16.mxu1 %v12876_v21  ;;  %v99_v21 = vld [vmem:[%s17166_s20 + $0x148] sm:$0xff]  ;;  %v12976_v17 = vld [vmem:[%s17165_s26 + $0x8d8] sm:$0xff]  }
  0xb8   :  { %12156 = vmatpush3.bf16.msra.mxu0 %v12877_v22  ;;  %v10843_v22 = vcombine.low %v71_v18, %v99_v21 }
  0xb9   :  { %12178 = vmatpush3.bf16.msra.mxu1 %v12878_v23  ;;  %12157 = vmatprep.subr.bf16.mxu0 %v12879_v24  ;;  %v10844_v23 = vcombine.high %v71_v18, %v99_v21  ;;  %v12927_v24 = vld [vmem:[%s17165_s26 + $0x778] sm:$0xff]   ;;  %v12980_v21 = vld [vmem:[%s17165_s26 + $0x8d0] sm:$0xff]  }
  0xba   :  { %12179 = vmatprep.subr.bf16.mxu1 %v12880_v25  ;;  %v12928_v25 = vld [vmem:[%s17165_s26 + $0x7f8] sm:$0xff]  }
  0xbb   :  { %v12977_v18 = vld [vmem:[%s17165_s26 + $0x818] sm:$0xff]  }
  0xbc   :  { %12158 = vmatpush3.bf16.msra.mxu0 %v12881_v26  ;;  %v12929_v26 = vld [vmem:[%s17165_s26 + $0x738] sm:$0xff]  }
  0xbd   :  { %12180 = vmatpush3.bf16.msra.mxu1 %v12882_v27  ;;  %12159 = vmatprep.subr.bf16.mxu0 %v12883_v28  ;;  %v12930_v27 = vld [vmem:[%s17165_s26 + $0x7b8] sm:$0xff]   ;;  %v12931_v28 = vld [vmem:[%s17165_s26 + $0x770] sm:$0xff]  }
  0xbe   :  { %12181 = vmatprep.subr.bf16.mxu1 %v12884_v29  ;;  %v12932_v29 = vld [vmem:[%s17165_s26 + $0x7f0] sm:$0xff]  }
  0xc0   :  { %12160 = vmatpush3.bf16.msra.mxu0 %v12885_v30  ;;  %v12933_v30 = vld [vmem:[%s17165_s26 + $0x730] sm:$0xff]  }
  0xc1   :  { %12182 = vmatpush3.bf16.msra.mxu1 %v12886_v31  ;;  %12161 = vmatprep.subr.bf16.mxu0 %v12887_v32  ;;  %v12934_v31 = vld [vmem:[%s17165_s26 + $0x7b0] sm:$0xff]   ;;  %v12935_v32 = vld [vmem:[%s17165_s26 + $0x768] sm:$0xff]  }
  0xc2   :  { %12183 = vmatprep.subr.bf16.mxu1 %v12888_v33  ;;  %v12936_v33 = vld [vmem:[%s17165_s26 + $0x7e8] sm:$0xff]  }
  0xc4   :  { %12162 = vmatpush3.bf16.msra.mxu0 %v12889_v34  ;;  %v12937_v34 = vld [vmem:[%s17165_s26 + $0x728] sm:$0xff]  }
  0xc5   :  { %12184 = vmatpush3.bf16.msra.mxu1 %v12890_v35  ;;  %12163 = vmatprep.subr.bf16.mxu0 %v12891_v36  ;;  %v12938_v35 = vld [vmem:[%s17165_s26 + $0x7a8] sm:$0xff]   ;;  %v12939_v36 = vld [vmem:[%s17165_s26 + $0x760] sm:$0xff]  }
  0xc6   :  { %12185 = vmatprep.subr.bf16.mxu1 %v12892_v37  ;;  %v12940_v37 = vld [vmem:[%s17165_s26 + $0x7e0] sm:$0xff]  }
  0xc8   :  { %12164 = vmatpush3.bf16.msra.mxu0 %v12893_v38  ;;  %v12941_v38 = vld [vmem:[%s17165_s26 + $0x720] sm:$0xff]  }
  0xc9   :  { %12186 = vmatpush3.bf16.msra.mxu1 %v12894_v39  ;;  %12193 = vmatprep.subr.bf16.mxu0 %v12895_v48  ;;  %v12942_v39 = vld [vmem:[%s17165_s26 + $0x7a0] sm:$0xff]   ;;  %v12951_v48 = vld [vmem:[%s17165_s26 + $0x748] sm:$0xff]  }
  0xca   :  { %12215 = vmatprep.subr.bf16.mxu1 %v12896_v49  ;;  %v12952_v49 = vld [vmem:[%s17165_s26 + $0x7c8] sm:$0xff]  }
  0xcb   :  { %4375 = vmatmul.mubr.bf16.vlgmr.msra.gmra.mxu0 %v10837_v44  ;;  %v12947_v44 = vld [vmem:[%s17165_s26 + $0x750] sm:$0xff]  }
  0xcc   :  { %4416 = vmatmul.mubr.bf16.vlgmr.msra.gmra.mxu1 %v10839_v46  ;;  %12194 = vmatpush3.bf16.msra.mxu0 %v12897_v50  ;;  %v12949_v46 = vld [vmem:[%s17165_s26 + $0x710] sm:$0xff]   ;;  %v12953_v50 = vld [vmem:[%s17165_s26 + $0x708] sm:$0xff]  }
  0xcd   :  { %12216 = vmatpush3.bf16.msra.mxu1 %v12898_v51  ;;  %12195 = vmatprep.subr.bf16.mxu0 %v12899_v52  ;;  %v12954_v51 = vld [vmem:[%s17165_s26 + $0x788] sm:$0xff]   ;;  %v12955_v52 = vld [vmem:[%s17165_s26 + $0x740] sm:$0xff]  }
  0xce   :  { %12217 = vmatprep.subr.bf16.mxu1 %v12900_v53  ;;  %4456 = vmatprep.mubr.bf16.mxu0 %v10842_v20  ;;  %v12956_v53 = vld [vmem:[%s17165_s26 + $0x7c0] sm:$0xff]   ;;  %v12979_v20 = vld [vmem:[%s17165_s26 + $0x850] sm:$0xff]  }
  0xcf   :  { %4497 = vmatprep.mubr.bf16.mxu1 %v10844_v23  ;;  %v12982_v23 = vld [vmem:[%s17165_s26 + $0x890] sm:$0xff]  }
  0xd0   :  { %12196 = vmatpush3.bf16.msra.mxu0 %v12901_v54  ;;  %v12957_v54 = vld [vmem:[%s17165_s26 + $0x700] sm:$0xff]  }
  0xd1   :  { %12218 = vmatpush3.bf16.msra.mxu1 %v12902_v55  ;;  %12197 = vmatprep.subr.bf16.mxu0 %v12903_v56  ;;  %v12958_v55 = vld [vmem:[%s17165_s26 + $0x780] sm:$0xff]   ;;  %v72_v56 = vld [vmem:[%s17166_s20 + $0x70] sm:$0xff] }
  0xd2   :  { %12219 = vmatprep.subr.bf16.mxu1 %v12904_v57  ;;  %v100_v57 = vld [vmem:[%s17166_s20 + $0x150] sm:$0xff] }
  0xd4   :  { %12198 = vmatpush3.bf16.msra.mxu0 %v12905_v58  ;;  %v73_v58 = vld [vmem:[%s17166_s20 + $0x78] sm:$0xff] }
  0xd5   :  { %12220 = vmatpush3.bf16.msra.mxu1 %v12906_v59  ;;  %12199 = vmatprep.subr.bf16.mxu0 %v12907_v60  ;;  %v101_v59 = vld [vmem:[%s17166_s20 + $0x158] sm:$0xff]  ;;  %v10845_v60 = vcombine.low %v72_v56, %v100_v57 }
  0xd6   :  { %12221 = vmatprep.subr.bf16.mxu1 %v12908_v61  ;;  %v10846_v61 = vcombine.high %v72_v56, %v100_v57  ;;  %v13007_v56 = vld [vmem:[%s17165_s26 + $0x958] sm:$0xff]  }
  0xd7   :  { %v13008_v57 = vld [vmem:[%s17165_s26 + $0x9d8] sm:$0xff]  }
  0xd8   :  { %12200 = vmatpush3.bf16.msra.mxu0 %v12909_v62  ;;  %v10847_v62 = vcombine.low %v73_v58, %v101_v59 }
  0xd9   :  { %12222 = vmatpush3.bf16.msra.mxu1 %v12910_v63  ;;  %12201 = vmatprep.subr.bf16.mxu0 %v12911_v0  ;;  %v10848_v63 = vcombine.high %v73_v58, %v101_v59  ;;  %v12959_v0 = vld [vmem:[%s17165_s26 + $0x878] sm:$0xff]  }
  0xda   :  { %12223 = vmatprep.subr.bf16.mxu1 %v12912_v1  ;;  %v12960_v1 = vld [vmem:[%s17165_s26 + $0x8f8] sm:$0xff]  }
  0xdb   :  { %v13009_v58 = vld [vmem:[%s17165_s26 + $0x918] sm:$0xff]  }
  0xdc   :  { %12202 = vmatpush3.bf16.msra.mxu0 %v12913_v2  ;;  %v12961_v2 = vld [vmem:[%s17165_s26 + $0x838] sm:$0xff]  }
  0xdd   :  { %12224 = vmatpush3.bf16.msra.mxu1 %v12914_v3  ;;  %12203 = vmatprep.subr.bf16.mxu0 %v12915_v4  ;;  %v12962_v3 = vld [vmem:[%s17165_s26 + $0x8b8] sm:$0xff]   ;;  %v12963_v4 = vld [vmem:[%s17165_s26 + $0x870] sm:$0xff]  }
  0xde   :  { %12225 = vmatprep.subr.bf16.mxu1 %v12916_v5  ;;  %v12964_v5 = vld [vmem:[%s17165_s26 + $0x8f0] sm:$0xff]   ;;  %v13010_v59 = vld [vmem:[%s17165_s26 + $0x998] sm:$0xff]  }
  0xe0   :  { %12204 = vmatpush3.bf16.msra.mxu0 %v12917_v6  ;;  %v12965_v6 = vld [vmem:[%s17165_s26 + $0x830] sm:$0xff]  }
  0xe1   :  { %12226 = vmatpush3.bf16.msra.mxu1 %v12918_v7  ;;  %12205 = vmatprep.subr.bf16.mxu0 %v12919_v8  ;;  %v12966_v7 = vld [vmem:[%s17165_s26 + $0x8b0] sm:$0xff]   ;;  %v12967_v8 = vld [vmem:[%s17165_s26 + $0x868] sm:$0xff]  }
  0xe2   :  { %12227 = vmatprep.subr.bf16.mxu1 %v12920_v9  ;;  %v12968_v9 = vld [vmem:[%s17165_s26 + $0x8e8] sm:$0xff]  }
  0xe4   :  { %12206 = vmatpush3.bf16.msra.mxu0 %v12921_v10  ;;  %v12969_v10 = vld [vmem:[%s17165_s26 + $0x828] sm:$0xff]  }
  0xe5   :  { %12228 = vmatpush3.bf16.msra.mxu1 %v12922_v11  ;;  %12207 = vmatprep.subr.bf16.mxu0 %v12923_v12  ;;  %v12970_v11 = vld [vmem:[%s17165_s26 + $0x8a8] sm:$0xff]   ;;  %v12971_v12 = vld [vmem:[%s17165_s26 + $0x860] sm:$0xff]  }
  0xe6   :  { %12229 = vmatprep.subr.bf16.mxu1 %v12924_v13  ;;  %v12972_v13 = vld [vmem:[%s17165_s26 + $0x8e0] sm:$0xff]  }
  0xe8   :  { %12208 = vmatpush3.bf16.msra.mxu0 %v12925_v14  ;;  %v12973_v14 = vld [vmem:[%s17165_s26 + $0x820] sm:$0xff]  }
  0xe9   :  { %12230 = vmatpush3.bf16.msra.mxu1 %v12926_v15  ;;  %12237 = vmatprep.subr.bf16.mxu0 %v12927_v24  ;;  %v12974_v15 = vld [vmem:[%s17165_s26 + $0x8a0] sm:$0xff]   ;;  %v12983_v24 = vld [vmem:[%s17165_s26 + $0x848] sm:$0xff]  }
  0xea   :  { %12259 = vmatprep.subr.bf16.mxu1 %v12928_v25  ;;  %v12984_v25 = vld [vmem:[%s17165_s26 + $0x8c8] sm:$0xff]  }
  0xeb   :  { %4457 = vmatmul.mubr.bf16.vlgmr.msra.gmra.mxu0 %v10841_v19  ;;  %v12978_v19 = vld [vmem:[%s17165_s26 + $0x898] sm:$0xff]  }
  0xec   :  { %4498 = vmatmul.mubr.bf16.vlgmr.msra.gmra.mxu1 %v10843_v22  ;;  %12238 = vmatpush3.bf16.msra.mxu0 %v12929_v26  ;;  %v12981_v22 = vld [vmem:[%s17165_s26 + $0x810] sm:$0xff]   ;;  %v12985_v26 = vld [vmem:[%s17165_s26 + $0x808] sm:$0xff]  }
  0xed   :  { %12260 = vmatpush3.bf16.msra.mxu1 %v12930_v27  ;;  %12239 = vmatprep.subr.bf16.mxu0 %v12931_v28  ;;  %v12986_v27 = vld [vmem:[%s17165_s26 + $0x888] sm:$0xff]   ;;  %v12987_v28 = vld [vmem:[%s17165_s26 + $0x840] sm:$0xff]  }
  0xee   :  { %12261 = vmatprep.subr.bf16.mxu1 %v12932_v29  ;;  %4538 = vmatprep.mubr.bf16.mxu0 %v10846_v61  ;;  %v12988_v29 = vld [vmem:[%s17165_s26 + $0x8c0] sm:$0xff]   ;;  %v13012_v61 = vld [vmem:[%s17165_s26 + $0x9d0] sm:$0xff]  }
  0xef   :  { %4579 = vmatprep.mubr.bf16.mxu1 %v10848_v63  ;;  %v13014_v63 = vld [vmem:[%s17165_s26 + $0x990] sm:$0xff]  }
  0xf0   :  { %12240 = vmatpush3.bf16.msra.mxu0 %v12933_v30  ;;  %v12989_v30 = vld [vmem:[%s17165_s26 + $0x800] sm:$0xff]  }
  0xf1   :  { %12262 = vmatpush3.bf16.msra.mxu1 %v12934_v31  ;;  %12241 = vmatprep.subr.bf16.mxu0 %v12935_v32  ;;  %v12990_v31 = vld [vmem:[%s17165_s26 + $0x880] sm:$0xff]  }
  0xf2   :  { %12263 = vmatprep.subr.bf16.mxu1 %v12936_v33  ;;  %v74_v32 = vld [vmem:[%s17166_s20 + $0x80] sm:$0xff] }
  0xf3   :  { %v102_v33 = vld [vmem:[%s17166_s20 + $0x160] sm:$0xff] }
  0xf4   :  { %12242 = vmatpush3.bf16.msra.mxu0 %v12937_v34  ;;  %v75_v34 = vld [vmem:[%s17166_s20 + $0x88] sm:$0xff] }
  0xf5   :  { %12264 = vmatpush3.bf16.msra.mxu1 %v12938_v35  ;;  %12243 = vmatprep.subr.bf16.mxu0 %v12939_v36  ;;  %v10849_v35 = vcombine.low %v74_v32, %v102_v33  ;;  %v10850_v36 = vcombine.high %v74_v32, %v102_v33  ;;  %v13039_v32 = vld [vmem:[%s17165_s26 + $0xa58] sm:$0xff]  }
  0xf6   :  { %12265 = vmatprep.subr.bf16.mxu1 %v12940_v37  ;;  %v103_v37 = vld [vmem:[%s17166_s20 + $0x168] sm:$0xff]  ;;  %v13040_v33 = vld [vmem:[%s17165_s26 + $0xad8] sm:$0xff]  }
  0xf8   :  { %12244 = vmatpush3.bf16.msra.mxu0 %v12941_v38  ;;  %v10851_v38 = vcombine.low %v75_v34, %v103_v37 }
  0xf9   :  { %12266 = vmatpush3.bf16.msra.mxu1 %v12942_v39  ;;  %12245 = vmatprep.subr.bf16.mxu0 %v12943_v40  ;;  %v10852_v39 = vcombine.high %v75_v34, %v103_v37  ;;  %v12991_v40 = vld [vmem:[%s17165_s26 + $0x978] sm:$0xff]   ;;  %v13044_v37 = vld [vmem:[%s17165_s26 + $0xad0] sm:$0xff]  }
  0xfa   :  { %12267 = vmatprep.subr.bf16.mxu1 %v12944_v41  ;;  %v12992_v41 = vld [vmem:[%s17165_s26 + $0x9f8] sm:$0xff]  }
  0xfb   :  { %v13041_v34 = vld [vmem:[%s17165_s26 + $0xa18] sm:$0xff]  }
  0xfc   :  { %12246 = vmatpush3.bf16.msra.mxu0 %v12945_v42  ;;  %v12993_v42 = vld [vmem:[%s17165_s26 + $0x938] sm:$0xff]  }
  0xfd   :  { %12268 = vmatpush3.bf16.msra.mxu1 %v12946_v43  ;;  %12247 = vmatprep.subr.bf16.mxu0 %v12947_v44  ;;  %v12994_v43 = vld [vmem:[%s17165_s26 + $0x9b8] sm:$0xff]   ;;  %v12995_v44 = vld [vmem:[%s17165_s26 + $0x970] sm:$0xff]  }
  0xfe   :  { %12269 = vmatprep.subr.bf16.mxu1 %v12948_v45  ;;  %v12996_v45 = vld [vmem:[%s17165_s26 + $0x9f0] sm:$0xff]  }
 0x100   :  { %12248 = vmatpush3.bf16.msra.mxu0 %v12949_v46  ;;  %v12997_v46 = vld [vmem:[%s17165_s26 + $0x930] sm:$0xff]  }
 0x101   :  { %12270 = vmatpush3.bf16.msra.mxu1 %v12950_v47  ;;  %12249 = vmatprep.subr.bf16.mxu0 %v12951_v48  ;;  %v12998_v47 = vld [vmem:[%s17165_s26 + $0x9b0] sm:$0xff]   ;;  %v12999_v48 = vld [vmem:[%s17165_s26 + $0x968] sm:$0xff]  }
 0x102   :  { %12271 = vmatprep.subr.bf16.mxu1 %v12952_v49  ;;  %v13000_v49 = vld [vmem:[%s17165_s26 + $0x9e8] sm:$0xff]  }
 0x104   :  { %12250 = vmatpush3.bf16.msra.mxu0 %v12953_v50  ;;  %v13001_v50 = vld [vmem:[%s17165_s26 + $0x928] sm:$0xff]  }
 0x105   :  { %12272 = vmatpush3.bf16.msra.mxu1 %v12954_v51  ;;  %12251 = vmatprep.subr.bf16.mxu0 %v12955_v52  ;;  %v13002_v51 = vld [vmem:[%s17165_s26 + $0x9a8] sm:$0xff]   ;;  %v13003_v52 = vld [vmem:[%s17165_s26 + $0x960] sm:$0xff]  }
 0x106   :  { %12273 = vmatprep.subr.bf16.mxu1 %v12956_v53  ;;  %v13004_v53 = vld [vmem:[%s17165_s26 + $0x9e0] sm:$0xff]  }
 0x108   :  { %12252 = vmatpush3.bf16.msra.mxu0 %v12957_v54  ;;  %v13005_v54 = vld [vmem:[%s17165_s26 + $0x920] sm:$0xff]  }
 0x109   :  { %12274 = vmatpush3.bf16.msra.mxu1 %v12958_v55  ;;  %12281 = vmatprep.subr.bf16.mxu0 %v12959_v0  ;;  %v13006_v55 = vld [vmem:[%s17165_s26 + $0x9a0] sm:$0xff]   ;;  %v13015_v0 = vld [vmem:[%s17165_s26 + $0x948] sm:$0xff]  }
 0x10a   :  { %12303 = vmatprep.subr.bf16.mxu1 %v12960_v1  ;;  %v13016_v1 = vld [vmem:[%s17165_s26 + $0x9c8] sm:$0xff]  }
 0x10b   :  { %4539 = vmatmul.mubr.bf16.vlgmr.msra.gmra.mxu0 %v10845_v60  ;;  %v13011_v60 = vld [vmem:[%s17165_s26 + $0x950] sm:$0xff]  }
 0x10c   :  { %4580 = vmatmul.mubr.bf16.vlgmr.msra.gmra.mxu1 %v10847_v62  ;;  %12282 = vmatpush3.bf16.msra.mxu0 %v12961_v2  ;;  %v13013_v62 = vld [vmem:[%s17165_s26 + $0x910] sm:$0xff]   ;;  %v13017_v2 = vld [vmem:[%s17165_s26 + $0x908] sm:$0xff]  }
 0x10d   :  { %12304 = vmatpush3.bf16.msra.mxu1 %v12962_v3  ;;  %12283 = vmatprep.subr.bf16.mxu0 %v12963_v4  ;;  %v13018_v3 = vld [vmem:[%s17165_s26 + $0x988] sm:$0xff]   ;;  %v13019_v4 = vld [vmem:[%s17165_s26 + $0x940] sm:$0xff]  }
 0x10e   :  { %12305 = vmatprep.subr.bf16.mxu1 %v12964_v5  ;;  %4620 = vmatprep.mubr.bf16.mxu0 %v10850_v36  ;;  %v13020_v5 = vld [vmem:[%s17165_s26 + $0x9c0] sm:$0xff]   ;;  %v13043_v36 = vld [vmem:[%s17165_s26 + $0xa50] sm:$0xff]  }
 0x10f   :  { %4661 = vmatprep.mubr.bf16.mxu1 %v10852_v39  ;;  %v13046_v39 = vld [vmem:[%s17165_s26 + $0xa90] sm:$0xff]  }
 0x110   :  { %12284 = vmatpush3.bf16.msra.mxu0 %v12965_v6  ;;  %v13021_v6 = vld [vmem:[%s17165_s26 + $0x900] sm:$0xff]  }
 0x111   :  { %12306 = vmatpush3.bf16.msra.mxu1 %v12966_v7  ;;  %12285 = vmatprep.subr.bf16.mxu0 %v12967_v8  ;;  %v13022_v7 = vld [vmem:[%s17165_s26 + $0x980] sm:$0xff]   ;;  %v76_v8 = vld [vmem:[%s17166_s20 + $0x90] sm:$0xff] }
 0x112   :  { %12307 = vmatprep.subr.bf16.mxu1 %v12968_v9  ;;  %v104_v9 = vld [vmem:[%s17166_s20 + $0x170] sm:$0xff] }
 0x114   :  { %12286 = vmatpush3.bf16.msra.mxu0 %v12969_v10  ;;  %v10853_v10 = vcombine.low %v76_v8, %v104_v9 }
 0x115   :  { %12308 = vmatpush3.bf16.msra.mxu1 %v12970_v11  ;;  %12287 = vmatprep.subr.bf16.mxu0 %v12971_v12  ;;  %v10854_v11 = vcombine.high %v76_v8, %v104_v9  ;;  %v77_v12 = vld [vmem:[%s17166_s20 + $0x98] sm:$0xff] }
 0x116   :  { %12309 = vmatprep.subr.bf16.mxu1 %v12972_v13  ;;  %v105_v13 = vld [vmem:[%s17166_s20 + $0x178] sm:$0xff] }
 0x117   :  { %v13071_v8 = vld [vmem:[%s17165_s26 + $0xb58] sm:$0xff]  }
 0x118   :  { %12288 = vmatpush3.bf16.msra.mxu0 %v12973_v14  ;;  %v10855_v14 = vcombine.low %v77_v12, %v105_v13  ;;  %v13072_v9 = vld [vmem:[%s17165_s26 + $0xbd8] sm:$0xff]  }
 0x119   :  { %12310 = vmatpush3.bf16.msra.mxu1 %v12974_v15  ;;  %12289 = vmatprep.subr.bf16.mxu0 %v12975_v16  ;;  %v10856_v15 = vcombine.high %v77_v12, %v105_v13  ;;  %v13023_v16 = vld [vmem:[%s17165_s26 + $0xa78] sm:$0xff]   ;;  %v13075_v12 = vld [vmem:[%s17165_s26 + $0xb50] sm:$0xff]  }
 0x11a   :  { %12311 = vmatprep.subr.bf16.mxu1 %v12976_v17  ;;  %v13024_v17 = vld [vmem:[%s17165_s26 + $0xaf8] sm:$0xff]   ;;  %v13076_v13 = vld [vmem:[%s17165_s26 + $0xbd0] sm:$0xff]  }
 0x11c   :  { %12290 = vmatpush3.bf16.msra.mxu0 %v12977_v18  ;;  %v13025_v18 = vld [vmem:[%s17165_s26 + $0xa38] sm:$0xff]  }
 0x11d   :  { %12312 = vmatpush3.bf16.msra.mxu1 %v12978_v19  ;;  %12291 = vmatprep.subr.bf16.mxu0 %v12979_v20  ;;  %v13026_v19 = vld [vmem:[%s17165_s26 + $0xab8] sm:$0xff]   ;;  %v13027_v20 = vld [vmem:[%s17165_s26 + $0xa70] sm:$0xff]  }
 0x11e   :  { %12313 = vmatprep.subr.bf16.mxu1 %v12980_v21  ;;  %v13028_v21 = vld [vmem:[%s17165_s26 + $0xaf0] sm:$0xff]  }
 0x120   :  { %12292 = vmatpush3.bf16.msra.mxu0 %v12981_v22  ;;  %v13029_v22 = vld [vmem:[%s17165_s26 + $0xa30] sm:$0xff]  }
 0x121   :  { %12314 = vmatpush3.bf16.msra.mxu1 %v12982_v23  ;;  %12293 = vmatprep.subr.bf16.mxu0 %v12983_v24  ;;  %v13030_v23 = vld [vmem:[%s17165_s26 + $0xab0] sm:$0xff]   ;;  %v13031_v24 = vld [vmem:[%s17165_s26 + $0xa68] sm:$0xff]  }
 0x122   :  { %12315 = vmatprep.subr.bf16.mxu1 %v12984_v25  ;;  %v13032_v25 = vld [vmem:[%s17165_s26 + $0xae8] sm:$0xff]  }
 0x124   :  { %12294 = vmatpush3.bf16.msra.mxu0 %v12985_v26  ;;  %v13033_v26 = vld [vmem:[%s17165_s26 + $0xa28] sm:$0xff]  }
 0x125   :  { %12316 = vmatpush3.bf16.msra.mxu1 %v12986_v27  ;;  %12295 = vmatprep.subr.bf16.mxu0 %v12987_v28  ;;  %v13034_v27 = vld [vmem:[%s17165_s26 + $0xaa8] sm:$0xff]   ;;  %v13035_v28 = vld [vmem:[%s17165_s26 + $0xa60] sm:$0xff]  }
 0x126   :  { %12317 = vmatprep.subr.bf16.mxu1 %v12988_v29  ;;  %v13036_v29 = vld [vmem:[%s17165_s26 + $0xae0] sm:$0xff]  }
 0x128   :  { %12296 = vmatpush3.bf16.msra.mxu0 %v12989_v30  ;;  %v13037_v30 = vld [vmem:[%s17165_s26 + $0xa20] sm:$0xff]  }
 0x129   :  { %12318 = vmatpush3.bf16.msra.mxu1 %v12990_v31  ;;  %12325 = vmatprep.subr.bf16.mxu0 %v12991_v40  ;;  %v13038_v31 = vld [vmem:[%s17165_s26 + $0xaa0] sm:$0xff]   ;;  %v13047_v40 = vld [vmem:[%s17165_s26 + $0xa48] sm:$0xff]  }
 0x12a   :  { %12347 = vmatprep.subr.bf16.mxu1 %v12992_v41  ;;  %v13048_v41 = vld [vmem:[%s17165_s26 + $0xac8] sm:$0xff]  }
 0x12b   :  { %4621 = vmatmul.mubr.bf16.vlgmr.msra.gmra.mxu0 %v10849_v35  ;;  %v13042_v35 = vld [vmem:[%s17165_s26 + $0xa98] sm:$0xff]  }
 0x12c   :  { %4662 = vmatmul.mubr.bf16.vlgmr.msra.gmra.mxu1 %v10851_v38  ;;  %12326 = vmatpush3.bf16.msra.mxu0 %v12993_v42  ;;  %v13045_v38 = vld [vmem:[%s17165_s26 + $0xa10] sm:$0xff]   ;;  %v13049_v42 = vld [vmem:[%s17165_s26 + $0xa08] sm:$0xff]  }
 0x12d   :  { %12348 = vmatpush3.bf16.msra.mxu1 %v12994_v43  ;;  %12327 = vmatprep.subr.bf16.mxu0 %v12995_v44  ;;  %v13050_v43 = vld [vmem:[%s17165_s26 + $0xa88] sm:$0xff]   ;;  %v13051_v44 = vld [vmem:[%s17165_s26 + $0xa40] sm:$0xff]  }
 0x12e   :  { %12349 = vmatprep.subr.bf16.mxu1 %v12996_v45  ;;  %4702 = vmatprep.mubr.bf16.mxu0 %v10854_v11  ;;  %v13052_v45 = vld [vmem:[%s17165_s26 + $0xac0] sm:$0xff]   ;;  %v13074_v11 = vld [vmem:[%s17165_s26 + $0xb98] sm:$0xff]  }
 0x12f   :  { %4743 = vmatprep.mubr.bf16.mxu1 %v10856_v15  ;;  %v13078_v15 = vld [vmem:[%s17165_s26 + $0xb90] sm:$0xff]  }
 0x130   :  { %12328 = vmatpush3.bf16.msra.mxu0 %v12997_v46  ;;  %v13053_v46 = vld [vmem:[%s17165_s26 + $0xa00] sm:$0xff]  }
 0x131   :  { %12350 = vmatpush3.bf16.msra.mxu1 %v12998_v47  ;;  %12329 = vmatprep.subr.bf16.mxu0 %v12999_v48  ;;  %v13054_v47 = vld [vmem:[%s17165_s26 + $0xa80] sm:$0xff]  }
 0x132   :  { %12351 = vmatprep.subr.bf16.mxu1 %v13000_v49  ;;  %v78_v48 = vld [vmem:[%s17166_s20 + $0xa0] sm:$0xff] }
 0x133   :  { %v106_v49 = vld [vmem:[%s17166_s20 + $0x180] sm:$0xff] }
 0x134   :  { %12330 = vmatpush3.bf16.msra.mxu0 %v13001_v50  ;;  %v79_v50 = vld [vmem:[%s17166_s20 + $0xa8] sm:$0xff] }
 0x135   :  { %12352 = vmatpush3.bf16.msra.mxu1 %v13002_v51  ;;  %12331 = vmatprep.subr.bf16.mxu0 %v13003_v52  ;;  %v107_v51 = vld [vmem:[%s17166_s20 + $0x188] sm:$0xff]  ;;  %v10857_v52 = vcombine.low %v78_v48, %v106_v49 }
 0x136   :  { %12353 = vmatprep.subr.bf16.mxu1 %v13004_v53  ;;  %v10858_v53 = vcombine.high %v78_v48, %v106_v49  ;;  %v13103_v48 = vld [vmem:[%s17165_s26 + $0xc58] sm:$0xff]  }
 0x137   :  { %v13104_v49 = vld [vmem:[%s17165_s26 + $0xcd8] sm:$0xff]  }
 0x138   :  { %12332 = vmatpush3.bf16.msra.mxu0 %v13005_v54  ;;  %v10859_v54 = vcombine.low %v79_v50, %v107_v51 }
 0x139   :  { %12354 = vmatpush3.bf16.msra.mxu1 %v13006_v55  ;;  %12333 = vmatprep.subr.bf16.mxu0 %v13007_v56  ;;  %v10860_v55 = vcombine.high %v79_v50, %v107_v51  ;;  %v13055_v56 = vld [vmem:[%s17165_s26 + $0xb78] sm:$0xff]  }
 0x13a   :  { %12355 = vmatprep.subr.bf16.mxu1 %v13008_v57  ;;  %v13056_v57 = vld [vmem:[%s17165_s26 + $0xbf8] sm:$0xff]  }
 0x13b   :  { %v13105_v50 = vld [vmem:[%s17165_s26 + $0xc18] sm:$0xff]  }
 0x13c   :  { %12334 = vmatpush3.bf16.msra.mxu0 %v13009_v58  ;;  %v13057_v58 = vld [vmem:[%s17165_s26 + $0xb38] sm:$0xff]  }
 0x13d   :  { %12356 = vmatpush3.bf16.msra.mxu1 %v13010_v59  ;;  %12335 = vmatprep.subr.bf16.mxu0 %v13011_v60  ;;  %v13058_v59 = vld [vmem:[%s17165_s26 + $0xbb8] sm:$0xff]   ;;  %v13059_v60 = vld [vmem:[%s17165_s26 + $0xb70] sm:$0xff]  }
 0x13e   :  { %12357 = vmatprep.subr.bf16.mxu1 %v13012_v61  ;;  %v13060_v61 = vld [vmem:[%s17165_s26 + $0xbf0] sm:$0xff]   ;;  %v13106_v51 = vld [vmem:[%s17165_s26 + $0xc98] sm:$0xff]  }
 0x140   :  { %12336 = vmatpush3.bf16.msra.mxu0 %v13013_v62  ;;  %v13061_v62 = vld [vmem:[%s17165_s26 + $0xb30] sm:$0xff]  }
 0x141   :  { %12358 = vmatpush3.bf16.msra.mxu1 %v13014_v63  ;;  %12337 = vmatprep.subr.bf16.mxu0 %v13015_v0  ;;  %v13062_v63 = vld [vmem:[%s17165_s26 + $0xbb0] sm:$0xff]   ;;  %v13063_v0 = vld [vmem:[%s17165_s26 + $0xb68] sm:$0xff]  }
 0x142   :  { %12359 = vmatprep.subr.bf16.mxu1 %v13016_v1  ;;  %v13064_v1 = vld [vmem:[%s17165_s26 + $0xbe8] sm:$0xff]  }
 0x144   :  { %12338 = vmatpush3.bf16.msra.mxu0 %v13017_v2  ;;  %v13065_v2 = vld [vmem:[%s17165_s26 + $0xb28] sm:$0xff]  }
 0x145   :  { %12360 = vmatpush3.bf16.msra.mxu1 %v13018_v3  ;;  %12339 = vmatprep.subr.bf16.mxu0 %v13019_v4  ;;  %v13066_v3 = vld [vmem:[%s17165_s26 + $0xba8] sm:$0xff]   ;;  %v13067_v4 = vld [vmem:[%s17165_s26 + $0xb60] sm:$0xff]  }
 0x146   :  { %12361 = vmatprep.subr.bf16.mxu1 %v13020_v5  ;;  %v13068_v5 = vld [vmem:[%s17165_s26 + $0xbe0] sm:$0xff]  }
 0x148   :  { %12340 = vmatpush3.bf16.msra.mxu0 %v13021_v6  ;;  %v13069_v6 = vld [vmem:[%s17165_s26 + $0xb20] sm:$0xff]  }
 0x149   :  { %12362 = vmatpush3.bf16.msra.mxu1 %v13022_v7  ;;  %12369 = vmatprep.subr.bf16.mxu0 %v13023_v16  ;;  %v13070_v7 = vld [vmem:[%s17165_s26 + $0xba0] sm:$0xff]   ;;  %v13079_v16 = vld [vmem:[%s17165_s26 + $0xb48] sm:$0xff]  }
 0x14a   :  { %12391 = vmatprep.subr.bf16.mxu1 %v13024_v17  ;;  %v13080_v17 = vld [vmem:[%s17165_s26 + $0xbc8] sm:$0xff]  }
 0x14b   :  { %4703 = vmatmul.mubr.bf16.vlgmr.msra.gmra.mxu0 %v10853_v10  ;;  %v13073_v10 = vld [vmem:[%s17165_s26 + $0xb18] sm:$0xff]  }
 0x14c   :  { %4744 = vmatmul.mubr.bf16.vlgmr.msra.gmra.mxu1 %v10855_v14  ;;  %12370 = vmatpush3.bf16.msra.mxu0 %v13025_v18  ;;  %v13077_v14 = vld [vmem:[%s17165_s26 + $0xb10] sm:$0xff]   ;;  %v13081_v18 = vld [vmem:[%s17165_s26 + $0xb08] sm:$0xff]  }
 0x14d   :  { %12392 = vmatpush3.bf16.msra.mxu1 %v13026_v19  ;;  %12371 = vmatprep.subr.bf16.mxu0 %v13027_v20  ;;  %v13082_v19 = vld [vmem:[%s17165_s26 + $0xb88] sm:$0xff]   ;;  %v13083_v20 = vld [vmem:[%s17165_s26 + $0xb40] sm:$0xff]  }
 0x14e   :  { %12393 = vmatprep.subr.bf16.mxu1 %v13028_v21  ;;  %4784 = vmatprep.mubr.bf16.mxu0 %v10858_v53  ;;  %v13084_v21 = vld [vmem:[%s17165_s26 + $0xbc0] sm:$0xff]   ;;  %v13108_v53 = vld [vmem:[%s17165_s26 + $0xcd0] sm:$0xff]  }
 0x14f   :  { %4825 = vmatprep.mubr.bf16.mxu1 %v10860_v55  ;;  %v13110_v55 = vld [vmem:[%s17165_s26 + $0xc90] sm:$0xff]  }
 0x150   :  { %12372 = vmatpush3.bf16.msra.mxu0 %v13029_v22  ;;  %v13085_v22 = vld [vmem:[%s17165_s26 + $0xb00] sm:$0xff]  }
 0x151   :  { %12394 = vmatpush3.bf16.msra.mxu1 %v13030_v23  ;;  %12373 = vmatprep.subr.bf16.mxu0 %v13031_v24  ;;  %v13086_v23 = vld [vmem:[%s17165_s26 + $0xb80] sm:$0xff]   ;;  %v80_v24 = vld [vmem:[%s17166_s20 + $0xb0] sm:$0xff] }
 0x152   :  { %12395 = vmatprep.subr.bf16.mxu1 %v13032_v25  ;;  %v108_v25 = vld [vmem:[%s17166_s20 + $0x190] sm:$0xff] }
 0x154   :  { %12374 = vmatpush3.bf16.msra.mxu0 %v13033_v26  ;;  %v81_v26 = vld [vmem:[%s17166_s20 + $0xb8] sm:$0xff] }
 0x155   :  { %12396 = vmatpush3.bf16.msra.mxu1 %v13034_v27  ;;  %12375 = vmatprep.subr.bf16.mxu0 %v13035_v28  ;;  %v10861_v27 = vcombine.low %v80_v24, %v108_v25  ;;  %v10862_v28 = vcombine.high %v80_v24, %v108_v25  ;;  %v13134_v24 = vld [vmem:[%s17165_s26 + $0xd50] sm:$0xff]  }
 0x156   :  { %12397 = vmatprep.subr.bf16.mxu1 %v13036_v29  ;;  %v109_v29 = vld [vmem:[%s17166_s20 + $0x198] sm:$0xff]  ;;  %v13135_v25 = vld [vmem:[%s17165_s26 + $0xd10] sm:$0xff]  }
 0x158   :  { %12376 = vmatpush3.bf16.msra.mxu0 %v13037_v30  ;;  %v10863_v30 = vcombine.low %v81_v26, %v109_v29 }
 0x159   :  { %12398 = vmatpush3.bf16.msra.mxu1 %v13038_v31  ;;  %12377 = vmatprep.subr.bf16.mxu0 %v13039_v32  ;;  %v10864_v31 = vcombine.high %v81_v26, %v109_v29  ;;  %v13087_v32 = vld [vmem:[%s17165_s26 + $0xc78] sm:$0xff]   ;;  %v13136_v26 = vld [vmem:[%s17165_s26 + $0xd90] sm:$0xff]   ;;  %v13139_v29 = vld [vmem:[%s17165_s26 + $0xd88] sm:$0xff]  }
 0x15a   :  { %12399 = vmatprep.subr.bf16.mxu1 %v13040_v33  ;;  %v13088_v33 = vld [vmem:[%s17165_s26 + $0xcf8] sm:$0xff]  }
 0x15c   :  { %12378 = vmatpush3.bf16.msra.mxu0 %v13041_v34  ;;  %v13089_v34 = vld [vmem:[%s17165_s26 + $0xc38] sm:$0xff]  }
 0x15d   :  { %12400 = vmatpush3.bf16.msra.mxu1 %v13042_v35  ;;  %12379 = vmatprep.subr.bf16.mxu0 %v13043_v36  ;;  %v13090_v35 = vld [vmem:[%s17165_s26 + $0xcb8] sm:$0xff]   ;;  %v13091_v36 = vld [vmem:[%s17165_s26 + $0xc70] sm:$0xff]  }
 0x15e   :  { %12401 = vmatprep.subr.bf16.mxu1 %v13044_v37  ;;  %v13092_v37 = vld [vmem:[%s17165_s26 + $0xcf0] sm:$0xff]  }
 0x160   :  { %12380 = vmatpush3.bf16.msra.mxu0 %v13045_v38  ;;  %v13093_v38 = vld [vmem:[%s17165_s26 + $0xc30] sm:$0xff]  }
 0x161   :  { %12402 = vmatpush3.bf16.msra.mxu1 %v13046_v39  ;;  %12381 = vmatprep.subr.bf16.mxu0 %v13047_v40  ;;  %v13094_v39 = vld [vmem:[%s17165_s26 + $0xcb0] sm:$0xff]   ;;  %v13095_v40 = vld [vmem:[%s17165_s26 + $0xc68] sm:$0xff]  }
 0x162   :  { %12403 = vmatprep.subr.bf16.mxu1 %v13048_v41  ;;  %v13096_v41 = vld [vmem:[%s17165_s26 + $0xce8] sm:$0xff]  }
 0x164   :  { %12382 = vmatpush3.bf16.msra.mxu0 %v13049_v42  ;;  %v13097_v42 = vld [vmem:[%s17165_s26 + $0xc28] sm:$0xff]  }
 0x165   :  { %12404 = vmatpush3.bf16.msra.mxu1 %v13050_v43  ;;  %12383 = vmatprep.subr.bf16.mxu0 %v13051_v44  ;;  %v13098_v43 = vld [vmem:[%s17165_s26 + $0xca8] sm:$0xff]   ;;  %v13099_v44 = vld [vmem:[%s17165_s26 + $0xc60] sm:$0xff]  }
 0x166   :  { %12405 = vmatprep.subr.bf16.mxu1 %v13052_v45  ;;  %v13100_v45 = vld [vmem:[%s17165_s26 + $0xce0] sm:$0xff]  }
 0x168   :  { %12384 = vmatpush3.bf16.msra.mxu0 %v13053_v46  ;;  %v13101_v46 = vld [vmem:[%s17165_s26 + $0xc20] sm:$0xff]  }
 0x169   :  { %12406 = vmatpush3.bf16.msra.mxu1 %v13054_v47  ;;  %12413 = vmatprep.subr.bf16.mxu0 %v13055_v56  ;;  %v13102_v47 = vld [vmem:[%s17165_s26 + $0xca0] sm:$0xff]   ;;  %v13111_v56 = vld [vmem:[%s17165_s26 + $0xc48] sm:$0xff]  }
 0x16a   :  { %12435 = vmatprep.subr.bf16.mxu1 %v13056_v57  ;;  %v13112_v57 = vld [vmem:[%s17165_s26 + $0xcc8] sm:$0xff]  }
 0x16b   :  { %4785 = vmatmul.mubr.bf16.vlgmr.msra.gmra.mxu0 %v10857_v52  ;;  %v13107_v52 = vld [vmem:[%s17165_s26 + $0xc50] sm:$0xff]  }
 0x16c   :  { %4826 = vmatmul.mubr.bf16.vlgmr.msra.gmra.mxu1 %v10859_v54  ;;  %12414 = vmatpush3.bf16.msra.mxu0 %v13057_v58  ;;  %v13109_v54 = vld [vmem:[%s17165_s26 + $0xc10] sm:$0xff]   ;;  %v13113_v58 = vld [vmem:[%s17165_s26 + $0xc08] sm:$0xff]  }
 0x16d   :  { %12436 = vmatpush3.bf16.msra.mxu1 %v13058_v59  ;;  %12415 = vmatprep.subr.bf16.mxu0 %v13059_v60  ;;  %v13114_v59 = vld [vmem:[%s17165_s26 + $0xc88] sm:$0xff]   ;;  %v13115_v60 = vld [vmem:[%s17165_s26 + $0xc40] sm:$0xff]  }
 0x16e   :  { %12437 = vmatprep.subr.bf16.mxu1 %v13060_v61  ;;  %4866 = vmatprep.mubr.bf16.mxu0 %v10862_v28  ;;  %v13116_v61 = vld [vmem:[%s17165_s26 + $0xcc0] sm:$0xff]   ;;  %v13138_v28 = vld [vmem:[%s17165_s26 + $0xd08] sm:$0xff]  }
 0x16f   :  { %4907 = vmatprep.mubr.bf16.mxu1 %v10864_v31  ;;  %v112_v31 = vld [vmem:[%s17166_s20 + $0x1b0] sm:$0xff] }
 0x170   :  { %12416 = vmatpush3.bf16.msra.mxu0 %v13061_v62  ;;  %v13117_v62 = vld [vmem:[%s17165_s26 + $0xc00] sm:$0xff]  }
 0x171   :  { %12438 = vmatpush3.bf16.msra.mxu1 %v13062_v63  ;;  %12417 = vmatprep.subr.bf16.mxu0 %v13063_v0  ;;  %v13118_v63 = vld [vmem:[%s17165_s26 + $0xc80] sm:$0xff]  }
 0x172   :  { %12439 = vmatprep.subr.bf16.mxu1 %v13064_v1  ;;  %v82_v0 = vld [vmem:[%s17166_s20 + $0xc0] sm:$0xff] }
 0x173   :  { %v110_v1 = vld [vmem:[%s17166_s20 + $0x1a0] sm:$0xff] }
 0x174   :  { %12418 = vmatpush3.bf16.msra.mxu0 %v13065_v2  ;;  %v10865_v2 = vcombine.low %v82_v0, %v110_v1 }
 0x175   :  { %12440 = vmatpush3.bf16.msra.mxu1 %v13066_v3  ;;  %12419 = vmatprep.subr.bf16.mxu0 %v13067_v4  ;;  %v10866_v3 = vcombine.high %v82_v0, %v110_v1  ;;  %v83_v4 = vld [vmem:[%s17166_s20 + $0xc8] sm:$0xff] }
 0x176   :  { %12441 = vmatprep.subr.bf16.mxu1 %v13068_v5  ;;  %v111_v5 = vld [vmem:[%s17166_s20 + $0x1a8] sm:$0xff] }
 0x178   :  { %12420 = vmatpush3.bf16.msra.mxu0 %v13069_v6  ;;  %v10867_v6 = vcombine.low %v83_v4, %v111_v5 }
 0x179   :  { %12442 = vmatpush3.bf16.msra.mxu1 %v13070_v7  ;;  %12421 = vmatprep.subr.bf16.mxu0 %v13071_v8  ;;  %v10868_v7 = vcombine.high %v83_v4, %v111_v5  ;;  %v13119_v8 = vld [vmem:[%s17165_s26 + $0xd78] sm:$0xff]  }
 0x17a   :  { %12443 = vmatprep.subr.bf16.mxu1 %v13072_v9  ;;  %v17159_v9 = vmov 0  }
 0x17c   :  { %12422 = vmatpush3.bf16.msra.mxu0 %v13073_v10  ;;  %v13120_v10 = vld [vmem:[%s17165_s26 + $0xd38] sm:$0xff]  }
 0x17d   :  { %12444 = vmatpush3.bf16.msra.mxu1 %v13074_v11  ;;  %12423 = vmatprep.subr.bf16.mxu0 %v13075_v12  ;;  %v13121_v11 = vld [vmem:[%s17165_s26 + $0xdb8] sm:$0xff]   ;;  %v13122_v12 = vld [vmem:[%s17165_s26 + $0xd70] sm:$0xff]  }
 0x17e   :  { %12445 = vmatprep.subr.bf16.mxu1 %v13076_v13  ;;  %v13123_v13 = vld [vmem:[%s17165_s26 + $0xd30] sm:$0xff]  }
 0x180   :  { %12424 = vmatpush3.bf16.msra.mxu0 %v13077_v14  ;;  %v13124_v14 = vld [vmem:[%s17165_s26 + $0xdb0] sm:$0xff]  }
 0x181   :  { %12446 = vmatpush3.bf16.msra.mxu1 %v13078_v15  ;;  %12425 = vmatprep.subr.bf16.mxu0 %v13079_v16  ;;  %v13125_v15 = vld [vmem:[%s17165_s26 + $0xd68] sm:$0xff]  }
 0x182   :  { %12447 = vmatprep.subr.bf16.mxu1 %v13080_v17  ;;  %v13126_v16 = vld [vmem:[%s17165_s26 + $0xd28] sm:$0xff]  }
 0x183   :  { %v13127_v17 = vld [vmem:[%s17165_s26 + $0xda8] sm:$0xff]  }
 0x184   :  { %12426 = vmatpush3.bf16.msra.mxu0 %v13081_v18  ;;  %v13128_v18 = vld [vmem:[%s17165_s26 + $0xd60] sm:$0xff]  }
 0x185   :  { %12448 = vmatpush3.bf16.msra.mxu1 %v13082_v19  ;;  %12427 = vmatprep.subr.bf16.mxu0 %v13083_v20  ;;  %v13129_v19 = vld [vmem:[%s17165_s26 + $0xd20] sm:$0xff]  }
 0x186   :  { %12449 = vmatprep.subr.bf16.mxu1 %v13084_v21  ;;  %v13130_v20 = vld [vmem:[%s17165_s26 + $0xda0] sm:$0xff]   ;;  %v13131_v21 = vld [vmem:[%s17165_s26 + $0xd58] sm:$0xff]  }
 0x188   :  { %12428 = vmatpush3.bf16.msra.mxu0 %v13085_v22  ;;  %v13132_v22 = vld [vmem:[%s17165_s26 + $0xd18] sm:$0xff]  }
 0x189   :  { %12450 = vmatpush3.bf16.msra.mxu1 %v13086_v23  ;;  %12457 = vmatprep.subr.bf16.mxu0 %v13087_v32  ;;  %v13133_v23 = vld [vmem:[%s17165_s26 + $0xd98] sm:$0xff]   ;;  %v13140_v32 = vld [vmem:[%s17165_s26 + $0xd40] sm:$0xff]  }
 0x18a   :  { %12479 = vmatprep.subr.bf16.mxu1 %v13088_v33 }
 0x18b   :  { %4867 = vmatmul.mubr.bf16.vlgmr.msra.gmra.mxu0 %v10861_v27  ;;  %v13137_v27 = vld [vmem:[%s17165_s26 + $0xd48] sm:$0xff]  }
 0x18c   :  { %4908 = vmatmul.mubr.bf16.vlgmr.msra.gmra.mxu1 %v10863_v30  ;;  %12458 = vmatpush3.bf16.msra.mxu0 %v13089_v34  ;;  %v84_v30 = vld [vmem:[%s17166_s20 + $0xd0] sm:$0xff]  ;;  %v85_v34 = vld [vmem:[%s17166_s20 + $0xd8] sm:$0xff] }
 0x18d   :  { %12480 = vmatpush3.bf16.msra.mxu1 %v13090_v35  ;;  %12459 = vmatprep.subr.bf16.mxu0 %v13091_v36  ;;  %v10870_v33 = vcombine.high %v84_v30, %v112_v31  ;;  %v113_v35 = vld [vmem:[%s17166_s20 + $0x1b8] sm:$0xff]  ;;  %v13141_v36 = vld [vmem:[%s17165_s26 + $0xd00] sm:$0xff]  }
 0x18e   :  { %12481 = vmatprep.subr.bf16.mxu1 %v13092_v37  ;;  %4948 = vmatprep.mubr.bf16.mxu0 %v10866_v3  ;;  %v13142_v37 = vld [vmem:[%s17165_s26 + $0xd80] sm:$0xff]  }
 0x18f   :  { %4989 = vmatprep.mubr.bf16.mxu1 %v10868_v7 }
 0x190   :  { %12460 = vmatpush3.bf16.msra.mxu0 %v13093_v38  ;;  %v10872_v38 = vcombine.high %v85_v34, %v113_v35 }
 0x191   :  { %12482 = vmatpush3.bf16.msra.mxu1 %v13094_v39  ;;  %12461 = vmatprep.subr.bf16.mxu0 %v13095_v40  ;;  %v13143_v39 = vld [vmem:[%s17165_s26 + $0xdc0] sm:$0xff]   ;;  %v10869_v40 = vcombine.low %v84_v30, %v112_v31 }
 0x192   :  { %12483 = vmatprep.subr.bf16.mxu1 %v13096_v41  ;;  %v10871_v41 = vcombine.low %v85_v34, %v113_v35 }
 0x194   :  { %12462 = vmatpush3.bf16.msra.mxu0 %v13097_v42  ;;  %v15034_v42 = vpop.f32.mrf.mxu0 }
 0x195   :  { %12484 = vmatpush3.bf16.msra.mxu1 %v13098_v43  ;;  %12463 = vmatprep.subr.bf16.mxu0 %v13099_v44  ;;  %v15038_v44 = vpop.f32.mrf.mxu1 }
 0x196   :  { %12485 = vmatprep.subr.bf16.mxu1 %v13100_v45  ;;  %v15036_v43 = vpop.f32.mrf.mxu0 }
 0x198   :  { %12464 = vmatpush3.bf16.msra.mxu0 %v13101_v46  ;;  %v15040_v45 = vpop.f32.mrf.mxu0  ;;  %v15042_v46 = vpop.f32.mrf.mxu1 }
 0x199   :  { %12486 = vmatpush3.bf16.msra.mxu1 %v13102_v47  ;;  %12465 = vmatprep.subr.bf16.mxu0 %v13103_v48 }
 0x19a   :  { %12487 = vmatprep.subr.bf16.mxu1 %v13104_v49  ;;  %v15044_v47 = vpop.f32.mrf.mxu0  ;;  %v15046_v48 = vpop.f32.mrf.mxu1 }
 0x19c   :  { %12466 = vmatpush3.bf16.msra.mxu0 %v13105_v50  ;;  %v15048_v49 = vpop.f32.mrf.mxu0 }
 0x19d   :  { %12488 = vmatpush3.bf16.msra.mxu1 %v13106_v51  ;;  %12467 = vmatprep.subr.bf16.mxu0 %v13107_v52 }
 0x19e   :  { %12489 = vmatprep.subr.bf16.mxu1 %v13108_v53 }
 0x1a0   :  { %12468 = vmatpush3.bf16.msra.mxu0 %v13109_v54 }
 0x1a1   :  { %12490 = vmatpush3.bf16.msra.mxu1 %v13110_v55  ;;  %12469 = vmatprep.subr.bf16.mxu0 %v13111_v56 }
 0x1a2   :  { %12491 = vmatprep.subr.bf16.mxu1 %v13112_v57 }
 0x1a4   :  { %12470 = vmatpush3.bf16.msra.mxu0 %v13113_v58 }
 0x1a5   :  { %12492 = vmatpush3.bf16.msra.mxu1 %v13114_v59  ;;  %12471 = vmatprep.subr.bf16.mxu0 %v13115_v60 }
 0x1a6   :  { %12493 = vmatprep.subr.bf16.mxu1 %v13116_v61 }
 0x1a8   :  { %12472 = vmatpush3.bf16.msra.mxu0 %v13117_v62 }
 0x1a9   :  { %12494 = vmatpush3.bf16.msra.mxu1 %v13118_v63  ;;  %12501 = vmatprep.subr.bf16.mxu0 %v13119_v8 }
 0x1aa   :  { %5039 = vmatprep.subr.bf16.mxu1 %v17159_v9 }
 0x1ab   :  { %4949 = vmatmul.mubr.bf16.vlgmr.msra.gmra.mxu0 %v10865_v2 }
 0x1ac   :  { %4990 = vmatmul.mubr.bf16.vlgmr.msra.gmra.mxu1 %v10867_v6  ;;  %12502 = vmatpush3.bf16.msra.mxu0 %v13120_v10 }
 0x1ad   :  { %5040 = vmatpush1.bf16.msra.mxu1 %v13121_v11  ;;  %12503 = vmatprep.subr.bf16.mxu0 %v13122_v12 }
 0x1ae   :  { %5041 = vmatprep.subr.bf16.mxu1 %v17159_v9  ;;  %5030 = vmatprep.mubr.bf16.mxu0 %v10870_v33 }
 0x1af   :  { %11314 = vmatprep.mubr.msk.bf16.mxu1 %vm3928_vm0, %v10872_v38 }
 0x1b0   :  { %12504 = vmatpush3.bf16.msra.mxu0 %v13123_v13 }
 0x1b1   :  { %5042 = vmatpush1.bf16.msra.mxu1 %v13124_v14  ;;  %12505 = vmatprep.subr.bf16.mxu0 %v13125_v15 }
 0x1b2   :  { %5043 = vmatprep.subr.bf16.mxu1 %v17159_v9 }
 0x1b4   :  { %12506 = vmatpush3.bf16.msra.mxu0 %v13126_v16 }
 0x1b5   :  { %5044 = vmatpush1.bf16.msra.mxu1 %v13127_v17  ;;  %12507 = vmatprep.subr.bf16.mxu0 %v13128_v18 }
 0x1b6   :  { %5045 = vmatprep.subr.bf16.mxu1 %v17159_v9 }
 0x1b8   :  { %12508 = vmatpush3.bf16.msra.mxu0 %v13129_v19 }
 0x1b9   :  { %5046 = vmatpush1.bf16.msra.mxu1 %v13130_v20  ;;  %12509 = vmatprep.subr.bf16.mxu0 %v13131_v21 }
 0x1ba   :  { %5047 = vmatprep.subr.bf16.mxu1 %v17159_v9 }
 0x1bc   :  { %12510 = vmatpush3.bf16.msra.mxu0 %v13132_v22 }
 0x1bd   :  { %5048 = vmatpush1.bf16.msra.mxu1 %v13133_v23  ;;  %12511 = vmatprep.subr.bf16.mxu0 %v13134_v24 }
 0x1be   :  { %5049 = vmatprep.subr.bf16.mxu1 %v17159_v9 }
 0x1c0   :  { %12512 = vmatpush3.bf16.msra.mxu0 %v13135_v25 }
 0x1c1   :  { %5050 = vmatpush1.bf16.msra.mxu1 %v13136_v26  ;;  %12513 = vmatprep.subr.bf16.mxu0 %v13137_v27 }
 0x1c2   :  { %5051 = vmatprep.subr.bf16.mxu1 %v17159_v9 }
 0x1c4   :  { %12514 = vmatpush3.bf16.msra.mxu0 %v13138_v28 }
 0x1c5   :  { %5052 = vmatpush1.bf16.msra.mxu1 %v13139_v29  ;;  %12515 = vmatprep.subr.bf16.mxu0 %v13140_v32 }
 0x1c6   :  { %5053 = vmatprep.subr.bf16.mxu1 %v17159_v9 }
 0x1c8   :  { %12516 = vmatpush3.bf16.msra.mxu0 %v13141_v36 }
 0x1c9   :  { %5054 = vmatpush1.bf16.msra.mxu1 %v13142_v37 }
 0x1ca   :  { %5069 = vmatprep.subr.bf16.mxu1 %v17159_v9 }
 0x1cb   :  { %5031 = vmatmul.mubr.bf16.vlgmr.msra.gmra.mxu0 %v10869_v40 }
 0x1cd   :  { %5070 = vmatpush2.bf16.msra.mxu1 %v13143_v39 }
 0x1d0   :  { %5072 = vmatmul.mubr.bf16.vlgmr.msra.gmra.mxu1 %v10871_v41 }
 0x1d1   :  { %22 = vsyncpa [#allocation3], 0  ;;  %v15050_v50 = vpop.f32.mrf.mxu1  ;;  %v15052_v51 = vpop.f32.mrf.mxu0  ;;  %v13144_v61 = vld [vmem:[%s17142_s3 + $0x38] sm:$0xff]   ;;  %v17161_v62 = vmov 0.0   ;;  %v13145_v0 = vld [vmem:[%s17142_s3 + $0x30] sm:$0xff]   ;;  %vm13440_vm1 = vmmov 0  }
 0x1d2   :  { %12577 = vmatprep.subr.bf16.mxu0 %v17161_v62  ;;  %12597 = vmatprep.subr.bf16.mxu1 %v17161_v62  ;;  %v13146_v3 = vld [vmem:[%s17142_s3 + $0x28] sm:$0xff]   ;;  %v13147_v6 = vld [vmem:[%s17142_s3 + $0x20] sm:$0xff]   ;;  %v13148_v16 = vld [vmem:[%s17142_s3 + $0x18] sm:$0xff]   ;;  %vm10792_vm2 = vcmask 1043456   ;;  %vm10793_vm3 = vcmask 130052  }
 0x1d3   :  { %v15054_v52 = vpop.f32.mrf.mxu1  ;;  %v15056_v53 = vpop.f32.mrf.mxu0  ;;  %12578 = vmatpush3.bf16.msra.mxu0 %v13144_v61  ;;  %v13149_v19 = vld [vmem:[%s17142_s3 + $0x10] sm:$0xff]   ;;  %v13150_v22 = vld [vmem:[%s17142_s3 + $0x8] sm:$0xff]   ;;  %v13151_v25 = vld [vmem:[%s17142_s3] sm:$0xff]   ;;  %12593 = vmatprep.mubr.msk.bf16.mxu0 %vm13440_vm1, %v17161_v62 }
 0x1d4   :  { %12579 = vmatprep.subr.bf16.mxu0 %v17161_v62  ;;  %12613 = vmatprep.mubr.msk.bf16.mxu1 %vm13440_vm1, %v17161_v62  ;;  %v13152_v28 = vld [vmem:[%s17144_s5 + $0x38] sm:$0xff]   ;;  %v13153_v31 = vld [vmem:[%s17144_s5 + $0x30] sm:$0xff]   ;;  %v13154_v34 = vld [vmem:[%s17144_s5 + $0x28] sm:$0xff]  }
 0x1d5   :  { %v15058_v54 = vpop.f32.mrf.mxu1  ;;  %v15060_v55 = vpop.f32.mrf.mxu0  ;;  %12598 = vmatpush3.bf16.msra.mxu1 %v13152_v28  ;;  %v13155_v37 = vld [vmem:[%s17144_s5 + $0x20] sm:$0xff]   ;;  %v13156_v40 = vld [vmem:[%s17144_s5 + $0x18] sm:$0xff]   ;;  %vm17128_vm4 = vmor %vm10793_vm3, %vm10792_vm2 }
 0x1d6   :  { %12599 = vmatprep.subr.bf16.mxu1 %v17161_v62 }
 0x1d7   :  { %v15062_v56 = vpop.f32.mrf.mxu1  ;;  %v15064_v57 = vpop.f32.mrf.mxu0  ;;  %12580 = vmatpush3.bf16.msra.mxu0 %v13145_v0 }
 0x1d8   :  { %12581 = vmatprep.subr.bf16.mxu0 %v17161_v62 }
 0x1d9   :  { %v15066_v58 = vpop.f32.mrf.mxu1  ;;  %v15068_v59 = vpop.f32.mrf.mxu0  ;;  %12600 = vmatpush3.bf16.msra.mxu1 %v13153_v31 }
 0x1da   :  { %12601 = vmatprep.subr.bf16.mxu1 %v17161_v62 }
 0x1db   :  { %v15070_v60 = vpop.f32.mrf.mxu1  ;;  %v15077_v63 = vpop.f32.mrf.mxu0  ;;  %12582 = vmatpush3.bf16.msra.mxu0 %v13146_v3 }
 0x1dc   :  { %12583 = vmatprep.subr.bf16.mxu0 %v17161_v62 }
 0x1dd   :  { %v15083_v1 = vpop.f32.mrf.mxu1  ;;  %v15085_v2 = vpop.f32.mrf.mxu0  ;;  %12602 = vmatpush3.bf16.msra.mxu1 %v13154_v34 }
 0x1de   :  { %12603 = vmatprep.subr.bf16.mxu1 %v17161_v62 }
 0x1df   :  { %v15091_v4 = vpop.f32.mrf.mxu1  ;;  %v15093_v5 = vpop.f32.mrf.mxu0  ;;  %12584 = vmatpush3.bf16.msra.mxu0 %v13147_v6 }
 0x1e0   :  { %12585 = vmatprep.subr.bf16.mxu0 %v17161_v62 }
 0x1e1   :  { %v15099_v7 = vpop.f32.mrf.mxu1  ;;  %v15101_v8 = vpop.f32.mrf.mxu0  ;;  %12604 = vmatpush3.bf16.msra.mxu1 %v13155_v37  ;;  %v11947_v37 = vadd.f32 %v15036_v43, %v15034_v42  ;;  %v11991_v42 = vadd.f32 %v15052_v51, %v15048_v49  ;;  %v12035_v49 = vadd.f32 %v15068_v59, %v15064_v57 }
 0x1e2   :  { %12605 = vmatprep.subr.bf16.mxu1 %v17161_v62  ;;  %v12079_v57 = vadd.f32 %v15101_v8, %v15093_v5 }
 0x1e3   :  { %v15103_v10 = vpop.f32.mrf.mxu1  ;;  %v15106_v11 = vpop.f32.mrf.mxu0  ;;  %12586 = vmatpush3.bf16.msra.mxu0 %v13148_v16 }
 0x1e4   :  { %12587 = vmatprep.subr.bf16.mxu0 %v17161_v62 }
 0x1e5   :  { %v15108_v12 = vpop.f32.mrf.mxu1  ;;  %v15110_v13 = vpop.f32.mrf.mxu0  ;;  %12606 = vmatpush3.bf16.msra.mxu1 %v13156_v40  ;;  %v10816_v40 = vld [vmem:[%s17141_s2] ss:$0 sm:$0xff] }
 0x1e6   :  { %12607 = vmatprep.subr.bf16.mxu1 %v17161_v62 }
 0x1e7   :  { %v15112_v14 = vpop.f32.mrf.mxu1  ;;  %v15114_v15 = vpop.f32.mrf.mxu0  ;;  %12588 = vmatpush3.bf16.msra.mxu0 %v13149_v19 }
 0x1e8   :  { %12589 = vmatprep.subr.bf16.mxu0 %v17161_v62 }
 0x1e9   :  { %v15120_v17 = vpop.f32.mrf.mxu1  ;;  %v15122_v18 = vpop.f32.mrf.mxu0 }
 0x1ea   :  { %v12123_v8 = vadd.f32 %v15122_v18, %v15114_v15 }
 0x1eb   :  { %v15127_v20 = vpop.f32.mrf.mxu1  ;;  %v15130_v21 = vpop.f32.mrf.mxu0  ;;  %12590 = vmatpush3.bf16.msra.mxu0 %v13150_v22 }
 0x1ec   :  { %12591 = vmatprep.subr.bf16.mxu0 %v17161_v62 }
 0x1ed   :  { %v15135_v23 = vpop.f32.mrf.mxu1  ;;  %v15138_v24 = vpop.f32.mrf.mxu0 }
 0x1ef   :  { %v15143_v26 = vpop.f32.mrf.mxu1  ;;  %v15145_v27 = vpop.f32.mrf.mxu0  ;;  %12592 = vmatpush3.bf16.msra.mxu0 %v13151_v25 }
 0x1f0   :  { %12617 = vmatprep.subr.bf16.mxu0 %v17161_v62 }
 0x1f1   :  { %v15155_v29 = vpop.f32.mrf.mxu1  ;;  %v15157_v30 = vpop.f32.mrf.mxu0 }
 0x1f2   :  { %v12167_v15 = vadd.f32 %v15157_v30, %v15145_v27 }
 0x1f3   :  { %v15162_v32 = vpop.f32.mrf.mxu1  ;;  %v15165_v33 = vpop.f32.mrf.mxu0 }
 0x1f5   :  { %v15170_v35 = vpop.f32.mrf.mxu1  ;;  %v15173_v36 = vpop.f32.mrf.mxu0 }
 0x1f7   :  { %v15178_v38 = vpop.f32.mrf.mxu1  ;;  %v15180_v39 = vpop.f32.mrf.mxu0 }
 0x1f9   :  { %v15186_v41 = vpop.f32.mrf.mxu1  ;;  %v15188_v61 = vpop.f32.mrf.mxu0 }
 0x1fb   :  { %v15191_v0 = vpop.f32.mrf.mxu1  ;;  %v15193_v3 = vpop.f32.mrf.mxu0 }
 0x1fd   :  { %v15196_v6 = vpop.f32.mrf.mxu1  ;;  %v15198_v16 = vpop.f32.mrf.mxu0 }
 0x1fe   :  { %17167 = vst [vmem:[#allocation5_spill] sm:$0xff] %v15198_v16 }
 0x1ff   :  { %v15200_v19 = vpop.f32.mrf.mxu1  ;;  %v15202_v22 = vpop.f32.mrf.mxu0 }
 0x200   :  { %17168 = vst [vmem:[#allocation6_spill] sm:$0xff] %v15200_v19  ;;  %17169 = vst [vmem:[#allocation7_spill] sm:$0xff] %v15202_v22  ;;  %v3967_v19 = vadd.f32 %v11947_v37, %v10816_v40  ;;  %v11972_v37 = vadd.f32 %v15050_v50, %v15046_v48  ;;  %v12016_v48 = vadd.f32 %v15066_v58, %v15062_v56 }
 0x201   :  { %v15204_v25 = vpop.f32.mrf.mxu1  ;;  %v15206_v28 = vpop.f32.mrf.mxu0  ;;  %v12060_v56 = vadd.f32 %v15099_v7, %v15091_v4  ;;  %v12104_v4 = vadd.f32 %v15120_v17, %v15112_v14  ;;  %v12148_v14 = vadd.f32 %v15155_v29, %v15143_v26  ;;  %v12233_v29 = vadd.f32 %v15196_v6, %v15191_v0 }
 0x202   :  { %17170 = vst [vmem:[#allocation8_spill] sm:$0xff] %v15204_v25  ;;  %17171 = vst [vmem:[#allocation9_spill] sm:$0xff] %v15206_v28  ;;  %v11969_v25 = vadd.f32 %v15042_v46, %v15038_v44  ;;  %v11994_v46 = vadd.f32 %v15060_v55, %v15056_v53  ;;  %v12038_v53 = vadd.f32 %v15085_v2, %v15077_v63 }
 0x203   :  { %v15208_v31 = vpop.f32.mrf.mxu1  ;;  %v15210_v34 = vpop.f32.mrf.mxu0  ;;  %v12082_v63 = vadd.f32 %v15110_v13, %v15106_v11  ;;  %v12126_v11 = vadd.f32 %v15138_v24, %v15130_v21  ;;  %v12170_v21 = vadd.f32 %v15173_v36, %v15165_v33  ;;  %v12211_v24 = vadd.f32 %v15188_v61, %v15180_v39 }
 0x204   :  { %17172 = vst [vmem:[#allocation10_spill] sm:$0xff] %v15208_v31  ;;  %17173 = vst [vmem:[#allocation11_spill] sm:$0xff] %v15210_v34  ;;  %v11950_v31 = vadd.f32 %v15044_v47, %v15040_v45  ;;  %v4008_v43 = vadd.f32 %v11969_v25, %v3967_v19  ;;  %v12013_v45 = vadd.f32 %v15058_v54, %v15054_v52 }
 0x205   :  { %v15217_v9 = vpop.f32.mrf.mxu1  ;;  %v15219_v62 = vpop.f32.mrf.mxu0  ;;  %v12057_v52 = vadd.f32 %v15083_v1, %v15070_v60  ;;  %v12101_v60 = vadd.f32 %v15108_v12, %v15103_v10  ;;  %v12145_v10 = vadd.f32 %v15135_v23, %v15127_v20  ;;  %v12189_v20 = vadd.f32 %v15170_v35, %v15162_v32  ;;  %v17176_v32 = vld [vmem:[#allocation5_spill] sm:$0xff] }
 0x206   :  { %17174 = vst [vmem:[#allocation12_spill] sm:$0xff] %v15217_v9  ;;  %v3970_v22 = vadd.f32 %v11950_v31, %v10816_v40  ;;  %v4049_v44 = vadd.f32 %v11991_v42, %v4008_v43  ;;  %v12214_v35 = vadd.f32 %v17176_v32, %v15193_v3 }
 0x207   :  { %v15225_v28 = vpop.f32.mrf.mxu1  ;;  %v15227_v34 = vpop.f32.mrf.mxu0 }
 0x208   :  { %17175 = vst [vmem:[#allocation13_spill] sm:$0xff] %v15225_v28  ;;  %v4011_v28 = vadd.f32 %v11972_v37, %v3970_v22  ;;  %v4090_v19 = vadd.f32 %v12013_v45, %v4049_v44 }
 0x209   :  { %v15231_v16 = vpop.f32.mrf.mxu1  ;;  %v15233_v9 = vpop.f32.mrf.mxu0 }
 0x20a   :  { %v4052_v25 = vadd.f32 %v11994_v46, %v4011_v28  ;;  %v4131_v50 = vadd.f32 %v12035_v49, %v4090_v19 }
 0x20b   :  { %v15241_v47 = vpop.f32.mrf.mxu1  ;;  %v15245_v51 = vpop.f32.mrf.mxu0  ;;  %v17183_v0 = vld [vmem:[#allocation11_spill] sm:$0xff] }
 0x20c   :  { %v4093_v55 = vadd.f32 %v12016_v48, %v4052_v25  ;;  %v4172_v28 = vadd.f32 %v12057_v52, %v4131_v50  ;;  %v12192_v52 = vadd.f32 %v15186_v41, %v15178_v38  ;;  %v17181_v41 = vld [vmem:[#allocation10_spill] sm:$0xff]  ;;  %v12258_v6 = vadd.f32 %v15219_v62, %v17183_v0 }
 0x20d   :  { %v15247_v31 = vpop.f32.mrf.mxu1  ;;  %v15255_v54 = vpop.f32.mrf.mxu0 }
 0x20e   :  { %v4134_v40 = vadd.f32 %v12038_v53, %v4093_v55  ;;  %v4213_v58 = vadd.f32 %v12079_v57, %v4172_v28  ;;  %v17177_v53 = vld [vmem:[#allocation7_spill] sm:$0xff]  ;;  %v17178_v55 = vld [vmem:[#allocation9_spill] sm:$0xff]  ;;  %v12302_v62 = vadd.f32 %v15255_v54, %v15245_v51 }
 0x20f   :  { %v15259_v59 = vpop.f32.mrf.mxu1  ;;  %v15261_v22 = vpop.f32.mrf.mxu0  ;;  %v12255_v39 = vadd.f32 %v17178_v55, %v17177_v53 }
 0x210   :  { %v4175_v5 = vadd.f32 %v12060_v56, %v4134_v40  ;;  %v4254_v43 = vadd.f32 %v12101_v60, %v4213_v58  ;;  %v17179_v56 = vld [vmem:[#allocation6_spill] sm:$0xff]  ;;  %v17180_v58 = vld [vmem:[#allocation8_spill] sm:$0xff] }
 0x211   :  { %v15269_v1 = vpop.f32.mrf.mxu1  ;;  %v12342_v2 = vpop.f32.mrf.mxu0  ;;  %v12236_v60 = vadd.f32 %v17180_v58, %v17179_v56 }
 0x212   :  { %v4216_v37 = vadd.f32 %v12082_v63, %v4175_v5  ;;  %v4295_v7 = vadd.f32 %v12123_v8, %v4254_v43  ;;  %v17182_v63 = vld [vmem:[#allocation12_spill] sm:$0xff] }
 0x213   :  { %v15273_v42 = vpop.f32.mrf.mxu1  ;;  %v12344_v44 = vpop.f32.mrf.mxu0  ;;  %v12277_v5 = vadd.f32 %v17182_v63, %v17181_v41 }
 0x214   :  { %v4257_v13 = vadd.f32 %v12104_v4, %v4216_v37  ;;  %v4336_v45 = vadd.f32 %v12145_v10, %v4295_v7  ;;  %v12299_v37 = vadd.f32 %v15233_v9, %v15227_v34 }
 0x215   :  { %v12364_v12 = vpop.f32.mrf.mxu1  ;;  %v12345_v18 = vpop.f32.mrf.mxu0 }
 0x216   :  { %v4298_v46 = vadd.f32 %v12126_v11, %v4257_v13  ;;  %v4377_v17 = vadd.f32 %v12167_v15, %v4336_v45  ;;  %v17184_v13 = vld [vmem:[#allocation13_spill] sm:$0xff] }
 0x217   :  { %v12366_v49 = vpop.f32.mrf.mxu1  ;;  %v12280_v15 = vadd.f32 %v15231_v16, %v17184_v13  ;;  %v12365_v16 = vadd.f32 %v12364_v12, %v15273_v42 }
 0x218   :  { %v4339_v23 = vadd.f32 %v12148_v14, %v4298_v46  ;;  %v4418_v25 = vadd.f32 %v12189_v20, %v4377_v17  ;;  %v12321_v46 = vadd.f32 %v15247_v31, %v15241_v47  ;;  %v12343_v20 = vadd.f32 %v12342_v2, %v15261_v22 }
 0x219   :  { %v12367_v27 = vpop.f32.mrf.mxu1 }
 0x21a   :  { %v4380_v48 = vadd.f32 %v12170_v21, %v4339_v23  ;;  %v4459_v26 = vadd.f32 %v12211_v24, %v4418_v25  ;;  %v12324_v24 = vadd.f32 %v15269_v1, %v15259_v59  ;;  %v12368_v32 = vadd.f32 %v12367_v27, %v12366_v49 }
 0x21c   :  { %v4421_v36 = vadd.f32 %v12192_v52, %v4380_v48  ;;  %v4500_v57 = vadd.f32 %v12233_v29, %v4459_v26  ;;  %v12346_v48 = vadd.f32 %v12345_v18, %v12344_v44 }
 0x21e   :  { %v4462_v28 = vadd.f32 %v12214_v35, %v4421_v36  ;;  %v4541_v38 = vadd.f32 %v12255_v39, %v4500_v57 }
 0x220   :  { %v4503_v43 = vadd.f32 %v12236_v60, %v4462_v28  ;;  %v4582_v4 = vadd.f32 %v12277_v5, %v4541_v38 }
 0x222   :  { %v4544_v7 = vadd.f32 %v12258_v6, %v4503_v43  ;;  %v4623_v45 = vadd.f32 %v12299_v37, %v4582_v4 }
 0x224   :  { %v4585_v17 = vadd.f32 %v12280_v15, %v4544_v7  ;;  %v4664_v9 = vadd.f32 %v12321_v46, %v4623_v45 }
 0x226   :  { %v4626_v34 = vadd.f32 %v12302_v62, %v4585_v17  ;;  %v4705_v25 = vadd.f32 %v12343_v20, %v4664_v9  ;;  %v17185_v9 = vmov 0.0  }
 0x228   :  { %v4667_v47 = vadd.f32 %v12324_v24, %v4626_v34  ;;  %v4746_v54 = vadd.f32 %v12365_v16, %v4705_v25  ;;  %v13157_v34 = vld [vmem:[%s17144_s5 + $0x10] sm:$0xff]   ;;  %v13159_v24 = vld [vmem:[%s17144_s5] sm:$0xff]   ;;  %v13160_v25 = vld [vmem:[%s17146_s7 + $0x38] sm:$0xff]  }
 0x229   :  { %12608 = vmatpush3.bf16.msra.mxu1 %v13157_v34  ;;  %v13161_v16 = vld [vmem:[%s17146_s7 + $0x30] sm:$0xff]  }
 0x22a   :  { %v4708_v29 = vadd.f32 %v12346_v48, %v4667_v47  ;;  %12609 = vmatprep.subr.bf16.mxu1 %v17185_v9  ;;  %v13162_v48 = vld [vmem:[%s17146_s7 + $0x28] sm:$0xff]   ;;  %v13164_v47 = vld [vmem:[%s17146_s7 + $0x18] sm:$0xff]  }
 0x22b   :  { %v12385_v19 = vpop.f32.mrf.mxu0 }
 0x22c   :  { %v12407_v50 = vpop.f32.mrf.mxu1  ;;  %v4749_v55 = vadd.f32 %v12368_v32, %v4708_v29 }
 0x22d   :  { %v12386_v30 = vpop.f32.mrf.mxu0 }
 0x22e   :  { %v12408_v61 = vpop.f32.mrf.mxu1  ;;  %v12387_v31 = vadd.f32 %v12386_v30, %v12385_v19 }
 0x22f   :  { %v12388_v33 = vpop.f32.mrf.mxu0  ;;  %v12409_v2 = vadd.f32 %v12408_v61, %v12407_v50 }
 0x230   :  { %v12410_v3 = vpop.f32.mrf.mxu1  ;;  %v4787_v22 = vadd.f32 %v12387_v31, %v4746_v54  ;;  %v11315_v31 = vld [vmem:[%s17143_s4] ss:$0 sm:$0xff] }
 0x231   :  { %v12389_v40 = vpop.f32.mrf.mxu0 }
 0x232   :  { %v12411_v10 = vpop.f32.mrf.mxu1  ;;  %v12390_v35 = vadd.f32 %v12389_v40, %v12388_v33  ;;  %v4828_v1 = vadd.f32 %v12409_v2, %v4787_v22 }
 0x233   :  { %v12412_v44 = vadd.f32 %v12411_v10, %v12410_v3 }
 0x234   :  { %v4790_v57 = vadd.f32 %v12390_v35, %v4749_v55  ;;  %v13166_v55 = vld [vmem:[%s17146_s7 + $0x8] sm:$0xff]  }
 0x236   :  { %v4831_v28 = vadd.f32 %v12412_v44, %v4790_v57  ;;  %v13170_v57 = vld [vmem:[%s17148_s9 + $0x28] sm:$0xff]   ;;  %v13172_v44 = vld [vmem:[%s17148_s9 + $0x18] sm:$0xff]  }
 0x24b   :  { %v12429_v8 = vpop.f32.mrf.mxu0 }
 0x24c   :  { %v12451_v14 = vpop.f32.mrf.mxu1 }
 0x24d   :  { %v12430_v11 = vpop.f32.mrf.mxu0 }
 0x24e   :  { %v12452_v23 = vpop.f32.mrf.mxu1  ;;  %v12431_v39 = vadd.f32 %v12430_v11, %v12429_v8 }
 0x24f   :  { %v12432_v21 = vpop.f32.mrf.mxu0  ;;  %v12453_v18 = vadd.f32 %v12452_v23, %v12451_v14  ;;  %v13158_v23 = vld [vmem:[%s17144_s5 + $0x8] sm:$0xff]  }
 0x250   :  { %v12454_v26 = vpop.f32.mrf.mxu1  ;;  %v4869_v12 = vadd.f32 %v12431_v39, %v4828_v1  ;;  %12610 = vmatpush3.bf16.msra.mxu1 %v13158_v23  ;;  %v13167_v39 = vld [vmem:[%s17146_s7] sm:$0xff]   ;;  %v13169_v1 = vld [vmem:[%s17148_s9 + $0x30] sm:$0xff]  }
 0x251   :  { %v12433_v52 = vpop.f32.mrf.mxu0  ;;  %12611 = vmatprep.subr.bf16.mxu1 %v17185_v9 }
 0x252   :  { %v12455_v36 = vpop.f32.mrf.mxu1  ;;  %v12434_v19 = vadd.f32 %v12433_v52, %v12432_v21  ;;  %v4910_v49 = vadd.f32 %v12453_v18, %v4869_v12  ;;  %v13163_v52 = vld [vmem:[%s17146_s7 + $0x20] sm:$0xff]   ;;  %v13173_v12 = vld [vmem:[%s17148_s9 + $0x10] sm:$0xff]  }
 0x253   :  { %v12456_v33 = vadd.f32 %v12455_v36, %v12454_v26  ;;  %v11324_v18 = vld [vmem:[%s17145_s6] ss:$0 sm:$0xff] }
 0x254   :  { %v4872_v27 = vadd.f32 %v12434_v19, %v4831_v28  ;;  %12612 = vmatpush3.bf16.msra.mxu1 %v13159_v24 }
 0x255   :  { %12637 = vmatprep.subr.bf16.mxu1 %v17185_v9 }
 0x256   :  { %v4913_v41 = vadd.f32 %v12456_v33, %v4872_v27 }
 0x26b   :  { %v12473_v51 = vpop.f32.mrf.mxu0 }
 0x26c   :  { %v12495_v59 = vpop.f32.mrf.mxu1 }
 0x26d   :  { %v12474_v53 = vpop.f32.mrf.mxu0 }
 0x26e   :  { %v12496_v30 = vpop.f32.mrf.mxu1  ;;  %v12475_v56 = vadd.f32 %v12474_v53, %v12473_v51  ;;  %v13165_v53 = vld [vmem:[%s17146_s7 + $0x10] sm:$0xff]  }
 0x26f   :  { %v12476_v42 = vpop.f32.mrf.mxu0  ;;  %v12497_v40 = vadd.f32 %v12496_v30, %v12495_v59  ;;  %v13168_v59 = vld [vmem:[%s17148_s9 + $0x38] sm:$0xff]  }
 0x270   :  { %v12498_v50 = vpop.f32.mrf.mxu1  ;;  %v4951_v61 = vadd.f32 %v12475_v56, %v4910_v49 }
 0x271   :  { %v12477_v58 = vpop.f32.mrf.mxu0 }
 0x272   :  { %v12478_v60 = vadd.f32 %v12477_v58, %v12476_v42  ;;  %v12499_v63 = vpop.f32.mrf.mxu1  ;;  %v4992_v0 = vadd.f32 %v12497_v40, %v4951_v61  ;;  %v13171_v42 = vld [vmem:[%s17148_s9 + $0x20] sm:$0xff]   ;;  %v13174_v61 = vld [vmem:[%s17148_s9 + $0x8] sm:$0xff]  }
 0x273   :  { %v12500_v37 = vadd.f32 %v12499_v63, %v12498_v50  ;;  %v13175_v40 = vld [vmem:[%s17148_s9] sm:$0xff]  }
 0x274   :  { %v4954_v6 = vadd.f32 %v12478_v60, %v4913_v41  ;;  %v13176_v60 = vld [vmem:[%s17150_s11 + $0x38] sm:$0xff]   ;;  %v13178_v41 = vld [vmem:[%s17150_s11 + $0x28] sm:$0xff]   ;;  %v13179_v63 = vld [vmem:[%s17150_s11 + $0x20] sm:$0xff]  }
 0x276   :  { %v4995_v11 = vadd.f32 %v12500_v37, %v4954_v6  ;;  %v11333_v6 = vld [vmem:[%s17147_s8] ss:$0 sm:$0xff] }
 0x28b   :  { %v12517_v38 = vpop.f32.mrf.mxu0 }
 0x28d   :  { %v12518_v5 = vpop.f32.mrf.mxu0 }
 0x28e   :  { %v12519_v3 = vadd.f32 %v12518_v5, %v12517_v38  ;;  %v13177_v38 = vld [vmem:[%s17150_s11 + $0x30] sm:$0xff]   ;;  %v13180_v5 = vld [vmem:[%s17150_s11 + $0x18] sm:$0xff]  }
 0x28f   :  { %v12520_v8 = vpop.f32.mrf.mxu0 }
 0x290   :  { %v5073_v43 = vpop.f32.mrf.mxu1  ;;  %v5033_v4 = vadd.f32 %v12519_v3, %v4992_v0 }
 0x291   :  { %v12521_v7 = vpop.f32.mrf.mxu0 }
 0x292   :  { %v5075_v10 = vpop.f32.mrf.mxu1  ;;  %v12522_v13 = vadd.f32 %v12521_v7, %v12520_v8  ;;  %v5074_v45 = vadd.f32 %v5073_v43, %v5033_v4 }
 0x293   :  { %v13181_v10 = vld [vmem:[%s17150_s11 + $0x10] sm:$0xff]  }
 0x294   :  { %v5076_v15 = vpop.f32.mrf.mxu1  ;;  %v5036_v46 = vadd.f32 %v12522_v13, %v4995_v11  ;;  %v5080_v17 = vmax.f32 %v5074_v45, 0.0  ;;  %v13182_v11 = vld [vmem:[%s17150_s11 + $0x8] sm:$0xff]   ;;  %v13183_v13 = vld [vmem:[%s17150_s11] sm:$0xff]   ;;  %v13185_v45 = vld [vmem:[%s17152_s13 + $0x30] sm:$0xff]  }
 0x296   :  { %v5078_v62 = vpop.f32.mrf.mxu1  ;;  %v5077_v14 = vadd.f32 %v5076_v15, %v5036_v46  ;;  %v13184_v15 = vld [vmem:[%s17152_s13 + $0x38] sm:$0xff]   ;;  %v13186_v46 = vld [vmem:[%s17152_s13 + $0x28] sm:$0xff]  }
 0x297   :  { %v13187_v62 = vld [vmem:[%s17152_s13 + $0x20] sm:$0xff]  }
 0x298   :  { %v5081_v20 = vmax.f32 %v5077_v14, 0.0  ;;  %v13188_v14 = vld [vmem:[%s17152_s13 + $0x18] sm:$0xff]  }
 0x29a   :  { %v5082_v21 = vpack.c.bf16 %v5081_v20, %v5080_v17  ;;  %v11342_v17 = vld [vmem:[%s17149_s10] ss:$0 sm:$0xff] }
 0x29c   :  { %12594 = vmatmul.mubr.bf16.vlgmr.msra.gmra.mxu0 %v5082_v21 }
 0x29d   :  { %12633 = vmatprep.mubr.msk.bf16.mxu0 %vm13440_vm1, %v17185_v9  ;;  %12618 = vmatpush3.bf16.msra.mxu0 %v13160_v25 }
 0x29e   :  { %12619 = vmatprep.subr.bf16.mxu0 %v17185_v9 }
 0x2a1   :  { %12620 = vmatpush3.bf16.msra.mxu0 %v13161_v16 }
 0x2a2   :  { %12621 = vmatprep.subr.bf16.mxu0 %v17185_v9 }
 0x2a5   :  { %12622 = vmatpush3.bf16.msra.mxu0 %v13162_v48 }
 0x2a6   :  { %12623 = vmatprep.subr.bf16.mxu0 %v17185_v9 }
 0x2a9   :  { %12624 = vmatpush3.bf16.msra.mxu0 %v13163_v52 }
 0x2aa   :  { %12625 = vmatprep.subr.bf16.mxu0 %v17185_v9 }
 0x2ad   :  { %12626 = vmatpush3.bf16.msra.mxu0 %v13164_v47  ;;  %v17186_v47 = vmov 0  }
 0x2ae   :  { %12627 = vmatprep.subr.bf16.mxu0 %v17185_v9 }
 0x2b1   :  { %12628 = vmatpush3.bf16.msra.mxu0 %v13165_v53 }
 0x2b2   :  { %12629 = vmatprep.subr.bf16.mxu0 %v17185_v9 }
 0x2b5   :  { %12630 = vmatpush3.bf16.msra.mxu0 %v13166_v55 }
 0x2b6   :  { %12631 = vmatprep.subr.bf16.mxu0 %v17185_v9 }
 0x2b9   :  { %12632 = vmatpush3.bf16.msra.mxu0 %v13167_v39 }
 0x2ba   :  { %12657 = vmatprep.subr.bf16.mxu0 %v17185_v9 }
 0x35c   :  { %v5188_v26 = vpop.f32.mrf.mxu0 }
 0x35d   :  { %v5189_v54 = vadd.f32 %v11315_v31, %v5188_v26  ;;  %v13190_v26 = vld [vmem:[%s17152_s13 + $0x8] sm:$0xff]  }
 0x35e   :  { %v12595_v51 = vpop.f32.mrf.mxu0 }
 0x35f   :  { %v5195_v2 = vmax.f32 %v5189_v54, 0.0  ;;  %v13191_v51 = vld [vmem:[%s17152_s13] sm:$0xff]  }
 0x360   :  { %v5191_v29 = vpop.f32.mrf.mxu0  ;;  %v5827_v54 = vld [vmem:[%s17154_s15 + $0xc40] sm:$0xff] }
 0x361   :  { %v5192_v32 = vadd.f32 %v11315_v31, %v5191_v29  ;;  %v13189_v31 = vld [vmem:[%s17152_s13 + $0x10] sm:$0xff]   ;;  %v5831_v29 = vld [vmem:[%s17154_s15 + $0xd20] sm:$0xff] }
 0x362   :  { %v12596_v22 = vpop.f32.mrf.mxu0 }
 0x363   :  { %v5196_v35 = vmax.f32 %v5192_v32, 0.0  ;;  %v5828_v32 = vld [vmem:[%s17154_s15 + $0xc48] sm:$0xff]  ;;  %v11425_v22 = vcombine.low %v5827_v54, %v5831_v29 }
 0x365   :  { %v5197_v36 = vpack.c.bf16 %v5196_v35, %v5195_v2  ;;  %v11426_v2 = vcombine.high %v5827_v54, %v5831_v29  ;;  %v5819_v35 = vld [vmem:[%s17154_s15 + $0xa80] sm:$0xff] }
 0x367   :  { %12614 = vmatmul.mubr.bf16.vlgmr.msra.gmra.mxu1 %v5197_v36  ;;  %v5823_v36 = vld [vmem:[%s17154_s15 + $0xb60] sm:$0xff] }
 0x368   :  { %12653 = vmatprep.mubr.msk.bf16.mxu1 %vm13440_vm1, %v17185_v9  ;;  %12638 = vmatpush3.bf16.msra.mxu1 %v13168_v59  ;;  %v11418_v39 = vcombine.high %v5819_v35, %v5823_v36  ;;  %v11417_v59 = vcombine.low %v5819_v35, %v5823_v36  ;;  %v5776_v36 = vld [vmem:[%s17154_s15 + $0xe8] sm:$0xff] }
 0x369   :  { %12639 = vmatprep.subr.bf16.mxu1 %v17185_v9 }
 0x36c   :  { %12640 = vmatpush3.bf16.msra.mxu1 %v13169_v1  ;;  %v5811_v1 = vld [vmem:[%s17154_s15 + $0x8c0] sm:$0xff] }
 0x36d   :  { %12641 = vmatprep.subr.bf16.mxu1 %v17185_v9 }
 0x370   :  { %12642 = vmatpush3.bf16.msra.mxu1 %v13170_v57  ;;  %v5815_v57 = vld [vmem:[%s17154_s15 + $0x9a0] sm:$0xff] }
 0x371   :  { %12643 = vmatprep.subr.bf16.mxu1 %v17185_v9 }
 0x374   :  { %12644 = vmatpush3.bf16.msra.mxu1 %v13171_v42  ;;  %v11410_v42 = vcombine.high %v5811_v1, %v5815_v57 }
 0x375   :  { %12645 = vmatprep.subr.bf16.mxu1 %v17185_v9 }
 0x378   :  { %12646 = vmatpush3.bf16.msra.mxu1 %v13172_v44  ;;  %v11409_v44 = vcombine.low %v5811_v1, %v5815_v57  ;;  %v5833_v1 = vld [vmem:[%s17154_s15 + $0xd30] sm:$0xff]  ;;  %v5830_v57 = vld [vmem:[%s17154_s15 + $0xc58] sm:$0xff] }
 0x379   :  { %12647 = vmatprep.subr.bf16.mxu1 %v17185_v9 }
 0x37c   :  { %12648 = vmatpush3.bf16.msra.mxu1 %v13173_v12  ;;  %v5803_v12 = vld [vmem:[%s17154_s15 + $0x700] sm:$0xff] }
 0x37d   :  { %12649 = vmatprep.subr.bf16.mxu1 %v17185_v9 }
 0x380   :  { %12650 = vmatpush3.bf16.msra.mxu1 %v13174_v61 }
 0x381   :  { %12651 = vmatprep.subr.bf16.mxu1 %v17185_v9 }
 0x384   :  { %12652 = vmatpush3.bf16.msra.mxu1 %v13175_v40  ;;  %v11351_v40 = vld [vmem:[%s17151_s12] ss:$0 sm:$0xff] }
 0x385   :  { %12677 = vmatprep.subr.bf16.mxu1 %v17185_v9 }
 0x427   :  { %v5303_v19 = vpop.f32.mrf.mxu1 }
 0x428   :  { %v5304_v28 = vadd.f32 %v11324_v18, %v5303_v19 }
 0x429   :  { %v12615_v30 = vpop.f32.mrf.mxu1 }
 0x42a   :  { %v5310_v27 = vmax.f32 %v5304_v28, 0.0  ;;  %v5795_v28 = vld [vmem:[%s17154_s15 + $0x540] sm:$0xff] }
 0x42b   :  { %v5306_v56 = vpop.f32.mrf.mxu1 }
 0x42c   :  { %v5307_v58 = vadd.f32 %v11324_v18, %v5306_v56  ;;  %v5807_v18 = vld [vmem:[%s17154_s15 + $0x7e0] sm:$0xff] }
 0x42d   :  { %v12616_v49 = vpop.f32.mrf.mxu1  ;;  %v11402_v19 = vcombine.high %v5803_v12, %v5807_v18  ;;  %v11401_v30 = vcombine.low %v5803_v12, %v5807_v18  ;;  %v5799_v56 = vld [vmem:[%s17154_s15 + $0x620] sm:$0xff] }
 0x42e   :  { %v5311_v50 = vmax.f32 %v5307_v58, 0.0  ;;  %v11394_v58 = vcombine.high %v5795_v28, %v5799_v56  ;;  %v11393_v49 = vcombine.low %v5795_v28, %v5799_v56 }
 0x430   :  { %v5312_v33 = vpack.c.bf16 %v5311_v50, %v5310_v27  ;;  %v5787_v27 = vld [vmem:[%s17154_s15 + $0x380] sm:$0xff] }
 0x431   :  { %v5791_v50 = vld [vmem:[%s17154_s15 + $0x460] sm:$0xff] }
 0x432   :  { %12634 = vmatmul.mubr.bf16.vlgmr.msra.gmra.mxu0 %v5312_v33  ;;  %v11386_v33 = vcombine.high %v5787_v27, %v5791_v50  ;;  %v11385_v61 = vcombine.low %v5787_v27, %v5791_v50  ;;  %v5821_v50 = vld [vmem:[%s17154_s15 + $0xa90] sm:$0xff] }
 0x433   :  { %12673 = vmatprep.mubr.msk.bf16.mxu0 %vm13440_vm1, %v17185_v9  ;;  %12658 = vmatpush3.bf16.msra.mxu0 %v13176_v60 }
 0x434   :  { %12659 = vmatprep.subr.bf16.mxu0 %v17185_v9 }
 0x437   :  { %12660 = vmatpush3.bf16.msra.mxu0 %v13177_v38 }
 0x438   :  { %12661 = vmatprep.subr.bf16.mxu0 %v17185_v9 }
 0x43b   :  { %12662 = vmatpush3.bf16.msra.mxu0 %v13178_v41 }
 0x43c   :  { %12663 = vmatprep.subr.bf16.mxu0 %v17185_v9 }
 0x43f   :  { %12664 = vmatpush3.bf16.msra.mxu0 %v13179_v63 }
 0x440   :  { %12665 = vmatprep.subr.bf16.mxu0 %v17185_v9 }
 0x443   :  { %12666 = vmatpush3.bf16.msra.mxu0 %v13180_v5 }
 0x444   :  { %12667 = vmatprep.subr.bf16.mxu0 %v17185_v9 }
 0x447   :  { %12668 = vmatpush3.bf16.msra.mxu0 %v13181_v10  ;;  %v5816_v10 = vld [vmem:[%s17154_s15 + $0x9a8] sm:$0xff] }
 0x448   :  { %12669 = vmatprep.subr.bf16.mxu0 %v17185_v9 }
 0x44b   :  { %12670 = vmatpush3.bf16.msra.mxu0 %v13182_v11 }
 0x44c   :  { %12671 = vmatprep.subr.bf16.mxu0 %v17185_v9 }
 0x44f   :  { %12672 = vmatpush3.bf16.msra.mxu0 %v13183_v13 }
 0x450   :  { %6197 = vmatprep.subr.bf16.mxu0 %v11426_v2  ;;  %v5775_v2 = vld [vmem:[%s17154_s15 + $0xe0] sm:$0xff] }
 0x4f2   :  { %v5418_v0 = vpop.f32.mrf.mxu0 }
 0x4f3   :  { %v5419_v43 = vadd.f32 %v11333_v6, %v5418_v0 }
 0x4f4   :  { %v12635_v3 = vpop.f32.mrf.mxu0 }
 0x4f5   :  { %v5824_v3 = vld [vmem:[%s17154_s15 + $0xb68] sm:$0xff] }
 0x4f6   :  { %v5421_v8 = vpop.f32.mrf.mxu0 }
 0x4f7   :  { %v5422_v37 = vadd.f32 %v11333_v6, %v5421_v8  ;;  %v5820_v6 = vld [vmem:[%s17154_s15 + $0xa88] sm:$0xff] }
 0x4f8   :  { %v12636_v4 = vpop.f32.mrf.mxu0  ;;  %v11419_v11 = vcombine.low %v5820_v6, %v5824_v3 }
 0x4f9   :  { %v5425_v7 = vpack.c.bf16 %v5422_v37, %v5419_v43  ;;  %v11420_v4 = vcombine.high %v5820_v6, %v5824_v3  ;;  %v5813_v6 = vld [vmem:[%s17154_s15 + $0x8d0] sm:$0xff] }
 0x4fa   :  { %v5817_v3 = vld [vmem:[%s17154_s15 + $0x9b0] sm:$0xff] }
 0x4fb   :  { %12654 = vmatmul.mubr.bf16.vlgmr.msra.gmra.mxu1 %v5425_v7  ;;  %v5812_v7 = vld [vmem:[%s17154_s15 + $0x8c8] sm:$0xff] }
 0x4fc   :  { %12693 = vmatprep.mubr.msk.bf16.mxu1 %vm13440_vm1, %v17185_v9  ;;  %12678 = vmatpush3.bf16.msra.mxu1 %v13184_v15  ;;  %v11412_v13 = vcombine.high %v5812_v7, %v5816_v10  ;;  %v5804_v15 = vld [vmem:[%s17154_s15 + $0x708] sm:$0xff] }
 0x4fd   :  { %12679 = vmatprep.subr.bf16.mxu1 %v17185_v9 }
 0x500   :  { %12680 = vmatpush3.bf16.msra.mxu1 %v13185_v45  ;;  %v5808_v45 = vld [vmem:[%s17154_s15 + $0x7e8] sm:$0xff] }
 0x501   :  { %12681 = vmatprep.subr.bf16.mxu1 %v17185_v9 }
 0x504   :  { %12682 = vmatpush3.bf16.msra.mxu1 %v13186_v46  ;;  %v11411_v46 = vcombine.low %v5812_v7, %v5816_v10  ;;  %v11414_v7 = vcombine.high %v5813_v6, %v5817_v3 }
 0x505   :  { %12683 = vmatprep.subr.bf16.mxu1 %v17185_v9 }
 0x508   :  { %12684 = vmatpush3.bf16.msra.mxu1 %v13187_v62  ;;  %v11404_v62 = vcombine.high %v5804_v15, %v5808_v45 }
 0x509   :  { %12685 = vmatprep.subr.bf16.mxu1 %v17185_v9 }
 0x50c   :  { %12686 = vmatpush3.bf16.msra.mxu1 %v13188_v14  ;;  %v5796_v14 = vld [vmem:[%s17154_s15 + $0x548] sm:$0xff] }
 0x50d   :  { %12687 = vmatprep.subr.bf16.mxu1 %v17185_v9 }
 0x510   :  { %12688 = vmatpush3.bf16.msra.mxu1 %v13189_v31  ;;  %v5780_v31 = vld [vmem:[%s17154_s15 + $0x1c8] sm:$0xff] }
 0x511   :  { %12689 = vmatprep.subr.bf16.mxu1 %v17185_v9 }
 0x514   :  { %12690 = vmatpush3.bf16.msra.mxu1 %v13190_v26 }
 0x515   :  { %12691 = vmatprep.subr.bf16.mxu1 %v17185_v9  ;;  %v5832_v9 = vld [vmem:[%s17154_s15 + $0xd28] sm:$0xff] }
 0x516   :  { %v11427_v53 = vcombine.low %v5828_v32, %v5832_v9  ;;  %v11428_v55 = vcombine.high %v5828_v32, %v5832_v9  ;;  %v5772_v9 = vld [vmem:[%s17154_s15 + $0x8] sm:$0xff] }
 0x518   :  { %12692 = vmatpush3.bf16.msra.mxu1 %v13191_v51  ;;  %v5784_v51 = vld [vmem:[%s17154_s15 + $0x2a8] sm:$0xff] }
 0x519   :  { %6240 = vmatprep.subr.bf16.mxu1 %v11428_v55  ;;  %v11379_v29 = vcombine.low %v5780_v31, %v5784_v51  ;;  %v11380_v32 = vcombine.high %v5780_v31, %v5784_v51  ;;  %v11371_v55 = vcombine.low %v5772_v9, %v5776_v36  ;;  %v5793_v31 = vld [vmem:[%s17154_s15 + $0x470] sm:$0xff]  ;;  %v5794_v51 = vld [vmem:[%s17154_s15 + $0x478] sm:$0xff] }
 0x5bb   :  { %v5531_v20 = vpop.f32.mrf.mxu1 }
 0x5bc   :  { %v5532_v34 = vadd.f32 %v11342_v17, %v5531_v20  ;;  %v11403_v20 = vcombine.low %v5804_v15, %v5808_v45  ;;  %v5806_v15 = vld [vmem:[%s17154_s15 + $0x718] sm:$0xff] }
 0x5bd   :  { %v12655_v21 = vpop.f32.mrf.mxu1  ;;  %v5810_v45 = vld [vmem:[%s17154_s15 + $0x7f8] sm:$0xff] }
 0x5be   :  { %v5538_v16 = vmax.f32 %v5532_v34, 0.0  ;;  %v5788_v34 = vld [vmem:[%s17154_s15 + $0x388] sm:$0xff] }
 0x5bf   :  { %v5534_v23 = vpop.f32.mrf.mxu1 }
 0x5c0   :  { %v5535_v24 = vadd.f32 %v11342_v17, %v5534_v23  ;;  %v5800_v17 = vld [vmem:[%s17154_s15 + $0x628] sm:$0xff] }
 0x5c1   :  { %v12656_v25 = vpop.f32.mrf.mxu1  ;;  %v11396_v21 = vcombine.high %v5796_v14, %v5800_v17  ;;  %v5792_v23 = vld [vmem:[%s17154_s15 + $0x468] sm:$0xff] }
 0x5c2   :  { %v5539_v48 = vmax.f32 %v5535_v24, 0.0  ;;  %v11395_v24 = vcombine.low %v5796_v14, %v5800_v17  ;;  %v11388_v25 = vcombine.high %v5788_v34, %v5792_v23  ;;  %v11408_v17 = vcombine.high %v5806_v15, %v5810_v45 }
 0x5c4   :  { %v5540_v52 = vpack.c.bf16 %v5539_v48, %v5538_v16  ;;  %v11387_v16 = vcombine.low %v5788_v34, %v5792_v23  ;;  %v5779_v48 = vld [vmem:[%s17154_s15 + $0x1c0] sm:$0xff]  ;;  %v5798_v34 = vld [vmem:[%s17154_s15 + $0x558] sm:$0xff] }
 0x5c5   :  { %v5802_v23 = vld [vmem:[%s17154_s15 + $0x638] sm:$0xff] }
 0x5c6   :  { %12674 = vmatmul.mubr.bf16.vlgmr.msra.gmra.mxu0 %v5540_v52  ;;  %v5783_v52 = vld [vmem:[%s17154_s15 + $0x2a0] sm:$0xff] }
 0x5c7   :  { %6229 = vmatprep.mubr.bf16.mxu0 %v17186_v47  ;;  %6198 = vmatpush1.bf16.msra.mxu0 %v11425_v22  ;;  %v11378_v26 = vcombine.high %v5779_v48, %v5783_v52  ;;  %v11377_v54 = vcombine.low %v5779_v48, %v5783_v52  ;;  %v5771_v22 = vld [vmem:[%s17154_s15] sm:$0xff]  ;;  %v11400_v48 = vcombine.high %v5798_v34, %v5802_v23  ;;  %v5789_v52 = vld [vmem:[%s17154_s15 + $0x390] sm:$0xff] }
 0x5c8   :  { %6199 = vmatprep.subr.bf16.mxu0 %v11418_v39  ;;  %v11370_v35 = vcombine.high %v5771_v22, %v5775_v2  ;;  %v11372_v39 = vcombine.high %v5772_v9, %v5776_v36  ;;  %v5785_v9 = vld [vmem:[%s17154_s15 + $0x2b0] sm:$0xff]  ;;  %v5786_v36 = vld [vmem:[%s17154_s15 + $0x2b8] sm:$0xff] }
 0x5cb   :  { %6200 = vmatpush1.bf16.msra.mxu0 %v11417_v59  ;;  %v5829_v59 = vld [vmem:[%s17154_s15 + $0xc50] sm:$0xff] }
 0x5cc   :  { %6201 = vmatprep.subr.bf16.mxu0 %v11410_v42  ;;  %v11430_v42 = vcombine.high %v5829_v59, %v5833_v1  ;;  %v11429_v12 = vcombine.low %v5829_v59, %v5833_v1  ;;  %v5773_v1 = vld [vmem:[%s17154_s15 + $0x10] sm:$0xff] }
 0x5cf   :  { %6202 = vmatpush1.bf16.msra.mxu0 %v11409_v44  ;;  %v5834_v44 = vld [vmem:[%s17154_s15 + $0xd38] sm:$0xff] }
 0x5d0   :  { %6203 = vmatprep.subr.bf16.mxu0 %v11402_v19  ;;  %v11431_v18 = vcombine.low %v5830_v57, %v5834_v44  ;;  %v11432_v19 = vcombine.high %v5830_v57, %v5834_v44  ;;  %v5777_v57 = vld [vmem:[%s17154_s15 + $0xf0] sm:$0xff]  ;;  %v5778_v44 = vld [vmem:[%s17154_s15 + $0xf8] sm:$0xff] }
 0x5d3   :  { %6204 = vmatpush1.bf16.msra.mxu0 %v11401_v30  ;;  %v11360_v30 = vld [vmem:[%s17153_s14] ss:$0 sm:$0xff] }
 0x5d4   :  { %6205 = vmatprep.subr.bf16.mxu0 %v11394_v58 }
 0x5d7   :  { %6206 = vmatpush1.bf16.msra.mxu0 %v11393_v49 }
 0x5d8   :  { %6207 = vmatprep.subr.bf16.mxu0 %v11386_v33 }
 0x5db   :  { %6208 = vmatpush1.bf16.msra.mxu0 %v11385_v61  ;;  %v5825_v61 = vld [vmem:[%s17154_s15 + $0xb70] sm:$0xff] }
 0x5dc   :  { %6209 = vmatprep.subr.bf16.mxu0 %v11378_v26  ;;  %v5790_v26 = vld [vmem:[%s17154_s15 + $0x398] sm:$0xff] }
 0x5df   :  { %6210 = vmatpush1.bf16.msra.mxu0 %v11377_v54 }
 0x5e0   :  { %6211 = vmatprep.subr.bf16.mxu0 %v11370_v35  ;;  %v5782_v35 = vld [vmem:[%s17154_s15 + $0x1d8] sm:$0xff] }
 0x5e1   :  { %v11384_v59 = vcombine.high %v5782_v35, %v5786_v36 }
 0x686   :  { %v5646_v60 = vpop.f32.mrf.mxu0 }
 0x687   :  { %v5647_v41 = vadd.f32 %v11351_v40, %v5646_v60  ;;  %v5826_v60 = vld [vmem:[%s17154_s15 + $0xb78] sm:$0xff] }
 0x688   :  { %v12675_v38 = vpop.f32.mrf.mxu0 }
 0x689   :  { %v5653_v8 = vmax.f32 %v5647_v41, 0.0 }
 0x68a   :  { %v5649_v63 = vpop.f32.mrf.mxu0 }
 0x68b   :  { %v5650_v5 = vadd.f32 %v11351_v40, %v5649_v63  ;;  %v5822_v40 = vld [vmem:[%s17154_s15 + $0xa98] sm:$0xff] }
 0x68c   :  { %v12676_v0 = vpop.f32.mrf.mxu0 }
 0x68d   :  { %v5654_v43 = vmax.f32 %v5650_v5, 0.0  ;;  %v11422_v5 = vcombine.high %v5821_v50, %v5825_v61  ;;  %v11424_v0 = vcombine.high %v5822_v40, %v5826_v60 }
 0x68f   :  { %v5655_v37 = vpack.c.bf16 %v5654_v43, %v5653_v8  ;;  %v5814_v8 = vld [vmem:[%s17154_s15 + $0x8d8] sm:$0xff] }
 0x690   :  { %v5818_v43 = vld [vmem:[%s17154_s15 + $0x9b8] sm:$0xff] }
 0x691   :  { %12694 = vmatmul.mubr.bf16.vlgmr.msra.gmra.mxu1 %v5655_v37  ;;  %v11421_v37 = vcombine.low %v5821_v50, %v5825_v61  ;;  %v11416_v10 = vcombine.high %v5814_v8, %v5818_v43 }
 0x692   :  { %6241 = vmatpush1.bf16.msra.mxu1 %v11427_v53  ;;  %6272 = vmatprep.mubr.bf16.mxu1 %v17186_v47  ;;  %v11369_v53 = vcombine.low %v5771_v22, %v5775_v2  ;;  %v11392_v22 = vcombine.high %v5790_v26, %v5794_v51  ;;  %v5781_v2 = vld [vmem:[%s17154_s15 + $0x1d0] sm:$0xff] }
 0x693   :  { %6242 = vmatprep.subr.bf16.mxu1 %v11420_v4  ;;  %v11423_v4 = vcombine.low %v5822_v40, %v5826_v60  ;;  %v6537_v40 = vld [vmem:[%s17154_s15 + $0xaa0] sm:$0xff] }
 0x694   :  { %6212 = vmatpush1.bf16.msra.mxu0 %v11369_v53  ;;  %v11389_v53 = vcombine.low %v5789_v52, %v5793_v31  ;;  %v6541_v60 = vld [vmem:[%s17154_s15 + $0xb80] sm:$0xff] }
 0x695   :  { %6283 = vmatprep.subr.bf16.mxu0 %v11430_v42  ;;  %v5774_v42 = vld [vmem:[%s17154_s15 + $0x18] sm:$0xff] }
 0x696   :  { %6243 = vmatpush1.bf16.msra.mxu1 %v11419_v11  ;;  %v5805_v11 = vld [vmem:[%s17154_s15 + $0x710] sm:$0xff]  ;;  %v11375_v50 = vcombine.low %v5774_v42, %v5778_v44 }
 0x697   :  { %6244 = vmatprep.subr.bf16.mxu1 %v11412_v13  ;;  %v5809_v13 = vld [vmem:[%s17154_s15 + $0x7f0] sm:$0xff] }
 0x698   :  { %v11406_v14 = vcombine.high %v5805_v11, %v5809_v13 }
 0x69a   :  { %6245 = vmatpush1.bf16.msra.mxu1 %v11411_v46  ;;  %v11413_v46 = vcombine.low %v5813_v6, %v5817_v3  ;;  %v11490_v6 = vcombine.high %v6537_v40, %v6541_v60 }
 0x69b   :  { %6246 = vmatprep.subr.bf16.mxu1 %v11404_v62  ;;  %v11415_v62 = vcombine.low %v5814_v8, %v5818_v43  ;;  %v6529_v8 = vld [vmem:[%s17154_s15 + $0x8e0] sm:$0xff] }
 0x69c   :  { %v6533_v43 = vld [vmem:[%s17154_s15 + $0x9c0] sm:$0xff] }
 0x69e   :  { %6247 = vmatpush1.bf16.msra.mxu1 %v11403_v20  ;;  %v5797_v20 = vld [vmem:[%s17154_s15 + $0x550] sm:$0xff] }
 0x69f   :  { %6248 = vmatprep.subr.bf16.mxu1 %v11396_v21  ;;  %v5801_v21 = vld [vmem:[%s17154_s15 + $0x630] sm:$0xff] }
 0x6a0   :  { %v11397_v54 = vcombine.low %v5797_v20, %v5801_v21 }
 0x6a2   :  { %6249 = vmatpush1.bf16.msra.mxu1 %v11395_v24  ;;  %v11405_v24 = vcombine.low %v5805_v11, %v5809_v13  ;;  %v11482_v11 = vcombine.high %v6529_v8, %v6533_v43 }
 0x6a3   :  { %6250 = vmatprep.subr.bf16.mxu1 %v11388_v25  ;;  %v11407_v25 = vcombine.low %v5806_v15, %v5810_v45  ;;  %v6521_v15 = vld [vmem:[%s17154_s15 + $0x720] sm:$0xff] }
 0x6a4   :  { %v6525_v45 = vld [vmem:[%s17154_s15 + $0x800] sm:$0xff] }
 0x6a6   :  { %6251 = vmatpush1.bf16.msra.mxu1 %v11387_v16  ;;  %v11398_v16 = vcombine.high %v5797_v20, %v5801_v21  ;;  %v11474_v20 = vcombine.high %v6521_v15, %v6525_v45 }
 0x6a7   :  { %6252 = vmatprep.subr.bf16.mxu1 %v11380_v32  ;;  %v11390_v32 = vcombine.high %v5789_v52, %v5793_v31 }
 0x6aa   :  { %6253 = vmatpush1.bf16.msra.mxu1 %v11379_v29  ;;  %v11399_v29 = vcombine.low %v5798_v34, %v5802_v23  ;;  %v6513_v34 = vld [vmem:[%s17154_s15 + $0x560] sm:$0xff] }
 0x6ab   :  { %6254 = vmatprep.subr.bf16.mxu1 %v11372_v39  ;;  %v11382_v39 = vcombine.high %v5781_v2, %v5785_v9  ;;  %v6517_v23 = vld [vmem:[%s17154_s15 + $0x640] sm:$0xff] }
 0x6ac   :  { %v11466_v52 = vcombine.high %v6513_v34, %v6517_v23 }
 0x6ae   :  { %6255 = vmatpush1.bf16.msra.mxu1 %v11371_v55  ;;  %v11391_v55 = vcombine.low %v5790_v26, %v5794_v51  ;;  %v6505_v26 = vld [vmem:[%s17154_s15 + $0x3a0] sm:$0xff] }
 0x6af   :  { %6326 = vmatprep.subr.bf16.mxu1 %v11432_v19  ;;  %v11374_v19 = vcombine.high %v5773_v1, %v5777_v57  ;;  %v6509_v51 = vld [vmem:[%s17154_s15 + $0x480] sm:$0xff] }
 0x751   :  { %v5761_v28 = vpop.f32.mrf.mxu1 }
 0x752   :  { %v5762_v58 = vadd.f32 %v11360_v30, %v5761_v28  ;;  %v6545_v28 = vld [vmem:[%s17154_s15 + $0xc60] sm:$0xff] }
 0x753   :  { %v12695_v56 = vpop.f32.mrf.mxu1 }
 0x754   :  { %v5768_v38 = vmax.f32 %v5762_v58, 0.0  ;;  %v6549_v56 = vld [vmem:[%s17154_s15 + $0xd40] sm:$0xff]  ;;  %v6546_v58 = vld [vmem:[%s17154_s15 + $0xc68] sm:$0xff] }
 0x755   :  { %v5764_v49 = vpop.f32.mrf.mxu1 }
 0x756   :  { %v5765_v27 = vadd.f32 %v11360_v30, %v5764_v49  ;;  %v11376_v30 = vcombine.high %v5774_v42, %v5778_v44  ;;  %v6550_v49 = vld [vmem:[%s17154_s15 + $0xd48] sm:$0xff]  ;;  %v6489_v42 = vld [vmem:[%s17154_s15 + $0x20] sm:$0xff] }
 0x757   :  { %v12696_v33 = vpop.f32.mrf.mxu1  ;;  %v11500_v61 = vcombine.high %v6546_v58, %v6550_v49  ;;  %v6493_v44 = vld [vmem:[%s17154_s15 + $0x100] sm:$0xff] }
 0x758   :  { %v5769_v41 = vmax.f32 %v5765_v27, 0.0  ;;  %v11373_v27 = vcombine.low %v5773_v1, %v5777_v57  ;;  %v11498_v33 = vcombine.high %v6545_v28, %v6549_v56 }
 0x75a   :  { %v15603_v63 = vpack.c.bf16 %v5769_v41, %v5768_v38  ;;  %v6538_v38 = vld [vmem:[%s17154_s15 + $0xaa8] sm:$0xff] }
 0x75b   :  { %v6542_v41 = vld [vmem:[%s17154_s15 + $0xb88] sm:$0xff] }
 0x75c   :  { %6230 = vmatmul.mubr.bf16.vlgmr.msra.gmra.mxu0 %v15603_v63  ;;  %6273 = vmatmul.mubr.bf16.vlgmr.msra.gmra.mxu1 %v15603_v63  ;;  %v11492_v3 = vcombine.high %v6538_v38, %v6542_v41 }
 0x75d   :  { %6284 = vmatpush1.bf16.msra.mxu0 %v11429_v12  ;;  %6327 = vmatpush1.bf16.msra.mxu1 %v11431_v18  ;;  %v11381_v12 = vcombine.low %v5781_v2, %v5785_v9  ;;  %v11383_v18 = vcombine.low %v5782_v35, %v5786_v36  ;;  %v11458_v2 = vcombine.high %v6505_v26, %v6509_v51  ;;  %v6497_v35 = vld [vmem:[%s17154_s15 + $0x1e0] sm:$0xff] }
 0x75e   :  { %6285 = vmatprep.subr.bf16.mxu0 %v11422_v5  ;;  %6328 = vmatprep.subr.bf16.mxu1 %v11424_v0  ;;  %v11497_v5 = vcombine.low %v6545_v28, %v6549_v56  ;;  %v11499_v0 = vcombine.low %v6546_v58, %v6550_v49  ;;  %v6501_v36 = vld [vmem:[%s17154_s15 + $0x2c0] sm:$0xff]  ;;  %v11442_v28 = vcombine.high %v6489_v42, %v6493_v44  ;;  %v6547_v58 = vld [vmem:[%s17154_s15 + $0xc70] sm:$0xff] }
 0x75f   :  { %6315 = vmatprep.mubr.bf16.mxu0 %v17186_v47  ;;  %6358 = vmatprep.mubr.bf16.mxu1 %v17186_v47  ;;  %v11450_v1 = vcombine.high %v6497_v35, %v6501_v36  ;;  %v6551_v49 = vld [vmem:[%s17154_s15 + $0xd50] sm:$0xff] }
 0x761   :  { %6286 = vmatpush1.bf16.msra.mxu0 %v11421_v37  ;;  %6329 = vmatpush1.bf16.msra.mxu1 %v11423_v4  ;;  %v6530_v37 = vld [vmem:[%s17154_s15 + $0x8e8] sm:$0xff] }
 0x762   :  { %6287 = vmatprep.subr.bf16.mxu0 %v11414_v7  ;;  %6330 = vmatprep.subr.bf16.mxu1 %v11416_v10  ;;  %v6534_v4 = vld [vmem:[%s17154_s15 + $0x9c8] sm:$0xff]  ;;  %v11489_v7 = vcombine.low %v6537_v40, %v6541_v60  ;;  %v11491_v10 = vcombine.low %v6538_v38, %v6542_v41  ;;  %v11502_v40 = vcombine.high %v6547_v58, %v6551_v49  ;;  %v6539_v38 = vld [vmem:[%s17154_s15 + $0xab0] sm:$0xff] }
 0x763   :  { %v11484_v13 = vcombine.high %v6530_v37, %v6534_v4  ;;  %v6543_v41 = vld [vmem:[%s17154_s15 + $0xb90] sm:$0xff] }
 0x765   :  { %6288 = vmatpush1.bf16.msra.mxu0 %v11413_v46  ;;  %6331 = vmatpush1.bf16.msra.mxu1 %v11415_v62  ;;  %v6522_v46 = vld [vmem:[%s17154_s15 + $0x728] sm:$0xff] }
 0x766   :  { %6289 = vmatprep.subr.bf16.mxu0 %v11406_v14  ;;  %6332 = vmatprep.subr.bf16.mxu1 %v11408_v17  ;;  %v6526_v62 = vld [vmem:[%s17154_s15 + $0x808] sm:$0xff]  ;;  %v11481_v14 = vcombine.low %v6529_v8, %v6533_v43  ;;  %v11483_v17 = vcombine.low %v6530_v37, %v6534_v4  ;;  %v11494_v8 = vcombine.high %v6539_v38, %v6543_v41  ;;  %v6531_v37 = vld [vmem:[%s17154_s15 + $0x8f0] sm:$0xff] }
 0x767   :  { %v11476_v21 = vcombine.high %v6522_v46, %v6526_v62  ;;  %v6535_v4 = vld [vmem:[%s17154_s15 + $0x9d0] sm:$0xff] }
 0x769   :  { %6290 = vmatpush1.bf16.msra.mxu0 %v11405_v24  ;;  %6333 = vmatpush1.bf16.msra.mxu1 %v11407_v25  ;;  %v6514_v24 = vld [vmem:[%s17154_s15 + $0x568] sm:$0xff] }
 0x76a   :  { %6291 = vmatprep.subr.bf16.mxu0 %v11398_v16  ;;  %6334 = vmatprep.subr.bf16.mxu1 %v11400_v48  ;;  %v6518_v25 = vld [vmem:[%s17154_s15 + $0x648] sm:$0xff]  ;;  %v11473_v16 = vcombine.low %v6521_v15, %v6525_v45  ;;  %v11475_v48 = vcombine.low %v6522_v46, %v6526_v62  ;;  %v11486_v15 = vcombine.high %v6531_v37, %v6535_v4  ;;  %v6523_v46 = vld [vmem:[%s17154_s15 + $0x730] sm:$0xff] }
 0x76b   :  { %v11468_v31 = vcombine.high %v6514_v24, %v6518_v25  ;;  %v6527_v62 = vld [vmem:[%s17154_s15 + $0x810] sm:$0xff] }
 0x76d   :  { %6292 = vmatpush1.bf16.msra.mxu0 %v11397_v54  ;;  %6335 = vmatpush1.bf16.msra.mxu1 %v11399_v29  ;;  %v6506_v54 = vld [vmem:[%s17154_s15 + $0x3a8] sm:$0xff] }
 0x76e   :  { %6293 = vmatprep.subr.bf16.mxu0 %v11390_v32  ;;  %6336 = vmatprep.subr.bf16.mxu1 %v11392_v22  ;;  %v6510_v29 = vld [vmem:[%s17154_s15 + $0x488] sm:$0xff]  ;;  %v11465_v32 = vcombine.low %v6513_v34, %v6517_v23  ;;  %v11467_v22 = vcombine.low %v6514_v24, %v6518_v25  ;;  %v11478_v34 = vcombine.high %v6523_v46, %v6527_v62  ;;  %v6515_v24 = vld [vmem:[%s17154_s15 + $0x570] sm:$0xff] }
 0x76f   :  { %v11460_v9 = vcombine.high %v6506_v54, %v6510_v29  ;;  %v6519_v25 = vld [vmem:[%s17154_s15 + $0x650] sm:$0xff] }
 0x771   :  { %6294 = vmatpush1.bf16.msra.mxu0 %v11389_v53  ;;  %6337 = vmatpush1.bf16.msra.mxu1 %v11391_v55  ;;  %v6498_v53 = vld [vmem:[%s17154_s15 + $0x1e8] sm:$0xff] }
 0x772   :  { %6295 = vmatprep.subr.bf16.mxu0 %v11382_v39  ;;  %6338 = vmatprep.subr.bf16.mxu1 %v11384_v59  ;;  %v6502_v55 = vld [vmem:[%s17154_s15 + $0x2c8] sm:$0xff]  ;;  %v11457_v39 = vcombine.low %v6505_v26, %v6509_v51  ;;  %v11459_v59 = vcombine.low %v6506_v54, %v6510_v29  ;;  %v11470_v26 = vcombine.high %v6515_v24, %v6519_v25  ;;  %v6507_v54 = vld [vmem:[%s17154_s15 + $0x3b0] sm:$0xff] }
 0x773   :  { %v11452_v57 = vcombine.high %v6498_v53, %v6502_v55  ;;  %v6511_v29 = vld [vmem:[%s17154_s15 + $0x490] sm:$0xff] }
 0x775   :  { %6296 = vmatpush1.bf16.msra.mxu0 %v11381_v12  ;;  %6339 = vmatpush1.bf16.msra.mxu1 %v11383_v18  ;;  %v6490_v12 = vld [vmem:[%s17154_s15 + $0x28] sm:$0xff] }
 0x776   :  { %6297 = vmatprep.subr.bf16.mxu0 %v11374_v19  ;;  %6340 = vmatprep.subr.bf16.mxu1 %v11376_v30  ;;  %v6494_v18 = vld [vmem:[%s17154_s15 + $0x108] sm:$0xff]  ;;  %v11449_v19 = vcombine.low %v6497_v35, %v6501_v36  ;;  %v11451_v30 = vcombine.low %v6498_v53, %v6502_v55  ;;  %v11462_v35 = vcombine.high %v6507_v54, %v6511_v29  ;;  %v6499_v53 = vld [vmem:[%s17154_s15 + $0x1f0] sm:$0xff] }
 0x777   :  { %v11444_v56 = vcombine.high %v6490_v12, %v6494_v18  ;;  %v6503_v55 = vld [vmem:[%s17154_s15 + $0x2d0] sm:$0xff] }
 0x779   :  { %6298 = vmatpush1.bf16.msra.mxu0 %v11373_v27  ;;  %6341 = vmatpush1.bf16.msra.mxu1 %v11375_v50  ;;  %v6548_v27 = vld [vmem:[%s17154_s15 + $0xc78] sm:$0xff] }
 0x77a   :  { %6915 = vmatprep.subr.bf16.mxu0 %v11498_v33  ;;  %6958 = vmatprep.subr.bf16.mxu1 %v11500_v61  ;;  %v6552_v50 = vld [vmem:[%s17154_s15 + $0xd58] sm:$0xff]  ;;  %v11441_v33 = vcombine.low %v6489_v42, %v6493_v44  ;;  %v11443_v61 = vcombine.low %v6490_v12, %v6494_v18  ;;  %v11454_v42 = vcombine.high %v6499_v53, %v6503_v55  ;;  %v6491_v12 = vld [vmem:[%s17154_s15 + $0x30] sm:$0xff] }
 0x77b   :  { %v11504_v60 = vcombine.high %v6548_v27, %v6552_v50  ;;  %v6495_v18 = vld [vmem:[%s17154_s15 + $0x110] sm:$0xff] }
 0x77c   :  { %6316 = vmatmul.mubr.bf16.vlgmr.msra.gmra.mxu0 %v15603_v63  ;;  %6359 = vmatmul.mubr.bf16.vlgmr.msra.gmra.mxu1 %v15603_v63 }
 0x77d   :  { %6916 = vmatpush1.bf16.msra.mxu0 %v11497_v5  ;;  %6959 = vmatpush1.bf16.msra.mxu1 %v11499_v0  ;;  %v6540_v5 = vld [vmem:[%s17154_s15 + $0xab8] sm:$0xff] }
 0x77e   :  { %6917 = vmatprep.subr.bf16.mxu0 %v11490_v6  ;;  %6960 = vmatprep.subr.bf16.mxu1 %v11492_v3  ;;  %v6544_v0 = vld [vmem:[%s17154_s15 + $0xb98] sm:$0xff]  ;;  %v11501_v6 = vcombine.low %v6547_v58, %v6551_v49  ;;  %v11503_v3 = vcombine.low %v6548_v27, %v6552_v50  ;;  %v11446_v58 = vcombine.high %v6491_v12, %v6495_v18  ;;  %v7263_v27 = vld [vmem:[%s17154_s15 + $0xc80] sm:$0xff] }
 0x77f   :  { %6947 = vmatprep.mubr.bf16.mxu0 %v17186_v47  ;;  %6990 = vmatprep.mubr.bf16.mxu1 %v17186_v47  ;;  %v11496_v43 = vcombine.high %v6540_v5, %v6544_v0  ;;  %v7267_v50 = vld [vmem:[%s17154_s15 + $0xd60] sm:$0xff] }
 0x781   :  { %6918 = vmatpush1.bf16.msra.mxu0 %v11489_v7  ;;  %6961 = vmatpush1.bf16.msra.mxu1 %v11491_v10  ;;  %v6532_v7 = vld [vmem:[%s17154_s15 + $0x8f8] sm:$0xff] }
 0x782   :  { %6919 = vmatprep.subr.bf16.mxu0 %v11482_v11  ;;  %6962 = vmatprep.subr.bf16.mxu1 %v11484_v13  ;;  %v6536_v10 = vld [vmem:[%s17154_s15 + $0x9d8] sm:$0xff]  ;;  %v11493_v11 = vcombine.low %v6539_v38, %v6543_v41  ;;  %v11495_v13 = vcombine.low %v6540_v5, %v6544_v0  ;;  %v11570_v38 = vcombine.high %v7263_v27, %v7267_v50  ;;  %v7255_v5 = vld [vmem:[%s17154_s15 + $0xac0] sm:$0xff] }
 0x783   :  { %v11488_v45 = vcombine.high %v6532_v7, %v6536_v10  ;;  %v7259_v0 = vld [vmem:[%s17154_s15 + $0xba0] sm:$0xff] }
 0x785   :  { %6920 = vmatpush1.bf16.msra.mxu0 %v11481_v14  ;;  %6963 = vmatpush1.bf16.msra.mxu1 %v11483_v17  ;;  %v6524_v14 = vld [vmem:[%s17154_s15 + $0x738] sm:$0xff] }
 0x786   :  { %6921 = vmatprep.subr.bf16.mxu0 %v11474_v20  ;;  %6964 = vmatprep.subr.bf16.mxu1 %v11476_v21  ;;  %v6528_v17 = vld [vmem:[%s17154_s15 + $0x818] sm:$0xff]  ;;  %v11485_v20 = vcombine.low %v6531_v37, %v6535_v4  ;;  %v11487_v21 = vcombine.low %v6532_v7, %v6536_v10  ;;  %v11562_v37 = vcombine.high %v7255_v5, %v7259_v0  ;;  %v7247_v7 = vld [vmem:[%s17154_s15 + $0x900] sm:$0xff] }
 0x787   :  { %v11480_v23 = vcombine.high %v6524_v14, %v6528_v17  ;;  %v7251_v10 = vld [vmem:[%s17154_s15 + $0x9e0] sm:$0xff] }
 0x789   :  { %6922 = vmatpush1.bf16.msra.mxu0 %v11473_v16  ;;  %6965 = vmatpush1.bf16.msra.mxu1 %v11475_v48  ;;  %v6516_v16 = vld [vmem:[%s17154_s15 + $0x578] sm:$0xff] }
 0x78a   :  { %6923 = vmatprep.subr.bf16.mxu0 %v11466_v52  ;;  %6966 = vmatprep.subr.bf16.mxu1 %v11468_v31  ;;  %v6520_v48 = vld [vmem:[%s17154_s15 + $0x658] sm:$0xff]  ;;  %v11477_v52 = vcombine.low %v6523_v46, %v6527_v62  ;;  %v11479_v31 = vcombine.low %v6524_v14, %v6528_v17  ;;  %v11554_v46 = vcombine.high %v7247_v7, %v7251_v10  ;;  %v7239_v14 = vld [vmem:[%s17154_s15 + $0x740] sm:$0xff] }
 0x78b   :  { %v11472_v51 = vcombine.high %v6516_v16, %v6520_v48  ;;  %v7243_v17 = vld [vmem:[%s17154_s15 + $0x820] sm:$0xff] }
 0x78d   :  { %6924 = vmatpush1.bf16.msra.mxu0 %v11465_v32  ;;  %6967 = vmatpush1.bf16.msra.mxu1 %v11467_v22  ;;  %v6508_v32 = vld [vmem:[%s17154_s15 + $0x3b8] sm:$0xff] }
 0x78e   :  { %6925 = vmatprep.subr.bf16.mxu0 %v11458_v2  ;;  %6968 = vmatprep.subr.bf16.mxu1 %v11460_v9  ;;  %v6512_v22 = vld [vmem:[%s17154_s15 + $0x498] sm:$0xff]  ;;  %v11469_v2 = vcombine.low %v6515_v24, %v6519_v25  ;;  %v11471_v9 = vcombine.low %v6516_v16, %v6520_v48  ;;  %v11546_v24 = vcombine.high %v7239_v14, %v7243_v17  ;;  %v7231_v16 = vld [vmem:[%s17154_s15 + $0x580] sm:$0xff] }
 0x78f   :  { %v11464_v36 = vcombine.high %v6508_v32, %v6512_v22  ;;  %v7235_v48 = vld [vmem:[%s17154_s15 + $0x660] sm:$0xff] }
 0x791   :  { %6926 = vmatpush1.bf16.msra.mxu0 %v11457_v39  ;;  %6969 = vmatpush1.bf16.msra.mxu1 %v11459_v59  ;;  %v6500_v39 = vld [vmem:[%s17154_s15 + $0x1f8] sm:$0xff] }
 0x792   :  { %6927 = vmatprep.subr.bf16.mxu0 %v11450_v1  ;;  %6970 = vmatprep.subr.bf16.mxu1 %v11452_v57  ;;  %v6504_v59 = vld [vmem:[%s17154_s15 + $0x2d8] sm:$0xff]  ;;  %v11461_v1 = vcombine.low %v6507_v54, %v6511_v29  ;;  %v11463_v57 = vcombine.low %v6508_v32, %v6512_v22  ;;  %v11538_v54 = vcombine.high %v7231_v16, %v7235_v48  ;;  %v7223_v32 = vld [vmem:[%s17154_s15 + $0x3c0] sm:$0xff] }
 0x793   :  { %v11456_v44 = vcombine.high %v6500_v39, %v6504_v59  ;;  %v7227_v22 = vld [vmem:[%s17154_s15 + $0x4a0] sm:$0xff] }
 0x795   :  { %6928 = vmatpush1.bf16.msra.mxu0 %v11449_v19  ;;  %6971 = vmatpush1.bf16.msra.mxu1 %v11451_v30  ;;  %v6492_v19 = vld [vmem:[%s17154_s15 + $0x38] sm:$0xff] }
 0x796   :  { %6929 = vmatprep.subr.bf16.mxu0 %v11442_v28  ;;  %6972 = vmatprep.subr.bf16.mxu1 %v11444_v56  ;;  %v6496_v30 = vld [vmem:[%s17154_s15 + $0x118] sm:$0xff]  ;;  %v11453_v28 = vcombine.low %v6499_v53, %v6503_v55  ;;  %v11455_v56 = vcombine.low %v6500_v39, %v6504_v59  ;;  %v11530_v53 = vcombine.high %v7223_v32, %v7227_v22  ;;  %v7215_v39 = vld [vmem:[%s17154_s15 + $0x200] sm:$0xff] }
 0x797   :  { %v11448_v49 = vcombine.high %v6492_v19, %v6496_v30  ;;  %v7219_v59 = vld [vmem:[%s17154_s15 + $0x2e0] sm:$0xff] }
 0x799   :  { %6930 = vmatpush1.bf16.msra.mxu0 %v11441_v33  ;;  %6973 = vmatpush1.bf16.msra.mxu1 %v11443_v61  ;;  %v7264_v33 = vld [vmem:[%s17154_s15 + $0xc88] sm:$0xff] }
 0x79a   :  { %7001 = vmatprep.subr.bf16.mxu0 %v11502_v40  ;;  %7044 = vmatprep.subr.bf16.mxu1 %v11504_v60  ;;  %v7268_v61 = vld [vmem:[%s17154_s15 + $0xd68] sm:$0xff]  ;;  %v11445_v40 = vcombine.low %v6491_v12, %v6495_v18  ;;  %v11447_v60 = vcombine.low %v6492_v19, %v6496_v30  ;;  %v11522_v12 = vcombine.high %v7215_v39, %v7219_v59  ;;  %v7207_v19 = vld [vmem:[%s17154_s15 + $0x40] sm:$0xff] }
 0x79b   :  { %v11572_v41 = vcombine.high %v7264_v33, %v7268_v61  ;;  %v7211_v30 = vld [vmem:[%s17154_s15 + $0x120] sm:$0xff] }
 0x79c   :  { %6948 = vmatmul.mubr.bf16.vlgmr.msra.gmra.mxu0 %v15603_v63  ;;  %6991 = vmatmul.mubr.bf16.vlgmr.msra.gmra.mxu1 %v15603_v63 }
 0x79d   :  { %7002 = vmatpush1.bf16.msra.mxu0 %v11501_v6  ;;  %7045 = vmatpush1.bf16.msra.mxu1 %v11503_v3  ;;  %v7256_v6 = vld [vmem:[%s17154_s15 + $0xac8] sm:$0xff] }
 0x79e   :  { %7003 = vmatprep.subr.bf16.mxu0 %v11494_v8  ;;  %7046 = vmatprep.subr.bf16.mxu1 %v11496_v43  ;;  %v7260_v3 = vld [vmem:[%s17154_s15 + $0xba8] sm:$0xff]  ;;  %v11569_v8 = vcombine.low %v7263_v27, %v7267_v50  ;;  %v11571_v43 = vcombine.low %v7264_v33, %v7268_v61  ;;  %v11514_v27 = vcombine.high %v7207_v19, %v7211_v30  ;;  %v7265_v33 = vld [vmem:[%s17154_s15 + $0xc90] sm:$0xff] }
 0x79f   :  { %7033 = vmatprep.mubr.bf16.mxu0 %v17186_v47  ;;  %7076 = vmatprep.mubr.bf16.mxu1 %v17186_v47  ;;  %v11564_v4 = vcombine.high %v7256_v6, %v7260_v3  ;;  %v7269_v61 = vld [vmem:[%s17154_s15 + $0xd70] sm:$0xff] }
 0x7a1   :  { %7004 = vmatpush1.bf16.msra.mxu0 %v11493_v11  ;;  %7047 = vmatpush1.bf16.msra.mxu1 %v11495_v13  ;;  %v7248_v11 = vld [vmem:[%s17154_s15 + $0x908] sm:$0xff] }
 0x7a2   :  { %7005 = vmatprep.subr.bf16.mxu0 %v11486_v15  ;;  %7048 = vmatprep.subr.bf16.mxu1 %v11488_v45  ;;  %v7252_v13 = vld [vmem:[%s17154_s15 + $0x9e8] sm:$0xff]  ;;  %v11561_v15 = vcombine.low %v7255_v5, %v7259_v0  ;;  %v11563_v45 = vcombine.low %v7256_v6, %v7260_v3  ;;  %v11574_v5 = vcombine.high %v7265_v33, %v7269_v61  ;;  %v7257_v6 = vld [vmem:[%s17154_s15 + $0xad0] sm:$0xff] }
 0x7a3   :  { %v11556_v62 = vcombine.high %v7248_v11, %v7252_v13  ;;  %v7261_v3 = vld [vmem:[%s17154_s15 + $0xbb0] sm:$0xff] }
 0x7a5   :  { %7006 = vmatpush1.bf16.msra.mxu0 %v11485_v20  ;;  %7049 = vmatpush1.bf16.msra.mxu1 %v11487_v21  ;;  %v7240_v20 = vld [vmem:[%s17154_s15 + $0x748] sm:$0xff] }
 0x7a6   :  { %7007 = vmatprep.subr.bf16.mxu0 %v11478_v34  ;;  %7050 = vmatprep.subr.bf16.mxu1 %v11480_v23  ;;  %v7244_v21 = vld [vmem:[%s17154_s15 + $0x828] sm:$0xff]  ;;  %v11553_v34 = vcombine.low %v7247_v7, %v7251_v10  ;;  %v11555_v23 = vcombine.low %v7248_v11, %v7252_v13  ;;  %v11566_v7 = vcombine.high %v7257_v6, %v7261_v3  ;;  %v7249_v11 = vld [vmem:[%s17154_s15 + $0x910] sm:$0xff] }
 0x7a7   :  { %v11548_v25 = vcombine.high %v7240_v20, %v7244_v21  ;;  %v7253_v13 = vld [vmem:[%s17154_s15 + $0x9f0] sm:$0xff] }
 0x7a9   :  { %7008 = vmatpush1.bf16.msra.mxu0 %v11477_v52  ;;  %7051 = vmatpush1.bf16.msra.mxu1 %v11479_v31  ;;  %v7232_v52 = vld [vmem:[%s17154_s15 + $0x588] sm:$0xff] }
 0x7aa   :  { %7009 = vmatprep.subr.bf16.mxu0 %v11470_v26  ;;  %7052 = vmatprep.subr.bf16.mxu1 %v11472_v51  ;;  %v7236_v31 = vld [vmem:[%s17154_s15 + $0x668] sm:$0xff]  ;;  %v11545_v26 = vcombine.low %v7239_v14, %v7243_v17  ;;  %v11547_v51 = vcombine.low %v7240_v20, %v7244_v21  ;;  %v11558_v14 = vcombine.high %v7249_v11, %v7253_v13  ;;  %v7241_v20 = vld [vmem:[%s17154_s15 + $0x750] sm:$0xff] }
 0x7ab   :  { %v11540_v29 = vcombine.high %v7232_v52, %v7236_v31  ;;  %v7245_v21 = vld [vmem:[%s17154_s15 + $0x830] sm:$0xff] }
 0x7ad   :  { %7010 = vmatpush1.bf16.msra.mxu0 %v11469_v2  ;;  %7053 = vmatpush1.bf16.msra.mxu1 %v11471_v9  ;;  %v7224_v2 = vld [vmem:[%s17154_s15 + $0x3c8] sm:$0xff] }
 0x7ae   :  { %7011 = vmatprep.subr.bf16.mxu0 %v11462_v35  ;;  %7054 = vmatprep.subr.bf16.mxu1 %v11464_v36  ;;  %v7228_v9 = vld [vmem:[%s17154_s15 + $0x4a8] sm:$0xff]  ;;  %v11537_v35 = vcombine.low %v7231_v16, %v7235_v48  ;;  %v11539_v36 = vcombine.low %v7232_v52, %v7236_v31  ;;  %v11550_v16 = vcombine.high %v7241_v20, %v7245_v21  ;;  %v7233_v52 = vld [vmem:[%s17154_s15 + $0x590] sm:$0xff] }
 0x7af   :  { %v11532_v55 = vcombine.high %v7224_v2, %v7228_v9  ;;  %v7237_v31 = vld [vmem:[%s17154_s15 + $0x670] sm:$0xff] }
 0x7b1   :  { %7012 = vmatpush1.bf16.msra.mxu0 %v11461_v1  ;;  %7055 = vmatpush1.bf16.msra.mxu1 %v11463_v57  ;;  %v7216_v1 = vld [vmem:[%s17154_s15 + $0x208] sm:$0xff] }
 0x7b2   :  { %7013 = vmatprep.subr.bf16.mxu0 %v11454_v42  ;;  %7056 = vmatprep.subr.bf16.mxu1 %v11456_v44  ;;  %v7220_v57 = vld [vmem:[%s17154_s15 + $0x2e8] sm:$0xff]  ;;  %v11529_v42 = vcombine.low %v7223_v32, %v7227_v22  ;;  %v11531_v44 = vcombine.low %v7224_v2, %v7228_v9  ;;  %v11542_v32 = vcombine.high %v7233_v52, %v7237_v31  ;;  %v7225_v2 = vld [vmem:[%s17154_s15 + $0x3d0] sm:$0xff] }
 0x7b3   :  { %v11524_v18 = vcombine.high %v7216_v1, %v7220_v57  ;;  %v7229_v9 = vld [vmem:[%s17154_s15 + $0x4b0] sm:$0xff] }
 0x7b5   :  { %7014 = vmatpush1.bf16.msra.mxu0 %v11453_v28  ;;  %7057 = vmatpush1.bf16.msra.mxu1 %v11455_v56  ;;  %v7208_v28 = vld [vmem:[%s17154_s15 + $0x48] sm:$0xff] }
 0x7b6   :  { %7015 = vmatprep.subr.bf16.mxu0 %v11446_v58  ;;  %7058 = vmatprep.subr.bf16.mxu1 %v11448_v49  ;;  %v7212_v56 = vld [vmem:[%s17154_s15 + $0x128] sm:$0xff]  ;;  %v11521_v58 = vcombine.low %v7215_v39, %v7219_v59  ;;  %v11523_v49 = vcombine.low %v7216_v1, %v7220_v57  ;;  %v11534_v39 = vcombine.high %v7225_v2, %v7229_v9  ;;  %v7217_v1 = vld [vmem:[%s17154_s15 + $0x210] sm:$0xff] }
 0x7b7   :  { %v11516_v50 = vcombine.high %v7208_v28, %v7212_v56  ;;  %v7221_v57 = vld [vmem:[%s17154_s15 + $0x2f0] sm:$0xff] }
 0x7b9   :  { %7016 = vmatpush1.bf16.msra.mxu0 %v11445_v40  ;;  %7059 = vmatpush1.bf16.msra.mxu1 %v11447_v60  ;;  %v7266_v40 = vld [vmem:[%s17154_s15 + $0xc98] sm:$0xff] }
 0x7ba   :  { %7633 = vmatprep.subr.bf16.mxu0 %v11570_v38  ;;  %7676 = vmatprep.subr.bf16.mxu1 %v11572_v41  ;;  %v7270_v60 = vld [vmem:[%s17154_s15 + $0xd78] sm:$0xff]  ;;  %v11513_v38 = vcombine.low %v7207_v19, %v7211_v30  ;;  %v11515_v41 = vcombine.low %v7208_v28, %v7212_v56  ;;  %v11526_v19 = vcombine.high %v7217_v1, %v7221_v57  ;;  %v7209_v28 = vld [vmem:[%s17154_s15 + $0x50] sm:$0xff] }
 0x7bb   :  { %v11576_v0 = vcombine.high %v7266_v40, %v7270_v60  ;;  %v7213_v56 = vld [vmem:[%s17154_s15 + $0x130] sm:$0xff] }
 0x7bc   :  { %7034 = vmatmul.mubr.bf16.vlgmr.msra.gmra.mxu0 %v15603_v63  ;;  %7077 = vmatmul.mubr.bf16.vlgmr.msra.gmra.mxu1 %v15603_v63 }
 0x7bd   :  { %7634 = vmatpush1.bf16.msra.mxu0 %v11569_v8  ;;  %7677 = vmatpush1.bf16.msra.mxu1 %v11571_v43  ;;  %v7258_v8 = vld [vmem:[%s17154_s15 + $0xad8] sm:$0xff] }
 0x7be   :  { %7635 = vmatprep.subr.bf16.mxu0 %v11562_v37  ;;  %7678 = vmatprep.subr.bf16.mxu1 %v11564_v4  ;;  %v7262_v43 = vld [vmem:[%s17154_s15 + $0xbb8] sm:$0xff]  ;;  %v11573_v37 = vcombine.low %v7265_v33, %v7269_v61  ;;  %v11575_v4 = vcombine.low %v7266_v40, %v7270_v60  ;;  %v11518_v33 = vcombine.high %v7209_v28, %v7213_v56  ;;  %v7981_v40 = vld [vmem:[%s17154_s15 + $0xca0] sm:$0xff] }
 0x7bf   :  { %7665 = vmatprep.mubr.bf16.mxu0 %v17186_v47  ;;  %7708 = vmatprep.mubr.bf16.mxu1 %v17186_v47  ;;  %v11568_v10 = vcombine.high %v7258_v8, %v7262_v43  ;;  %v7985_v60 = vld [vmem:[%s17154_s15 + $0xd80] sm:$0xff] }
 0x7c1   :  { %7636 = vmatpush1.bf16.msra.mxu0 %v11561_v15  ;;  %7679 = vmatpush1.bf16.msra.mxu1 %v11563_v45  ;;  %v7250_v15 = vld [vmem:[%s17154_s15 + $0x918] sm:$0xff] }
 0x7c2   :  { %7637 = vmatprep.subr.bf16.mxu0 %v11554_v46  ;;  %7680 = vmatprep.subr.bf16.mxu1 %v11556_v62  ;;  %v7254_v45 = vld [vmem:[%s17154_s15 + $0x9f8] sm:$0xff]  ;;  %v11565_v46 = vcombine.low %v7257_v6, %v7261_v3  ;;  %v11567_v62 = vcombine.low %v7258_v8, %v7262_v43  ;;  %v11642_v6 = vcombine.high %v7981_v40, %v7985_v60  ;;  %v7973_v8 = vld [vmem:[%s17154_s15 + $0xae0] sm:$0xff] }
 0x7c3   :  { %v11560_v17 = vcombine.high %v7250_v15, %v7254_v45  ;;  %v7977_v43 = vld [vmem:[%s17154_s15 + $0xbc0] sm:$0xff] }
 0x7c5   :  { %7638 = vmatpush1.bf16.msra.mxu0 %v11553_v34  ;;  %7681 = vmatpush1.bf16.msra.mxu1 %v11555_v23  ;;  %v7242_v34 = vld [vmem:[%s17154_s15 + $0x758] sm:$0xff] }
 0x7c6   :  { %7639 = vmatprep.subr.bf16.mxu0 %v11546_v24  ;;  %7682 = vmatprep.subr.bf16.mxu1 %v11548_v25  ;;  %v7246_v23 = vld [vmem:[%s17154_s15 + $0x838] sm:$0xff]  ;;  %v11557_v24 = vcombine.low %v7249_v11, %v7253_v13  ;;  %v11559_v25 = vcombine.low %v7250_v15, %v7254_v45  ;;  %v11634_v11 = vcombine.high %v7973_v8, %v7977_v43  ;;  %v7965_v15 = vld [vmem:[%s17154_s15 + $0x920] sm:$0xff] }
 0x7c7   :  { %v11552_v48 = vcombine.high %v7242_v34, %v7246_v23  ;;  %v7969_v45 = vld [vmem:[%s17154_s15 + $0xa00] sm:$0xff] }
 0x7c9   :  { %7640 = vmatpush1.bf16.msra.mxu0 %v11545_v26  ;;  %7683 = vmatpush1.bf16.msra.mxu1 %v11547_v51  ;;  %v7234_v26 = vld [vmem:[%s17154_s15 + $0x598] sm:$0xff] }
 0x7ca   :  { %7641 = vmatprep.subr.bf16.mxu0 %v11538_v54  ;;  %7684 = vmatprep.subr.bf16.mxu1 %v11540_v29  ;;  %v7238_v51 = vld [vmem:[%s17154_s15 + $0x678] sm:$0xff]  ;;  %v11549_v54 = vcombine.low %v7241_v20, %v7245_v21  ;;  %v11551_v29 = vcombine.low %v7242_v34, %v7246_v23  ;;  %v11626_v20 = vcombine.high %v7965_v15, %v7969_v45  ;;  %v7957_v34 = vld [vmem:[%s17154_s15 + $0x760] sm:$0xff] }
 0x7cb   :  { %v11544_v22 = vcombine.high %v7234_v26, %v7238_v51  ;;  %v7961_v23 = vld [vmem:[%s17154_s15 + $0x840] sm:$0xff] }
 0x7cd   :  { %7642 = vmatpush1.bf16.msra.mxu0 %v11537_v35  ;;  %7685 = vmatpush1.bf16.msra.mxu1 %v11539_v36  ;;  %v7226_v35 = vld [vmem:[%s17154_s15 + $0x3d8] sm:$0xff] }
 0x7ce   :  { %7643 = vmatprep.subr.bf16.mxu0 %v11530_v53  ;;  %7686 = vmatprep.subr.bf16.mxu1 %v11532_v55  ;;  %v7230_v36 = vld [vmem:[%s17154_s15 + $0x4b8] sm:$0xff]  ;;  %v11541_v53 = vcombine.low %v7233_v52, %v7237_v31  ;;  %v11543_v55 = vcombine.low %v7234_v26, %v7238_v51  ;;  %v11618_v52 = vcombine.high %v7957_v34, %v7961_v23  ;;  %v7949_v26 = vld [vmem:[%s17154_s15 + $0x5a0] sm:$0xff] }
 0x7cf   :  { %v11536_v59 = vcombine.high %v7226_v35, %v7230_v36  ;;  %v7953_v51 = vld [vmem:[%s17154_s15 + $0x680] sm:$0xff] }
 0x7d1   :  { %7644 = vmatpush1.bf16.msra.mxu0 %v11529_v42  ;;  %7687 = vmatpush1.bf16.msra.mxu1 %v11531_v44  ;;  %v7218_v42 = vld [vmem:[%s17154_s15 + $0x218] sm:$0xff] }
 0x7d2   :  { %7645 = vmatprep.subr.bf16.mxu0 %v11522_v12  ;;  %7688 = vmatprep.subr.bf16.mxu1 %v11524_v18  ;;  %v7222_v44 = vld [vmem:[%s17154_s15 + $0x2f8] sm:$0xff]  ;;  %v11533_v12 = vcombine.low %v7225_v2, %v7229_v9  ;;  %v11535_v18 = vcombine.low %v7226_v35, %v7230_v36  ;;  %v11610_v2 = vcombine.high %v7949_v26, %v7953_v51  ;;  %v7941_v35 = vld [vmem:[%s17154_s15 + $0x3e0] sm:$0xff] }
 0x7d3   :  { %v11528_v30 = vcombine.high %v7218_v42, %v7222_v44  ;;  %v7945_v36 = vld [vmem:[%s17154_s15 + $0x4c0] sm:$0xff] }
 0x7d5   :  { %7646 = vmatpush1.bf16.msra.mxu0 %v11521_v58  ;;  %7689 = vmatpush1.bf16.msra.mxu1 %v11523_v49  ;;  %v7210_v58 = vld [vmem:[%s17154_s15 + $0x58] sm:$0xff] }
 0x7d6   :  { %7647 = vmatprep.subr.bf16.mxu0 %v11514_v27  ;;  %7690 = vmatprep.subr.bf16.mxu1 %v11516_v50  ;;  %v7214_v49 = vld [vmem:[%s17154_s15 + $0x138] sm:$0xff]  ;;  %v11525_v27 = vcombine.low %v7217_v1, %v7221_v57  ;;  %v11527_v50 = vcombine.low %v7218_v42, %v7222_v44  ;;  %v11602_v1 = vcombine.high %v7941_v35, %v7945_v36  ;;  %v7933_v42 = vld [vmem:[%s17154_s15 + $0x220] sm:$0xff] }
 0x7d7   :  { %v11520_v61 = vcombine.high %v7210_v58, %v7214_v49  ;;  %v7937_v44 = vld [vmem:[%s17154_s15 + $0x300] sm:$0xff] }
 0x7d9   :  { %7648 = vmatpush1.bf16.msra.mxu0 %v11513_v38  ;;  %7691 = vmatpush1.bf16.msra.mxu1 %v11515_v41  ;;  %v7982_v38 = vld [vmem:[%s17154_s15 + $0xca8] sm:$0xff] }
 0x7da   :  { %7719 = vmatprep.subr.bf16.mxu0 %v11574_v5  ;;  %7762 = vmatprep.subr.bf16.mxu1 %v11576_v0  ;;  %v7986_v41 = vld [vmem:[%s17154_s15 + $0xd88] sm:$0xff]  ;;  %v11517_v5 = vcombine.low %v7209_v28, %v7213_v56  ;;  %v11519_v0 = vcombine.low %v7210_v58, %v7214_v49  ;;  %v5837_v28 = vlaneseq  ;;  %v11594_v56 = vcombine.high %v7933_v42, %v7937_v44  ;;  %v7925_v49 = vld [vmem:[%s17154_s15 + $0x60] sm:$0xff] }
 0x7db   :  { %v11644_v3 = vcombine.high %v7982_v38, %v7986_v41 }
 0x7dc   :  { %7666 = vmatmul.mubr.bf16.vlgmr.msra.gmra.mxu0 %v15603_v63  ;;  %7709 = vmatmul.mubr.bf16.vlgmr.msra.gmra.mxu1 %v15603_v63 }
 0x7dd   :  { %7720 = vmatpush1.bf16.msra.mxu0 %v11573_v37  ;;  %7763 = vmatpush1.bf16.msra.mxu1 %v11575_v4  ;;  %v7974_v37 = vld [vmem:[%s17154_s15 + $0xae8] sm:$0xff] }
 0x7de   :  { %7721 = vmatprep.subr.bf16.mxu0 %v11566_v7  ;;  %7764 = vmatprep.subr.bf16.mxu1 %v11568_v10  ;;  %v7978_v4 = vld [vmem:[%s17154_s15 + $0xbc8] sm:$0xff]  ;;  %v11641_v7 = vcombine.low %v7981_v40, %v7985_v60  ;;  %v11643_v10 = vcombine.low %v7982_v38, %v7986_v41  ;;  %v16181_v60 = vshrl.u32 %v5837_v28, 7 }
 0x7df   :  { %7751 = vmatprep.mubr.bf16.mxu0 %v17186_v47  ;;  %7794 = vmatprep.mubr.bf16.mxu1 %v17186_v47  ;;  %v11636_v13 = vcombine.high %v7974_v37, %v7978_v4 }
 0x7e1   :  { %7722 = vmatpush1.bf16.msra.mxu0 %v11565_v46  ;;  %7765 = vmatpush1.bf16.msra.mxu1 %v11567_v62  ;;  %v7966_v46 = vld [vmem:[%s17154_s15 + $0x928] sm:$0xff] }
 0x7e2   :  { %7723 = vmatprep.subr.bf16.mxu0 %v11558_v14  ;;  %7766 = vmatprep.subr.bf16.mxu1 %v11560_v17  ;;  %v7970_v62 = vld [vmem:[%s17154_s15 + $0xa08] sm:$0xff]  ;;  %v11633_v14 = vcombine.low %v7973_v8, %v7977_v43  ;;  %v11635_v17 = vcombine.low %v7974_v37, %v7978_v4  ;;  %v16196_v37 = vsub.s32 0, %v16181_v60  ;;  %v16199_v4 = vsub.s32 2, %v16181_v60 }
 0x7e3   :  { %v11628_v21 = vcombine.high %v7966_v46, %v7970_v62 }
 0x7e5   :  { %7724 = vmatpush1.bf16.msra.mxu0 %v11557_v24  ;;  %7767 = vmatpush1.bf16.msra.mxu1 %v11559_v25  ;;  %v7958_v24 = vld [vmem:[%s17154_s15 + $0x768] sm:$0xff] }
 0x7e6   :  { %7725 = vmatprep.subr.bf16.mxu0 %v11550_v16  ;;  %7768 = vmatprep.subr.bf16.mxu1 %v11552_v48  ;;  %v7962_v25 = vld [vmem:[%s17154_s15 + $0x848] sm:$0xff]  ;;  %v11625_v16 = vcombine.low %v7965_v15, %v7969_v45  ;;  %v11627_v48 = vcombine.low %v7966_v46, %v7970_v62  ;;  %v16210_v15 = vsub.s32 1, %v16181_v60  ;;  %v16213_v45 = vsub.s32 3, %v16181_v60  ;;  %v7979_v46 = vld [vmem:[%s17154_s15 + $0xbd0] sm:$0xff]  ;;  %v7976_v62 = vld [vmem:[%s17154_s15 + $0xaf8] sm:$0xff] }
 0x7e7   :  { %v11620_v31 = vcombine.high %v7958_v24, %v7962_v25 }
 0x7e9   :  { %7726 = vmatpush1.bf16.msra.mxu0 %v11549_v54  ;;  %7769 = vmatpush1.bf16.msra.mxu1 %v11551_v29  ;;  %v7950_v54 = vld [vmem:[%s17154_s15 + $0x5a8] sm:$0xff] }
 0x7ea   :  { %7727 = vmatprep.subr.bf16.mxu0 %v11542_v32  ;;  %7770 = vmatprep.subr.bf16.mxu1 %v11544_v22  ;;  %v7954_v29 = vld [vmem:[%s17154_s15 + $0x688] sm:$0xff]  ;;  %v11617_v32 = vcombine.low %v7957_v34, %v7961_v23  ;;  %v11619_v22 = vcombine.low %v7958_v24, %v7962_v25  ;;  %v16231_v25 = vld [vmem:[%s17154_s15 + $0x930] sm:$0xff] }
 0x7eb   :  { %v11612_v9 = vcombine.high %v7950_v54, %v7954_v29 }
 0x7ed   :  { %7728 = vmatpush1.bf16.msra.mxu0 %v11541_v53  ;;  %7771 = vmatpush1.bf16.msra.mxu1 %v11543_v55  ;;  %v7942_v53 = vld [vmem:[%s17154_s15 + $0x3e8] sm:$0xff] }
 0x7ee   :  { %7729 = vmatprep.subr.bf16.mxu0 %v11534_v39  ;;  %7772 = vmatprep.subr.bf16.mxu1 %v11536_v59  ;;  %v7946_v55 = vld [vmem:[%s17154_s15 + $0x4c8] sm:$0xff]  ;;  %v11609_v39 = vcombine.low %v7949_v26, %v7953_v51  ;;  %v11611_v59 = vcombine.low %v7950_v54, %v7954_v29  ;;  %v7972_v26 = vld [vmem:[%s17154_s15 + $0xa18] sm:$0xff] }
 0x7ef   :  { %v11604_v57 = vcombine.high %v7942_v53, %v7946_v55 }
 0x7f1   :  { %7730 = vmatpush1.bf16.msra.mxu0 %v11533_v12  ;;  %7773 = vmatpush1.bf16.msra.mxu1 %v11535_v18  ;;  %v7934_v12 = vld [vmem:[%s17154_s15 + $0x228] sm:$0xff] }
 0x7f2   :  { %7731 = vmatprep.subr.bf16.mxu0 %v11526_v19  ;;  %7774 = vmatprep.subr.bf16.mxu1 %v11528_v30  ;;  %v7938_v18 = vld [vmem:[%s17154_s15 + $0x308] sm:$0xff]  ;;  %v11601_v19 = vcombine.low %v7941_v35, %v7945_v36  ;;  %v11603_v30 = vcombine.low %v7942_v53, %v7946_v55  ;;  %v7959_v55 = vld [vmem:[%s17154_s15 + $0x770] sm:$0xff] }
 0x7f3   :  { %v11596_v58 = vcombine.high %v7934_v12, %v7938_v18  ;;  %v11595_v40 = vcombine.low %v7934_v12, %v7938_v18  ;;  %v7964_v12 = vld [vmem:[%s17154_s15 + $0x858] sm:$0xff] }
 0x7f5   :  { %7732 = vmatpush1.bf16.msra.mxu0 %v11525_v27  ;;  %7775 = vmatpush1.bf16.msra.mxu1 %v11527_v50  ;;  %v7929_v27 = vld [vmem:[%s17154_s15 + $0x140] sm:$0xff]  ;;  %v7926_v50 = vld [vmem:[%s17154_s15 + $0x68] sm:$0xff] }
 0x7f6   :  { %7733 = vmatprep.subr.bf16.mxu0 %v11518_v33  ;;  %7776 = vmatprep.subr.bf16.mxu1 %v11520_v61  ;;  %v7930_v33 = vld [vmem:[%s17154_s15 + $0x148] sm:$0xff]  ;;  %v11593_v61 = vcombine.low %v7933_v42, %v7937_v44  ;;  %v11586_v38 = vcombine.high %v7925_v49, %v7929_v27  ;;  %v11585_v8 = vcombine.low %v7925_v49, %v7929_v27  ;;  %v7963_v42 = vld [vmem:[%s17154_s15 + $0x850] sm:$0xff]  ;;  %v7960_v44 = vld [vmem:[%s17154_s15 + $0x778] sm:$0xff] }
 0x7f7   :  { %v11588_v41 = vcombine.high %v7926_v50, %v7930_v33  ;;  %v11587_v43 = vcombine.low %v7926_v50, %v7930_v33 }
 0x7f9   :  { %7734 = vmatpush1.bf16.msra.mxu0 %v11517_v5  ;;  %7777 = vmatpush1.bf16.msra.mxu1 %v11519_v0  ;;  %v7983_v5 = vld [vmem:[%s17154_s15 + $0xcb0] sm:$0xff] }
 0x7fa   :  { %8351 = vmatprep.subr.bf16.mxu0 %v11642_v6  ;;  %8394 = vmatprep.subr.bf16.mxu1 %v11644_v3  ;;  %v7987_v0 = vld [vmem:[%s17154_s15 + $0xd90] sm:$0xff]  ;;  %v7984_v6 = vld [vmem:[%s17154_s15 + $0xcb8] sm:$0xff] }
 0x7fb   :  { %v7988_v3 = vld [vmem:[%s17154_s15 + $0xd98] sm:$0xff] }
 0x7fc   :  { %7752 = vmatmul.mubr.bf16.vlgmr.msra.gmra.mxu0 %v15603_v63  ;;  %7795 = vmatmul.mubr.bf16.vlgmr.msra.gmra.mxu1 %v15603_v63 }
 0x7fd   :  { %8352 = vmatpush1.bf16.msra.mxu0 %v11641_v7  ;;  %8395 = vmatpush1.bf16.msra.mxu1 %v11643_v10  ;;  %v11646_v7 = vcombine.high %v7983_v5, %v7987_v0  ;;  %v11648_v10 = vcombine.high %v7984_v6, %v7988_v3 }
 0x7fe   :  { %8353 = vmatprep.subr.bf16.mxu0 %v11634_v11  ;;  %8396 = vmatprep.subr.bf16.mxu1 %v11636_v13  ;;  %v16204_v11 = vld [vmem:[%s17155_s16] sm:$0xff]  ;;  %v7975_v13 = vld [vmem:[%s17154_s15 + $0xaf0] sm:$0xff] }
 0x7ff   :  { %8383 = vmatprep.mubr.bf16.mxu0 %v17186_v47  ;;  %8426 = vmatprep.mubr.bf16.mxu1 %v17186_v47  ;;  %v5848_v34 = vrot.slane %v16204_v11, %v16199_v4  ;;  %v11638_v23 = vcombine.high %v7975_v13, %v7979_v46  ;;  %v11637_v29 = vcombine.low %v7975_v13, %v7979_v46 }
 0x800   :  { %v11623_v46 = vcombine.low %v7960_v44, %v7964_v12 }
 0x801   :  { %8354 = vmatpush1.bf16.msra.mxu0 %v11633_v14  ;;  %8397 = vmatpush1.bf16.msra.mxu1 %v11635_v17  ;;  %v7980_v14 = vld [vmem:[%s17154_s15 + $0xbd8] sm:$0xff]  ;;  %v11645_v17 = vcombine.low %v7983_v5, %v7987_v0 }
 0x802   :  { %8355 = vmatprep.subr.bf16.mxu0 %v11626_v20  ;;  %8398 = vmatprep.subr.bf16.mxu1 %v11628_v21  ;;  %v11647_v20 = vcombine.low %v7984_v6, %v7988_v3  ;;  %v5840_v21 = vrot.slane %v16204_v11, %v16196_v37  ;;  %v11640_v24 = vcombine.high %v7976_v62, %v7980_v14  ;;  %v7955_v6 = vld [vmem:[%s17154_s15 + $0x690] sm:$0xff]  ;;  %v7952_v3 = vld [vmem:[%s17154_s15 + $0x5b8] sm:$0xff] }
 0x805   :  { %8356 = vmatpush1.bf16.msra.mxu0 %v11625_v16  ;;  %8399 = vmatpush1.bf16.msra.mxu1 %v11627_v48  ;;  %v5844_v16 = vrot.slane %v16204_v11, %v16210_v15  ;;  %v5852_v48 = vrot.slane %v16204_v11, %v16213_v45 }
 0x806   :  { %8357 = vmatprep.subr.bf16.mxu0 %v11618_v52  ;;  %8400 = vmatprep.subr.bf16.mxu1 %v11620_v31  ;;  %v7971_v52 = vld [vmem:[%s17154_s15 + $0xa10] sm:$0xff]  ;;  %v7968_v31 = vld [vmem:[%s17154_s15 + $0x938] sm:$0xff] }
 0x807   :  { %v11630_v36 = vcombine.high %v16231_v25, %v7971_v52  ;;  %v11632_v53 = vcombine.high %v7968_v31, %v7972_v26  ;;  %v11631_v28 = vcombine.low %v7968_v31, %v7972_v26  ;;  %v7936_v31 = vld [vmem:[%s17154_s15 + $0x238] sm:$0xff] }
 0x808   :  { %v7940_v26 = vld [vmem:[%s17154_s15 + $0x318] sm:$0xff] }
 0x809   :  { %8358 = vmatpush1.bf16.msra.mxu0 %v11617_v32  ;;  %8401 = vmatpush1.bf16.msra.mxu1 %v11619_v22 }
 0x80a   :  { %8359 = vmatprep.subr.bf16.mxu0 %v11610_v2  ;;  %8402 = vmatprep.subr.bf16.mxu1 %v11612_v9  ;;  %v11639_v2 = vcombine.low %v7976_v62, %v7980_v14 }
 0x80d   :  { %8360 = vmatpush1.bf16.msra.mxu0 %v11609_v39  ;;  %8403 = vmatpush1.bf16.msra.mxu1 %v11611_v59 }
 0x80e   :  { %8361 = vmatprep.subr.bf16.mxu0 %v11602_v1  ;;  %8404 = vmatprep.subr.bf16.mxu1 %v11604_v57 }
 0x811   :  { %8362 = vmatpush1.bf16.msra.mxu0 %v11601_v19  ;;  %8405 = vmatpush1.bf16.msra.mxu1 %v11603_v30  ;;  %v11629_v30 = vcombine.low %v16231_v25, %v7971_v52  ;;  %v7939_v52 = vld [vmem:[%s17154_s15 + $0x310] sm:$0xff] }
 0x812   :  { %8363 = vmatprep.subr.bf16.mxu0 %v11594_v56  ;;  %8406 = vmatprep.subr.bf16.mxu1 %v11596_v58 }
 0x815   :  { %8364 = vmatpush1.bf16.msra.mxu0 %v11593_v61  ;;  %8407 = vmatpush1.bf16.msra.mxu1 %v11595_v40  ;;  %v11622_v61 = vcombine.high %v7959_v55, %v7963_v42  ;;  %v11624_v40 = vcombine.high %v7960_v44, %v7964_v12  ;;  %v11599_v44 = vcombine.low %v7936_v31, %v7940_v26 }
 0x816   :  { %8365 = vmatprep.subr.bf16.mxu0 %v11586_v38  ;;  %8408 = vmatprep.subr.bf16.mxu1 %v11588_v41  ;;  %v7951_v38 = vld [vmem:[%s17154_s15 + $0x5b0] sm:$0xff] }
 0x817   :  { %v11614_v62 = vcombine.high %v7951_v38, %v7955_v6 }
 0x819   :  { %8366 = vmatpush1.bf16.msra.mxu0 %v11585_v8  ;;  %8409 = vmatpush1.bf16.msra.mxu1 %v11587_v43  ;;  %v7956_v8 = vld [vmem:[%s17154_s15 + $0x698] sm:$0xff] }
 0x81a   :  { %8437 = vmatprep.subr.bf16.mxu0 %v11646_v7  ;;  %8480 = vmatprep.subr.bf16.mxu1 %v11648_v10  ;;  %v11621_v7 = vcombine.low %v7959_v55, %v7963_v42  ;;  %v11616_v14 = vcombine.high %v7952_v3, %v7956_v8  ;;  %v7932_v55 = vld [vmem:[%s17154_s15 + $0x158] sm:$0xff] }
 0x81c   :  { %8384 = vmatmul.mubr.bf16.vlgmr.msra.gmra.mxu0 %v15603_v63  ;;  %8427 = vmatmul.mubr.bf16.vlgmr.msra.gmra.mxu1 %v15603_v63  ;;  %v6231_v51 = vpop.f32.mrf.mxu0  ;;  %v6274_v54 = vpop.f32.mrf.mxu1 }
 0x81d   :  { %v6232_v32 = vadd.f32 %v6231_v51, %v5840_v21  ;;  %v6275_v22 = vadd.f32 %v6274_v54, %v5848_v34  ;;  %8438 = vmatpush1.bf16.msra.mxu0 %v11645_v17  ;;  %8481 = vmatpush1.bf16.msra.mxu1 %v11647_v20  ;;  %v7943_v17 = vld [vmem:[%s17154_s15 + $0x3f0] sm:$0xff] }
 0x81e   :  { %v6233_v9 = vpop.f32.mrf.mxu0  ;;  %v6276_v35 = vpop.f32.mrf.mxu1  ;;  %8439 = vmatprep.subr.bf16.mxu0 %v11638_v23  ;;  %8482 = vmatprep.subr.bf16.mxu1 %v11640_v24  ;;  %v7947_v20 = vld [vmem:[%s17154_s15 + $0x4d0] sm:$0xff]  ;;  %v11613_v23 = vcombine.low %v7951_v38, %v7955_v6  ;;  %v11615_v24 = vcombine.low %v7952_v3, %v7956_v8  ;;  %v8704_v38 = vld [vmem:[%s17154_s15 + $0xda8] sm:$0xff]  ;;  %v16332_v3 = vsub.s32 6, %v16181_v60 }
 0x81f   :  { %v6369_v39 = vmul.f32 0.5, %v6232_v32  ;;  %v6371_v59 = vmul.f32 0.5, %v6275_v22  ;;  %v6234_v1 = vadd.f32 %v6233_v9, %v5844_v16  ;;  %v6277_v57 = vadd.f32 %v6276_v35, %v5852_v48  ;;  %8469 = vmatprep.mubr.bf16.mxu0 %v17186_v47  ;;  %8512 = vmatprep.mubr.bf16.mxu1 %v17186_v47 }
 0x820   :  { %v6235_v18 = vpop.f32.mrf.mxu0  ;;  %v6278_v19 = vpop.f32.mrf.mxu1  ;;  %v11606_v25 = vcombine.high %v7943_v17, %v7947_v20  ;;  %v11605_v51 = vcombine.low %v7943_v17, %v7947_v20  ;;  %v11600_v22 = vcombine.high %v7936_v31, %v7940_v26  ;;  %v16337_v17 = vsub.s32 5, %v16181_v60  ;;  %v16342_v20 = vld [vmem:[%s17154_s15 + $0xb00] sm:$0xff] }
 0x821   :  { %13192 = vtanh.f32 %v6369_v39  ;;  %v6370_v56 = vmul.f32 0.5, %v6234_v1  ;;  %v6372_v58 = vmul.f32 0.5, %v6277_v57  ;;  %v6236_v49 = vadd.f32 %v6235_v18, %v5840_v21  ;;  %8440 = vmatpush1.bf16.msra.mxu0 %v11637_v29  ;;  %8483 = vmatpush1.bf16.msra.mxu1 %v11639_v2  ;;  %v7944_v21 = vld [vmem:[%s17154_s15 + $0x3f8] sm:$0xff]  ;;  %v7927_v2 = vld [vmem:[%s17154_s15 + $0x70] sm:$0xff] }
 0x822   :  { %13194 = vtanh.f32 %v6371_v59  ;;  %v6279_v27 = vadd.f32 %v6278_v19, %v5848_v34  ;;  %v6237_v50 = vpop.f32.mrf.mxu0  ;;  %v6280_v33 = vpop.f32.mrf.mxu1  ;;  %8441 = vmatprep.subr.bf16.mxu0 %v11630_v36  ;;  %8484 = vmatprep.subr.bf16.mxu1 %v11632_v53  ;;  %v7948_v34 = vld [vmem:[%s17154_s15 + $0x4d8] sm:$0xff]  ;;  %v7931_v36 = vld [vmem:[%s17154_s15 + $0x150] sm:$0xff] }
 0x823   :  { %13196 = vtanh.f32 %v6370_v56  ;;  %v6377_v41 = vmul.f32 0.5, %v6236_v49  ;;  %v6238_v5 = vadd.f32 %v6237_v50, %v5844_v16  ;;  %v6281_v0 = vadd.f32 %v6280_v33, %v5852_v48  ;;  %v7935_v48 = vld [vmem:[%s17154_s15 + $0x230] sm:$0xff]  ;;  %v7928_v53 = vld [vmem:[%s17154_s15 + $0x78] sm:$0xff]  ;;  %v16315_v56 = vld [vmem:[%s17154_s15 + $0xcc0] sm:$0xff] }
 0x824   :  { %13198 = vtanh.f32 %v6372_v58  ;;  %v6379_v43 = vmul.f32 0.5, %v6279_v27  ;;  %v11608_v16 = vcombine.high %v7944_v21, %v7948_v34  ;;  %v11607_v54 = vcombine.low %v7944_v21, %v7948_v34  ;;  %v16320_v58 = vld [vmem:[%s17154_s15 + $0xda0] sm:$0xff] }
 0x825   :  { %13200 = vtanh.f32 %v6377_v41  ;;  %v6378_v10 = vmul.f32 0.5, %v6238_v5  ;;  %v6380_v13 = vmul.f32 0.5, %v6281_v0  ;;  %8442 = vmatpush1.bf16.msra.mxu0 %v11629_v30  ;;  %8485 = vmatpush1.bf16.msra.mxu1 %v11631_v28  ;;  %v11598_v32 = vcombine.high %v7935_v48, %v7939_v52 }
 0x826   :  { %13202 = vtanh.f32 %v6379_v43  ;;  %8443 = vmatprep.subr.bf16.mxu0 %v11622_v61  ;;  %8486 = vmatprep.subr.bf16.mxu1 %v11624_v40  ;;  %v11597_v42 = vcombine.low %v7935_v48, %v7939_v52  ;;  %v11589_v19 = vcombine.low %v7927_v2, %v7931_v36  ;;  %v11590_v30 = vcombine.high %v7927_v2, %v7931_v36  ;;  %v8700_v40 = vld [vmem:[%s17154_s15 + $0xcc8] sm:$0xff]  ;;  %v16366_v2 = vld [vmem:[%s17154_s15 + $0x940] sm:$0xff] }
 0x827   :  { %13204 = vtanh.f32 %v6378_v10  ;;  %v11592_v28 = vcombine.high %v7928_v53, %v7932_v55  ;;  %v16323_v61 = vsub.s32 4, %v16181_v60  ;;  %v11591_v10 = vcombine.low %v7928_v53, %v7932_v55  ;;  %v8687_v36 = vld [vmem:[%s17154_s15 + $0xa20] sm:$0xff]  ;;  %v8684_v53 = vld [vmem:[%s17154_s15 + $0x948] sm:$0xff] }
 0x828   :  { %13206 = vtanh.f32 %v6380_v13  ;;  %v11714_v13 = vcombine.high %v16315_v56, %v16320_v58  ;;  %v8688_v55 = vld [vmem:[%s17154_s15 + $0xa28] sm:$0xff] }
 0x829   :  { %8444 = vmatpush1.bf16.msra.mxu0 %v11621_v7  ;;  %8487 = vmatpush1.bf16.msra.mxu1 %v11623_v46  ;;  %v5856_v31 = vrot.slane %v16204_v11, %v16323_v61 }
 0x82a   :  { %8445 = vmatprep.subr.bf16.mxu0 %v11614_v62  ;;  %8488 = vmatprep.subr.bf16.mxu1 %v11616_v14  ;;  %v11716_v14 = vcombine.high %v8700_v40, %v8704_v38 }
 0x82d   :  { %8446 = vmatpush1.bf16.msra.mxu0 %v11613_v23  ;;  %8489 = vmatpush1.bf16.msra.mxu1 %v11615_v24  ;;  %v16345_v23 = vsub.s32 7, %v16181_v60  ;;  %v8695_v24 = vld [vmem:[%s17154_s15 + $0xbe0] sm:$0xff]  ;;  %v5864_v60 = vrot.slane %v16204_v11, %v16332_v3 }
 0x82e   :  { %v13193_v29 = vpop.eup %13192  ;;  %8447 = vmatprep.subr.bf16.mxu0 %v11606_v25  ;;  %8490 = vmatprep.subr.bf16.mxu1 %v11608_v16  ;;  %v8692_v25 = vld [vmem:[%s17154_s15 + $0xb08] sm:$0xff] }
 0x82f   :  { %v13195_v9 = vpop.eup %13194  ;;  %v6401_v35 = vmul.f32 0.5, %v13193_v29  ;;  %v8696_v16 = vld [vmem:[%s17154_s15 + $0xbe8] sm:$0xff] }
 0x830   :  { %v13197_v39 = vpop.eup %13196  ;;  %v6403_v59 = vmul.f32 0.5, %v13195_v9  ;;  %v5860_v9 = vrot.slane %v16204_v11, %v16337_v17 }
 0x831   :  { %v13199_v1 = vpop.eup %13198  ;;  %v6402_v57 = vmul.f32 0.5, %v13197_v39  ;;  %8448 = vmatpush1.bf16.msra.mxu0 %v11605_v51  ;;  %8491 = vmatpush1.bf16.msra.mxu1 %v11607_v54  ;;  %v6417_v27 = vadd.f32 0.5, %v6401_v35  ;;  %v11713_v51 = vcombine.low %v16315_v56, %v16320_v58  ;;  %v11715_v54 = vcombine.low %v8700_v40, %v8704_v38 }
 0x832   :  { %v13201_v12 = vpop.eup %13200  ;;  %v6404_v18 = vmul.f32 0.5, %v13199_v1  ;;  %8449 = vmatprep.subr.bf16.mxu0 %v11598_v32  ;;  %8492 = vmatprep.subr.bf16.mxu1 %v11600_v22  ;;  %v6419_v5 = vadd.f32 0.5, %v6403_v59  ;;  %v11706_v32 = vcombine.high %v16342_v20, %v8695_v24  ;;  %v11708_v22 = vcombine.high %v8692_v25, %v8696_v16 }
 0x833   :  { %v13203_v49 = vpop.eup %13202  ;;  %v6418_v50 = vadd.f32 0.5, %v6402_v57  ;;  %v6409_v33 = vmul.f32 0.5, %v13201_v12  ;;  %v5868_v35 = vrot.slane %v16204_v11, %v16345_v23  ;;  %v11705_v11 = vcombine.low %v16342_v20, %v8695_v24  ;;  %v8668_v24 = vld [vmem:[%s17154_s15 + $0x5c8] sm:$0xff] }
 0x834   :  { %v13205_v41 = vpop.eup %13204  ;;  %v6420_v0 = vadd.f32 0.5, %v6404_v18  ;;  %v6411_v6 = vmul.f32 0.5, %v13203_v49  ;;  %v11698_v18 = vcombine.high %v16366_v2, %v8687_v36 }
 0x835   :  { %v13207_v8 = vpop.eup %13206  ;;  %v11873_v43 = vpack.c.bf16 %v6418_v50, %v6417_v27  ;;  %v6410_v7 = vmul.f32 0.5, %v13205_v41  ;;  %8450 = vmatpush1.bf16.msra.mxu0 %v11597_v42  ;;  %8493 = vmatpush1.bf16.msra.mxu1 %v11599_v44  ;;  %v6425_v21 = vadd.f32 0.5, %v6409_v33  ;;  %v11707_v42 = vcombine.low %v8692_v25, %v8696_v16  ;;  %v8679_v27 = vld [vmem:[%s17154_s15 + $0x860] sm:$0xff]  ;;  %v8676_v50 = vld [vmem:[%s17154_s15 + $0x788] sm:$0xff] }
 0x836   :  { %v11874_v46 = vpack.c.bf16 %v6420_v0, %v6419_v5  ;;  %v6412_v62 = vmul.f32 0.5, %v13207_v8  ;;  %8451 = vmatprep.subr.bf16.mxu0 %v11590_v30  ;;  %8494 = vmatprep.subr.bf16.mxu1 %v11592_v28  ;;  %v6427_v48 = vadd.f32 0.5, %v6411_v6  ;;  %v8675_v30 = vld [vmem:[%s17154_s15 + $0x780] sm:$0xff]  ;;  %v8680_v33 = vld [vmem:[%s17154_s15 + $0x868] sm:$0xff]  ;;  %v11697_v41 = vcombine.low %v16366_v2, %v8687_v36 }
 0x837   :  { %6481 = vst [vmem:[#allocation2] sm:$0xff] %v11873_v43  ;;  %v6426_v34 = vadd.f32 0.5, %v6410_v7  ;;  %v11699_v5 = vcombine.low %v8684_v53, %v8688_v55  ;;  %v8672_v25 = vld [vmem:[%s17154_s15 + $0x6a8] sm:$0xff] }
 0x838   :  { %6482 = vst [vmem:[#allocation2 + $0x8] sm:$0xff] %v11874_v46  ;;  %v6428_v52 = vadd.f32 0.5, %v6412_v62  ;;  %v11692_v46 = vcombine.high %v8676_v50, %v8680_v33  ;;  %v8667_v62 = vld [vmem:[%s17154_s15 + $0x5c0] sm:$0xff] }
 0x839   :  { %v11877_v26 = vpack.c.bf16 %v6426_v34, %v6425_v21  ;;  %8452 = vmatpush1.bf16.msra.mxu0 %v11589_v19  ;;  %8495 = vmatpush1.bf16.msra.mxu1 %v11591_v10  ;;  %v11700_v19 = vcombine.high %v8684_v53, %v8688_v55  ;;  %v8671_v34 = vld [vmem:[%s17154_s15 + $0x6a0] sm:$0xff] }
 0x83a   :  { %v11878_v29 = vpack.c.bf16 %v6428_v52, %v6427_v48  ;;  %9069 = vmatprep.subr.bf16.mxu0 %v11714_v13  ;;  %9112 = vmatprep.subr.bf16.mxu1 %v11716_v14  ;;  %v11690_v13 = vcombine.high %v8675_v30, %v8679_v27  ;;  %v11689_v48 = vcombine.low %v8675_v30, %v8679_v27  ;;  %v8651_v53 = vld [vmem:[%s17154_s15 + $0x240] sm:$0xff] }
 0x83b   :  { %6485 = vst [vmem:[#allocation2 + $0xe0] sm:$0xff] %v11877_v26  ;;  %v11682_v26 = vcombine.high %v8667_v62, %v8671_v34  ;;  %v11681_v2 = vcombine.low %v8667_v62, %v8671_v34  ;;  %v8655_v55 = vld [vmem:[%s17154_s15 + $0x320] sm:$0xff]  ;;  %v8706_v62 = vld [vmem:[%s17154_s15 + $0xdb8] sm:$0xff] }
 0x83c   :  { %6486 = vst [vmem:[#allocation2 + $0xe8] sm:$0xff] %v11878_v29  ;;  %v6317_v39 = vpop.f32.mrf.mxu0  ;;  %v6360_v59 = vpop.f32.mrf.mxu1  ;;  %8470 = vmatmul.mubr.bf16.vlgmr.msra.gmra.mxu0 %v15603_v63  ;;  %8513 = vmatmul.mubr.bf16.vlgmr.msra.gmra.mxu1 %v15603_v63  ;;  %v8663_v29 = vld [vmem:[%s17154_s15 + $0x4e0] sm:$0xff] }
 0x83d   :  { %v6318_v1 = vadd.f32 %v6317_v39, %v5856_v31  ;;  %v6361_v57 = vadd.f32 %v6360_v59, %v5864_v60  ;;  %9070 = vmatpush1.bf16.msra.mxu0 %v11713_v51  ;;  %9113 = vmatpush1.bf16.msra.mxu1 %v11715_v54  ;;  %v11684_v51 = vcombine.high %v8668_v24, %v8672_v25  ;;  %v8659_v54 = vld [vmem:[%s17154_s15 + $0x400] sm:$0xff]  ;;  %v8652_v39 = vld [vmem:[%s17154_s15 + $0x248] sm:$0xff] }
 0x83e   :  { %v6319_v44 = vpop.f32.mrf.mxu0  ;;  %v6362_v12 = vpop.f32.mrf.mxu1  ;;  %9071 = vmatprep.subr.bf16.mxu0 %v11706_v32  ;;  %9114 = vmatprep.subr.bf16.mxu1 %v11708_v22  ;;  %v8660_v32 = vld [vmem:[%s17154_s15 + $0x408] sm:$0xff]  ;;  %v8647_v30 = vld [vmem:[%s17154_s15 + $0x160] sm:$0xff] }
 0x83f   :  { %v6373_v28 = vmul.f32 0.5, %v6318_v1  ;;  %v6375_v56 = vmul.f32 0.5, %v6361_v57  ;;  %v6320_v58 = vadd.f32 %v6319_v44, %v5860_v9  ;;  %v6363_v49 = vadd.f32 %v6362_v12, %v5868_v35  ;;  %9101 = vmatprep.mubr.bf16.mxu0 %v17186_v47  ;;  %9144 = vmatprep.mubr.bf16.mxu1 %v17186_v47  ;;  %v8664_v22 = vld [vmem:[%s17154_s15 + $0x4e8] sm:$0xff]  ;;  %v8643_v12 = vld [vmem:[%s17154_s15 + $0x80] sm:$0xff] }
 0x840   :  { %v6321_v40 = vpop.f32.mrf.mxu0  ;;  %v6364_v38 = vpop.f32.mrf.mxu1  ;;  %v11676_v36 = vcombine.high %v8660_v32, %v8664_v22  ;;  %v8656_v59 = vld [vmem:[%s17154_s15 + $0x328] sm:$0xff]  ;;  %v11675_v1 = vcombine.low %v8660_v32, %v8664_v22 }
 0x841   :  { %13208 = vtanh.f32 %v6373_v28  ;;  %v6374_v0 = vmul.f32 0.5, %v6320_v58  ;;  %v6376_v6 = vmul.f32 0.5, %v6363_v49  ;;  %v6322_v8 = vadd.f32 %v6321_v40, %v5856_v31  ;;  %9072 = vmatpush1.bf16.msra.mxu0 %v11705_v11  ;;  %9115 = vmatpush1.bf16.msra.mxu1 %v11707_v42  ;;  %v8644_v28 = vld [vmem:[%s17154_s15 + $0x88] sm:$0xff] }
 0x842   :  { %13210 = vtanh.f32 %v6375_v56  ;;  %v6365_v43 = vadd.f32 %v6364_v38, %v5864_v60  ;;  %v6323_v7 = vpop.f32.mrf.mxu0  ;;  %v6366_v10 = vpop.f32.mrf.mxu1  ;;  %9073 = vmatprep.subr.bf16.mxu0 %v11698_v18  ;;  %9116 = vmatprep.subr.bf16.mxu1 %v11700_v19  ;;  %v11691_v60 = vcombine.low %v8676_v50, %v8680_v33  ;;  %v11673_v11 = vcombine.low %v8659_v54, %v8663_v29  ;;  %v8648_v56 = vld [vmem:[%s17154_s15 + $0x168] sm:$0xff] }
 0x843   :  { %13212 = vtanh.f32 %v6374_v0  ;;  %v6381_v14 = vmul.f32 0.5, %v6322_v8  ;;  %v6324_v20 = vadd.f32 %v6323_v7, %v5860_v9  ;;  %v6367_v21 = vadd.f32 %v6366_v10, %v5868_v35 }
 0x844   :  { %13214 = vtanh.f32 %v6376_v6  ;;  %v6383_v16 = vmul.f32 0.5, %v6365_v43  ;;  %v11683_v9 = vcombine.low %v8668_v24, %v8672_v25  ;;  %v11674_v35 = vcombine.high %v8659_v54, %v8663_v29  ;;  %v16451_v6 = vld [vmem:[%s17154_s15 + $0xcd0] sm:$0xff] }
 0x845   :  { %13216 = vtanh.f32 %v6381_v14  ;;  %v6382_v52 = vmul.f32 0.5, %v6324_v20  ;;  %v6384_v31 = vmul.f32 0.5, %v6367_v21  ;;  %9074 = vmatpush1.bf16.msra.mxu0 %v11697_v41  ;;  %9117 = vmatpush1.bf16.msra.mxu1 %v11699_v5  ;;  %v11666_v42 = vcombine.high %v8651_v53, %v8655_v55  ;;  %v16471_v29 = vld [vmem:[%s17154_s15 + $0xb10] sm:$0xff] }
 0x846   :  { %13218 = vtanh.f32 %v6383_v16  ;;  %9075 = vmatprep.subr.bf16.mxu0 %v11690_v13  ;;  %9118 = vmatprep.subr.bf16.mxu1 %v11692_v46  ;;  %v11668_v44 = vcombine.high %v8652_v39, %v8656_v59  ;;  %v11665_v33 = vcombine.low %v8651_v53, %v8655_v55  ;;  %v11667_v40 = vcombine.low %v8652_v39, %v8656_v59  ;;  %v8705_v13 = vld [vmem:[%s17154_s15 + $0xdb0] sm:$0xff]  ;;  %v8702_v46 = vld [vmem:[%s17154_s15 + $0xcd8] sm:$0xff] }
 0x847   :  { %13220 = vtanh.f32 %v6382_v52  ;;  %v11658_v5 = vcombine.high %v8643_v12, %v8647_v30  ;;  %v11660_v0 = vcombine.high %v8644_v28, %v8648_v56  ;;  %v11659_v52 = vcombine.low %v8644_v28, %v8648_v56  ;;  %v8686_v28 = vld [vmem:[%s17154_s15 + $0x958] sm:$0xff] }
 0x848   :  { %13222 = vtanh.f32 %v6384_v31  ;;  %v16465_v31 = vld [vmem:[%s17155_s16 + $0x8] sm:$0xff]  ;;  %v11720_v54 = vcombine.high %v8702_v46, %v8706_v62  ;;  %v8690_v56 = vld [vmem:[%s17154_s15 + $0xa38] sm:$0xff] }
 0x849   :  { %9076 = vmatpush1.bf16.msra.mxu0 %v11689_v48  ;;  %9119 = vmatpush1.bf16.msra.mxu1 %v11691_v60  ;;  %v11657_v48 = vcombine.low %v8643_v12, %v8647_v30  ;;  %v6558_v55 = vrot.slane %v16465_v31, %v16196_v37  ;;  %v6566_v39 = vrot.slane %v16465_v31, %v16199_v4  ;;  %v16491_v12 = vld [vmem:[%s17154_s15 + $0x950] sm:$0xff] }
 0x84a   :  { %9077 = vmatprep.subr.bf16.mxu0 %v11682_v26  ;;  %9120 = vmatprep.subr.bf16.mxu1 %v11684_v51  ;;  %v11718_v51 = vcombine.high %v16451_v6, %v8705_v13  ;;  %v8689_v30 = vld [vmem:[%s17154_s15 + $0xa30] sm:$0xff] }
 0x84d   :  { %9078 = vmatpush1.bf16.msra.mxu0 %v11681_v2  ;;  %9121 = vmatpush1.bf16.msra.mxu1 %v11683_v9  ;;  %v8697_v2 = vld [vmem:[%s17154_s15 + $0xbf0] sm:$0xff]  ;;  %v8694_v9 = vld [vmem:[%s17154_s15 + $0xb18] sm:$0xff] }
 0x84e   :  { %v13209_v57 = vpop.eup %13208  ;;  %9079 = vmatprep.subr.bf16.mxu0 %v11674_v35  ;;  %9122 = vmatprep.subr.bf16.mxu1 %v11676_v36  ;;  %v8698_v35 = vld [vmem:[%s17154_s15 + $0xbf8] sm:$0xff] }
 0x84f   :  { %v13211_v18 = vpop.eup %13210  ;;  %v6405_v19 = vmul.f32 0.5, %v13209_v57 }
 0x850   :  { %v13213_v58 = vpop.eup %13212  ;;  %v6407_v49 = vmul.f32 0.5, %v13211_v18  ;;  %v6562_v18 = vrot.slane %v16465_v31, %v16210_v15 }
 0x851   :  { %v13215_v27 = vpop.eup %13214  ;;  %v6406_v50 = vmul.f32 0.5, %v13213_v58  ;;  %9080 = vmatpush1.bf16.msra.mxu0 %v11673_v11  ;;  %9123 = vmatpush1.bf16.msra.mxu1 %v11675_v1  ;;  %v6421_v43 = vadd.f32 0.5, %v6405_v19  ;;  %v11717_v11 = vcombine.low %v16451_v6, %v8705_v13  ;;  %v11719_v1 = vcombine.low %v8702_v46, %v8706_v62  ;;  %v8677_v6 = vld [vmem:[%s17154_s15 + $0x790] sm:$0xff]  ;;  %v8678_v46 = vld [vmem:[%s17154_s15 + $0x798] sm:$0xff] }
 0x852   :  { %v13217_v38 = vpop.eup %13216  ;;  %v6408_v41 = vmul.f32 0.5, %v13215_v27  ;;  %9081 = vmatprep.subr.bf16.mxu0 %v11666_v42  ;;  %9124 = vmatprep.subr.bf16.mxu1 %v11668_v44  ;;  %v6423_v20 = vadd.f32 0.5, %v6407_v49  ;;  %v11710_v42 = vcombine.high %v16471_v29, %v8697_v2  ;;  %v11712_v44 = vcombine.high %v8694_v9, %v8698_v35  ;;  %v8681_v13 = vld [vmem:[%s17154_s15 + $0x870] sm:$0xff]  ;;  %v8682_v62 = vld [vmem:[%s17154_s15 + $0x878] sm:$0xff] }
 0x853   :  { %v13219_v8 = vpop.eup %13218  ;;  %v6422_v7 = vadd.f32 0.5, %v6406_v50  ;;  %v6413_v10 = vmul.f32 0.5, %v13217_v38  ;;  %v6570_v19 = vrot.slane %v16465_v31, %v16213_v45  ;;  %v11709_v27 = vcombine.low %v16471_v29, %v8697_v2  ;;  %v8673_v2 = vld [vmem:[%s17154_s15 + $0x6b0] sm:$0xff] }
 0x854   :  { %v13221_v14 = vpop.eup %13220  ;;  %v6424_v21 = vadd.f32 0.5, %v6408_v41  ;;  %v6415_v34 = vmul.f32 0.5, %v13219_v8 }
 0x855   :  { %v13223_v24 = vpop.eup %13222  ;;  %v11875_v25 = vpack.c.bf16 %v6422_v7, %v6421_v43  ;;  %v6414_v16 = vmul.f32 0.5, %v13221_v14  ;;  %9082 = vmatpush1.bf16.msra.mxu0 %v11665_v33  ;;  %9125 = vmatpush1.bf16.msra.mxu1 %v11667_v40  ;;  %v6429_v32 = vadd.f32 0.5, %v6413_v10  ;;  %v11711_v40 = vcombine.low %v8694_v9, %v8698_v35  ;;  %v8670_v9 = vld [vmem:[%s17154_s15 + $0x5d8] sm:$0xff] }
 0x856   :  { %v11876_v60 = vpack.c.bf16 %v6424_v21, %v6423_v20  ;;  %v6416_v26 = vmul.f32 0.5, %v13223_v24  ;;  %9083 = vmatprep.subr.bf16.mxu0 %v11658_v5  ;;  %9126 = vmatprep.subr.bf16.mxu1 %v11660_v0  ;;  %v6431_v36 = vadd.f32 0.5, %v6415_v34  ;;  %v11702_v5 = vcombine.high %v16491_v12, %v8689_v30  ;;  %v8674_v35 = vld [vmem:[%s17154_s15 + $0x6b8] sm:$0xff] }
 0x857   :  { %6483 = vst [vmem:[#allocation2 + $0x10] sm:$0xff] %v11875_v25  ;;  %v6430_v22 = vadd.f32 0.5, %v6414_v16  ;;  %v11704_v0 = vcombine.high %v8686_v28, %v8690_v56  ;;  %v11701_v21 = vcombine.low %v16491_v12, %v8689_v30  ;;  %v11703_v34 = vcombine.low %v8686_v28, %v8690_v56  ;;  %v8666_v12 = vld [vmem:[%s17154_s15 + $0x4f8] sm:$0xff]  ;;  %v8653_v56 = vld [vmem:[%s17154_s15 + $0x250] sm:$0xff] }
 0x858   :  { %6484 = vst [vmem:[#allocation2 + $0x18] sm:$0xff] %v11876_v60  ;;  %v6432_v53 = vadd.f32 0.5, %v6416_v26  ;;  %v11694_v26 = vcombine.high %v8677_v6, %v8681_v13 }
 0x859   :  { %v11879_v59 = vpack.c.bf16 %v6430_v22, %v6429_v32  ;;  %9084 = vmatpush1.bf16.msra.mxu0 %v11657_v48  ;;  %9127 = vmatpush1.bf16.msra.mxu1 %v11659_v52 }
 0x85a   :  { %v11880_v57 = vpack.c.bf16 %v6432_v53, %v6431_v36  ;;  %9155 = vmatprep.subr.bf16.mxu0 %v11718_v51  ;;  %9198 = vmatprep.subr.bf16.mxu1 %v11720_v54  ;;  %v11696_v51 = vcombine.high %v8678_v46, %v8682_v62  ;;  %v8669_v54 = vld [vmem:[%s17154_s15 + $0x5d0] sm:$0xff]  ;;  %v11693_v53 = vcombine.low %v8677_v6, %v8681_v13 }
 0x85b   :  { %6487 = vst [vmem:[#allocation2 + $0xf0] sm:$0xff] %v11879_v59  ;;  %v11695_v59 = vcombine.low %v8678_v46, %v8682_v62 }
 0x85c   :  { %6488 = vst [vmem:[#allocation2 + $0xf8] sm:$0xff] %v11880_v57  ;;  %v6949_v58 = vpop.f32.mrf.mxu0  ;;  %v6992_v49 = vpop.f32.mrf.mxu1  ;;  %9102 = vmatmul.mubr.bf16.vlgmr.msra.gmra.mxu0 %v15603_v63  ;;  %9145 = vmatmul.mubr.bf16.vlgmr.msra.gmra.mxu1 %v15603_v63  ;;  %v8661_v57 = vld [vmem:[%s17154_s15 + $0x410] sm:$0xff] }
 0x85d   :  { %v6950_v50 = vadd.f32 %v6949_v58, %v6558_v55  ;;  %v6993_v33 = vadd.f32 %v6992_v49, %v6566_v39  ;;  %9156 = vmatpush1.bf16.msra.mxu0 %v11717_v11  ;;  %9199 = vmatpush1.bf16.msra.mxu1 %v11719_v1  ;;  %v11686_v11 = vcombine.high %v8669_v54, %v8673_v2  ;;  %v8657_v58 = vld [vmem:[%s17154_s15 + $0x330] sm:$0xff]  ;;  %v8654_v49 = vld [vmem:[%s17154_s15 + $0x258] sm:$0xff] }
 0x85e   :  { %v6951_v38 = vpop.f32.mrf.mxu0  ;;  %v6994_v41 = vpop.f32.mrf.mxu1  ;;  %9157 = vmatprep.subr.bf16.mxu0 %v11710_v42  ;;  %9200 = vmatprep.subr.bf16.mxu1 %v11712_v44  ;;  %v11688_v1 = vcombine.high %v8670_v9, %v8674_v35  ;;  %v8665_v42 = vld [vmem:[%s17154_s15 + $0x4f0] sm:$0xff]  ;;  %v8662_v44 = vld [vmem:[%s17154_s15 + $0x418] sm:$0xff] }
 0x85f   :  { %v7087_v8 = vmul.f32 0.5, %v6950_v50  ;;  %v7089_v43 = vmul.f32 0.5, %v6993_v33  ;;  %v6952_v7 = vadd.f32 %v6951_v38, %v6562_v18  ;;  %v6995_v10 = vadd.f32 %v6994_v41, %v6570_v19  ;;  %9187 = vmatprep.mubr.bf16.mxu0 %v17186_v47  ;;  %9230 = vmatprep.mubr.bf16.mxu1 %v17186_v47 }
 0x860   :  { %v6953_v14 = vpop.f32.mrf.mxu0  ;;  %v6996_v20 = vpop.f32.mrf.mxu1  ;;  %v11678_v30 = vcombine.high %v8661_v57, %v8665_v42  ;;  %v11680_v28 = vcombine.high %v8662_v44, %v8666_v12  ;;  %v11677_v50 = vcombine.low %v8661_v57, %v8665_v42  ;;  %v11679_v33 = vcombine.low %v8662_v44, %v8666_v12  ;;  %v16588_v42 = vld [vmem:[%s17154_s15 + $0xb20] sm:$0xff] }
 0x861   :  { %13224 = vtanh.f32 %v7087_v8  ;;  %v7088_v24 = vmul.f32 0.5, %v6952_v7  ;;  %v7090_v25 = vmul.f32 0.5, %v6995_v10  ;;  %v6954_v16 = vadd.f32 %v6953_v14, %v6558_v55  ;;  %9158 = vmatpush1.bf16.msra.mxu0 %v11709_v27  ;;  %9201 = vmatpush1.bf16.msra.mxu1 %v11711_v40  ;;  %v8658_v27 = vld [vmem:[%s17154_s15 + $0x338] sm:$0xff]  ;;  %v8649_v8 = vld [vmem:[%s17154_s15 + $0x170] sm:$0xff] }
 0x862   :  { %13226 = vtanh.f32 %v7089_v43  ;;  %v6997_v48 = vadd.f32 %v6996_v20, %v6566_v39  ;;  %v6955_v52 = vpop.f32.mrf.mxu0  ;;  %v6998_v60 = vpop.f32.mrf.mxu1  ;;  %9159 = vmatprep.subr.bf16.mxu0 %v11702_v5  ;;  %9202 = vmatprep.subr.bf16.mxu1 %v11704_v0  ;;  %v11670_v38 = vcombine.high %v8653_v56, %v8657_v58  ;;  %v11672_v41 = vcombine.high %v8654_v49, %v8658_v27  ;;  %v8645_v5 = vld [vmem:[%s17154_s15 + $0x90] sm:$0xff]  ;;  %v8646_v43 = vld [vmem:[%s17154_s15 + $0x98] sm:$0xff] }
 0x863   :  { %13228 = vtanh.f32 %v7088_v24  ;;  %v7095_v29 = vmul.f32 0.5, %v6954_v16  ;;  %v6956_v32 = vadd.f32 %v6955_v52, %v6562_v18  ;;  %v6999_v22 = vadd.f32 %v6998_v60, %v6570_v19  ;;  %v8650_v7 = vld [vmem:[%s17154_s15 + $0x178] sm:$0xff]  ;;  %v9417_v16 = vld [vmem:[%s17154_s15 + $0xce0] sm:$0xff] }
 0x864   :  { %13230 = vtanh.f32 %v7090_v25  ;;  %v7097_v36 = vmul.f32 0.5, %v6997_v48  ;;  %v11685_v18 = vcombine.low %v8669_v54, %v8673_v2  ;;  %v11687_v19 = vcombine.low %v8670_v9, %v8674_v35  ;;  %v9418_v54 = vld [vmem:[%s17154_s15 + $0xce8] sm:$0xff] }
 0x865   :  { %13232 = vtanh.f32 %v7095_v29  ;;  %v7096_v55 = vmul.f32 0.5, %v6956_v32  ;;  %v7098_v39 = vmul.f32 0.5, %v6999_v22  ;;  %9160 = vmatpush1.bf16.msra.mxu0 %v11701_v21  ;;  %9203 = vmatpush1.bf16.msra.mxu1 %v11703_v34  ;;  %v11669_v14 = vcombine.low %v8653_v56, %v8657_v58  ;;  %v9422_v29 = vld [vmem:[%s17154_s15 + $0xdc8] sm:$0xff] }
 0x866   :  { %13234 = vtanh.f32 %v7097_v36  ;;  %9161 = vmatprep.subr.bf16.mxu0 %v11694_v26  ;;  %9204 = vmatprep.subr.bf16.mxu1 %v11696_v51  ;;  %v11671_v20 = vcombine.low %v8654_v49, %v8658_v27  ;;  %v11662_v24 = vcombine.high %v8645_v5, %v8649_v8  ;;  %v11664_v25 = vcombine.high %v8646_v43, %v8650_v7  ;;  %v9421_v51 = vld [vmem:[%s17154_s15 + $0xdc0] sm:$0xff] }
 0x867   :  { %13236 = vtanh.f32 %v7096_v55  ;;  %v11661_v55 = vcombine.low %v8645_v5, %v8649_v8  ;;  %v11788_v57 = vcombine.high %v9418_v54, %v9422_v29  ;;  %v6574_v58 = vrot.slane %v16465_v31, %v16323_v61  ;;  %v16607_v5 = vld [vmem:[%s17154_s15 + $0x960] sm:$0xff] }
 0x868   :  { %13238 = vtanh.f32 %v7098_v39  ;;  %v11663_v39 = vcombine.low %v8646_v43, %v8650_v7  ;;  %v6582_v49 = vrot.slane %v16465_v31, %v16332_v3  ;;  %v9405_v8 = vld [vmem:[%s17154_s15 + $0xa40] sm:$0xff]  ;;  %v9402_v43 = vld [vmem:[%s17154_s15 + $0x968] sm:$0xff] }
 0x869   :  { %9162 = vmatpush1.bf16.msra.mxu0 %v11693_v53  ;;  %9205 = vmatpush1.bf16.msra.mxu1 %v11695_v59  ;;  %v9406_v7 = vld [vmem:[%s17154_s15 + $0xa48] sm:$0xff] }
 0x86a   :  { %9163 = vmatprep.subr.bf16.mxu0 %v11686_v11  ;;  %9206 = vmatprep.subr.bf16.mxu1 %v11688_v1  ;;  %v11786_v1 = vcombine.high %v9417_v16, %v9421_v51 }
 0x86d   :  { %9164 = vmatpush1.bf16.msra.mxu0 %v11685_v18  ;;  %9207 = vmatpush1.bf16.msra.mxu1 %v11687_v19  ;;  %v9413_v18 = vld [vmem:[%s17154_s15 + $0xc00] sm:$0xff]  ;;  %v9410_v19 = vld [vmem:[%s17154_s15 + $0xb28] sm:$0xff] }
 0x86e   :  { %v13225_v40 = vpop.eup %13224  ;;  %9165 = vmatprep.subr.bf16.mxu0 %v11678_v30  ;;  %9208 = vmatprep.subr.bf16.mxu1 %v11680_v28  ;;  %v9414_v30 = vld [vmem:[%s17154_s15 + $0xc08] sm:$0xff] }
 0x86f   :  { %v13227_v0 = vpop.eup %13226  ;;  %v7119_v6 = vmul.f32 0.5, %v13225_v40 }
 0x870   :  { %v13229_v10 = vpop.eup %13228  ;;  %v7121_v13 = vmul.f32 0.5, %v13227_v0  ;;  %v6578_v0 = vrot.slane %v16465_v31, %v16337_v17 }
 0x871   :  { %v13231_v46 = vpop.eup %13230  ;;  %v7120_v62 = vmul.f32 0.5, %v13229_v10  ;;  %9166 = vmatpush1.bf16.msra.mxu0 %v11677_v50  ;;  %9209 = vmatpush1.bf16.msra.mxu1 %v11679_v33  ;;  %v7135_v52 = vadd.f32 0.5, %v7119_v6  ;;  %v11785_v50 = vcombine.low %v9417_v16, %v9421_v51  ;;  %v11787_v33 = vcombine.low %v9418_v54, %v9422_v29  ;;  %v9394_v51 = vld [vmem:[%s17154_s15 + $0x7a8] sm:$0xff] }
 0x872   :  { %v13233_v21 = vpop.eup %13232  ;;  %v7122_v34 = vmul.f32 0.5, %v13231_v46  ;;  %9167 = vmatprep.subr.bf16.mxu0 %v11670_v38  ;;  %9210 = vmatprep.subr.bf16.mxu1 %v11672_v41  ;;  %v7137_v22 = vadd.f32 0.5, %v7121_v13  ;;  %v11778_v38 = vcombine.high %v16588_v42, %v9413_v18  ;;  %v11780_v41 = vcombine.high %v9410_v19, %v9414_v30  ;;  %v9398_v54 = vld [vmem:[%s17154_s15 + $0x888] sm:$0xff] }
 0x873   :  { %v13235_v48 = vpop.eup %13234  ;;  %v7136_v60 = vadd.f32 0.5, %v7120_v62  ;;  %v7127_v26 = vmul.f32 0.5, %v13233_v21  ;;  %v6586_v6 = vrot.slane %v16465_v31, %v16345_v23  ;;  %v11777_v31 = vcombine.low %v16588_v42, %v9413_v18  ;;  %v9386_v18 = vld [vmem:[%s17154_s15 + $0x5e8] sm:$0xff] }
 0x874   :  { %v13237_v32 = vpop.eup %13236  ;;  %v7138_v2 = vadd.f32 0.5, %v7122_v34  ;;  %v7129_v9 = vmul.f32 0.5, %v13235_v48  ;;  %v11770_v34 = vcombine.high %v16607_v5, %v9405_v8 }
 0x875   :  { %v13239_v35 = vpop.eup %13238  ;;  %v11881_v36 = vpack.c.bf16 %v7136_v60, %v7135_v52  ;;  %v7128_v53 = vmul.f32 0.5, %v13237_v32  ;;  %9168 = vmatpush1.bf16.msra.mxu0 %v11669_v14  ;;  %9211 = vmatpush1.bf16.msra.mxu1 %v11671_v20  ;;  %v7143_v44 = vadd.f32 0.5, %v7127_v26  ;;  %v11779_v14 = vcombine.low %v9410_v19, %v9414_v30  ;;  %v9397_v26 = vld [vmem:[%s17154_s15 + $0x880] sm:$0xff]  ;;  %v9390_v19 = vld [vmem:[%s17154_s15 + $0x6c8] sm:$0xff] }
 0x876   :  { %v11882_v59 = vpack.c.bf16 %v7138_v2, %v7137_v22  ;;  %v7130_v11 = vmul.f32 0.5, %v13239_v35  ;;  %9169 = vmatprep.subr.bf16.mxu0 %v11662_v24  ;;  %9212 = vmatprep.subr.bf16.mxu1 %v11664_v25  ;;  %v7145_v28 = vadd.f32 0.5, %v7129_v9  ;;  %v11772_v24 = vcombine.high %v9402_v43, %v9406_v7  ;;  %v9393_v25 = vld [vmem:[%s17154_s15 + $0x7a0] sm:$0xff] }
 0x877   :  { %7199 = vst [vmem:[#allocation2 + $0x20] sm:$0xff] %v11881_v36  ;;  %v7144_v12 = vadd.f32 0.5, %v7128_v53  ;;  %v11769_v22 = vcombine.low %v16607_v5, %v9405_v8  ;;  %v11771_v2 = vcombine.low %v9402_v43, %v9406_v7  ;;  %v9369_v43 = vld [vmem:[%s17154_s15 + $0x260] sm:$0xff] }
 0x878   :  { %7200 = vst [vmem:[#allocation2 + $0x28] sm:$0xff] %v11882_v59  ;;  %v7146_v56 = vadd.f32 0.5, %v7130_v11  ;;  %v11762_v59 = vcombine.high %v9393_v25, %v9397_v26  ;;  %v11764_v11 = vcombine.high %v9394_v51, %v9398_v54  ;;  %v9373_v7 = vld [vmem:[%s17154_s15 + $0x340] sm:$0xff] }
 0x879   :  { %v11885_v27 = vpack.c.bf16 %v7144_v12, %v7143_v44  ;;  %9170 = vmatpush1.bf16.msra.mxu0 %v11661_v55  ;;  %9213 = vmatpush1.bf16.msra.mxu1 %v11663_v39  ;;  %v9389_v12 = vld [vmem:[%s17154_s15 + $0x6c0] sm:$0xff] }
 0x87a   :  { %v11886_v40 = vpack.c.bf16 %v7146_v56, %v7145_v28  ;;  %9787 = vmatprep.subr.bf16.mxu0 %v11786_v1  ;;  %9830 = vmatprep.subr.bf16.mxu1 %v11788_v57  ;;  %v9385_v1 = vld [vmem:[%s17154_s15 + $0x5e0] sm:$0xff]  ;;  %v11761_v28 = vcombine.low %v9393_v25, %v9397_v26 }
 0x87b   :  { %7203 = vst [vmem:[#allocation2 + $0x100] sm:$0xff] %v11885_v27  ;;  %v11754_v27 = vcombine.high %v9385_v1, %v9389_v12  ;;  %v11753_v5 = vcombine.low %v9385_v1, %v9389_v12  ;;  %v9365_v25 = vld [vmem:[%s17154_s15 + $0x180] sm:$0xff]  ;;  %v9424_v1 = vld [vmem:[%s17154_s15 + $0xdd8] sm:$0xff] }
 0x87c   :  { %7204 = vst [vmem:[#allocation2 + $0x108] sm:$0xff] %v11886_v40  ;;  %v7035_v10 = vpop.f32.mrf.mxu0  ;;  %v7078_v13 = vpop.f32.mrf.mxu1  ;;  %9188 = vmatmul.mubr.bf16.vlgmr.msra.gmra.mxu0 %v15603_v63  ;;  %9231 = vmatmul.mubr.bf16.vlgmr.msra.gmra.mxu1 %v15603_v63  ;;  %v9381_v40 = vld [vmem:[%s17154_s15 + $0x500] sm:$0xff] }
 0x87d   :  { %v7036_v46 = vadd.f32 %v7035_v10, %v6574_v58  ;;  %v7079_v62 = vadd.f32 %v7078_v13, %v6582_v49  ;;  %9788 = vmatpush1.bf16.msra.mxu0 %v11785_v50  ;;  %9831 = vmatpush1.bf16.msra.mxu1 %v11787_v33  ;;  %v11756_v50 = vcombine.high %v9386_v18, %v9390_v19  ;;  %v9377_v33 = vld [vmem:[%s17154_s15 + $0x420] sm:$0xff]  ;;  %v9370_v10 = vld [vmem:[%s17154_s15 + $0x268] sm:$0xff] }
 0x87e   :  { %v7037_v20 = vpop.f32.mrf.mxu0  ;;  %v7080_v21 = vpop.f32.mrf.mxu1  ;;  %9789 = vmatprep.subr.bf16.mxu0 %v11778_v38  ;;  %9832 = vmatprep.subr.bf16.mxu1 %v11780_v41  ;;  %v9378_v38 = vld [vmem:[%s17154_s15 + $0x428] sm:$0xff] }
 0x87f   :  { %v7091_v16 = vmul.f32 0.5, %v7036_v46  ;;  %v7093_v48 = vmul.f32 0.5, %v7079_v62  ;;  %v7038_v52 = vadd.f32 %v7037_v20, %v6578_v0  ;;  %v7081_v60 = vadd.f32 %v7080_v21, %v6586_v6  ;;  %9819 = vmatprep.mubr.bf16.mxu0 %v17186_v47  ;;  %9862 = vmatprep.mubr.bf16.mxu1 %v17186_v47  ;;  %v9382_v41 = vld [vmem:[%s17154_s15 + $0x508] sm:$0xff]  ;;  %v9361_v21 = vld [vmem:[%s17154_s15 + $0xa0] sm:$0xff] }
 0x880   :  { %v7039_v29 = vpop.f32.mrf.mxu0  ;;  %v7082_v32 = vpop.f32.mrf.mxu1  ;;  %v11748_v8 = vcombine.high %v9378_v38, %v9382_v41  ;;  %v9374_v13 = vld [vmem:[%s17154_s15 + $0x348] sm:$0xff]  ;;  %v11747_v46 = vcombine.low %v9378_v38, %v9382_v41 }
 0x881   :  { %13240 = vtanh.f32 %v7091_v16  ;;  %v7092_v9 = vmul.f32 0.5, %v7038_v52  ;;  %v7094_v35 = vmul.f32 0.5, %v7081_v60  ;;  %v7040_v36 = vadd.f32 %v7039_v29, %v6574_v58  ;;  %9790 = vmatpush1.bf16.msra.mxu0 %v11777_v31  ;;  %9833 = vmatpush1.bf16.msra.mxu1 %v11779_v14  ;;  %v9362_v16 = vld [vmem:[%s17154_s15 + $0xa8] sm:$0xff] }
 0x882   :  { %13242 = vtanh.f32 %v7093_v48  ;;  %v7083_v53 = vadd.f32 %v7082_v32, %v6582_v49  ;;  %v7041_v55 = vpop.f32.mrf.mxu0  ;;  %v7084_v39 = vpop.f32.mrf.mxu1  ;;  %9791 = vmatprep.subr.bf16.mxu0 %v11770_v34  ;;  %9834 = vmatprep.subr.bf16.mxu1 %v11772_v24  ;;  %v11763_v49 = vcombine.low %v9394_v51, %v9398_v54  ;;  %v11745_v31 = vcombine.low %v9377_v33, %v9381_v40  ;;  %v9366_v48 = vld [vmem:[%s17154_s15 + $0x188] sm:$0xff] }
 0x883   :  { %13244 = vtanh.f32 %v7092_v9  ;;  %v7099_v57 = vmul.f32 0.5, %v7040_v36  ;;  %v7042_v42 = vadd.f32 %v7041_v55, %v6578_v0  ;;  %v7085_v44 = vadd.f32 %v7084_v39, %v6586_v6 }
 0x884   :  { %13246 = vtanh.f32 %v7094_v35  ;;  %v7101_v30 = vmul.f32 0.5, %v7083_v53  ;;  %v11755_v0 = vcombine.low %v9386_v18, %v9390_v19  ;;  %v11746_v6 = vcombine.high %v9377_v33, %v9381_v40  ;;  %v16692_v35 = vld [vmem:[%s17154_s15 + $0xcf0] sm:$0xff] }
 0x885   :  { %13248 = vtanh.f32 %v7099_v57  ;;  %v7100_v56 = vmul.f32 0.5, %v7042_v42  ;;  %v7102_v58 = vmul.f32 0.5, %v7085_v44  ;;  %9792 = vmatpush1.bf16.msra.mxu0 %v11769_v22  ;;  %9835 = vmatpush1.bf16.msra.mxu1 %v11771_v2  ;;  %v11738_v14 = vcombine.high %v9369_v43, %v9373_v7  ;;  %v16712_v40 = vld [vmem:[%s17154_s15 + $0xb30] sm:$0xff] }
 0x886   :  { %13250 = vtanh.f32 %v7101_v30  ;;  %9793 = vmatprep.subr.bf16.mxu0 %v11762_v59  ;;  %9836 = vmatprep.subr.bf16.mxu1 %v11764_v11  ;;  %v11740_v20 = vcombine.high %v9370_v10, %v9374_v13  ;;  %v11737_v54 = vcombine.low %v9369_v43, %v9373_v7  ;;  %v11739_v29 = vcombine.low %v9370_v10, %v9374_v13  ;;  %v9423_v59 = vld [vmem:[%s17154_s15 + $0xdd0] sm:$0xff]  ;;  %v9420_v11 = vld [vmem:[%s17154_s15 + $0xcf8] sm:$0xff] }
 0x887   :  { %13252 = vtanh.f32 %v7100_v56  ;;  %v11730_v2 = vcombine.high %v9361_v21, %v9365_v25  ;;  %v11732_v9 = vcombine.high %v9362_v16, %v9366_v48  ;;  %v11731_v56 = vcombine.low %v9362_v16, %v9366_v48  ;;  %v9404_v16 = vld [vmem:[%s17154_s15 + $0x978] sm:$0xff] }
 0x888   :  { %13254 = vtanh.f32 %v7102_v58  ;;  %v16706_v58 = vld [vmem:[%s17155_s16 + $0x10] sm:$0xff]  ;;  %v11792_v33 = vcombine.high %v9420_v11, %v9424_v1  ;;  %v9408_v48 = vld [vmem:[%s17154_s15 + $0xa58] sm:$0xff] }
 0x889   :  { %9794 = vmatpush1.bf16.msra.mxu0 %v11761_v28  ;;  %9837 = vmatpush1.bf16.msra.mxu1 %v11763_v49  ;;  %v11729_v28 = vcombine.low %v9361_v21, %v9365_v25  ;;  %v7276_v7 = vrot.slane %v16706_v58, %v16196_v37  ;;  %v7284_v10 = vrot.slane %v16706_v58, %v16199_v4  ;;  %v16732_v21 = vld [vmem:[%s17154_s15 + $0x970] sm:$0xff] }
 0x88a   :  { %9795 = vmatprep.subr.bf16.mxu0 %v11754_v27  ;;  %9838 = vmatprep.subr.bf16.mxu1 %v11756_v50  ;;  %v11790_v50 = vcombine.high %v16692_v35, %v9423_v59  ;;  %v9407_v25 = vld [vmem:[%s17154_s15 + $0xa50] sm:$0xff] }
 0x88d   :  { %9796 = vmatpush1.bf16.msra.mxu0 %v11753_v5  ;;  %9839 = vmatpush1.bf16.msra.mxu1 %v11755_v0  ;;  %v9415_v5 = vld [vmem:[%s17154_s15 + $0xc10] sm:$0xff]  ;;  %v9412_v0 = vld [vmem:[%s17154_s15 + $0xb38] sm:$0xff] }
 0x88e   :  { %v13241_v62 = vpop.eup %13240  ;;  %9797 = vmatprep.subr.bf16.mxu0 %v11746_v6  ;;  %9840 = vmatprep.subr.bf16.mxu1 %v11748_v8  ;;  %v9416_v6 = vld [vmem:[%s17154_s15 + $0xc18] sm:$0xff] }
 0x88f   :  { %v13243_v34 = vpop.eup %13242  ;;  %v7123_v24 = vmul.f32 0.5, %v13241_v62 }
 0x890   :  { %v13245_v52 = vpop.eup %13244  ;;  %v7125_v60 = vmul.f32 0.5, %v13243_v34  ;;  %v7280_v34 = vrot.slane %v16706_v58, %v16210_v15 }
 0x891   :  { %v13247_v26 = vpop.eup %13246  ;;  %v7124_v51 = vmul.f32 0.5, %v13245_v52  ;;  %9798 = vmatpush1.bf16.msra.mxu0 %v11745_v31  ;;  %9841 = vmatpush1.bf16.msra.mxu1 %v11747_v46  ;;  %v7139_v53 = vadd.f32 0.5, %v7123_v24  ;;  %v11789_v31 = vcombine.low %v16692_v35, %v9423_v59  ;;  %v11791_v46 = vcombine.low %v9420_v11, %v9424_v1  ;;  %v9395_v35 = vld [vmem:[%s17154_s15 + $0x7b0] sm:$0xff]  ;;  %v9396_v11 = vld [vmem:[%s17154_s15 + $0x7b8] sm:$0xff] }
 0x892   :  { %v13249_v32 = vpop.eup %13248  ;;  %v7126_v22 = vmul.f32 0.5, %v13247_v26  ;;  %9799 = vmatprep.subr.bf16.mxu0 %v11738_v14  ;;  %9842 = vmatprep.subr.bf16.mxu1 %v11740_v20  ;;  %v7141_v42 = vadd.f32 0.5, %v7125_v60  ;;  %v11782_v14 = vcombine.high %v16712_v40, %v9415_v5  ;;  %v11784_v20 = vcombine.high %v9412_v0, %v9416_v6  ;;  %v9399_v59 = vld [vmem:[%s17154_s15 + $0x890] sm:$0xff]  ;;  %v9400_v1 = vld [vmem:[%s17154_s15 + $0x898] sm:$0xff] }
 0x893   :  { %v13251_v36 = vpop.eup %13250  ;;  %v7140_v55 = vadd.f32 0.5, %v7124_v51  ;;  %v7131_v39 = vmul.f32 0.5, %v13249_v32  ;;  %v7288_v24 = vrot.slane %v16706_v58, %v16213_v45  ;;  %v11781_v26 = vcombine.low %v16712_v40, %v9415_v5  ;;  %v9391_v5 = vld [vmem:[%s17154_s15 + $0x6d0] sm:$0xff] }
 0x894   :  { %v13253_v57 = vpop.eup %13252  ;;  %v7142_v44 = vadd.f32 0.5, %v7126_v22  ;;  %v7133_v12 = vmul.f32 0.5, %v13251_v36 }
 0x895   :  { %v13255_v18 = vpop.eup %13254  ;;  %v11883_v19 = vpack.c.bf16 %v7140_v55, %v7139_v53  ;;  %v7132_v30 = vmul.f32 0.5, %v13253_v57  ;;  %9800 = vmatpush1.bf16.msra.mxu0 %v11737_v54  ;;  %9843 = vmatpush1.bf16.msra.mxu1 %v11739_v29  ;;  %v7147_v38 = vadd.f32 0.5, %v7131_v39  ;;  %v11783_v29 = vcombine.low %v9412_v0, %v9416_v6  ;;  %v9388_v0 = vld [vmem:[%s17154_s15 + $0x5f8] sm:$0xff] }
 0x896   :  { %v11884_v49 = vpack.c.bf16 %v7142_v44, %v7141_v42  ;;  %v7134_v27 = vmul.f32 0.5, %v13255_v18  ;;  %9801 = vmatprep.subr.bf16.mxu0 %v11730_v2  ;;  %9844 = vmatprep.subr.bf16.mxu1 %v11732_v9  ;;  %v7149_v8 = vadd.f32 0.5, %v7133_v12  ;;  %v11774_v2 = vcombine.high %v16732_v21, %v9407_v25  ;;  %v9392_v6 = vld [vmem:[%s17154_s15 + $0x6d8] sm:$0xff] }
 0x897   :  { %7201 = vst [vmem:[#allocation2 + $0x30] sm:$0xff] %v11883_v19  ;;  %v7148_v41 = vadd.f32 0.5, %v7132_v30  ;;  %v11776_v9 = vcombine.high %v9404_v16, %v9408_v48  ;;  %v11773_v44 = vcombine.low %v16732_v21, %v9407_v25  ;;  %v11775_v12 = vcombine.low %v9404_v16, %v9408_v48  ;;  %v9384_v21 = vld [vmem:[%s17154_s15 + $0x518] sm:$0xff]  ;;  %v9371_v48 = vld [vmem:[%s17154_s15 + $0x270] sm:$0xff] }
 0x898   :  { %7202 = vst [vmem:[#allocation2 + $0x38] sm:$0xff] %v11884_v49  ;;  %v7150_v43 = vadd.f32 0.5, %v7134_v27  ;;  %v11766_v27 = vcombine.high %v9395_v35, %v9399_v59 }
 0x899   :  { %v11887_v13 = vpack.c.bf16 %v7148_v41, %v7147_v38  ;;  %9802 = vmatpush1.bf16.msra.mxu0 %v11729_v28  ;;  %9845 = vmatpush1.bf16.msra.mxu1 %v11731_v56 }
 0x89a   :  { %v11888_v62 = vpack.c.bf16 %v7150_v43, %v7149_v8  ;;  %9873 = vmatprep.subr.bf16.mxu0 %v11790_v50  ;;  %9916 = vmatprep.subr.bf16.mxu1 %v11792_v33  ;;  %v11768_v50 = vcombine.high %v9396_v11, %v9400_v1  ;;  %v9387_v33 = vld [vmem:[%s17154_s15 + $0x5f0] sm:$0xff]  ;;  %v11765_v43 = vcombine.low %v9395_v35, %v9399_v59 }
 0x89b   :  { %7205 = vst [vmem:[#allocation2 + $0x110] sm:$0xff] %v11887_v13  ;;  %v11767_v13 = vcombine.low %v9396_v11, %v9400_v1 }
 0x89c   :  { %7206 = vst [vmem:[#allocation2 + $0x118] sm:$0xff] %v11888_v62  ;;  %v7667_v52 = vpop.f32.mrf.mxu0  ;;  %v7710_v60 = vpop.f32.mrf.mxu1  ;;  %9820 = vmatmul.mubr.bf16.vlgmr.msra.gmra.mxu0 %v15603_v63  ;;  %9863 = vmatmul.mubr.bf16.vlgmr.msra.gmra.mxu1 %v15603_v63  ;;  %v9379_v62 = vld [vmem:[%s17154_s15 + $0x430] sm:$0xff] }
 0x89d   :  { %v7668_v51 = vadd.f32 %v7667_v52, %v7276_v7  ;;  %v7711_v54 = vadd.f32 %v7710_v60, %v7284_v10  ;;  %9874 = vmatpush1.bf16.msra.mxu0 %v11789_v31  ;;  %9917 = vmatpush1.bf16.msra.mxu1 %v11791_v46  ;;  %v11758_v31 = vcombine.high %v9387_v33, %v9391_v5  ;;  %v9375_v52 = vld [vmem:[%s17154_s15 + $0x350] sm:$0xff]  ;;  %v9372_v60 = vld [vmem:[%s17154_s15 + $0x278] sm:$0xff] }
 0x89e   :  { %v7669_v32 = vpop.f32.mrf.mxu0  ;;  %v7712_v22 = vpop.f32.mrf.mxu1  ;;  %9875 = vmatprep.subr.bf16.mxu0 %v11782_v14  ;;  %9918 = vmatprep.subr.bf16.mxu1 %v11784_v20  ;;  %v11760_v46 = vcombine.high %v9388_v0, %v9392_v6  ;;  %v9383_v14 = vld [vmem:[%s17154_s15 + $0x510] sm:$0xff]  ;;  %v9380_v20 = vld [vmem:[%s17154_s15 + $0x438] sm:$0xff] }
 0x89f   :  { %v7805_v36 = vmul.f32 0.5, %v7668_v51  ;;  %v7807_v53 = vmul.f32 0.5, %v7711_v54  ;;  %v7670_v55 = vadd.f32 %v7669_v32, %v7280_v34  ;;  %v7713_v39 = vadd.f32 %v7712_v22, %v7288_v24  ;;  %9905 = vmatprep.mubr.bf16.mxu0 %v17186_v47  ;;  %9948 = vmatprep.mubr.bf16.mxu1 %v17186_v47 }
 0x8a0   :  { %v7671_v57 = vpop.f32.mrf.mxu0  ;;  %v7714_v42 = vpop.f32.mrf.mxu1  ;;  %v11750_v25 = vcombine.high %v9379_v62, %v9383_v14  ;;  %v11752_v16 = vcombine.high %v9380_v20, %v9384_v21  ;;  %v11749_v51 = vcombine.low %v9379_v62, %v9383_v14  ;;  %v11751_v54 = vcombine.low %v9380_v20, %v9384_v21  ;;  %v16829_v14 = vld [vmem:[%s17154_s15 + $0xb40] sm:$0xff] }
 0x8a1   :  { %13256 = vtanh.f32 %v7805_v36  ;;  %v7806_v18 = vmul.f32 0.5, %v7670_v55  ;;  %v7808_v19 = vmul.f32 0.5, %v7713_v39  ;;  %v7672_v30 = vadd.f32 %v7671_v57, %v7276_v7  ;;  %9876 = vmatpush1.bf16.msra.mxu0 %v11781_v26  ;;  %9919 = vmatpush1.bf16.msra.mxu1 %v11783_v29  ;;  %v9376_v26 = vld [vmem:[%s17154_s15 + $0x358] sm:$0xff]  ;;  %v9367_v36 = vld [vmem:[%s17154_s15 + $0x190] sm:$0xff] }
 0x8a2   :  { %13258 = vtanh.f32 %v7807_v53  ;;  %v7715_v28 = vadd.f32 %v7714_v42, %v7284_v10  ;;  %v7673_v56 = vpop.f32.mrf.mxu0  ;;  %v7716_v49 = vpop.f32.mrf.mxu1  ;;  %9877 = vmatprep.subr.bf16.mxu0 %v11774_v2  ;;  %9920 = vmatprep.subr.bf16.mxu1 %v11776_v9  ;;  %v11742_v32 = vcombine.high %v9371_v48, %v9375_v52  ;;  %v11744_v22 = vcombine.high %v9372_v60, %v9376_v26  ;;  %v9363_v2 = vld [vmem:[%s17154_s15 + $0xb0] sm:$0xff]  ;;  %v9364_v53 = vld [vmem:[%s17154_s15 + $0xb8] sm:$0xff] }
 0x8a3   :  { %13260 = vtanh.f32 %v7806_v18  ;;  %v7813_v40 = vmul.f32 0.5, %v7672_v30  ;;  %v7674_v38 = vadd.f32 %v7673_v56, %v7280_v34  ;;  %v7717_v41 = vadd.f32 %v7716_v49, %v7288_v24  ;;  %v9368_v55 = vld [vmem:[%s17154_s15 + $0x198] sm:$0xff]  ;;  %v10135_v30 = vld [vmem:[%s17154_s15 + $0xd00] sm:$0xff] }
 0x8a4   :  { %13262 = vtanh.f32 %v7808_v19  ;;  %v7815_v8 = vmul.f32 0.5, %v7715_v28  ;;  %v11757_v34 = vcombine.low %v9387_v33, %v9391_v5  ;;  %v11759_v24 = vcombine.low %v9388_v0, %v9392_v6  ;;  %v10136_v33 = vld [vmem:[%s17154_s15 + $0xd08] sm:$0xff] }
 0x8a5   :  { %13264 = vtanh.f32 %v7813_v40  ;;  %v7814_v7 = vmul.f32 0.5, %v7674_v38  ;;  %v7816_v10 = vmul.f32 0.5, %v7717_v41  ;;  %9878 = vmatpush1.bf16.msra.mxu0 %v11773_v44  ;;  %9921 = vmatpush1.bf16.msra.mxu1 %v11775_v12  ;;  %v11741_v57 = vcombine.low %v9371_v48, %v9375_v52  ;;  %v10140_v40 = vld [vmem:[%s17154_s15 + $0xde8] sm:$0xff] }
 0x8a6   :  { %13266 = vtanh.f32 %v7815_v8  ;;  %9879 = vmatprep.subr.bf16.mxu0 %v11766_v27  ;;  %9922 = vmatprep.subr.bf16.mxu1 %v11768_v50  ;;  %v11743_v42 = vcombine.low %v9372_v60, %v9376_v26  ;;  %v11734_v18 = vcombine.high %v9363_v2, %v9367_v36  ;;  %v11736_v19 = vcombine.high %v9364_v53, %v9368_v55  ;;  %v10139_v50 = vld [vmem:[%s17154_s15 + $0xde0] sm:$0xff] }
 0x8a7   :  { %13268 = vtanh.f32 %v7814_v7  ;;  %v11733_v7 = vcombine.low %v9363_v2, %v9367_v36  ;;  %v11860_v62 = vcombine.high %v10136_v33, %v10140_v40  ;;  %v7292_v52 = vrot.slane %v16706_v58, %v16323_v61  ;;  %v16848_v2 = vld [vmem:[%s17154_s15 + $0x980] sm:$0xff] }
 0x8a8   :  { %13270 = vtanh.f32 %v7816_v10  ;;  %v11735_v10 = vcombine.low %v9364_v53, %v9368_v55  ;;  %v7300_v60 = vrot.slane %v16706_v58, %v16332_v3  ;;  %v10123_v36 = vld [vmem:[%s17154_s15 + $0xa60] sm:$0xff]  ;;  %v10120_v53 = vld [vmem:[%s17154_s15 + $0x988] sm:$0xff] }
 0x8a9   :  { %9880 = vmatpush1.bf16.msra.mxu0 %v11765_v43  ;;  %9923 = vmatpush1.bf16.msra.mxu1 %v11767_v13  ;;  %v10124_v55 = vld [vmem:[%s17154_s15 + $0xa68] sm:$0xff] }
 0x8aa   :  { %9881 = vmatprep.subr.bf16.mxu0 %v11758_v31  ;;  %9924 = vmatprep.subr.bf16.mxu1 %v11760_v46  ;;  %v11858_v46 = vcombine.high %v10135_v30, %v10139_v50 }
 0x8ad   :  { %9882 = vmatpush1.bf16.msra.mxu0 %v11757_v34  ;;  %9925 = vmatpush1.bf16.msra.mxu1 %v11759_v24  ;;  %v10131_v34 = vld [vmem:[%s17154_s15 + $0xc20] sm:$0xff]  ;;  %v10128_v24 = vld [vmem:[%s17154_s15 + $0xb48] sm:$0xff] }
 0x8ae   :  { %v13257_v29 = vpop.eup %13256  ;;  %9883 = vmatprep.subr.bf16.mxu0 %v11750_v25  ;;  %9926 = vmatprep.subr.bf16.mxu1 %v11752_v16  ;;  %v10132_v25 = vld [vmem:[%s17154_s15 + $0xc28] sm:$0xff] }
 0x8af   :  { %v13259_v9 = vpop.eup %13258  ;;  %v7837_v35 = vmul.f32 0.5, %v13257_v29 }
 0x8b0   :  { %v13261_v39 = vpop.eup %13260  ;;  %v7839_v59 = vmul.f32 0.5, %v13259_v9  ;;  %v7296_v9 = vrot.slane %v16706_v58, %v16337_v17 }
 0x8b1   :  { %v13263_v11 = vpop.eup %13262  ;;  %v7838_v1 = vmul.f32 0.5, %v13261_v39  ;;  %9884 = vmatpush1.bf16.msra.mxu0 %v11749_v51  ;;  %9927 = vmatpush1.bf16.msra.mxu1 %v11751_v54  ;;  %v7853_v56 = vadd.f32 0.5, %v7837_v35  ;;  %v11857_v51 = vcombine.low %v10135_v30, %v10139_v50  ;;  %v11859_v54 = vcombine.low %v10136_v33, %v10140_v40  ;;  %v10112_v50 = vld [vmem:[%s17154_s15 + $0x7c8] sm:$0xff] }
 0x8b2   :  { %v13265_v44 = vpop.eup %13264  ;;  %v7840_v12 = vmul.f32 0.5, %v13263_v11  ;;  %9885 = vmatprep.subr.bf16.mxu0 %v11742_v32  ;;  %9928 = vmatprep.subr.bf16.mxu1 %v11744_v22  ;;  %v7855_v41 = vadd.f32 0.5, %v7839_v59  ;;  %v11850_v32 = vcombine.high %v16829_v14, %v10131_v34  ;;  %v11852_v22 = vcombine.high %v10128_v24, %v10132_v25  ;;  %v10116_v33 = vld [vmem:[%s17154_s15 + $0x8a8] sm:$0xff] }
 0x8b3   :  { %v13267_v28 = vpop.eup %13266  ;;  %v7854_v49 = vadd.f32 0.5, %v7838_v1  ;;  %v7845_v27 = vmul.f32 0.5, %v13265_v44  ;;  %v7304_v35 = vrot.slane %v16706_v58, %v16345_v23  ;;  %v11849_v58 = vcombine.low %v16829_v14, %v10131_v34  ;;  %v10104_v34 = vld [vmem:[%s17154_s15 + $0x608] sm:$0xff] }
 0x8b4   :  { %v13269_v38 = vpop.eup %13268  ;;  %v7856_v5 = vadd.f32 0.5, %v7840_v12  ;;  %v7847_v0 = vmul.f32 0.5, %v13267_v28  ;;  %v11842_v12 = vcombine.high %v16848_v2, %v10123_v36 }
 0x8b5   :  { %v13271_v6 = vpop.eup %13270  ;;  %v11889_v8 = vpack.c.bf16 %v7854_v49, %v7853_v56  ;;  %v7846_v43 = vmul.f32 0.5, %v13269_v38  ;;  %9886 = vmatpush1.bf16.msra.mxu0 %v11741_v57  ;;  %9929 = vmatpush1.bf16.msra.mxu1 %v11743_v42  ;;  %v7861_v20 = vadd.f32 0.5, %v7845_v27  ;;  %v11851_v57 = vcombine.low %v10128_v24, %v10132_v25  ;;  %v10115_v27 = vld [vmem:[%s17154_s15 + $0x8a0] sm:$0xff]  ;;  %v10108_v24 = vld [vmem:[%s17154_s15 + $0x6e8] sm:$0xff] }
 0x8b6   :  { %v11890_v13 = vpack.c.bf16 %v7856_v5, %v7855_v41  ;;  %v7848_v31 = vmul.f32 0.5, %v13271_v6  ;;  %9887 = vmatprep.subr.bf16.mxu0 %v11734_v18  ;;  %9930 = vmatprep.subr.bf16.mxu1 %v11736_v19  ;;  %v7863_v16 = vadd.f32 0.5, %v7847_v0  ;;  %v11844_v18 = vcombine.high %v10120_v53, %v10124_v55  ;;  %v10111_v19 = vld [vmem:[%s17154_s15 + $0x7c0] sm:$0xff] }
 0x8b7   :  { %7917 = vst [vmem:[#allocation2 + $0x40] sm:$0xff] %v11889_v8  ;;  %v7862_v21 = vadd.f32 0.5, %v7846_v43  ;;  %v11841_v41 = vcombine.low %v16848_v2, %v10123_v36  ;;  %v11843_v5 = vcombine.low %v10120_v53, %v10124_v55  ;;  %v10087_v53 = vld [vmem:[%s17154_s15 + $0x280] sm:$0xff] }
 0x8b8   :  { %7918 = vst [vmem:[#allocation2 + $0x48] sm:$0xff] %v11890_v13  ;;  %v7864_v48 = vadd.f32 0.5, %v7848_v31  ;;  %v11834_v13 = vcombine.high %v10111_v19, %v10115_v27  ;;  %v11836_v31 = vcombine.high %v10112_v50, %v10116_v33  ;;  %v10091_v55 = vld [vmem:[%s17154_s15 + $0x360] sm:$0xff] }
 0x8b9   :  { %v11893_v26 = vpack.c.bf16 %v7862_v21, %v7861_v20  ;;  %9888 = vmatpush1.bf16.msra.mxu0 %v11733_v7  ;;  %9931 = vmatpush1.bf16.msra.mxu1 %v11735_v10  ;;  %v10107_v21 = vld [vmem:[%s17154_s15 + $0x6e0] sm:$0xff] }
 0x8ba   :  { %v11894_v29 = vpack.c.bf16 %v7864_v48, %v7863_v16  ;;  %10505 = vmatprep.subr.bf16.mxu0 %v11858_v46  ;;  %10548 = vmatprep.subr.bf16.mxu1 %v11860_v62  ;;  %v10103_v46 = vld [vmem:[%s17154_s15 + $0x600] sm:$0xff]  ;;  %v11833_v16 = vcombine.low %v10111_v19, %v10115_v27 }
 0x8bb   :  { %7921 = vst [vmem:[#allocation2 + $0x120] sm:$0xff] %v11893_v26  ;;  %v11826_v26 = vcombine.high %v10103_v46, %v10107_v21  ;;  %v11825_v2 = vcombine.low %v10103_v46, %v10107_v21  ;;  %v10083_v19 = vld [vmem:[%s17154_s15 + $0x1a0] sm:$0xff]  ;;  %v10142_v46 = vld [vmem:[%s17154_s15 + $0xdf8] sm:$0xff] }
 0x8bc   :  { %7922 = vst [vmem:[#allocation2 + $0x128] sm:$0xff] %v11894_v29  ;;  %v7753_v39 = vpop.f32.mrf.mxu0  ;;  %v7796_v59 = vpop.f32.mrf.mxu1  ;;  %9906 = vmatmul.mubr.bf16.vlgmr.msra.gmra.mxu0 %v15603_v63  ;;  %9949 = vmatmul.mubr.bf16.vlgmr.msra.gmra.mxu1 %v15603_v63  ;;  %v10099_v29 = vld [vmem:[%s17154_s15 + $0x520] sm:$0xff] }
 0x8bd   :  { %v7754_v11 = vadd.f32 %v7753_v39, %v7292_v52  ;;  %v7797_v1 = vadd.f32 %v7796_v59, %v7300_v60  ;;  %10506 = vmatpush1.bf16.msra.mxu0 %v11857_v51  ;;  %10549 = vmatpush1.bf16.msra.mxu1 %v11859_v54  ;;  %v11828_v51 = vcombine.high %v10104_v34, %v10108_v24  ;;  %v10095_v54 = vld [vmem:[%s17154_s15 + $0x440] sm:$0xff]  ;;  %v10088_v39 = vld [vmem:[%s17154_s15 + $0x288] sm:$0xff] }
 0x8be   :  { %v7755_v42 = vpop.f32.mrf.mxu0  ;;  %v7798_v44 = vpop.f32.mrf.mxu1  ;;  %10507 = vmatprep.subr.bf16.mxu0 %v11850_v32  ;;  %10550 = vmatprep.subr.bf16.mxu1 %v11852_v22  ;;  %v10096_v32 = vld [vmem:[%s17154_s15 + $0x448] sm:$0xff] }
 0x8bf   :  { %v7809_v30 = vmul.f32 0.5, %v7754_v11  ;;  %v7811_v28 = vmul.f32 0.5, %v7797_v1  ;;  %v7756_v56 = vadd.f32 %v7755_v42, %v7296_v9  ;;  %v7799_v49 = vadd.f32 %v7798_v44, %v7304_v35  ;;  %10537 = vmatprep.mubr.bf16.mxu0 %v17186_v47  ;;  %10580 = vmatprep.mubr.bf16.mxu1 %v17186_v47  ;;  %v10100_v22 = vld [vmem:[%s17154_s15 + $0x528] sm:$0xff]  ;;  %v10079_v44 = vld [vmem:[%s17154_s15 + $0xc0] sm:$0xff] }
 0x8c0   :  { %v7757_v40 = vpop.f32.mrf.mxu0  ;;  %v7800_v38 = vpop.f32.mrf.mxu1  ;;  %v11820_v36 = vcombine.high %v10096_v32, %v10100_v22  ;;  %v10092_v59 = vld [vmem:[%s17154_s15 + $0x368] sm:$0xff]  ;;  %v11819_v11 = vcombine.low %v10096_v32, %v10100_v22 }
 0x8c1   :  { %13272 = vtanh.f32 %v7809_v30  ;;  %v7810_v0 = vmul.f32 0.5, %v7756_v56  ;;  %v7812_v6 = vmul.f32 0.5, %v7799_v49  ;;  %v7758_v8 = vadd.f32 %v7757_v40, %v7292_v52  ;;  %10508 = vmatpush1.bf16.msra.mxu0 %v11849_v58  ;;  %10551 = vmatpush1.bf16.msra.mxu1 %v11851_v57  ;;  %v10080_v30 = vld [vmem:[%s17154_s15 + $0xc8] sm:$0xff] }
 0x8c2   :  { %13274 = vtanh.f32 %v7811_v28  ;;  %v7801_v43 = vadd.f32 %v7800_v38, %v7300_v60  ;;  %v7759_v7 = vpop.f32.mrf.mxu0  ;;  %v7802_v10 = vpop.f32.mrf.mxu1  ;;  %10509 = vmatprep.subr.bf16.mxu0 %v11842_v12  ;;  %10552 = vmatprep.subr.bf16.mxu1 %v11844_v18  ;;  %v11835_v60 = vcombine.low %v10112_v50, %v10116_v33  ;;  %v11817_v58 = vcombine.low %v10095_v54, %v10099_v29  ;;  %v10084_v28 = vld [vmem:[%s17154_s15 + $0x1a8] sm:$0xff] }
 0x8c3   :  { %13276 = vtanh.f32 %v7810_v0  ;;  %v7817_v62 = vmul.f32 0.5, %v7758_v8  ;;  %v7760_v14 = vadd.f32 %v7759_v7, %v7296_v9  ;;  %v7803_v20 = vadd.f32 %v7802_v10, %v7304_v35 }
 0x8c4   :  { %13278 = vtanh.f32 %v7812_v6  ;;  %v7819_v25 = vmul.f32 0.5, %v7801_v43  ;;  %v11827_v9 = vcombine.low %v10104_v34, %v10108_v24  ;;  %v11818_v35 = vcombine.high %v10095_v54, %v10099_v29  ;;  %v16933_v6 = vld [vmem:[%s17154_s15 + $0xd10] sm:$0xff] }
 0x8c5   :  { %13280 = vtanh.f32 %v7817_v62  ;;  %v7818_v48 = vmul.f32 0.5, %v7760_v14  ;;  %v7820_v52 = vmul.f32 0.5, %v7803_v20  ;;  %10510 = vmatpush1.bf16.msra.mxu0 %v11841_v41  ;;  %10553 = vmatpush1.bf16.msra.mxu1 %v11843_v5  ;;  %v11810_v57 = vcombine.high %v10087_v53, %v10091_v55  ;;  %v16953_v29 = vld [vmem:[%s17154_s15 + $0xb50] sm:$0xff] }
 0x8c6   :  { %13282 = vtanh.f32 %v7819_v25  ;;  %10511 = vmatprep.subr.bf16.mxu0 %v11834_v13  ;;  %10554 = vmatprep.subr.bf16.mxu1 %v11836_v31  ;;  %v11812_v42 = vcombine.high %v10088_v39, %v10092_v59  ;;  %v11809_v33 = vcombine.low %v10087_v53, %v10091_v55  ;;  %v11811_v40 = vcombine.low %v10088_v39, %v10092_v59  ;;  %v10141_v13 = vld [vmem:[%s17154_s15 + $0xdf0] sm:$0xff]  ;;  %v10138_v31 = vld [vmem:[%s17154_s15 + $0xd18] sm:$0xff] }
 0x8c7   :  { %13284 = vtanh.f32 %v7818_v48  ;;  %v11802_v5 = vcombine.high %v10079_v44, %v10083_v19  ;;  %v11804_v0 = vcombine.high %v10080_v30, %v10084_v28  ;;  %v11803_v48 = vcombine.low %v10080_v30, %v10084_v28  ;;  %v10122_v30 = vld [vmem:[%s17154_s15 + $0x998] sm:$0xff] }
 0x8c8   :  { %13286 = vtanh.f32 %v7820_v52  ;;  %v16947_v52 = vld [vmem:[%s17155_s16 + $0x18] sm:$0xff]  ;;  %v11864_v54 = vcombine.high %v10138_v31, %v10142_v46 }
 0x8c9   :  { %10512 = vmatpush1.bf16.msra.mxu0 %v11833_v16  ;;  %10555 = vmatpush1.bf16.msra.mxu1 %v11835_v60  ;;  %v11801_v16 = vcombine.low %v10079_v44, %v10083_v19  ;;  %v7994_v55 = vrot.slane %v16947_v52, %v16196_v37  ;;  %v8002_v39 = vrot.slane %v16947_v52, %v16199_v4  ;;  %v16973_v44 = vld [vmem:[%s17154_s15 + $0x990] sm:$0xff]  ;;  %v10126_v28 = vld [vmem:[%s17154_s15 + $0xa78] sm:$0xff] }
 0x8ca   :  { %10513 = vmatprep.subr.bf16.mxu0 %v11826_v26  ;;  %10556 = vmatprep.subr.bf16.mxu1 %v11828_v51  ;;  %v11862_v51 = vcombine.high %v16933_v6, %v10141_v13  ;;  %v10125_v19 = vld [vmem:[%s17154_s15 + $0xa70] sm:$0xff] }
 0x8cd   :  { %10514 = vmatpush1.bf16.msra.mxu0 %v11825_v2  ;;  %10557 = vmatpush1.bf16.msra.mxu1 %v11827_v9  ;;  %v10133_v2 = vld [vmem:[%s17154_s15 + $0xc30] sm:$0xff]  ;;  %v10130_v9 = vld [vmem:[%s17154_s15 + $0xb58] sm:$0xff] }
 0x8ce   :  { %v13273_v1 = vpop.eup %13272  ;;  %10515 = vmatprep.subr.bf16.mxu0 %v11818_v35  ;;  %10558 = vmatprep.subr.bf16.mxu1 %v11820_v36  ;;  %v10134_v35 = vld [vmem:[%s17154_s15 + $0xc38] sm:$0xff] }
 0x8cf   :  { %v13275_v12 = vpop.eup %13274  ;;  %v7841_v18 = vmul.f32 0.5, %v13273_v1 }
 0x8d0   :  { %v13277_v56 = vpop.eup %13276  ;;  %v7843_v49 = vmul.f32 0.5, %v13275_v12  ;;  %v7998_v12 = vrot.slane %v16947_v52, %v16210_v15 }
 0x8d1   :  { %v13279_v27 = vpop.eup %13278  ;;  %v7842_v50 = vmul.f32 0.5, %v13277_v56  ;;  %10516 = vmatpush1.bf16.msra.mxu0 %v11817_v58  ;;  %10559 = vmatpush1.bf16.msra.mxu1 %v11819_v11  ;;  %v7857_v43 = vadd.f32 0.5, %v7841_v18  ;;  %v11861_v58 = vcombine.low %v16933_v6, %v10141_v13  ;;  %v11863_v11 = vcombine.low %v10138_v31, %v10142_v46  ;;  %v10113_v6 = vld [vmem:[%s17154_s15 + $0x7d0] sm:$0xff]  ;;  %v10114_v31 = vld [vmem:[%s17154_s15 + $0x7d8] sm:$0xff] }
 0x8d2   :  { %v13281_v38 = vpop.eup %13280  ;;  %v7844_v41 = vmul.f32 0.5, %v13279_v27  ;;  %10517 = vmatprep.subr.bf16.mxu0 %v11810_v57  ;;  %10560 = vmatprep.subr.bf16.mxu1 %v11812_v42  ;;  %v7859_v14 = vadd.f32 0.5, %v7843_v49  ;;  %v11854_v57 = vcombine.high %v16953_v29, %v10133_v2  ;;  %v11856_v42 = vcombine.high %v10130_v9, %v10134_v35  ;;  %v10117_v13 = vld [vmem:[%s17154_s15 + $0x8b0] sm:$0xff]  ;;  %v10118_v46 = vld [vmem:[%s17154_s15 + $0x8b8] sm:$0xff] }
 0x8d3   :  { %v13283_v8 = vpop.eup %13282  ;;  %v7858_v7 = vadd.f32 0.5, %v7842_v50  ;;  %v7849_v10 = vmul.f32 0.5, %v13281_v38  ;;  %v8006_v18 = vrot.slane %v16947_v52, %v16213_v45  ;;  %v11853_v27 = vcombine.low %v16953_v29, %v10133_v2  ;;  %v10106_v2 = vld [vmem:[%s17154_s15 + $0x618] sm:$0xff] }
 0x8d4   :  { %v13285_v62 = vpop.eup %13284  ;;  %v7860_v20 = vadd.f32 0.5, %v7844_v41  ;;  %v7851_v21 = vmul.f32 0.5, %v13283_v8 }
 0x8d5   :  { %v13287_v34 = vpop.eup %13286  ;;  %v11891_v24 = vpack.c.bf16 %v7858_v7, %v7857_v43  ;;  %v7850_v25 = vmul.f32 0.5, %v13285_v62  ;;  %10518 = vmatpush1.bf16.msra.mxu0 %v11809_v33  ;;  %10561 = vmatpush1.bf16.msra.mxu1 %v11811_v40  ;;  %v7865_v32 = vadd.f32 0.5, %v7849_v10  ;;  %v11855_v40 = vcombine.low %v10130_v9, %v10134_v35  ;;  %v10110_v9 = vld [vmem:[%s17154_s15 + $0x6f8] sm:$0xff] }
 0x8d6   :  { %v11892_v60 = vpack.c.bf16 %v7860_v20, %v7859_v14  ;;  %v7852_v26 = vmul.f32 0.5, %v13287_v34  ;;  %10519 = vmatprep.subr.bf16.mxu0 %v11802_v5  ;;  %10562 = vmatprep.subr.bf16.mxu1 %v11804_v0  ;;  %v7867_v36 = vadd.f32 0.5, %v7851_v21  ;;  %v11846_v5 = vcombine.high %v16973_v44, %v10125_v19 }
 0x8d7   :  { %7919 = vst [vmem:[#allocation2 + $0x50] sm:$0xff] %v11891_v24  ;;  %v7866_v22 = vadd.f32 0.5, %v7850_v25  ;;  %v11848_v0 = vcombine.high %v10122_v30, %v10126_v28  ;;  %v11845_v20 = vcombine.low %v16973_v44, %v10125_v19  ;;  %v11847_v21 = vcombine.low %v10122_v30, %v10126_v28  ;;  %v10089_v30 = vld [vmem:[%s17154_s15 + $0x290] sm:$0xff] }
 0x8d8   :  { %7920 = vst [vmem:[#allocation2 + $0x58] sm:$0xff] %v11892_v60  ;;  %v7868_v53 = vadd.f32 0.5, %v7852_v26  ;;  %v11838_v26 = vcombine.high %v10113_v6, %v10117_v13  ;;  %v10093_v28 = vld [vmem:[%s17154_s15 + $0x370] sm:$0xff] }
 0x8d9   :  { %v11895_v59 = vpack.c.bf16 %v7866_v22, %v7865_v32  ;;  %10520 = vmatpush1.bf16.msra.mxu0 %v11801_v16  ;;  %10563 = vmatpush1.bf16.msra.mxu1 %v11803_v48  ;;  %v10109_v22 = vld [vmem:[%s17154_s15 + $0x6f0] sm:$0xff] }
 0x8da   :  { %v11896_v1 = vpack.c.bf16 %v7868_v53, %v7867_v36  ;;  %10591 = vmatprep.subr.bf16.mxu0 %v11862_v51  ;;  %10634 = vmatprep.subr.bf16.mxu1 %v11864_v54  ;;  %v11840_v51 = vcombine.high %v10114_v31, %v10118_v46  ;;  %v11837_v36 = vcombine.low %v10113_v6, %v10117_v13  ;;  %v10085_v6 = vld [vmem:[%s17154_s15 + $0x1b0] sm:$0xff] }
 0x8db   :  { %7923 = vst [vmem:[#allocation2 + $0x130] sm:$0xff] %v11895_v59 }
 0x8dc   :  { %7924 = vst [vmem:[#allocation2 + $0x138] sm:$0xff] %v11896_v1  ;;  %v8385_v56 = vpop.f32.mrf.mxu0  ;;  %v8428_v49 = vpop.f32.mrf.mxu1  ;;  %10538 = vmatmul.mubr.bf16.vlgmr.msra.gmra.mxu0 %v15603_v63  ;;  %10581 = vmatmul.mubr.bf16.vlgmr.msra.gmra.mxu1 %v15603_v63  ;;  %v10101_v1 = vld [vmem:[%s17154_s15 + $0x530] sm:$0xff] }
 0x8dd   :  { %v8386_v50 = vadd.f32 %v8385_v56, %v7994_v55  ;;  %v8429_v33 = vadd.f32 %v8428_v49, %v8002_v39  ;;  %10592 = vmatpush1.bf16.msra.mxu0 %v11861_v58  ;;  %10635 = vmatpush1.bf16.msra.mxu1 %v11863_v11  ;;  %v11832_v58 = vcombine.high %v10106_v2, %v10110_v9  ;;  %v10097_v11 = vld [vmem:[%s17154_s15 + $0x450] sm:$0xff]  ;;  %v10090_v56 = vld [vmem:[%s17154_s15 + $0x298] sm:$0xff] }
 0x8de   :  { %v8387_v38 = vpop.f32.mrf.mxu0  ;;  %v8430_v41 = vpop.f32.mrf.mxu1  ;;  %10593 = vmatprep.subr.bf16.mxu0 %v11854_v57  ;;  %10636 = vmatprep.subr.bf16.mxu1 %v11856_v42  ;;  %v10098_v57 = vld [vmem:[%s17154_s15 + $0x458] sm:$0xff] }
 0x8df   :  { %v8523_v8 = vmul.f32 0.5, %v8386_v50  ;;  %v8525_v43 = vmul.f32 0.5, %v8429_v33  ;;  %v8388_v7 = vadd.f32 %v8387_v38, %v7998_v12  ;;  %v8431_v10 = vadd.f32 %v8430_v41, %v8006_v18  ;;  %10623 = vmatprep.mubr.bf16.mxu0 %v17186_v47  ;;  %10666 = vmatprep.mubr.bf16.mxu1 %v17186_v47  ;;  %v10105_v47 = vld [vmem:[%s17154_s15 + $0x610] sm:$0xff]  ;;  %v10102_v42 = vld [vmem:[%s17154_s15 + $0x538] sm:$0xff] }
 0x8e0   :  { %v8389_v62 = vpop.f32.mrf.mxu0  ;;  %v8432_v14 = vpop.f32.mrf.mxu1  ;;  %v11830_v59 = vcombine.high %v10105_v47, %v10109_v22  ;;  %v11829_v44 = vcombine.low %v10105_v47, %v10109_v22  ;;  %v11824_v19 = vcombine.high %v10098_v57, %v10102_v42  ;;  %v10094_v49 = vld [vmem:[%s17154_s15 + $0x378] sm:$0xff]  ;;  %v11823_v50 = vcombine.low %v10098_v57, %v10102_v42  ;;  %v10081_v41 = vld [vmem:[%s17154_s15 + $0xd0] sm:$0xff] }
 0x8e1   :  { %13288 = vtanh.f32 %v8523_v8  ;;  %v8524_v34 = vmul.f32 0.5, %v8388_v7  ;;  %v8526_v24 = vmul.f32 0.5, %v8431_v10  ;;  %v8390_v25 = vadd.f32 %v8389_v62, %v7994_v55  ;;  %10594 = vmatpush1.bf16.msra.mxu0 %v11853_v27  ;;  %10637 = vmatpush1.bf16.msra.mxu1 %v11855_v40  ;;  %v10082_v8 = vld [vmem:[%s17154_s15 + $0xd8] sm:$0xff] }
 0x8e2   :  { %13290 = vtanh.f32 %v8525_v43  ;;  %v8433_v16 = vadd.f32 %v8432_v14, %v8002_v39  ;;  %v8391_v48 = vpop.f32.mrf.mxu0  ;;  %v8434_v60 = vpop.f32.mrf.mxu1  ;;  %10595 = vmatprep.subr.bf16.mxu0 %v11846_v5  ;;  %10638 = vmatprep.subr.bf16.mxu1 %v11848_v0  ;;  %v11839_v39 = vcombine.low %v10114_v31, %v10118_v46  ;;  %v11821_v27 = vcombine.low %v10097_v11, %v10101_v1  ;;  %v10086_v43 = vld [vmem:[%s17154_s15 + $0x1b8] sm:$0xff] }
 0x8e3   :  { %13292 = vtanh.f32 %v8524_v34  ;;  %v8531_v54 = vmul.f32 0.5, %v8390_v25  ;;  %v8392_v29 = vadd.f32 %v8391_v48, %v7998_v12  ;;  %v8435_v32 = vadd.f32 %v8434_v60, %v8006_v18 }
 0x8e4   :  { %13294 = vtanh.f32 %v8526_v24  ;;  %v8533_v35 = vmul.f32 0.5, %v8433_v16  ;;  %v11831_v12 = vcombine.low %v10106_v2, %v10110_v9  ;;  %v11822_v18 = vcombine.high %v10097_v11, %v10101_v1 }
 0x8e5   :  { %13296 = vtanh.f32 %v8531_v54  ;;  %v8532_v53 = vmul.f32 0.5, %v8392_v29  ;;  %v8534_v55 = vmul.f32 0.5, %v8435_v32  ;;  %10596 = vmatpush1.bf16.msra.mxu0 %v11845_v20  ;;  %10639 = vmatpush1.bf16.msra.mxu1 %v11847_v21  ;;  %v11814_v40 = vcombine.high %v10089_v30, %v10093_v28 }
 0x8e6   :  { %13298 = vtanh.f32 %v8533_v35  ;;  %10597 = vmatprep.subr.bf16.mxu0 %v11838_v26  ;;  %10640 = vmatprep.subr.bf16.mxu1 %v11840_v51  ;;  %v11816_v38 = vcombine.high %v10090_v56, %v10094_v49  ;;  %v11813_v46 = vcombine.low %v10089_v30, %v10093_v28  ;;  %v11815_v62 = vcombine.low %v10090_v56, %v10094_v49 }
 0x8e7   :  { %13300 = vtanh.f32 %v8532_v53  ;;  %v11806_v21 = vcombine.high %v10081_v41, %v10085_v6  ;;  %v11808_v34 = vcombine.high %v10082_v8, %v10086_v43  ;;  %v11805_v22 = vcombine.low %v10081_v41, %v10085_v6 }
 0x8e8   :  { %13302 = vtanh.f32 %v8534_v55  ;;  %v11807_v2 = vcombine.low %v10082_v8, %v10086_v43  ;;  %v8018_v11 = vrot.slane %v16947_v52, %v16332_v3  ;;  %v8014_v57 = vrot.slane %v16947_v52, %v16337_v17 }
 0x8e9   :  { %10598 = vmatpush1.bf16.msra.mxu0 %v11837_v36  ;;  %10641 = vmatpush1.bf16.msra.mxu1 %v11839_v39  ;;  %v8022_v42 = vrot.slane %v16947_v52, %v16345_v23 }
 0x8ea   :  { %10599 = vmatprep.subr.bf16.mxu0 %v11830_v59  ;;  %10642 = vmatprep.subr.bf16.mxu1 %v11832_v58  ;;  %v8010_v58 = vrot.slane %v16947_v52, %v16323_v61 }
 0x8ed   :  { %10600 = vmatpush1.bf16.msra.mxu0 %v11829_v44  ;;  %10643 = vmatpush1.bf16.msra.mxu1 %v11831_v12 }
 0x8ee   :  { %v13289_v33 = vpop.eup %13288  ;;  %10601 = vmatprep.subr.bf16.mxu0 %v11822_v18  ;;  %10644 = vmatprep.subr.bf16.mxu1 %v11824_v19 }
 0x8ef   :  { %v13291_v5 = vpop.eup %13290  ;;  %v8555_v0 = vmul.f32 0.5, %v13289_v33 }
 0x8f0   :  { %v13293_v7 = vpop.eup %13292  ;;  %v8557_v10 = vmul.f32 0.5, %v13291_v5 }
 0x8f1   :  { %v13295_v13 = vpop.eup %13294  ;;  %v8556_v31 = vmul.f32 0.5, %v13293_v7  ;;  %10602 = vmatpush1.bf16.msra.mxu0 %v11821_v27  ;;  %10645 = vmatpush1.bf16.msra.mxu1 %v11823_v50  ;;  %v8571_v25 = vadd.f32 0.5, %v8555_v0 }
 0x8f2   :  { %v13297_v14 = vpop.eup %13296  ;;  %v8558_v20 = vmul.f32 0.5, %v13295_v13  ;;  %10603 = vmatprep.subr.bf16.mxu0 %v11814_v40  ;;  %10646 = vmatprep.subr.bf16.mxu1 %v11816_v38  ;;  %v8573_v26 = vadd.f32 0.5, %v8557_v10 }
 0x8f3   :  { %v13299_v24 = vpop.eup %13298  ;;  %v8572_v16 = vadd.f32 0.5, %v8556_v31  ;;  %v8563_v48 = vmul.f32 0.5, %v13297_v14 }
 0x8f4   :  { %v13301_v60 = vpop.eup %13300  ;;  %v8574_v51 = vadd.f32 0.5, %v8558_v20  ;;  %v8565_v47 = vmul.f32 0.5, %v13299_v24 }
 0x8f5   :  { %v13303_v54 = vpop.eup %13302  ;;  %v11897_v29 = vpack.c.bf16 %v8572_v16, %v8571_v25  ;;  %v8564_v32 = vmul.f32 0.5, %v13301_v60  ;;  %10604 = vmatpush1.bf16.msra.mxu0 %v11813_v46  ;;  %10647 = vmatpush1.bf16.msra.mxu1 %v11815_v62  ;;  %v8579_v36 = vadd.f32 0.5, %v8563_v48 }
 0x8f6   :  { %v11898_v9 = vpack.c.bf16 %v8574_v51, %v8573_v26  ;;  %v8566_v35 = vmul.f32 0.5, %v13303_v54  ;;  %10605 = vmatprep.subr.bf16.mxu0 %v11806_v21  ;;  %10648 = vmatprep.subr.bf16.mxu1 %v11808_v34  ;;  %v8581_v55 = vadd.f32 0.5, %v8565_v47 }
 0x8f7   :  { %8635 = vst [vmem:[#allocation2 + $0x60] sm:$0xff] %v11897_v29  ;;  %v8580_v53 = vadd.f32 0.5, %v8564_v32 }
 0x8f8   :  { %8636 = vst [vmem:[#allocation2 + $0x68] sm:$0xff] %v11898_v9  ;;  %v8582_v39 = vadd.f32 0.5, %v8566_v35 }
 0x8f9   :  { %v11901_v59 = vpack.c.bf16 %v8580_v53, %v8579_v36  ;;  %10606 = vmatpush1.bf16.msra.mxu0 %v11805_v22  ;;  %10649 = vmatpush1.bf16.msra.mxu1 %v11807_v2  ;;  %v17068_v36 = vld [vmem:[%s17155_s16 + $0x20] sm:$0xff] }
 0x8fa   :  { %v11902_v1 = vpack.c.bf16 %v8582_v39, %v8581_v55 }
 0x8fb   :  { %8639 = vst [vmem:[#allocation2 + $0x140] sm:$0xff] %v11901_v59 }
 0x8fc   :  { %8640 = vst [vmem:[#allocation2 + $0x148] sm:$0xff] %v11902_v1  ;;  %v8471_v44 = vpop.f32.mrf.mxu0  ;;  %v8514_v12 = vpop.f32.mrf.mxu1  ;;  %10624 = vmatmul.mubr.bf16.vlgmr.msra.gmra.mxu0 %v15603_v63  ;;  %10667 = vmatmul.mubr.bf16.vlgmr.msra.gmra.mxu1 %v15603_v63  ;;  %v8720_v1 = vrot.slane %v17068_v36, %v16199_v4 }
 0x8fd   :  { %v8472_v18 = vadd.f32 %v8471_v44, %v8010_v58  ;;  %v8515_v19 = vadd.f32 %v8514_v12, %v8018_v11  ;;  %v8724_v44 = vrot.slane %v17068_v36, %v16213_v45 }
 0x8fe   :  { %v8473_v30 = vpop.f32.mrf.mxu0  ;;  %v8516_v28 = vpop.f32.mrf.mxu1 }
 0x8ff   :  { %v8527_v56 = vmul.f32 0.5, %v8472_v18  ;;  %v8529_v49 = vmul.f32 0.5, %v8515_v19  ;;  %v8474_v27 = vadd.f32 %v8473_v30, %v8014_v57  ;;  %v8517_v50 = vadd.f32 %v8516_v28, %v8022_v42 }
 0x900   :  { %v8475_v33 = vpop.f32.mrf.mxu0  ;;  %v8518_v40 = vpop.f32.mrf.mxu1 }
 0x901   :  { %13304 = vtanh.f32 %v8527_v56  ;;  %v8528_v38 = vmul.f32 0.5, %v8474_v27  ;;  %v8530_v52 = vmul.f32 0.5, %v8517_v50  ;;  %v8476_v41 = vadd.f32 %v8475_v33, %v8010_v58 }
 0x902   :  { %13306 = vtanh.f32 %v8529_v49  ;;  %v8519_v5 = vadd.f32 %v8518_v40, %v8018_v11  ;;  %v8477_v0 = vpop.f32.mrf.mxu0  ;;  %v8520_v6 = vpop.f32.mrf.mxu1  ;;  %v8712_v11 = vrot.slane %v17068_v36, %v16196_v37 }
 0x903   :  { %13308 = vtanh.f32 %v8528_v38  ;;  %v8535_v63 = vmul.f32 0.5, %v8476_v41  ;;  %v8478_v8 = vadd.f32 %v8477_v0, %v8014_v57  ;;  %v8521_v43 = vadd.f32 %v8520_v6, %v8022_v42 }
 0x904   :  { %13310 = vtanh.f32 %v8530_v52  ;;  %v8537_v7 = vmul.f32 0.5, %v8519_v5  ;;  %v8716_v42 = vrot.slane %v17068_v36, %v16210_v15 }
 0x905   :  { %13312 = vtanh.f32 %v8535_v63  ;;  %v8536_v10 = vmul.f32 0.5, %v8478_v8  ;;  %v8538_v13 = vmul.f32 0.5, %v8521_v43 }
 0x906   :  { %13314 = vtanh.f32 %v8537_v7 }
 0x907   :  { %13316 = vtanh.f32 %v8536_v10 }
 0x908   :  { %13318 = vtanh.f32 %v8538_v13 }
 0x90e   :  { %v13305_v31 = vpop.eup %13304 }
 0x90f   :  { %v13307_v46 = vpop.eup %13306  ;;  %v8559_v62 = vmul.f32 0.5, %v13305_v31 }
 0x910   :  { %v13309_v14 = vpop.eup %13308  ;;  %v8561_v20 = vmul.f32 0.5, %v13307_v46 }
 0x911   :  { %v13311_v21 = vpop.eup %13310  ;;  %v8560_v34 = vmul.f32 0.5, %v13309_v14  ;;  %v8575_v48 = vadd.f32 0.5, %v8559_v62 }
 0x912   :  { %v13313_v24 = vpop.eup %13312  ;;  %v8562_v25 = vmul.f32 0.5, %v13311_v21  ;;  %v8577_v47 = vadd.f32 0.5, %v8561_v20 }
 0x913   :  { %v13315_v16 = vpop.eup %13314  ;;  %v8576_v60 = vadd.f32 0.5, %v8560_v34  ;;  %v8567_v26 = vmul.f32 0.5, %v13313_v24 }
 0x914   :  { %v13317_v51 = vpop.eup %13316  ;;  %v8578_v54 = vadd.f32 0.5, %v8562_v25  ;;  %v8569_v29 = vmul.f32 0.5, %v13315_v16 }
 0x915   :  { %v13319_v32 = vpop.eup %13318  ;;  %v11899_v22 = vpack.c.bf16 %v8576_v60, %v8575_v48  ;;  %v8568_v2 = vmul.f32 0.5, %v13317_v51  ;;  %v8583_v53 = vadd.f32 0.5, %v8567_v26 }
 0x916   :  { %v11900_v9 = vpack.c.bf16 %v8578_v54, %v8577_v47  ;;  %v8570_v35 = vmul.f32 0.5, %v13319_v32  ;;  %v8585_v39 = vadd.f32 0.5, %v8569_v29 }
 0x917   :  { %8637 = vst [vmem:[#allocation2 + $0x70] sm:$0xff] %v11899_v22  ;;  %v8584_v55 = vadd.f32 0.5, %v8568_v2 }
 0x918   :  { %8638 = vst [vmem:[#allocation2 + $0x78] sm:$0xff] %v11900_v9  ;;  %v8586_v59 = vadd.f32 0.5, %v8570_v35 }
 0x919   :  { %v11903_v58 = vpack.c.bf16 %v8584_v55, %v8583_v53 }
 0x91a   :  { %v11904_v57 = vpack.c.bf16 %v8586_v59, %v8585_v39 }
 0x91b   :  { %8641 = vst [vmem:[#allocation2 + $0x150] sm:$0xff] %v11903_v58 }
 0x91c   :  { %8642 = vst [vmem:[#allocation2 + $0x158] sm:$0xff] %v11904_v57  ;;  %v9103_v12 = vpop.f32.mrf.mxu0  ;;  %v9146_v18 = vpop.f32.mrf.mxu1  ;;  %v8736_v57 = vrot.slane %v17068_v36, %v16332_v3 }
 0x91d   :  { %v9104_v19 = vadd.f32 %v9103_v12, %v8712_v11  ;;  %v9147_v30 = vadd.f32 %v9146_v18, %v8720_v1  ;;  %v8740_v12 = vrot.slane %v17068_v36, %v16345_v23 }
 0x91e   :  { %v9105_v28 = vpop.f32.mrf.mxu0  ;;  %v9148_v56 = vpop.f32.mrf.mxu1 }
 0x91f   :  { %v9241_v49 = vmul.f32 0.5, %v9104_v19  ;;  %v9243_v27 = vmul.f32 0.5, %v9147_v30  ;;  %v9106_v50 = vadd.f32 %v9105_v28, %v8716_v42  ;;  %v9149_v33 = vadd.f32 %v9148_v56, %v8724_v44 }
 0x920   :  { %v9107_v40 = vpop.f32.mrf.mxu0  ;;  %v9150_v38 = vpop.f32.mrf.mxu1 }
 0x921   :  { %13320 = vtanh.f32 %v9241_v49  ;;  %v9242_v52 = vmul.f32 0.5, %v9106_v50  ;;  %v9244_v41 = vmul.f32 0.5, %v9149_v33  ;;  %v9108_v5 = vadd.f32 %v9107_v40, %v8712_v11 }
 0x922   :  { %13322 = vtanh.f32 %v9243_v27  ;;  %v9151_v0 = vadd.f32 %v9150_v38, %v8720_v1  ;;  %v9109_v6 = vpop.f32.mrf.mxu0  ;;  %v9152_v63 = vpop.f32.mrf.mxu1  ;;  %v8728_v1 = vrot.slane %v17068_v36, %v16323_v61 }
 0x923   :  { %13324 = vtanh.f32 %v9242_v52  ;;  %v9249_v8 = vmul.f32 0.5, %v9108_v5  ;;  %v9110_v43 = vadd.f32 %v9109_v6, %v8716_v42  ;;  %v9153_v7 = vadd.f32 %v9152_v63, %v8724_v44 }
 0x924   :  { %13326 = vtanh.f32 %v9244_v41  ;;  %v9251_v10 = vmul.f32 0.5, %v9151_v0  ;;  %v8732_v44 = vrot.slane %v17068_v36, %v16337_v17 }
 0x925   :  { %13328 = vtanh.f32 %v9249_v8  ;;  %v9250_v13 = vmul.f32 0.5, %v9110_v43  ;;  %v9252_v31 = vmul.f32 0.5, %v9153_v7 }
 0x926   :  { %13330 = vtanh.f32 %v9251_v10 }
 0x927   :  { %13332 = vtanh.f32 %v9250_v13 }
 0x928   :  { %13334 = vtanh.f32 %v9252_v31 }
 0x92e   :  { %v13321_v46 = vpop.eup %13320 }
 0x92f   :  { %v13323_v62 = vpop.eup %13322  ;;  %v9273_v14 = vmul.f32 0.5, %v13321_v46 }
 0x930   :  { %v13325_v20 = vpop.eup %13324  ;;  %v9275_v21 = vmul.f32 0.5, %v13323_v62 }
 0x931   :  { %v13327_v34 = vpop.eup %13326  ;;  %v9274_v24 = vmul.f32 0.5, %v13325_v20  ;;  %v9289_v60 = vadd.f32 0.5, %v9273_v14 }
 0x932   :  { %v13329_v25 = vpop.eup %13328  ;;  %v9276_v16 = vmul.f32 0.5, %v13327_v34  ;;  %v9291_v54 = vadd.f32 0.5, %v9275_v21 }
 0x933   :  { %v13331_v48 = vpop.eup %13330  ;;  %v9290_v26 = vadd.f32 0.5, %v9274_v24  ;;  %v9281_v51 = vmul.f32 0.5, %v13329_v25 }
 0x934   :  { %v13333_v47 = vpop.eup %13332  ;;  %v9292_v29 = vadd.f32 0.5, %v9276_v16  ;;  %v9283_v32 = vmul.f32 0.5, %v13331_v48 }
 0x935   :  { %v13335_v22 = vpop.eup %13334  ;;  %v11905_v2 = vpack.c.bf16 %v9290_v26, %v9289_v60  ;;  %v9282_v9 = vmul.f32 0.5, %v13333_v47  ;;  %v9297_v55 = vadd.f32 0.5, %v9281_v51 }
 0x936   :  { %v11906_v35 = vpack.c.bf16 %v9292_v29, %v9291_v54  ;;  %v9284_v53 = vmul.f32 0.5, %v13335_v22  ;;  %v9299_v59 = vadd.f32 0.5, %v9283_v32 }
 0x937   :  { %9353 = vst [vmem:[#allocation2 + $0x80] sm:$0xff] %v11905_v2  ;;  %v9298_v39 = vadd.f32 0.5, %v9282_v9 }
 0x938   :  { %9354 = vst [vmem:[#allocation2 + $0x88] sm:$0xff] %v11906_v35  ;;  %v9300_v58 = vadd.f32 0.5, %v9284_v53 }
 0x939   :  { %v11909_v11 = vpack.c.bf16 %v9298_v39, %v9297_v55  ;;  %v17089_v55 = vld [vmem:[%s17155_s16 + $0x28] sm:$0xff] }
 0x93a   :  { %v11910_v42 = vpack.c.bf16 %v9300_v58, %v9299_v59 }
 0x93b   :  { %9357 = vst [vmem:[#allocation2 + $0x160] sm:$0xff] %v11909_v11 }
 0x93c   :  { %9358 = vst [vmem:[#allocation2 + $0x168] sm:$0xff] %v11910_v42  ;;  %v9189_v18 = vpop.f32.mrf.mxu0  ;;  %v9232_v19 = vpop.f32.mrf.mxu1  ;;  %v9438_v42 = vrot.slane %v17089_v55, %v16199_v4 }
 0x93d   :  { %v9190_v30 = vadd.f32 %v9189_v18, %v8728_v1  ;;  %v9233_v28 = vadd.f32 %v9232_v19, %v8736_v57  ;;  %v9442_v18 = vrot.slane %v17089_v55, %v16213_v45 }
 0x93e   :  { %v9191_v56 = vpop.f32.mrf.mxu0  ;;  %v9234_v49 = vpop.f32.mrf.mxu1 }
 0x93f   :  { %v9245_v27 = vmul.f32 0.5, %v9190_v30  ;;  %v9247_v50 = vmul.f32 0.5, %v9233_v28  ;;  %v9192_v33 = vadd.f32 %v9191_v56, %v8732_v44  ;;  %v9235_v40 = vadd.f32 %v9234_v49, %v8740_v12 }
 0x940   :  { %v9193_v38 = vpop.f32.mrf.mxu0  ;;  %v9236_v52 = vpop.f32.mrf.mxu1 }
 0x941   :  { %13336 = vtanh.f32 %v9245_v27  ;;  %v9246_v41 = vmul.f32 0.5, %v9192_v33  ;;  %v9248_v5 = vmul.f32 0.5, %v9235_v40  ;;  %v9194_v0 = vadd.f32 %v9193_v38, %v8728_v1 }
 0x942   :  { %13338 = vtanh.f32 %v9247_v50  ;;  %v9237_v6 = vadd.f32 %v9236_v52, %v8736_v57  ;;  %v9195_v36 = vpop.f32.mrf.mxu0  ;;  %v9238_v63 = vpop.f32.mrf.mxu1  ;;  %v9430_v57 = vrot.slane %v17089_v55, %v16196_v37 }
 0x943   :  { %13340 = vtanh.f32 %v9246_v41  ;;  %v9253_v8 = vmul.f32 0.5, %v9194_v0  ;;  %v9196_v43 = vadd.f32 %v9195_v36, %v8732_v44  ;;  %v9239_v7 = vadd.f32 %v9238_v63, %v8740_v12 }
 0x944   :  { %13342 = vtanh.f32 %v9248_v5  ;;  %v9255_v10 = vmul.f32 0.5, %v9237_v6  ;;  %v9434_v12 = vrot.slane %v17089_v55, %v16210_v15 }
 0x945   :  { %13344 = vtanh.f32 %v9253_v8  ;;  %v9254_v13 = vmul.f32 0.5, %v9196_v43  ;;  %v9256_v31 = vmul.f32 0.5, %v9239_v7 }
 0x946   :  { %13346 = vtanh.f32 %v9255_v10 }
 0x947   :  { %13348 = vtanh.f32 %v9254_v13 }
 0x948   :  { %13350 = vtanh.f32 %v9256_v31 }
 0x94e   :  { %v13337_v46 = vpop.eup %13336 }
 0x94f   :  { %v13339_v62 = vpop.eup %13338  ;;  %v9277_v14 = vmul.f32 0.5, %v13337_v46 }
 0x950   :  { %v13341_v20 = vpop.eup %13340  ;;  %v9279_v21 = vmul.f32 0.5, %v13339_v62 }
 0x951   :  { %v13343_v34 = vpop.eup %13342  ;;  %v9278_v24 = vmul.f32 0.5, %v13341_v20  ;;  %v9293_v60 = vadd.f32 0.5, %v9277_v14 }
 0x952   :  { %v13345_v25 = vpop.eup %13344  ;;  %v9280_v16 = vmul.f32 0.5, %v13343_v34  ;;  %v9295_v54 = vadd.f32 0.5, %v9279_v21 }
 0x953   :  { %v13347_v48 = vpop.eup %13346  ;;  %v9294_v26 = vadd.f32 0.5, %v9278_v24  ;;  %v9285_v51 = vmul.f32 0.5, %v13345_v25 }
 0x954   :  { %v13349_v47 = vpop.eup %13348  ;;  %v9296_v29 = vadd.f32 0.5, %v9280_v16  ;;  %v9287_v32 = vmul.f32 0.5, %v13347_v48 }
 0x955   :  { %v13351_v22 = vpop.eup %13350  ;;  %v11907_v2 = vpack.c.bf16 %v9294_v26, %v9293_v60  ;;  %v9286_v9 = vmul.f32 0.5, %v13349_v47  ;;  %v9301_v39 = vadd.f32 0.5, %v9285_v51 }
 0x956   :  { %v11908_v35 = vpack.c.bf16 %v9296_v29, %v9295_v54  ;;  %v9288_v53 = vmul.f32 0.5, %v13351_v22  ;;  %v9303_v58 = vadd.f32 0.5, %v9287_v32 }
 0x957   :  { %9355 = vst [vmem:[#allocation2 + $0x90] sm:$0xff] %v11907_v2  ;;  %v9302_v59 = vadd.f32 0.5, %v9286_v9 }
 0x958   :  { %9356 = vst [vmem:[#allocation2 + $0x98] sm:$0xff] %v11908_v35  ;;  %v9304_v11 = vadd.f32 0.5, %v9288_v53 }
 0x959   :  { %v11911_v1 = vpack.c.bf16 %v9302_v59, %v9301_v39 }
 0x95a   :  { %v11912_v44 = vpack.c.bf16 %v9304_v11, %v9303_v58 }
 0x95b   :  { %9359 = vst [vmem:[#allocation2 + $0x170] sm:$0xff] %v11911_v1 }
 0x95c   :  { %9360 = vst [vmem:[#allocation2 + $0x178] sm:$0xff] %v11912_v44  ;;  %v9821_v19 = vpop.f32.mrf.mxu0  ;;  %v9864_v30 = vpop.f32.mrf.mxu1  ;;  %v9454_v44 = vrot.slane %v17089_v55, %v16332_v3 }
 0x95d   :  { %v9822_v28 = vadd.f32 %v9821_v19, %v9430_v57  ;;  %v9865_v56 = vadd.f32 %v9864_v30, %v9438_v42  ;;  %v9458_v19 = vrot.slane %v17089_v55, %v16345_v23 }
 0x95e   :  { %v9823_v49 = vpop.f32.mrf.mxu0  ;;  %v9866_v27 = vpop.f32.mrf.mxu1 }
 0x95f   :  { %v9959_v50 = vmul.f32 0.5, %v9822_v28  ;;  %v9961_v33 = vmul.f32 0.5, %v9865_v56  ;;  %v9824_v40 = vadd.f32 %v9823_v49, %v9434_v12  ;;  %v9867_v38 = vadd.f32 %v9866_v27, %v9442_v18 }
 0x960   :  { %v9825_v52 = vpop.f32.mrf.mxu0  ;;  %v9868_v41 = vpop.f32.mrf.mxu1 }
 0x961   :  { %13352 = vtanh.f32 %v9959_v50  ;;  %v9960_v5 = vmul.f32 0.5, %v9824_v40  ;;  %v9962_v0 = vmul.f32 0.5, %v9867_v38  ;;  %v9826_v6 = vadd.f32 %v9825_v52, %v9430_v57 }
 0x962   :  { %13354 = vtanh.f32 %v9961_v33  ;;  %v9869_v36 = vadd.f32 %v9868_v41, %v9438_v42  ;;  %v9827_v63 = vpop.f32.mrf.mxu0  ;;  %v9870_v8 = vpop.f32.mrf.mxu1  ;;  %v9446_v42 = vrot.slane %v17089_v55, %v16323_v61 }
 0x963   :  { %13356 = vtanh.f32 %v9960_v5  ;;  %v9967_v43 = vmul.f32 0.5, %v9826_v6  ;;  %v9828_v7 = vadd.f32 %v9827_v63, %v9434_v12  ;;  %v9871_v10 = vadd.f32 %v9870_v8, %v9442_v18 }
 0x964   :  { %13358 = vtanh.f32 %v9962_v0  ;;  %v9969_v13 = vmul.f32 0.5, %v9869_v36  ;;  %v9450_v18 = vrot.slane %v17089_v55, %v16337_v17 }
 0x965   :  { %13360 = vtanh.f32 %v9967_v43  ;;  %v9968_v31 = vmul.f32 0.5, %v9828_v7  ;;  %v9970_v46 = vmul.f32 0.5, %v9871_v10 }
 0x966   :  { %13362 = vtanh.f32 %v9969_v13 }
 0x967   :  { %13364 = vtanh.f32 %v9968_v31 }
 0x968   :  { %13366 = vtanh.f32 %v9970_v46 }
 0x96e   :  { %v13353_v62 = vpop.eup %13352 }
 0x96f   :  { %v13355_v14 = vpop.eup %13354  ;;  %v9991_v20 = vmul.f32 0.5, %v13353_v62 }
 0x970   :  { %v13357_v21 = vpop.eup %13356  ;;  %v9993_v34 = vmul.f32 0.5, %v13355_v14 }
 0x971   :  { %v13359_v24 = vpop.eup %13358  ;;  %v9992_v25 = vmul.f32 0.5, %v13357_v21  ;;  %v10007_v26 = vadd.f32 0.5, %v9991_v20 }
 0x972   :  { %v13361_v16 = vpop.eup %13360  ;;  %v9994_v48 = vmul.f32 0.5, %v13359_v24  ;;  %v10009_v29 = vadd.f32 0.5, %v9993_v34 }
 0x973   :  { %v13363_v60 = vpop.eup %13362  ;;  %v10008_v51 = vadd.f32 0.5, %v9992_v25  ;;  %v9999_v47 = vmul.f32 0.5, %v13361_v16 }
 0x974   :  { %v13365_v54 = vpop.eup %13364  ;;  %v10010_v32 = vadd.f32 0.5, %v9994_v48  ;;  %v10001_v22 = vmul.f32 0.5, %v13363_v60 }
 0x975   :  { %v13367_v2 = vpop.eup %13366  ;;  %v11913_v9 = vpack.c.bf16 %v10008_v51, %v10007_v26  ;;  %v10000_v35 = vmul.f32 0.5, %v13365_v54  ;;  %v10015_v59 = vadd.f32 0.5, %v9999_v47 }
 0x976   :  { %v11914_v53 = vpack.c.bf16 %v10010_v32, %v10009_v29  ;;  %v10002_v39 = vmul.f32 0.5, %v13367_v2  ;;  %v10017_v11 = vadd.f32 0.5, %v10001_v22 }
 0x977   :  { %10071 = vst [vmem:[#allocation2 + $0xa0] sm:$0xff] %v11913_v9  ;;  %v10016_v58 = vadd.f32 0.5, %v10000_v35 }
 0x978   :  { %10072 = vst [vmem:[#allocation2 + $0xa8] sm:$0xff] %v11914_v53  ;;  %v10018_v1 = vadd.f32 0.5, %v10002_v39 }
 0x979   :  { %v11917_v57 = vpack.c.bf16 %v10016_v58, %v10015_v59  ;;  %v17110_v59 = vld [vmem:[%s17155_s16 + $0x30] sm:$0xff]  ;;  %s13441_s16 = smov [#allocation2]  }
 0x97a   :  { %v11918_v12 = vpack.c.bf16 %v10018_v1, %v10017_v11  ;;  %s10805_s3 = sshll.u32 %s13441_s16, 4  ;;  %s10806_s3 = int_to_ptr.vmem [resolvable:$true] %s10805_s3 }
 0x97b   :  { %10075 = vst [vmem:[#allocation2 + $0x180] sm:$0xff] %v11917_v57  ;;  %s13416_s9 = scalar_lea.vmem %s10806_s3, 7168  ;;  %p13421_p1 = scmp.lt.s32.totalorder %s10806_s3, %s10806_s3 }
 0x97c   :  { %10076 = vst [vmem:[#allocation2 + $0x188] sm:$0xff] %v11918_v12  ;;  %v9907_v30 = vpop.f32.mrf.mxu0  ;;  %v9950_v28 = vpop.f32.mrf.mxu1  ;;  %v10156_v12 = vrot.slane %v17110_v59, %v16199_v4  ;;  %p13417_p0 = scmp.ne.s32.totalorder %s10806_s3, %s13416_s9  ;;  %p13422_p2 = scmp.lt.s32.totalorder %s13416_s9, %s13416_s9 }
 0x97d   :  { %v9908_v56 = vadd.f32 %v9907_v30, %v9446_v42  ;;  %v9951_v49 = vadd.f32 %v9950_v28, %v9454_v44  ;;  %v10160_v30 = vrot.slane %v17110_v59, %v16213_v45 }
 0x97e   :  { %v9909_v27 = vpop.f32.mrf.mxu0  ;;  %v9952_v50 = vpop.f32.mrf.mxu1  ;;  %p13423_p3 = por %p13422_p2, %p13421_p1 }
 0x97f   :  { %v9963_v33 = vmul.f32 0.5, %v9908_v56  ;;  %v9965_v40 = vmul.f32 0.5, %v9951_v49  ;;  %v9910_v38 = vadd.f32 %v9909_v27, %v9450_v18  ;;  %v9953_v52 = vadd.f32 %v9952_v50, %v9458_v19 }
 0x980   :  { %v9911_v41 = vpop.f32.mrf.mxu0  ;;  %v9954_v5 = vpop.f32.mrf.mxu1  ;;  %p13424_p4 = pnand %p13423_p3, %p13417_p0 }
 0x981   :  { %13368 = vtanh.f32 %v9963_v33  ;;  %v9964_v0 = vmul.f32 0.5, %v9910_v38  ;;  %v9966_v6 = vmul.f32 0.5, %v9953_v52  ;;  %v9912_v36 = vadd.f32 %v9911_v41, %v9446_v42 }
 0x982   :  { %13370 = vtanh.f32 %v9965_v40  ;;  %v9955_v63 = vadd.f32 %v9954_v5, %v9454_v44  ;;  %v9913_v55 = vpop.f32.mrf.mxu0  ;;  %v9956_v8 = vpop.f32.mrf.mxu1  ;;  %v10148_v44 = vrot.slane %v17110_v59, %v16196_v37 }
 0x983   :  { %13372 = vtanh.f32 %v9964_v0  ;;  %v9971_v43 = vmul.f32 0.5, %v9912_v36  ;;  %v9914_v7 = vadd.f32 %v9913_v55, %v9450_v18  ;;  %v9957_v10 = vadd.f32 %v9956_v8, %v9458_v19 }
 0x984   :  { %13374 = vtanh.f32 %v9966_v6  ;;  %v9973_v13 = vmul.f32 0.5, %v9955_v63  ;;  %v10152_v19 = vrot.slane %v17110_v59, %v16210_v15 }
 0x985   :  { %13376 = vtanh.f32 %v9971_v43  ;;  %v9972_v31 = vmul.f32 0.5, %v9914_v7  ;;  %v9974_v46 = vmul.f32 0.5, %v9957_v10 }
 0x986   :  { %13378 = vtanh.f32 %v9973_v13 }
 0x987   :  { %13380 = vtanh.f32 %v9972_v31 }
 0x988   :  { %13382 = vtanh.f32 %v9974_v46 }
 0x98e   :  { %v13369_v62 = vpop.eup %13368 }
 0x98f   :  { %v13371_v14 = vpop.eup %13370  ;;  %v9995_v20 = vmul.f32 0.5, %v13369_v62 }
 0x990   :  { %v13373_v21 = vpop.eup %13372  ;;  %v9997_v34 = vmul.f32 0.5, %v13371_v14 }
 0x991   :  { %v13375_v24 = vpop.eup %13374  ;;  %v9996_v25 = vmul.f32 0.5, %v13373_v21  ;;  %v10011_v26 = vadd.f32 0.5, %v9995_v20 }
 0x992   :  { %v13377_v16 = vpop.eup %13376  ;;  %v9998_v48 = vmul.f32 0.5, %v13375_v24  ;;  %v10013_v29 = vadd.f32 0.5, %v9997_v34 }
 0x993   :  { %v13379_v60 = vpop.eup %13378  ;;  %v10012_v51 = vadd.f32 0.5, %v9996_v25  ;;  %v10003_v47 = vmul.f32 0.5, %v13377_v16 }
 0x994   :  { %v13381_v54 = vpop.eup %13380  ;;  %v10014_v32 = vadd.f32 0.5, %v9998_v48  ;;  %v10005_v22 = vmul.f32 0.5, %v13379_v60 }
 0x995   :  { %v13383_v2 = vpop.eup %13382  ;;  %v11915_v9 = vpack.c.bf16 %v10012_v51, %v10011_v26  ;;  %v10004_v35 = vmul.f32 0.5, %v13381_v54  ;;  %v10019_v58 = vadd.f32 0.5, %v10003_v47 }
 0x996   :  { %v11916_v53 = vpack.c.bf16 %v10014_v32, %v10013_v29  ;;  %v10006_v39 = vmul.f32 0.5, %v13383_v2  ;;  %v10021_v1 = vadd.f32 0.5, %v10005_v22 }
 0x997   :  { %10073 = vst [vmem:[#allocation2 + $0xb0] sm:$0xff] %v11915_v9  ;;  %v10020_v11 = vadd.f32 0.5, %v10004_v35 }
 0x998   :  { %10074 = vst [vmem:[#allocation2 + $0xb8] sm:$0xff] %v11916_v53  ;;  %v10022_v57 = vadd.f32 0.5, %v10006_v39 }
 0x999   :  { %v11919_v42 = vpack.c.bf16 %v10020_v11, %v10019_v58 }
 0x99a   :  { %v11920_v18 = vpack.c.bf16 %v10022_v57, %v10021_v1  ;;  %v10164_v1 = vrot.slane %v17110_v59, %v16323_v61  ;;  %v10172_v57 = vrot.slane %v17110_v59, %v16332_v3 }
 0x99b   :  { %10077 = vst [vmem:[#allocation2 + $0x190] sm:$0xff] %v11919_v42 }
 0x99c   :  { %10078 = vst [vmem:[#allocation2 + $0x198] sm:$0xff] %v11920_v18  ;;  %v10539_v28 = vpop.f32.mrf.mxu0  ;;  %v10582_v56 = vpop.f32.mrf.mxu1 }
 0x99d   :  { %v10540_v49 = vadd.f32 %v10539_v28, %v10148_v44  ;;  %v10583_v27 = vadd.f32 %v10582_v56, %v10156_v12 }
 0x99e   :  { %v10541_v50 = vpop.f32.mrf.mxu0  ;;  %v10584_v33 = vpop.f32.mrf.mxu1 }
 0x99f   :  { %v10677_v40 = vmul.f32 0.5, %v10540_v49  ;;  %v10679_v37 = vmul.f32 0.5, %v10583_v27  ;;  %v10542_v38 = vadd.f32 %v10541_v50, %v10152_v19  ;;  %v10585_v52 = vadd.f32 %v10584_v33, %v10160_v30 }
 0x9a0   :  { %v10543_v4 = vpop.f32.mrf.mxu0  ;;  %v10586_v41 = vpop.f32.mrf.mxu1 }
 0x9a1   :  { %13384 = vtanh.f32 %v10677_v40  ;;  %v10678_v5 = vmul.f32 0.5, %v10542_v38  ;;  %v10680_v0 = vmul.f32 0.5, %v10585_v52  ;;  %v10544_v15 = vadd.f32 %v10543_v4, %v10148_v44 }
 0x9a2   :  { %13386 = vtanh.f32 %v10679_v37  ;;  %v10587_v6 = vadd.f32 %v10586_v41, %v10156_v12  ;;  %v10545_v45 = vpop.f32.mrf.mxu0  ;;  %v10588_v36 = vpop.f32.mrf.mxu1  ;;  %v10168_v44 = vrot.slane %v17110_v59, %v16337_v17  ;;  %v10176_v12 = vrot.slane %v17110_v59, %v16345_v23 }
 0x9a3   :  { %13388 = vtanh.f32 %v10678_v5  ;;  %v10685_v63 = vmul.f32 0.5, %v10544_v15  ;;  %v10546_v55 = vadd.f32 %v10545_v45, %v10152_v19  ;;  %v10589_v8 = vadd.f32 %v10588_v36, %v10160_v30 }
 0x9a4   :  { %13390 = vtanh.f32 %v10680_v0  ;;  %v10687_v43 = vmul.f32 0.5, %v10587_v6 }
 0x9a5   :  { %13392 = vtanh.f32 %v10685_v63  ;;  %v10686_v7 = vmul.f32 0.5, %v10546_v55  ;;  %v10688_v10 = vmul.f32 0.5, %v10589_v8 }
 0x9a6   :  { %13394 = vtanh.f32 %v10687_v43 }
 0x9a7   :  { %13396 = vtanh.f32 %v10686_v7 }
 0x9a8   :  { %13398 = vtanh.f32 %v10688_v10 }
 0x9ae   :  { %v13385_v13 = vpop.eup %13384 }
 0x9af   :  { %v13387_v31 = vpop.eup %13386  ;;  %v10709_v46 = vmul.f32 0.5, %v13385_v13 }
 0x9b0   :  { %v13389_v62 = vpop.eup %13388  ;;  %v10711_v14 = vmul.f32 0.5, %v13387_v31 }
 0x9b1   :  { %v13391_v20 = vpop.eup %13390  ;;  %v10710_v21 = vmul.f32 0.5, %v13389_v62  ;;  %v10725_v16 = vadd.f32 0.5, %v10709_v46 }
 0x9b2   :  { %v13393_v34 = vpop.eup %13392  ;;  %v10712_v24 = vmul.f32 0.5, %v13391_v20  ;;  %v10727_v51 = vadd.f32 0.5, %v10711_v14 }
 0x9b3   :  { %v13395_v25 = vpop.eup %13394  ;;  %v10726_v48 = vadd.f32 0.5, %v10710_v21  ;;  %v10717_v60 = vmul.f32 0.5, %v13393_v34 }
 0x9b4   :  { %v13397_v26 = vpop.eup %13396  ;;  %v10728_v47 = vadd.f32 0.5, %v10712_v24  ;;  %v10719_v54 = vmul.f32 0.5, %v13395_v25 }
 0x9b5   :  { %v13399_v29 = vpop.eup %13398  ;;  %v11921_v32 = vpack.c.bf16 %v10726_v48, %v10725_v16  ;;  %v10718_v22 = vmul.f32 0.5, %v13397_v26  ;;  %v10733_v35 = vadd.f32 0.5, %v10717_v60 }
 0x9b6   :  { %v11922_v2 = vpack.c.bf16 %v10728_v47, %v10727_v51  ;;  %v10720_v9 = vmul.f32 0.5, %v13399_v29  ;;  %v10735_v39 = vadd.f32 0.5, %v10719_v54 }
 0x9b7   :  { %10789 = vst [vmem:[#allocation2 + $0xc0] sm:$0xff] %v11921_v32  ;;  %v10734_v53 = vadd.f32 0.5, %v10718_v22 }
 0x9b8   :  { %10790 = vst [vmem:[#allocation2 + $0xc8] sm:$0xff] %v11922_v2  ;;  %v10736_v58 = vadd.f32 0.5, %v10720_v9 }
 0x9b9   :  { %v11925_v11 = vpack.c.bf16 %v10734_v53, %v10733_v35 }
 0x9ba   :  { %v11926_v42 = vpack.c.bf16 %v10736_v58, %v10735_v39 }
 0x9bb   :  { %10796 = vst [vmem:[#allocation2 + $0x1a0] sm:$0xff] %v11925_v11 }
 0x9bc   :  { %10797 = vst [vmem:[#allocation2 + $0x1a8] sm:$0xff] %v11926_v42  ;;  %v10625_v18 = vpop.f32.mrf.mxu0  ;;  %v10668_v19 = vpop.f32.mrf.mxu1 }
 0x9bd   :  { %v10626_v30 = vadd.f32 %v10625_v18, %v10164_v1  ;;  %v10669_v28 = vadd.f32 %v10668_v19, %v10172_v57 }
 0x9be   :  { %v10627_v56 = vpop.f32.mrf.mxu0  ;;  %v10670_v49 = vpop.f32.mrf.mxu1 }
 0x9bf   :  { %v10681_v27 = vmul.f32 0.5, %v10626_v30  ;;  %v10683_v61 = vmul.f32 0.5, %v10669_v28  ;;  %v10628_v50 = vadd.f32 %v10627_v56, %v10168_v44  ;;  %v10671_v33 = vadd.f32 %v10670_v49, %v10176_v12 }
 0x9c0   :  { %v10629_v3 = vpop.f32.mrf.mxu0  ;;  %v10672_v40 = vpop.f32.mrf.mxu1 }
 0x9c1   :  { %13400 = vtanh.f32 %v10681_v27  ;;  %v10682_v37 = vmul.f32 0.5, %v10628_v50  ;;  %v10684_v38 = vmul.f32 0.5, %v10671_v33  ;;  %v10630_v17 = vadd.f32 %v10629_v3, %v10164_v1 }
 0x9c2   :  { %13402 = vtanh.f32 %v10683_v61  ;;  %v10673_v52 = vadd.f32 %v10672_v40, %v10172_v57  ;;  %v10631_v23 = vpop.f32.mrf.mxu0  ;;  %v10674_v59 = vpop.f32.mrf.mxu1 }
 0x9c3   :  { %13404 = vtanh.f32 %v10682_v37  ;;  %v10689_v4 = vmul.f32 0.5, %v10630_v17  ;;  %v10632_v41 = vadd.f32 %v10631_v23, %v10168_v44  ;;  %v10675_v5 = vadd.f32 %v10674_v59, %v10176_v12 }
 0x9c4   :  { %13406 = vtanh.f32 %v10684_v38  ;;  %v10691_v0 = vmul.f32 0.5, %v10673_v52 }
 0x9c5   :  { %13408 = vtanh.f32 %v10689_v4  ;;  %v10690_v15 = vmul.f32 0.5, %v10632_v41  ;;  %v10692_v6 = vmul.f32 0.5, %v10675_v5 }
 0x9c6   :  { %13410 = vtanh.f32 %v10691_v0 }
 0x9c7   :  { %13412 = vtanh.f32 %v10690_v15 }
 0x9c8   :  { %13414 = vtanh.f32 %v10692_v6 }
 0x9ce   :  { %v13401_v45 = vpop.eup %13400 }
 0x9cf   :  { %v13403_v36 = vpop.eup %13402  ;;  %v10713_v63 = vmul.f32 0.5, %v13401_v45 }
 0x9d0   :  { %v13405_v55 = vpop.eup %13404  ;;  %v10715_v8 = vmul.f32 0.5, %v13403_v36 }
 0x9d1   :  { %v13407_v43 = vpop.eup %13406  ;;  %v10714_v7 = vmul.f32 0.5, %v13405_v55  ;;  %v10729_v46 = vadd.f32 0.5, %v10713_v63 }
 0x9d2   :  { %v13409_v10 = vpop.eup %13408  ;;  %v10716_v13 = vmul.f32 0.5, %v13407_v43  ;;  %v10731_v21 = vadd.f32 0.5, %v10715_v8 }
 0x9d3   :  { %v13411_v31 = vpop.eup %13410  ;;  %v10730_v62 = vadd.f32 0.5, %v10714_v7  ;;  %v10721_v14 = vmul.f32 0.5, %v13409_v10 }
 0x9d4   :  { %v13413_v20 = vpop.eup %13412  ;;  %v10732_v34 = vadd.f32 0.5, %v10716_v13  ;;  %v10723_v24 = vmul.f32 0.5, %v13411_v31 }
 0x9d5   :  { %v13415_v25 = vpop.eup %13414  ;;  %v11923_v16 = vpack.c.bf16 %v10730_v62, %v10729_v46  ;;  %v10722_v60 = vmul.f32 0.5, %v13413_v20  ;;  %v10737_v47 = vadd.f32 0.5, %v10721_v14 }
 0x9d6   :  { %v11924_v26 = vpack.c.bf16 %v10732_v34, %v10731_v21  ;;  %v10724_v51 = vmul.f32 0.5, %v13415_v25  ;;  %v10739_v29 = vadd.f32 0.5, %v10723_v24 }
 0x9d7   :  { %10791 = vst [vmem:[#allocation2 + $0xd0] sm:$0xff] %v11923_v16  ;;  %v10738_v54 = vadd.f32 0.5, %v10722_v60 }
 0x9d8   :  { %10795 = vst.msk [vmem:[#allocation2 + $0xd8] sm:$0xff] %vm17128_vm4, %v11924_v26  ;;  %v10740_v32 = vadd.f32 0.5, %v10724_v51 }
 0x9d9   :  { %v11927_v22 = vpack.c.bf16 %v10738_v54, %v10737_v47 }
 0x9da   :  { %v11928_v2 = vpack.c.bf16 %v10740_v32, %v10739_v29 }
 0x9db   :  { %10798 = vst [vmem:[#allocation2 + $0x1b0] sm:$0xff] %v11927_v22 }
 0x9dc   :  { %10799 = vst.msk [vmem:[#allocation2 + $0x1b8] sm:$0xff] %vm17128_vm4, %v11928_v2 }
 0x9dd   :  { %13427 = shalt.err (!%p13424_p4)
}
 0x9de   :  { %s13442_s28 = smov 3584   ;;  %s13443_s10 = smov 224  }
 0x9df   :  { %10811 = dma.vmem_to_hbm [thread:$0]  %s10806_s3, 7168, %s17156_s17, [#allocation3], %s13442_s28, %s13442_s28, %s13443_s10  }
 0x9e0   :  { %13436 = dma.done.wait [#allocation3], 7168  }
 0x9e1   :  { %13437 = vsyncadd [#allocation3], 4294960128 }
 0x9e2   :  { %10815 = vsyncpa [#allocation3], 1 }

</bundles_post_ra>
